<compile_context>
chip_gen: v7x
topology: tpu7x:2x2x1
jax: 0.10.0
libtpu: 0.0.40
codegen_flags: <defaults>
</compile_context>

<pallas_src>
import math

import jax
import jax.numpy as jnp
import numpy as np
from jax.experimental import pallas as pl
from jax.experimental.pallas import tpu as pltpu

# ----------------------------- config (small, lane/sublane aligned) -----------------------------
B, S, D = 2, 64, 128        # batch, seq, n_embd  (B*S = 128 -> full-height MXU tiles)
H = 4                       # n_head
DH = D // H                 # head dim
V = 512                     # n_vocab (small synthetic; real = 49408)
L = 2                       # number of CLIPLayers
FF = 4 * D                  # MLP hidden
EPS = 1e-5                  # nn.LayerNorm default eps
BS = B * S                  # folded batch*seq rows for all projection matmuls
NSEM = 4                    # DMA-semaphore ring depth for the embedding gather
assert BS >= NSEM and BS % 8 == 0 and D % 128 == 0 and FF % 128 == 0 and (3 * D) % 128 == 0


# ----------------------------- kernel helpers -----------------------------
def _ln(x, w, b):
    """LayerNorm over last dim (biased variance, like torch.nn.LayerNorm)."""
    mu = jnp.mean(x, axis=-1, keepdims=True)
    var = jnp.mean(jnp.square(x - mu), axis=-1, keepdims=True)
    return (x - mu) * jax.lax.rsqrt(var + EPS) * w + b


# ----------------------------- fused kernel -----------------------------
def clip_kernel(tok_ref,                               # SMEM (BS,) int32 (scalar prefetch)
                pos_ref, table_ref,                    # VMEM (BS,D) const / HBM (V,D) pl.ANY
                ln1w_ref, ln1b_ref, wqkv_ref, bqkv_ref, wo_ref, bo_ref,
                ln2w_ref, ln2b_ref, w1_ref, b1_ref, w2_ref, b2_ref,
                lnfw_ref, lnfb_ref,
                y_ref,
                state_ref, gsem):
    l = pl.program_id(0)

    # ----- grid step 0: gather token-embedding rows straight into the residual scratch -----
    @pl.when(l == 0)
    def _():
        def row_copy(i, slot):
            return pltpu.make_async_copy(table_ref.at[tok_ref[i]], state_ref.at[i],
                                         gsem.at[slot])

        def prime(i, c):
            row_copy(i, i).start()
            return c
        jax.lax.fori_loop(0, NSEM, prime, 0, unroll=True)

        def step(i, c):                                 # wait row i, start row i+NSEM
            slot = i & (NSEM - 1)
            row_copy(i, slot).wait()

            @pl.when(i + NSEM < BS)
            def _():
                row_copy(i + NSEM, slot).start()
            return c
        jax.lax.fori_loop(0, BS, step, 0)

        state_ref[...] = state_ref[...] + pos_ref[...]

    x = state_ref[...]                                  # (BS, D) residual stream
    scale = 1.0 / math.sqrt(DH)

    # ----- attention block -----
    h = _ln(x, ln1w_ref[0], ln1b_ref[0])
    wqkv = wqkv_ref[0].astype(jnp.float32)              # bf16 stream -> f32 compute
    qkv = jnp.dot(h, wqkv, preferred_element_type=jnp.float32) + bqkv_ref[0]   # (BS, 3D)

    def split_heads(base):                              # -> (H*B, S, DH), head-major
        parts = [qkv[:, base + hh * DH: base + (hh + 1) * DH] for hh in range(H)]
        return jnp.stack(parts, axis=0).reshape(H * B, S, DH)

    q, k, v = split_heads(0), split_heads(D), split_heads(2 * D)

    # per-sequence causal scores: (H*B, S, S) -- no cross-batch work, mask built in-kernel
    s = jnp.einsum('bqd,bkd->bqk', q, k, preferred_element_type=jnp.float32) * scale
    row = jax.lax.broadcasted_iota(jnp.int32, (S, S), 0)
    col = jax.lax.broadcasted_iota(jnp.int32, (S, S), 1)
    s = s + jnp.where(col <= row, 0.0, -1e30).astype(jnp.float32)
    m = jnp.max(s, axis=-1, keepdims=True)
    e = jnp.exp(s - m)
    p = e * pl.reciprocal(jnp.sum(e, axis=-1, keepdims=True), approx=True)
    o = jnp.einsum('bqk,bkd->bqd', p, v, preferred_element_type=jnp.float32)   # (H*B, S, DH)
    o = o.reshape(H, BS, DH)

    # out-proj: per-head row-slices of W_o, accumulated (avoids the H-way lane concat)
    wo = wo_ref[0].astype(jnp.float32)
    proj = jnp.dot(o[0], wo[0:DH, :], preferred_element_type=jnp.float32)
    for hh in range(1, H):
        proj = proj + jnp.dot(o[hh], wo[hh * DH:(hh + 1) * DH, :],
                              preferred_element_type=jnp.float32)
    x = x + proj + bo_ref[0]

    # ----- MLP block -----
    h = _ln(x, ln2w_ref[0], ln2b_ref[0])
    a = jnp.dot(h, w1_ref[0].astype(jnp.float32), preferred_element_type=jnp.float32) + b1_ref[0]
    a = a * jax.nn.sigmoid(1.702 * a)                   # quick GELU
    x = x + jnp.dot(a, w2_ref[0].astype(jnp.float32), preferred_element_type=jnp.float32) + b2_ref[0]

    state_ref[...] = x

    # output written exactly once (no dead per-layer store)
    @pl.when(l == pl.num_programs(0) - 1)
    def _():
        y_ref[...] = _ln(x, lnfw_ref[...], lnfb_ref[...]).astype(y_ref.dtype)


# ----------------------------- pallas_call wrapper -----------------------------
def _stacked(shape):
    # per-layer stacked weight [L, ...]: stream block l at grid step l
    return pl.BlockSpec((1,) + shape, lambda l, tok: (l, 0, 0))


def _const2d(shape):
    # resident across all layers (block index never changes -> loaded once)
    return pl.BlockSpec(shape, lambda l, tok: (0, 0))


def _vmem_limit_bytes():
    try:
        cap = pltpu.get_tpu_info().vmem_capacity_bytes
    except Exception:
        cap = 64 * 1024 * 1024
    return min(100 * 1024 * 1024, int(cap * 3 // 4))   # ~96 MiB v5e/v6e, 48 MiB v7x


VMEM_LIMIT = _vmem_limit_bytes()


def clip_forward_impl(tokens, params):
    tok = jnp.clip(tokens.reshape(BS).astype(jnp.int32), 0, V - 1)   # guard OOB gather
    pos_full = jnp.tile(params['pos_emb'], (B, 1)).astype(jnp.float32)   # (BS, D)
    lp = params['layers']

    in_specs = [
        _const2d((BS, D)),                              # position embedding (loaded once)
        pl.BlockSpec(memory_space=pl.ANY),              # token-embedding table stays in HBM
        _stacked((1, D)), _stacked((1, D)),             # layernorm_1
        _stacked((D, 3 * D)), _stacked((1, 3 * D)),     # attention in_proj   (bf16 weight)
        _stacked((D, D)), _stacked((1, D)),             # attention out_proj  (bf16 weight)
        _stacked((1, D)), _stacked((1, D)),             # layernorm_2
        _stacked((D, FF)), _stacked((1, FF)),           # linear_1            (bf16 weight)
        _stacked((FF, D)), _stacked((1, D)),            # linear_2            (bf16 weight)
        _const2d((1, D)), _const2d((1, D)),             # final layernorm (loaded once)
    ]

    y = pl.pallas_call(
        clip_kernel,
        out_shape=jax.ShapeDtypeStruct((BS, D), jnp.float32),
        grid_spec=pltpu.PrefetchScalarGridSpec(
            num_scalar_prefetch=1,
            grid=(L,),
            in_specs=in_specs,
            out_specs=pl.BlockSpec((BS, D), lambda l, tok: (0, 0)),
            scratch_shapes=[pltpu.VMEM((BS, D), jnp.float32),       # resident residual stream
                            pltpu.SemaphoreType.DMA((NSEM,))],      # gather DMA ring
        ),
        compiler_params=pltpu.CompilerParams(
            dimension_semantics=("arbitrary",),          # layers are sequentially dependent
            vmem_limit_bytes=VMEM_LIMIT),
    )(tok, pos_full, params['tok_emb'],
      lp['ln1_w'], lp['ln1_b'], lp['w_qkv'], lp['b_qkv'], lp['w_o'], lp['b_o'],
      lp['ln2_w'], lp['ln2_b'], lp['w1'], lp['b1'], lp['w2'], lp['b2'],
      params['ln_f_w'], params['ln_f_b'])
    return y.reshape(B, S, D)


clip_forward = jax.jit(clip_forward_impl)


# ----------------------------- deterministic init -----------------------------
def init_params(key):
    def rnd(k, shape, scale=0.02, dtype=jnp.float32):
        return (scale * jax.random.normal(k, shape, jnp.float32)).astype(dtype)

    keys = jax.random.split(key, 2 + L)
    per_layer = []
    for li in range(L):
        ks = jax.random.split(keys[2 + li], 12)
        per_layer.append({
            'ln1_w': 1.0 + rnd(ks[0], (1, D), 0.05),
            'ln1_b': rnd(ks[1], (1, D), 0.02),
            'w_qkv': rnd(ks[2], (D, 3 * D), dtype=jnp.bfloat16),
            'b_qkv': rnd(ks[3], (1, 3 * D), 0.01),
            'w_o':   rnd(ks[4], (D, D), dtype=jnp.bfloat16),
            'b_o':   rnd(ks[5], (1, D), 0.01),
            'ln2_w': 1.0 + rnd(ks[6], (1, D), 0.05),
            'ln2_b': rnd(ks[7], (1, D), 0.02),
            'w1':    rnd(ks[8], (D, FF), dtype=jnp.bfloat16),
            'b1':    rnd(ks[9], (1, FF), 0.01),
            'w2':    rnd(ks[10], (FF, D), dtype=jnp.bfloat16),
            'b2':    rnd(ks[11], (1, D), 0.01),
        })
    stacked = {name: jnp.stack([d[name] for d in per_layer], axis=0)
               for name in per_layer[0]}                 # each -> [L, ...]
    return {
        'tok_emb': rnd(keys[0], (V, D)),                 # nn.Embedding(n_vocab, n_embd), f32
        'pos_emb': rnd(keys[1], (S, D), 0.01),           # position embedding
        'ln_f_w': jnp.ones((1, D), jnp.float32),
        'ln_f_b': jnp.zeros((1, D), jnp.float32),
        'layers': stacked,
    }


# ----------------------------- pure-JAX reference -----------------------------
def _ln_ref(x, w, b):
    mu = x.mean(-1, keepdims=True)
    var = ((x - mu) ** 2).mean(-1, keepdims=True)
    return (x - mu) / jnp.sqrt(var + EPS) * w + b


def ref_forward(tokens, params):
    x = params['tok_emb'][tokens] + params['pos_emb'][None]
    lp = params['layers']
    for l in range(L):
        res = x
        h = _ln_ref(x, lp['ln1_w'][l], lp['ln1_b'][l])
        qkv = h @ lp['w_qkv'][l].astype(jnp.float32) + lp['b_qkv'][l]
        q, k, v = jnp.split(qkv, 3, axis=-1)
        q = q.reshape(B, S, H, DH).transpose(0, 2, 1, 3)
        k = k.reshape(B, S, H, DH).transpose(0, 2, 1, 3)
        v = v.reshape(B, S, H, DH).transpose(0, 2, 1, 3)
        s = jnp.einsum('bhqd,bhkd->bhqk', q, k) / math.sqrt(DH)
        mask = jnp.triu(jnp.ones((S, S), bool), 1)
        s = jnp.where(mask, -jnp.inf, s)
        p = jax.nn.softmax(s, axis=-1)
        o = jnp.einsum('bhqk,bhkd->bhqd', p, v).transpose(0, 2, 1, 3).reshape(B, S, D)
        x = res + (o @ lp['w_o'][l].astype(jnp.float32) + lp['b_o'][l])
        res = x
        h = _ln_ref(x, lp['ln2_w'][l], lp['ln2_b'][l])
        a = h @ lp['w1'][l].astype(jnp.float32) + lp['b1'][l]
        a = a * jax.nn.sigmoid(1.702 * a)
        x = res + (a @ lp['w2'][l].astype(jnp.float32) + lp['b2'][l])
    return _ln_ref(x, params['ln_f_w'], params['ln_f_b'])


# ----------------------------- main -----------------------------
if __name__ == "__main__":
    key = jax.random.PRNGKey(0)
    pkey, tkey = jax.random.split(key)
    params = init_params(pkey)
    tokens = jax.random.randint(tkey, (B, S), 0, V, dtype=jnp.int32)

    out = clip_forward(tokens, params)
    out = jax.block_until_ready(out)

    ref = ref_forward(tokens, params)
    assert out.shape == (B, S, D) and out.dtype == jnp.float32
    np.testing.assert_allclose(np.asarray(out), np.asarray(ref), atol=5e-3, rtol=5e-3)
    print("KERNEL_OK")
</pallas_src>

<mosaic_0001>
module attributes {stable_mosaic.version = 11 : i64} {
  func.func @clip_kernel(%arg0: i32, %arg1: memref<128xi32, #tpu.memory_space<smem>>, %arg2: memref<128x128xf32, #tpu.memory_space<vmem>>, %arg3: memref<512x128xf32, #tpu.memory_space<any>>, %arg4: memref<1x1x128xf32, #tpu.memory_space<vmem>>, %arg5: memref<1x1x128xf32, #tpu.memory_space<vmem>>, %arg6: memref<1x128x384xbf16, #tpu.memory_space<vmem>>, %arg7: memref<1x1x384xf32, #tpu.memory_space<vmem>>, %arg8: memref<1x128x128xbf16, #tpu.memory_space<vmem>>, %arg9: memref<1x1x128xf32, #tpu.memory_space<vmem>>, %arg10: memref<1x1x128xf32, #tpu.memory_space<vmem>>, %arg11: memref<1x1x128xf32, #tpu.memory_space<vmem>>, %arg12: memref<1x128x512xbf16, #tpu.memory_space<vmem>>, %arg13: memref<1x1x512xf32, #tpu.memory_space<vmem>>, %arg14: memref<1x512x128xbf16, #tpu.memory_space<vmem>>, %arg15: memref<1x1x128xf32, #tpu.memory_space<vmem>>, %arg16: memref<1x128xf32, #tpu.memory_space<vmem>>, %arg17: memref<1x128xf32, #tpu.memory_space<vmem>>, %arg18: memref<128x128xf32, #tpu.memory_space<vmem>>, %arg19: memref<128x128xf32, #tpu.memory_space<vmem>>, %arg20: memref<4x!tpu.dma_semaphore, #tpu.memory_space<semaphore_mem>>) attributes {dimension_semantics = [#tpu.dimension_semantics<arbitrary>], iteration_bounds = array<i64: 2>, scalar_prefetch = 1 : i64, scratch_operands = 2 : i64, tpu.core_type = #tpu.core_type<tc>, window_params = [{pipeline_mode = #tpu.pipeline_mode<synchronous>, transform_indices = @transform_0, window_bounds = array<i64: 128, 128>}, {}, {transform_indices = @transform_2, window_bounds = array<i64: 1, 1, 128>}, {transform_indices = @transform_3, window_bounds = array<i64: 1, 1, 128>}, {transform_indices = @transform_4, window_bounds = array<i64: 1, 128, 384>}, {transform_indices = @transform_5, window_bounds = array<i64: 1, 1, 384>}, {transform_indices = @transform_6, window_bounds = array<i64: 1, 128, 128>}, {transform_indices = @transform_7, window_bounds = array<i64: 1, 1, 128>}, {transform_indices = @transform_8, window_bounds = array<i64: 1, 1, 128>}, {transform_indices = @transform_9, window_bounds = array<i64: 1, 1, 128>}, {transform_indices = @transform_10, window_bounds = array<i64: 1, 128, 512>}, {transform_indices = @transform_11, window_bounds = array<i64: 1, 1, 512>}, {transform_indices = @transform_12, window_bounds = array<i64: 1, 512, 128>}, {transform_indices = @transform_13, window_bounds = array<i64: 1, 1, 128>}, {pipeline_mode = #tpu.pipeline_mode<synchronous>, transform_indices = @transform_14, window_bounds = array<i64: 1, 128>}, {pipeline_mode = #tpu.pipeline_mode<synchronous>, transform_indices = @transform_15, window_bounds = array<i64: 1, 128>}, {pipeline_mode = #tpu.pipeline_mode<synchronous>, transform_indices = @transform_16, window_bounds = array<i64: 128, 128>}]} {
    %c0_i32 = arith.constant 0 : i32
    %0 = arith.cmpi eq, %arg0, %c0_i32 : i32
    %1 = arith.extui %0 : i1 to i32
    %c0_i32_0 = arith.constant 0 : i32
    %2 = arith.cmpi ne, %1, %c0_i32_0 : i32
    scf.if %2 {
      %c0_i32_66 = arith.constant 0 : i32
      %174 = arith.index_cast %c0_i32_66 : i32 to index
      %175 = memref.load %arg1[%174] : memref<128xi32, #tpu.memory_space<smem>>
      %c0_i32_67 = arith.constant 0 : i32
      %176 = tpu.memref_slice %arg3[%175, %c0_i32_67] : memref<512x128xf32, #tpu.memory_space<any>> -> memref<1x128xf32, #tpu.memory_space<any>>
      %177 = tpu.memref_squeeze %176 : memref<1x128xf32, #tpu.memory_space<any>> -> memref<128xf32, #tpu.memory_space<any>>
      %c0_i32_68 = arith.constant 0 : i32
      %178 = tpu.memref_slice %arg19[%c0_i32_66, %c0_i32_68] : memref<128x128xf32, #tpu.memory_space<vmem>> -> memref<1x128xf32, #tpu.memory_space<vmem>>
      %179 = tpu.memref_squeeze %178 : memref<1x128xf32, #tpu.memory_space<vmem>> -> memref<128xf32, #tpu.memory_space<vmem>>
      %180 = tpu.memref_slice %arg20[%c0_i32_66] : memref<4x!tpu.dma_semaphore, #tpu.memory_space<semaphore_mem>> -> memref<1x!tpu.dma_semaphore, #tpu.memory_space<semaphore_mem>>
      %181 = tpu.memref_squeeze %180 : memref<1x!tpu.dma_semaphore, #tpu.memory_space<semaphore_mem>> -> memref<!tpu.dma_semaphore, #tpu.memory_space<semaphore_mem>>
      tpu.enqueue_dma source(%177 : memref<128xf32, #tpu.memory_space<any>>) target(%179 : memref<128xf32, #tpu.memory_space<vmem>>) target_semaphore(%181 : memref<!tpu.dma_semaphore, #tpu.memory_space<semaphore_mem>>)
      %c1_i32_69 = arith.constant 1 : i32
      %182 = arith.index_cast %c1_i32_69 : i32 to index
      %183 = memref.load %arg1[%182] : memref<128xi32, #tpu.memory_space<smem>>
      %c0_i32_70 = arith.constant 0 : i32
      %184 = tpu.memref_slice %arg3[%183, %c0_i32_70] : memref<512x128xf32, #tpu.memory_space<any>> -> memref<1x128xf32, #tpu.memory_space<any>>
      %185 = tpu.memref_squeeze %184 : memref<1x128xf32, #tpu.memory_space<any>> -> memref<128xf32, #tpu.memory_space<any>>
      %c0_i32_71 = arith.constant 0 : i32
      %186 = tpu.memref_slice %arg19[%c1_i32_69, %c0_i32_71] : memref<128x128xf32, #tpu.memory_space<vmem>> -> memref<1x128xf32, #tpu.memory_space<vmem>>
      %187 = tpu.memref_squeeze %186 : memref<1x128xf32, #tpu.memory_space<vmem>> -> memref<128xf32, #tpu.memory_space<vmem>>
      %188 = tpu.memref_slice %arg20[%c1_i32_69] : memref<4x!tpu.dma_semaphore, #tpu.memory_space<semaphore_mem>> -> memref<1x!tpu.dma_semaphore, #tpu.memory_space<semaphore_mem>>
      %189 = tpu.memref_squeeze %188 : memref<1x!tpu.dma_semaphore, #tpu.memory_space<semaphore_mem>> -> memref<!tpu.dma_semaphore, #tpu.memory_space<semaphore_mem>>
      tpu.enqueue_dma source(%185 : memref<128xf32, #tpu.memory_space<any>>) target(%187 : memref<128xf32, #tpu.memory_space<vmem>>) target_semaphore(%189 : memref<!tpu.dma_semaphore, #tpu.memory_space<semaphore_mem>>)
      %c2_i32 = arith.constant 2 : i32
      %190 = arith.index_cast %c2_i32 : i32 to index
      %191 = memref.load %arg1[%190] : memref<128xi32, #tpu.memory_space<smem>>
      %c0_i32_72 = arith.constant 0 : i32
      %192 = tpu.memref_slice %arg3[%191, %c0_i32_72] : memref<512x128xf32, #tpu.memory_space<any>> -> memref<1x128xf32, #tpu.memory_space<any>>
      %193 = tpu.memref_squeeze %192 : memref<1x128xf32, #tpu.memory_space<any>> -> memref<128xf32, #tpu.memory_space<any>>
      %c0_i32_73 = arith.constant 0 : i32
      %194 = tpu.memref_slice %arg19[%c2_i32, %c0_i32_73] : memref<128x128xf32, #tpu.memory_space<vmem>> -> memref<1x128xf32, #tpu.memory_space<vmem>>
      %195 = tpu.memref_squeeze %194 : memref<1x128xf32, #tpu.memory_space<vmem>> -> memref<128xf32, #tpu.memory_space<vmem>>
      %196 = tpu.memref_slice %arg20[%c2_i32] : memref<4x!tpu.dma_semaphore, #tpu.memory_space<semaphore_mem>> -> memref<1x!tpu.dma_semaphore, #tpu.memory_space<semaphore_mem>>
      %197 = tpu.memref_squeeze %196 : memref<1x!tpu.dma_semaphore, #tpu.memory_space<semaphore_mem>> -> memref<!tpu.dma_semaphore, #tpu.memory_space<semaphore_mem>>
      tpu.enqueue_dma source(%193 : memref<128xf32, #tpu.memory_space<any>>) target(%195 : memref<128xf32, #tpu.memory_space<vmem>>) target_semaphore(%197 : memref<!tpu.dma_semaphore, #tpu.memory_space<semaphore_mem>>)
      %c3_i32 = arith.constant 3 : i32
      %198 = arith.index_cast %c3_i32 : i32 to index
      %199 = memref.load %arg1[%198] : memref<128xi32, #tpu.memory_space<smem>>
      %c0_i32_74 = arith.constant 0 : i32
      %200 = tpu.memref_slice %arg3[%199, %c0_i32_74] : memref<512x128xf32, #tpu.memory_space<any>> -> memref<1x128xf32, #tpu.memory_space<any>>
      %201 = tpu.memref_squeeze %200 : memref<1x128xf32, #tpu.memory_space<any>> -> memref<128xf32, #tpu.memory_space<any>>
      %c0_i32_75 = arith.constant 0 : i32
      %202 = tpu.memref_slice %arg19[%c3_i32, %c0_i32_75] : memref<128x128xf32, #tpu.memory_space<vmem>> -> memref<1x128xf32, #tpu.memory_space<vmem>>
      %203 = tpu.memref_squeeze %202 : memref<1x128xf32, #tpu.memory_space<vmem>> -> memref<128xf32, #tpu.memory_space<vmem>>
      %204 = tpu.memref_slice %arg20[%c3_i32] : memref<4x!tpu.dma_semaphore, #tpu.memory_space<semaphore_mem>> -> memref<1x!tpu.dma_semaphore, #tpu.memory_space<semaphore_mem>>
      %205 = tpu.memref_squeeze %204 : memref<1x!tpu.dma_semaphore, #tpu.memory_space<semaphore_mem>> -> memref<!tpu.dma_semaphore, #tpu.memory_space<semaphore_mem>>
      tpu.enqueue_dma source(%201 : memref<128xf32, #tpu.memory_space<any>>) target(%203 : memref<128xf32, #tpu.memory_space<vmem>>) target_semaphore(%205 : memref<!tpu.dma_semaphore, #tpu.memory_space<semaphore_mem>>)
      %c4_i32 = arith.constant 4 : i32
      %c0_i32_76 = arith.constant 0 : i32
      %c128_i32 = arith.constant 128 : i32
      %206 = arith.addi %c0_i32_76, %c128_i32 : i32
      %c1_i32_77 = arith.constant 1 : i32
      scf.for %arg21 = %c0_i32_76 to %206 step %c1_i32_77  : i32 {
        %c3_i32_85 = arith.constant 3 : i32
        %211 = arith.andi %arg21, %c3_i32_85 : i32
        %212 = arith.index_cast %arg21 : i32 to index
        %213 = memref.load %arg1[%212] : memref<128xi32, #tpu.memory_space<smem>>
        %c0_i32_86 = arith.constant 0 : i32
        %214 = tpu.memref_slice %arg3[%213, %c0_i32_86] : memref<512x128xf32, #tpu.memory_space<any>> -> memref<1x128xf32, #tpu.memory_space<any>>
        %215 = tpu.memref_squeeze %214 : memref<1x128xf32, #tpu.memory_space<any>> -> memref<128xf32, #tpu.memory_space<any>>
        %c0_i32_87 = arith.constant 0 : i32
        %216 = tpu.memref_slice %arg19[%arg21, %c0_i32_87] : memref<128x128xf32, #tpu.memory_space<vmem>> -> memref<1x128xf32, #tpu.memory_space<vmem>>
        %217 = tpu.memref_squeeze %216 : memref<1x128xf32, #tpu.memory_space<vmem>> -> memref<128xf32, #tpu.memory_space<vmem>>
        %218 = tpu.memref_slice %arg20[%211] : memref<4x!tpu.dma_semaphore, #tpu.memory_space<semaphore_mem>> -> memref<1x!tpu.dma_semaphore, #tpu.memory_space<semaphore_mem>>
        %219 = tpu.memref_squeeze %218 : memref<1x!tpu.dma_semaphore, #tpu.memory_space<semaphore_mem>> -> memref<!tpu.dma_semaphore, #tpu.memory_space<semaphore_mem>>
        tpu.wait_dma2 semaphore(%219 : memref<!tpu.dma_semaphore, #tpu.memory_space<semaphore_mem>>) src(%215 : memref<128xf32, #tpu.memory_space<any>>) dst(%217 : memref<128xf32, #tpu.memory_space<vmem>>)
        %c4_i32_88 = arith.constant 4 : i32
        %220 = arith.addi %arg21, %c4_i32_88 : i32
        %c128_i32_89 = arith.constant 128 : i32
        %221 = arith.cmpi slt, %220, %c128_i32_89 : i32
        %222 = arith.extui %221 : i1 to i32
        %c0_i32_90 = arith.constant 0 : i32
        %223 = arith.cmpi ne, %222, %c0_i32_90 : i32
        scf.if %223 {
          %c4_i32_91 = arith.constant 4 : i32
          %224 = arith.addi %arg21, %c4_i32_91 : i32
          %225 = arith.index_cast %224 : i32 to index
          %226 = memref.load %arg1[%225] : memref<128xi32, #tpu.memory_space<smem>>
          %c0_i32_92 = arith.constant 0 : i32
          %227 = tpu.memref_slice %arg3[%226, %c0_i32_92] : memref<512x128xf32, #tpu.memory_space<any>> -> memref<1x128xf32, #tpu.memory_space<any>>
          %228 = tpu.memref_squeeze %227 : memref<1x128xf32, #tpu.memory_space<any>> -> memref<128xf32, #tpu.memory_space<any>>
          %c0_i32_93 = arith.constant 0 : i32
          %229 = tpu.memref_slice %arg19[%224, %c0_i32_93] : memref<128x128xf32, #tpu.memory_space<vmem>> -> memref<1x128xf32, #tpu.memory_space<vmem>>
          %230 = tpu.memref_squeeze %229 : memref<1x128xf32, #tpu.memory_space<vmem>> -> memref<128xf32, #tpu.memory_space<vmem>>
          %231 = tpu.memref_slice %arg20[%211] : memref<4x!tpu.dma_semaphore, #tpu.memory_space<semaphore_mem>> -> memref<1x!tpu.dma_semaphore, #tpu.memory_space<semaphore_mem>>
          %232 = tpu.memref_squeeze %231 : memref<1x!tpu.dma_semaphore, #tpu.memory_space<semaphore_mem>> -> memref<!tpu.dma_semaphore, #tpu.memory_space<semaphore_mem>>
          tpu.enqueue_dma source(%228 : memref<128xf32, #tpu.memory_space<any>>) target(%230 : memref<128xf32, #tpu.memory_space<vmem>>) target_semaphore(%232 : memref<!tpu.dma_semaphore, #tpu.memory_space<semaphore_mem>>)
        } else {
        }
      }
      %c128_i32_78 = arith.constant 128 : i32
      %c0_79 = arith.constant 0 : index
      %c0_80 = arith.constant 0 : index
      %207 = vector.load %arg19[%c0_79, %c0_80] : memref<128x128xf32, #tpu.memory_space<vmem>>, vector<128x128xf32>
      %c0_81 = arith.constant 0 : index
      %c0_82 = arith.constant 0 : index
      %208 = vector.load %arg2[%c0_81, %c0_82] : memref<128x128xf32, #tpu.memory_space<vmem>>, vector<128x128xf32>
      %209 = arith.addf %207, %208 : vector<128x128xf32>
      %c0_83 = arith.constant 0 : index
      %c0_84 = arith.constant 0 : index
      %210 = vector.load %arg19[%c0_83, %c0_84] : memref<128x128xf32, #tpu.memory_space<vmem>>, vector<128x128xf32>
      tpu.vector_store %arg19[%c0_83, %c0_84], %209 {strides = array<i32>} : memref<128x128xf32, #tpu.memory_space<vmem>>, vector<128x128xf32>,
    } else {
    }
    %c0 = arith.constant 0 : index
    %c0_1 = arith.constant 0 : index
    %3 = vector.load %arg19[%c0, %c0_1] : memref<128x128xf32, #tpu.memory_space<vmem>>, vector<128x128xf32>
    %c0_2 = arith.constant 0 : index
    %c0_3 = arith.constant 0 : index
    %c0_4 = arith.constant 0 : index
    %4 = vector.load %arg4[%c0_2, %c0_3, %c0_4] : memref<1x1x128xf32, #tpu.memory_space<vmem>>, vector<1x1x128xf32>
    %5 = vector.shape_cast %4 : vector<1x1x128xf32> to vector<1x128xf32>
    %c0_5 = arith.constant 0 : index
    %c0_6 = arith.constant 0 : index
    %c0_7 = arith.constant 0 : index
    %6 = vector.load %arg5[%c0_5, %c0_6, %c0_7] : memref<1x1x128xf32, #tpu.memory_space<vmem>>, vector<1x1x128xf32>
    %7 = vector.shape_cast %6 : vector<1x1x128xf32> to vector<1x128xf32>
    %cst = arith.constant dense<0.000000e+00> : vector<128xf32>
    %8 = vector.multi_reduction <add>, %3, %cst [1] : vector<128x128xf32> to vector<128xf32>
    %9 = vector.shape_cast %8 : vector<128xf32> to vector<128x1xf32>
    %cst_8 = arith.constant 1.280000e+02 : f32
    %10 = vector.broadcast %cst_8 : f32 to vector<128x1xf32>
    %11 = arith.divf %9, %10 : vector<128x1xf32>
    %12 = vector.broadcast %11 : vector<128x1xf32> to vector<128x128xf32>
    %13 = arith.subf %3, %12 : vector<128x128xf32>
    %14 = arith.mulf %13, %13 : vector<128x128xf32>
    %cst_9 = arith.constant dense<0.000000e+00> : vector<128xf32>
    %15 = vector.multi_reduction <add>, %14, %cst_9 [1] : vector<128x128xf32> to vector<128xf32>
    %16 = vector.shape_cast %15 : vector<128xf32> to vector<128x1xf32>
    %cst_10 = arith.constant 1.280000e+02 : f32
    %17 = vector.broadcast %cst_10 : f32 to vector<128x1xf32>
    %18 = arith.divf %16, %17 : vector<128x1xf32>
    %19 = vector.broadcast %11 : vector<128x1xf32> to vector<128x128xf32>
    %20 = arith.subf %3, %19 : vector<128x128xf32>
    %cst_11 = arith.constant 9.99999974E-6 : f32
    %21 = vector.broadcast %cst_11 : f32 to vector<128x1xf32>
    %22 = arith.addf %18, %21 : vector<128x1xf32>
    %23 = math.rsqrt %22 : vector<128x1xf32>
    %24 = vector.broadcast %23 : vector<128x1xf32> to vector<128x128xf32>
    %25 = arith.mulf %20, %24 : vector<128x128xf32>
    %26 = vector.broadcast %5 : vector<1x128xf32> to vector<128x128xf32>
    %27 = arith.mulf %25, %26 : vector<128x128xf32>
    %28 = vector.broadcast %7 : vector<1x128xf32> to vector<128x128xf32>
    %29 = arith.addf %27, %28 : vector<128x128xf32>
    %c0_12 = arith.constant 0 : index
    %c0_13 = arith.constant 0 : index
    %c0_14 = arith.constant 0 : index
    %30 = vector.load %arg6[%c0_12, %c0_13, %c0_14] : memref<1x128x384xbf16, #tpu.memory_space<vmem>>, vector<1x128x384xbf16>
    %31 = vector.shape_cast %30 : vector<1x128x384xbf16> to vector<128x384xbf16>
    %32 = arith.extf %31 : vector<128x384xbf16> to vector<128x384xf32>
    %cst_15 = arith.constant dense<0.000000e+00> : vector<128x384xf32>
    %33 = tpu.matmul %29, %32, %cst_15 {dimension_numbers = #tpu.dot_dimension_numbers<[1], [0], [0], [1], [0, 0, 1, 1], [], []>} : vector<128x128xf32>, vector<128x384xf32>, vector<128x384xf32> -> vector<128x384xf32>
    %c0_16 = arith.constant 0 : index
    %c0_17 = arith.constant 0 : index
    %c0_18 = arith.constant 0 : index
    %34 = vector.load %arg7[%c0_16, %c0_17, %c0_18] : memref<1x1x384xf32, #tpu.memory_space<vmem>>, vector<1x1x384xf32>
    %35 = vector.shape_cast %34 : vector<1x1x384xf32> to vector<1x384xf32>
    %36 = vector.broadcast %35 : vector<1x384xf32> to vector<128x384xf32>
    %37 = arith.addf %33, %36 : vector<128x384xf32>
    %38 = vector.extract_strided_slice %37 {offsets = [0, 0], sizes = [128, 32], strides = [1, 1]} : vector<128x384xf32> to vector<128x32xf32>
    %39 = vector.extract_strided_slice %37 {offsets = [0, 32], sizes = [128, 32], strides = [1, 1]} : vector<128x384xf32> to vector<128x32xf32>
    %40 = vector.extract_strided_slice %37 {offsets = [0, 64], sizes = [128, 32], strides = [1, 1]} : vector<128x384xf32> to vector<128x32xf32>
    %41 = vector.extract_strided_slice %37 {offsets = [0, 96], sizes = [128, 32], strides = [1, 1]} : vector<128x384xf32> to vector<128x32xf32>
    %42 = vector.shape_cast %38 : vector<128x32xf32> to vector<1x128x32xf32>
    %43 = vector.shape_cast %39 : vector<128x32xf32> to vector<1x128x32xf32>
    %44 = vector.shape_cast %40 : vector<128x32xf32> to vector<1x128x32xf32>
    %45 = vector.shape_cast %41 : vector<128x32xf32> to vector<1x128x32xf32>
    %46 = tpu.concatenate %42, %43, %44, %45 in 0 : vector<1x128x32xf32>, vector<1x128x32xf32>, vector<1x128x32xf32>, vector<1x128x32xf32> -> vector<4x128x32xf32>
    %47 = vector.shape_cast %46 : vector<4x128x32xf32> to vector<8x64x32xf32>
    %48 = vector.extract_strided_slice %37 {offsets = [0, 128], sizes = [128, 32], strides = [1, 1]} : vector<128x384xf32> to vector<128x32xf32>
    %49 = vector.extract_strided_slice %37 {offsets = [0, 160], sizes = [128, 32], strides = [1, 1]} : vector<128x384xf32> to vector<128x32xf32>
    %50 = vector.extract_strided_slice %37 {offsets = [0, 192], sizes = [128, 32], strides = [1, 1]} : vector<128x384xf32> to vector<128x32xf32>
    %51 = vector.extract_strided_slice %37 {offsets = [0, 224], sizes = [128, 32], strides = [1, 1]} : vector<128x384xf32> to vector<128x32xf32>
    %52 = vector.shape_cast %48 : vector<128x32xf32> to vector<1x128x32xf32>
    %53 = vector.shape_cast %49 : vector<128x32xf32> to vector<1x128x32xf32>
    %54 = vector.shape_cast %50 : vector<128x32xf32> to vector<1x128x32xf32>
    %55 = vector.shape_cast %51 : vector<128x32xf32> to vector<1x128x32xf32>
    %56 = tpu.concatenate %52, %53, %54, %55 in 0 : vector<1x128x32xf32>, vector<1x128x32xf32>, vector<1x128x32xf32>, vector<1x128x32xf32> -> vector<4x128x32xf32>
    %57 = vector.shape_cast %56 : vector<4x128x32xf32> to vector<8x64x32xf32>
    %58 = vector.extract_strided_slice %37 {offsets = [0, 256], sizes = [128, 32], strides = [1, 1]} : vector<128x384xf32> to vector<128x32xf32>
    %59 = vector.extract_strided_slice %37 {offsets = [0, 288], sizes = [128, 32], strides = [1, 1]} : vector<128x384xf32> to vector<128x32xf32>
    %60 = vector.extract_strided_slice %37 {offsets = [0, 320], sizes = [128, 32], strides = [1, 1]} : vector<128x384xf32> to vector<128x32xf32>
    %61 = vector.extract_strided_slice %37 {offsets = [0, 352], sizes = [128, 32], strides = [1, 1]} : vector<128x384xf32> to vector<128x32xf32>
    %62 = vector.shape_cast %58 : vector<128x32xf32> to vector<1x128x32xf32>
    %63 = vector.shape_cast %59 : vector<128x32xf32> to vector<1x128x32xf32>
    %64 = vector.shape_cast %60 : vector<128x32xf32> to vector<1x128x32xf32>
    %65 = vector.shape_cast %61 : vector<128x32xf32> to vector<1x128x32xf32>
    %66 = tpu.concatenate %62, %63, %64, %65 in 0 : vector<1x128x32xf32>, vector<1x128x32xf32>, vector<1x128x32xf32>, vector<1x128x32xf32> -> vector<4x128x32xf32>
    %67 = vector.shape_cast %66 : vector<4x128x32xf32> to vector<8x64x32xf32>
    "tpu.trace_start"() <{level = 10 : i32, message = "bqd,bkd->bqk"}> : () -> ()
    %cst_19 = arith.constant dense<0.000000e+00> : vector<8x64x64xf32>
    %68 = tpu.matmul %47, %57, %cst_19 {dimension_numbers = #tpu.dot_dimension_numbers<[2], [2], [1], [1], [0, 0, 0, 1, 1, 1], [0], [0]>} : vector<8x64x32xf32>, vector<8x64x32xf32>, vector<8x64x64xf32> -> vector<8x64x64xf32>
    "tpu.trace_stop"() : () -> ()
    %cst_20 = arith.constant 0.176776692 : f32
    %69 = vector.broadcast %cst_20 : f32 to vector<8x64x64xf32>
    %70 = arith.mulf %68, %69 : vector<8x64x64xf32>
    %71 = tpu.iota {dimensions = array<i32: 0>} : vector<64x64xi32>
    %72 = tpu.iota {dimensions = array<i32: 1>} : vector<64x64xi32>
    %73 = arith.cmpi sle, %72, %71 : vector<64x64xi32>
    %cst_21 = arith.constant 0.000000e+00 : f32
    %cst_22 = arith.constant -1.000000e+30 : f32
    %74 = vector.broadcast %cst_21 : f32 to vector<64x64xf32>
    %75 = vector.broadcast %cst_22 : f32 to vector<64x64xf32>
    %76 = arith.select %73, %74, %75 : vector<64x64xi1>, vector<64x64xf32>
    %77 = vector.shape_cast %76 : vector<64x64xf32> to vector<1x64x64xf32>
    %78 = vector.broadcast %77 : vector<1x64x64xf32> to vector<8x64x64xf32>
    %79 = arith.addf %70, %78 : vector<8x64x64xf32>
    %cst_23 = arith.constant dense<0xFF800000> : vector<8x64xf32>
    %80 = vector.multi_reduction <maximumf>, %79, %cst_23 [2] : vector<8x64x64xf32> to vector<8x64xf32>
    %81 = vector.shape_cast %80 : vector<8x64xf32> to vector<8x64x1xf32>
    %82 = vector.broadcast %81 : vector<8x64x1xf32> to vector<8x64x64xf32>
    %83 = arith.subf %79, %82 : vector<8x64x64xf32>
    %84 = math.exp %83 : vector<8x64x64xf32>
    %cst_24 = arith.constant dense<0.000000e+00> : vector<8x64xf32>
    %85 = vector.multi_reduction <add>, %84, %cst_24 [2] : vector<8x64x64xf32> to vector<8x64xf32>
    %86 = vector.shape_cast %85 : vector<8x64xf32> to vector<8x64x1xf32>
    %87 = tpu.reciprocal %86 {approx = true} : vector<8x64x1xf32> -> vector<8x64x1xf32>
    %88 = vector.broadcast %87 : vector<8x64x1xf32> to vector<8x64x64xf32>
    %89 = arith.mulf %84, %88 : vector<8x64x64xf32>
    "tpu.trace_start"() <{level = 10 : i32, message = "bqk,bkd->bqd"}> : () -> ()
    %cst_25 = arith.constant dense<0.000000e+00> : vector<8x64x32xf32>
    %90 = tpu.matmul %89, %67, %cst_25 {dimension_numbers = #tpu.dot_dimension_numbers<[2], [1], [1], [2], [0, 0, 0, 1, 1, 2], [0], [0]>} : vector<8x64x64xf32>, vector<8x64x32xf32>, vector<8x64x32xf32> -> vector<8x64x32xf32>
    "tpu.trace_stop"() : () -> ()
    %91 = vector.shape_cast %90 : vector<8x64x32xf32> to vector<4x128x32xf32>
    %c0_26 = arith.constant 0 : index
    %c0_27 = arith.constant 0 : index
    %c0_28 = arith.constant 0 : index
    %92 = vector.load %arg8[%c0_26, %c0_27, %c0_28] : memref<1x128x128xbf16, #tpu.memory_space<vmem>>, vector<1x128x128xbf16>
    %93 = vector.shape_cast %92 : vector<1x128x128xbf16> to vector<128x128xbf16>
    %94 = arith.extf %93 : vector<128x128xbf16> to vector<128x128xf32>
    %95 = vector.extract_strided_slice %91 {offsets = [0, 0, 0], sizes = [1, 128, 32], strides = [1, 1, 1]} : vector<4x128x32xf32> to vector<1x128x32xf32>
    %96 = vector.shape_cast %95 : vector<1x128x32xf32> to vector<128x32xf32>
    %97 = vector.extract_strided_slice %94 {offsets = [0, 0], sizes = [32, 128], strides = [1, 1]} : vector<128x128xf32> to vector<32x128xf32>
    %cst_29 = arith.constant dense<0.000000e+00> : vector<128x128xf32>
    %98 = tpu.matmul %96, %97, %cst_29 {dimension_numbers = #tpu.dot_dimension_numbers<[1], [0], [0], [1], [0, 0, 1, 1], [], []>} : vector<128x32xf32>, vector<32x128xf32>, vector<128x128xf32> -> vector<128x128xf32>
    %99 = vector.extract_strided_slice %91 {offsets = [1, 0, 0], sizes = [1, 128, 32], strides = [1, 1, 1]} : vector<4x128x32xf32> to vector<1x128x32xf32>
    %100 = vector.shape_cast %99 : vector<1x128x32xf32> to vector<128x32xf32>
    %101 = vector.extract_strided_slice %94 {offsets = [32, 0], sizes = [32, 128], strides = [1, 1]} : vector<128x128xf32> to vector<32x128xf32>
    %cst_30 = arith.constant dense<0.000000e+00> : vector<128x128xf32>
    %102 = tpu.matmul %100, %101, %cst_30 {dimension_numbers = #tpu.dot_dimension_numbers<[1], [0], [0], [1], [0, 0, 1, 1], [], []>} : vector<128x32xf32>, vector<32x128xf32>, vector<128x128xf32> -> vector<128x128xf32>
    %103 = arith.addf %98, %102 : vector<128x128xf32>
    %104 = vector.extract_strided_slice %91 {offsets = [2, 0, 0], sizes = [1, 128, 32], strides = [1, 1, 1]} : vector<4x128x32xf32> to vector<1x128x32xf32>
    %105 = vector.shape_cast %104 : vector<1x128x32xf32> to vector<128x32xf32>
    %106 = vector.extract_strided_slice %94 {offsets = [64, 0], sizes = [32, 128], strides = [1, 1]} : vector<128x128xf32> to vector<32x128xf32>
    %cst_31 = arith.constant dense<0.000000e+00> : vector<128x128xf32>
    %107 = tpu.matmul %105, %106, %cst_31 {dimension_numbers = #tpu.dot_dimension_numbers<[1], [0], [0], [1], [0, 0, 1, 1], [], []>} : vector<128x32xf32>, vector<32x128xf32>, vector<128x128xf32> -> vector<128x128xf32>
    %108 = arith.addf %103, %107 : vector<128x128xf32>
    %109 = vector.extract_strided_slice %91 {offsets = [3, 0, 0], sizes = [1, 128, 32], strides = [1, 1, 1]} : vector<4x128x32xf32> to vector<1x128x32xf32>
    %110 = vector.shape_cast %109 : vector<1x128x32xf32> to vector<128x32xf32>
    %111 = vector.extract_strided_slice %94 {offsets = [96, 0], sizes = [32, 128], strides = [1, 1]} : vector<128x128xf32> to vector<32x128xf32>
    %cst_32 = arith.constant dense<0.000000e+00> : vector<128x128xf32>
    %112 = tpu.matmul %110, %111, %cst_32 {dimension_numbers = #tpu.dot_dimension_numbers<[1], [0], [0], [1], [0, 0, 1, 1], [], []>} : vector<128x32xf32>, vector<32x128xf32>, vector<128x128xf32> -> vector<128x128xf32>
    %113 = arith.addf %108, %112 : vector<128x128xf32>
    %114 = arith.addf %3, %113 : vector<128x128xf32>
    %c0_33 = arith.constant 0 : index
    %c0_34 = arith.constant 0 : index
    %c0_35 = arith.constant 0 : index
    %115 = vector.load %arg9[%c0_33, %c0_34, %c0_35] : memref<1x1x128xf32, #tpu.memory_space<vmem>>, vector<1x1x128xf32>
    %116 = vector.shape_cast %115 : vector<1x1x128xf32> to vector<1x128xf32>
    %117 = vector.broadcast %116 : vector<1x128xf32> to vector<128x128xf32>
    %118 = arith.addf %114, %117 : vector<128x128xf32>
    %c0_36 = arith.constant 0 : index
    %c0_37 = arith.constant 0 : index
    %c0_38 = arith.constant 0 : index
    %119 = vector.load %arg10[%c0_36, %c0_37, %c0_38] : memref<1x1x128xf32, #tpu.memory_space<vmem>>, vector<1x1x128xf32>
    %120 = vector.shape_cast %119 : vector<1x1x128xf32> to vector<1x128xf32>
    %c0_39 = arith.constant 0 : index
    %c0_40 = arith.constant 0 : index
    %c0_41 = arith.constant 0 : index
    %121 = vector.load %arg11[%c0_39, %c0_40, %c0_41] : memref<1x1x128xf32, #tpu.memory_space<vmem>>, vector<1x1x128xf32>
    %122 = vector.shape_cast %121 : vector<1x1x128xf32> to vector<1x128xf32>
    %cst_42 = arith.constant dense<0.000000e+00> : vector<128xf32>
    %123 = vector.multi_reduction <add>, %118, %cst_42 [1] : vector<128x128xf32> to vector<128xf32>
    %124 = vector.shape_cast %123 : vector<128xf32> to vector<128x1xf32>
    %cst_43 = arith.constant 1.280000e+02 : f32
    %125 = vector.broadcast %cst_43 : f32 to vector<128x1xf32>
    %126 = arith.divf %124, %125 : vector<128x1xf32>
    %127 = vector.broadcast %126 : vector<128x1xf32> to vector<128x128xf32>
    %128 = arith.subf %118, %127 : vector<128x128xf32>
    %129 = arith.mulf %128, %128 : vector<128x128xf32>
    %cst_44 = arith.constant dense<0.000000e+00> : vector<128xf32>
    %130 = vector.multi_reduction <add>, %129, %cst_44 [1] : vector<128x128xf32> to vector<128xf32>
    %131 = vector.shape_cast %130 : vector<128xf32> to vector<128x1xf32>
    %cst_45 = arith.constant 1.280000e+02 : f32
    %132 = vector.broadcast %cst_45 : f32 to vector<128x1xf32>
    %133 = arith.divf %131, %132 : vector<128x1xf32>
    %134 = vector.broadcast %126 : vector<128x1xf32> to vector<128x128xf32>
    %135 = arith.subf %118, %134 : vector<128x128xf32>
    %cst_46 = arith.constant 9.99999974E-6 : f32
    %136 = vector.broadcast %cst_46 : f32 to vector<128x1xf32>
    %137 = arith.addf %133, %136 : vector<128x1xf32>
    %138 = math.rsqrt %137 : vector<128x1xf32>
    %139 = vector.broadcast %138 : vector<128x1xf32> to vector<128x128xf32>
    %140 = arith.mulf %135, %139 : vector<128x128xf32>
    %141 = vector.broadcast %120 : vector<1x128xf32> to vector<128x128xf32>
    %142 = arith.mulf %140, %141 : vector<128x128xf32>
    %143 = vector.broadcast %122 : vector<1x128xf32> to vector<128x128xf32>
    %144 = arith.addf %142, %143 : vector<128x128xf32>
    %c0_47 = arith.constant 0 : index
    %c0_48 = arith.constant 0 : index
    %c0_49 = arith.constant 0 : index
    %145 = vector.load %arg12[%c0_47, %c0_48, %c0_49] : memref<1x128x512xbf16, #tpu.memory_space<vmem>>, vector<1x128x512xbf16>
    %146 = vector.shape_cast %145 : vector<1x128x512xbf16> to vector<128x512xbf16>
    %147 = arith.extf %146 : vector<128x512xbf16> to vector<128x512xf32>
    %cst_50 = arith.constant dense<0.000000e+00> : vector<128x512xf32>
    %148 = tpu.matmul %144, %147, %cst_50 {dimension_numbers = #tpu.dot_dimension_numbers<[1], [0], [0], [1], [0, 0, 1, 1], [], []>} : vector<128x128xf32>, vector<128x512xf32>, vector<128x512xf32> -> vector<128x512xf32>
    %c0_51 = arith.constant 0 : index
    %c0_52 = arith.constant 0 : index
    %c0_53 = arith.constant 0 : index
    %149 = vector.load %arg13[%c0_51, %c0_52, %c0_53] : memref<1x1x512xf32, #tpu.memory_space<vmem>>, vector<1x1x512xf32>
    %150 = vector.shape_cast %149 : vector<1x1x512xf32> to vector<1x512xf32>
    %151 = vector.broadcast %150 : vector<1x512xf32> to vector<128x512xf32>
    %152 = arith.addf %148, %151 : vector<128x512xf32>
    %cst_54 = arith.constant 1.702000e+00 : f32
    %153 = vector.broadcast %cst_54 : f32 to vector<128x512xf32>
    %154 = arith.mulf %153, %152 : vector<128x512xf32>
    %155 = arith.negf %154 : vector<128x512xf32>
    %156 = math.exp %155 : vector<128x512xf32>
    %cst_55 = arith.constant 1.000000e+00 : f32
    %157 = vector.broadcast %cst_55 : f32 to vector<128x512xf32>
    %158 = arith.addf %157, %156 : vector<128x512xf32>
    %159 = arith.divf %157, %158 : vector<128x512xf32>
    %160 = arith.mulf %152, %159 : vector<128x512xf32>
    %c0_56 = arith.constant 0 : index
    %c0_57 = arith.constant 0 : index
    %c0_58 = arith.constant 0 : index
    %161 = vector.load %arg14[%c0_56, %c0_57, %c0_58] : memref<1x512x128xbf16, #tpu.memory_space<vmem>>, vector<1x512x128xbf16>
    %162 = vector.shape_cast %161 : vector<1x512x128xbf16> to vector<512x128xbf16>
    %163 = arith.extf %162 : vector<512x128xbf16> to vector<512x128xf32>
    %cst_59 = arith.constant dense<0.000000e+00> : vector<128x128xf32>
    %164 = tpu.matmul %160, %163, %cst_59 {dimension_numbers = #tpu.dot_dimension_numbers<[1], [0], [0], [1], [0, 0, 1, 1], [], []>} : vector<128x512xf32>, vector<512x128xf32>, vector<128x128xf32> -> vector<128x128xf32>
    %165 = arith.addf %118, %164 : vector<128x128xf32>
    %c0_60 = arith.constant 0 : index
    %c0_61 = arith.constant 0 : index
    %c0_62 = arith.constant 0 : index
    %166 = vector.load %arg15[%c0_60, %c0_61, %c0_62] : memref<1x1x128xf32, #tpu.memory_space<vmem>>, vector<1x1x128xf32>
    %167 = vector.shape_cast %166 : vector<1x1x128xf32> to vector<1x128xf32>
    %168 = vector.broadcast %167 : vector<1x128xf32> to vector<128x128xf32>
    %169 = arith.addf %165, %168 : vector<128x128xf32>
    %c0_63 = arith.constant 0 : index
    %c0_64 = arith.constant 0 : index
    %170 = vector.load %arg19[%c0_63, %c0_64] : memref<128x128xf32, #tpu.memory_space<vmem>>, vector<128x128xf32>
    tpu.vector_store %arg19[%c0_63, %c0_64], %169 {strides = array<i32>} : memref<128x128xf32, #tpu.memory_space<vmem>>, vector<128x128xf32>,
    %c1_i32 = arith.constant 1 : i32
    %171 = arith.cmpi eq, %arg0, %c1_i32 : i32
    %172 = arith.extui %171 : i1 to i32
    %c0_i32_65 = arith.constant 0 : i32
    %173 = arith.cmpi ne, %172, %c0_i32_65 : i32
    scf.if %173 {
      %c0_66 = arith.constant 0 : index
      %c0_67 = arith.constant 0 : index
      %174 = vector.load %arg16[%c0_66, %c0_67] : memref<1x128xf32, #tpu.memory_space<vmem>>, vector<1x128xf32>
      %c0_68 = arith.constant 0 : index
      %c0_69 = arith.constant 0 : index
      %175 = vector.load %arg17[%c0_68, %c0_69] : memref<1x128xf32, #tpu.memory_space<vmem>>, vector<1x128xf32>
      %cst_70 = arith.constant dense<0.000000e+00> : vector<128xf32>
      %176 = vector.multi_reduction <add>, %169, %cst_70 [1] : vector<128x128xf32> to vector<128xf32>
      %177 = vector.shape_cast %176 : vector<128xf32> to vector<128x1xf32>
      %cst_71 = arith.constant 1.280000e+02 : f32
      %178 = vector.broadcast %cst_71 : f32 to vector<128x1xf32>
      %179 = arith.divf %177, %178 : vector<128x1xf32>
      %180 = vector.broadcast %179 : vector<128x1xf32> to vector<128x128xf32>
      %181 = arith.subf %169, %180 : vector<128x128xf32>
      %182 = arith.mulf %181, %181 : vector<128x128xf32>
      %cst_72 = arith.constant dense<0.000000e+00> : vector<128xf32>
      %183 = vector.multi_reduction <add>, %182, %cst_72 [1] : vector<128x128xf32> to vector<128xf32>
      %184 = vector.shape_cast %183 : vector<128xf32> to vector<128x1xf32>
      %cst_73 = arith.constant 1.280000e+02 : f32
      %185 = vector.broadcast %cst_73 : f32 to vector<128x1xf32>
      %186 = arith.divf %184, %185 : vector<128x1xf32>
      %187 = vector.broadcast %179 : vector<128x1xf32> to vector<128x128xf32>
      %188 = arith.subf %169, %187 : vector<128x128xf32>
      %cst_74 = arith.constant 9.99999974E-6 : f32
      %189 = vector.broadcast %cst_74 : f32 to vector<128x1xf32>
      %190 = arith.addf %186, %189 : vector<128x1xf32>
      %191 = math.rsqrt %190 : vector<128x1xf32>
      %192 = vector.broadcast %191 : vector<128x1xf32> to vector<128x128xf32>
      %193 = arith.mulf %188, %192 : vector<128x128xf32>
      %194 = vector.broadcast %174 : vector<1x128xf32> to vector<128x128xf32>
      %195 = arith.mulf %193, %194 : vector<128x128xf32>
      %196 = vector.broadcast %175 : vector<1x128xf32> to vector<128x128xf32>
      %197 = arith.addf %195, %196 : vector<128x128xf32>
      %c0_75 = arith.constant 0 : index
      %c0_76 = arith.constant 0 : index
      %198 = vector.load %arg18[%c0_75, %c0_76] : memref<128x128xf32, #tpu.memory_space<vmem>>, vector<128x128xf32>
      tpu.vector_store %arg18[%c0_75, %c0_76], %197 {strides = array<i32>} : memref<128x128xf32, #tpu.memory_space<vmem>>, vector<128x128xf32>,
    } else {
    }
    return
  }
  func.func @transform_0(%arg0: i32, %arg1: memref<128xi32, #tpu.memory_space<smem>>) -> (i32, i32) {
    %c0_i32 = arith.constant 0 : i32
    %c0_i32_0 = arith.constant 0 : i32
    %c0_i32_1 = arith.constant 0 : i32
    return %c0_i32, %c0_i32_0 : i32, i32
  }
  func.func @transform_2(%arg0: i32, %arg1: memref<128xi32, #tpu.memory_space<smem>>) -> (i32, i32, i32) {
    %c0_i32 = arith.constant 0 : i32
    %c0_i32_0 = arith.constant 0 : i32
    %c0_i32_1 = arith.constant 0 : i32
    return %arg0, %c0_i32, %c0_i32_0 : i32, i32, i32
  }
  func.func @transform_3(%arg0: i32, %arg1: memref<128xi32, #tpu.memory_space<smem>>) -> (i32, i32, i32) {
    %c0_i32 = arith.constant 0 : i32
    %c0_i32_0 = arith.constant 0 : i32
    %c0_i32_1 = arith.constant 0 : i32
    return %arg0, %c0_i32, %c0_i32_0 : i32, i32, i32
  }
  func.func @transform_4(%arg0: i32, %arg1: memref<128xi32, #tpu.memory_space<smem>>) -> (i32, i32, i32) {
    %c0_i32 = arith.constant 0 : i32
    %c0_i32_0 = arith.constant 0 : i32
    %c0_i32_1 = arith.constant 0 : i32
    return %arg0, %c0_i32, %c0_i32_0 : i32, i32, i32
  }
  func.func @transform_5(%arg0: i32, %arg1: memref<128xi32, #tpu.memory_space<smem>>) -> (i32, i32, i32) {
    %c0_i32 = arith.constant 0 : i32
    %c0_i32_0 = arith.constant 0 : i32
    %c0_i32_1 = arith.constant 0 : i32
    return %arg0, %c0_i32, %c0_i32_0 : i32, i32, i32
  }
  func.func @transform_6(%arg0: i32, %arg1: memref<128xi32, #tpu.memory_space<smem>>) -> (i32, i32, i32) {
    %c0_i32 = arith.constant 0 : i32
    %c0_i32_0 = arith.constant 0 : i32
    %c0_i32_1 = arith.constant 0 : i32
    return %arg0, %c0_i32, %c0_i32_0 : i32, i32, i32
  }
  func.func @transform_7(%arg0: i32, %arg1: memref<128xi32, #tpu.memory_space<smem>>) -> (i32, i32, i32) {
    %c0_i32 = arith.constant 0 : i32
    %c0_i32_0 = arith.constant 0 : i32
    %c0_i32_1 = arith.constant 0 : i32
    return %arg0, %c0_i32, %c0_i32_0 : i32, i32, i32
  }
  func.func @transform_8(%arg0: i32, %arg1: memref<128xi32, #tpu.memory_space<smem>>) -> (i32, i32, i32) {
    %c0_i32 = arith.constant 0 : i32
    %c0_i32_0 = arith.constant 0 : i32
    %c0_i32_1 = arith.constant 0 : i32
    return %arg0, %c0_i32, %c0_i32_0 : i32, i32, i32
  }
  func.func @transform_9(%arg0: i32, %arg1: memref<128xi32, #tpu.memory_space<smem>>) -> (i32, i32, i32) {
    %c0_i32 = arith.constant 0 : i32
    %c0_i32_0 = arith.constant 0 : i32
    %c0_i32_1 = arith.constant 0 : i32
    return %arg0, %c0_i32, %c0_i32_0 : i32, i32, i32
  }
  func.func @transform_10(%arg0: i32, %arg1: memref<128xi32, #tpu.memory_space<smem>>) -> (i32, i32, i32) {
    %c0_i32 = arith.constant 0 : i32
    %c0_i32_0 = arith.constant 0 : i32
    %c0_i32_1 = arith.constant 0 : i32
    return %arg0, %c0_i32, %c0_i32_0 : i32, i32, i32
  }
  func.func @transform_11(%arg0: i32, %arg1: memref<128xi32, #tpu.memory_space<smem>>) -> (i32, i32, i32) {
    %c0_i32 = arith.constant 0 : i32
    %c0_i32_0 = arith.constant 0 : i32
    %c0_i32_1 = arith.constant 0 : i32
    return %arg0, %c0_i32, %c0_i32_0 : i32, i32, i32
  }
  func.func @transform_12(%arg0: i32, %arg1: memref<128xi32, #tpu.memory_space<smem>>) -> (i32, i32, i32) {
    %c0_i32 = arith.constant 0 : i32
    %c0_i32_0 = arith.constant 0 : i32
    %c0_i32_1 = arith.constant 0 : i32
    return %arg0, %c0_i32, %c0_i32_0 : i32, i32, i32
  }
  func.func @transform_13(%arg0: i32, %arg1: memref<128xi32, #tpu.memory_space<smem>>) -> (i32, i32, i32) {
    %c0_i32 = arith.constant 0 : i32
    %c0_i32_0 = arith.constant 0 : i32
    %c0_i32_1 = arith.constant 0 : i32
    return %arg0, %c0_i32, %c0_i32_0 : i32, i32, i32
  }
  func.func @transform_14(%arg0: i32, %arg1: memref<128xi32, #tpu.memory_space<smem>>) -> (i32, i32) {
    %c0_i32 = arith.constant 0 : i32
    %c0_i32_0 = arith.constant 0 : i32
    %c0_i32_1 = arith.constant 0 : i32
    return %c0_i32, %c0_i32_0 : i32, i32
  }
  func.func @transform_15(%arg0: i32, %arg1: memref<128xi32, #tpu.memory_space<smem>>) -> (i32, i32) {
    %c0_i32 = arith.constant 0 : i32
    %c0_i32_0 = arith.constant 0 : i32
    %c0_i32_1 = arith.constant 0 : i32
    return %c0_i32, %c0_i32_0 : i32, i32
  }
  func.func @transform_16(%arg0: i32, %arg1: memref<128xi32, #tpu.memory_space<smem>>) -> (i32, i32) {
    %c0_i32 = arith.constant 0 : i32
    %c0_i32_0 = arith.constant 0 : i32
    %c0_i32_1 = arith.constant 0 : i32
    return %c0_i32, %c0_i32_0 : i32, i32
  }
}

</mosaic_0001>

<bundles_post_ra>
// kernel: clip_forward_impl.1
= control target key start
LH: loop header
LB: loop body
LE: loop exit
PB: predicated region body
PF: predicated region fallthrough
CT: control target
= control target key end

     0   :  { %s15176_s0 = inlined_call_operand.vmem [shape: s32[128], index: 0, kind: input, shape index: {}]   ;;  %s15177_s1 = inlined_call_operand.vmem [shape: f32[128,128], index: 1, kind: input, shape index: {}]   ;;  %s15178_s2 = inlined_call_operand.hbm [shape: f32[512,128], index: 2, kind: input, shape index: {}]   ;;  %s15179_s3 = inlined_call_operand.vmem [shape: f32[2,1,128], index: 3, kind: input, shape index: {}]   ;;  %s15180_s4 = inlined_call_operand.vmem [shape: f32[2,1,128], index: 4, kind: input, shape index: {}]   ;;  %s15181_s5 = inlined_call_operand.hbm [shape: bf16[2,128,384], index: 5, kind: input, shape index: {}]   ;;  %s15182_s6 = inlined_call_operand.vmem [shape: f32[2,1,384], index: 6, kind: input, shape index: {}]   ;;  %s15183_s7 = inlined_call_operand.vmem [shape: bf16[2,128,128], index: 7, kind: input, shape index: {}]   ;;  %s15184_s8 = inlined_call_operand.vmem [shape: f32[2,1,128], index: 8, kind: input, shape index: {}]   ;;  %s15185_s9 = inlined_call_operand.vmem [shape: f32[2,1,128], index: 9, kind: input, shape index: {}]   ;;  %s15186_s10 = inlined_call_operand.vmem [shape: f32[2,1,128], index: 10, kind: input, shape index: {}]   ;;  %s15187_s11 = inlined_call_operand.hbm [shape: bf16[2,128,512], index: 11, kind: input, shape index: {}]   ;;  %s15188_s12 = inlined_call_operand.vmem [shape: f32[2,1,512], index: 12, kind: input, shape index: {}]   ;;  %s15189_s13 = inlined_call_operand.hbm [shape: bf16[2,512,128], index: 13, kind: input, shape index: {}]   ;;  %s15190_s14 = inlined_call_operand.vmem [shape: f32[2,1,128], index: 14, kind: input, shape index: {}]   ;;  %s15191_s15 = inlined_call_operand.vmem [shape: f32[1,128], index: 15, kind: input, shape index: {}]   ;;  %s15192_s16 = inlined_call_operand.vmem [shape: f32[1,128], index: 16, kind: input, shape index: {}]   ;;  %s15193_s17 = inlined_call_operand.hbm [shape: f32[128,128], index: 17, kind: output, shape index: {}]  }
   0x1   :  { %15272 = sst [smem:[#allocation85_spill]] %s15176_s0 }
   0x2   :  { %15273 = sst [smem:[#allocation86_spill]] %s15177_s1  ;;  %s15285_s26 = sld [smem:[#allocation85_spill]] }
   0x3   :  { %15274 = sst [smem:[#allocation87_spill]] %s15178_s2 }
   0x4   :  { %15275 = sst [smem:[#allocation88_spill]] %s15181_s5 }
   0x5   :  { %15276 = sst [smem:[#allocation89_spill]] %s15182_s6 }
   0x6   :  { %15277 = sst [smem:[#allocation90_spill]] %s15183_s7 }
   0x7   :  { %15278 = sst [smem:[#allocation91_spill]] %s15187_s11 }
   0x8   :  { %15279 = sst [smem:[#allocation92_spill]] %s15188_s12  ;;  %s22_s2 = sshll.u32 %s15285_s26, 4  ;;  %s23_s2 = int_to_ptr.vmem [resolvable:$true] %s22_s2 }
   0x9   :  { %15280 = sst [smem:[#allocation93_spill]] %s15189_s13  ;;  %s11332_s27 = scalar_lea.vmem %s23_s2, 16 }
   0xa   :  { %15281 = sst [smem:[#allocation94_spill]] %s15190_s14  ;;  %p11333_p0 = scmp.ne.s32.totalorder %s23_s2, %s11332_s27 }
   0xb   :  { %15282 = sst [smem:[#allocation95_spill]] %s15191_s15  ;;  %p11337_p1 = scmp.lt.s32.totalorder %s23_s2, %s23_s2 }
   0xc   :  { %15283 = sst [smem:[#allocation96_spill]] %s15192_s16  ;;  %p11338_p2 = scmp.lt.s32.totalorder %s11332_s27, %s11332_s27 }
   0xd   :  { %15284 = sst [smem:[#allocation97_spill]] %s15193_s17 }
   0xe   :  { %p11339_p3 = por %p11338_p2, %p11337_p1 }
  0x10   :  { %p11340_p4 = pnand %p11339_p3, %p11333_p0 }
  0x12   :  { %11343 = shalt.err (!%p11340_p4)  }
  0x13   :  { %s11640_s28 = smov [#allocation5]  }
  0x14   :  { %25 = dma.vmem_to_smem %s23_s2, 16, %s11640_s28, [#allocation4] }
  0x15   :  { %11604 = dma.done.wait [#allocation4], 16 }
  0x16   :  { %11605 = vsyncadd [#allocation4], 4294967280 }
  0x17   :  { %27 = sfence }
  0x18   :  { %28 = vsyncpa [#allocation7], 0 }
  0x19   :  { %30 = vsyncpa [#allocation7 + $0x1], 0 }
  0x1a   :  { %31 = vsyncpa [#allocation10], 0 }
  0x1b   :  { %33 = vsyncpa [#allocation10 + $0x1], 0 }
  0x1c   :  { %34 = vsyncpa [#allocation8], 0  ;;  %s11755_s29 = smov 0   ;;  %s11757_s0 = smov 0  }
  0x1d   :  { %s11759_s30 = smov 0   ;;  %s11761_s18 = smov 0  }
  0x1e LB: > { %15286 = sst [smem:[#allocation31_spill]] %s11626_s0  ;;  %s11774_s2 = sadd.s32 4294967295, %s11634_s18   ;;  %s11634_s18 = sphi %s11761_s18, %s15449_s18   ;;  %s11630_s30 = sphi %s11759_s30, %s15452_s30   ;;  %s11626_s0 = sphi %s11757_s0, %s15451_s0   ;;  %s11622_s29 = sphi %s11755_s29, %s15450_s29  }
  0x1f   : > { %15287 = sst [smem:[#allocation32_spill]] %s11630_s30  ;;  %s11777_s19 = sadd.s32 1, %s11634_s18  }
  0x20   : > { %15288 = sst [smem:[#allocation33_spill]] %s11774_s2  ;;  %s117_s1 = ssub.s32 %s11634_s18, %s11777_s19 }
  0x21   : > { %15289 = sst [smem:[#allocation34_spill]] %s11777_s19  ;;  %s120_s20 = sadd.s32 1, %s11630_s30 }
  0x22   : > { %p118_p5 = scmp.eq.s32.totalorder %s117_s1, 0  ;;  %p127_p6 = scmp.ne.s32.totalorder %s11630_s30, %s11626_s0 }
  0x23   : > { %p128_p7 = scmp.eq.s32.totalorder %s11634_s18, 0  ;;  %p133_p8 = scmp.ne.s32.totalorder %s11626_s0, %s11622_s29 }
  0x24   : > { %s11787_s21 = scalar_select %p118_p5, %s11630_s30, %s120_s20  }
  0x25   : > { %p129_p9 = por %p128_p7, %p127_p6  ;;  %p134_p10 = scmp.eq.s32.totalorder %s11774_s2, 0 }
  0x26   : > { %15290 = sst [smem:[#allocation35_spill]] %s11787_s21  ;;  %p10325_p11 = scmp.lt.s32.totalorder %s11634_s18, 2 }
  0x27   : > { %p11791_p12 = por %p134_p10, %p133_p8  ;;  %s11796_s23 = sand.u32 1, %s11630_s30  }
  0x28   : > { %p11798_p13 = pnand %p10325_p11, %p129_p9  ;;  %s529_s25 = sand.u32 1, %s11634_s18  }
  0x29   : > { %s15291_s22 = scalar_select %p11791_p12, 1, 0 }
  0x2a   : > { %s15200_s26 = sshll.u32 %s11796_s23, 8  ;;  %s15201_s27 = sshll.u32 %s11634_s18, 12 }
  0x2b   : > { %s533_s28 = scalar_lea.vmem [#allocation9], %s15200_s26  ;;  %s15293_s11 = sld [smem:[#allocation91_spill]] }
  0x2c   : > { %s540_s29 = sshll.u32 %s533_s28, 4  ;;  %s11816_s30 = scalar_lea.sflag [#allocation10], %s529_s25  ;;  %s11814_s29 = int_to_ptr.vmem [resolvable:$true] %s540_s29 }
  0x2d   : > { %p11822_p1 = pneg %p11798_p13 }
  0x31   : > { %s11812_s21 = scalar_lea.hbm %s15293_s11, %s15201_s27  ;;  %s11349_s20 = scalar_lea.hbm %s15293_s11, 8192 }
  0x32   : > { %s11344_s19 = scalar_lea.hbm %s11812_s21, 4096  ;;  %p11350_p4 = scmp.lt.u32.totalorder %s11812_s21, %s15293_s11 }
  0x33   : > { %p11345_p0 = scmp.ne.s32.totalorder %s11812_s21, %s11344_s19  ;;  %p11351_p5 = scmp.lt.u32.totalorder %s11349_s20, %s11344_s19 }
  0x34   : > { %p11353_p7 = scmp.lt.u32.totalorder %s11344_s19, %s11812_s21 }
  0x35   : > { %p11347_p2 = pnand %p11822_p1, %p11345_p0  ;;  %p11352_p6 = por %p11351_p5, %p11350_p4 }
  0x37   : > { %p11348_p3 = pneg %p11347_p2  ;;  %p11354_p8 = por %p11353_p7, %p11352_p6 }
  0x39   : > { %p11355_p9 = pnand %p11354_p8, %p11348_p3 }
  0x3b   : > { %11358 = shalt.err (!%p11355_p9)
}
  0x3c   : > { %s11359_s25 = scalar_lea.vmem %s11814_s29, 4096  ;;  %s11641_s28 = smov [#allocation9]  }
  0x3d   : > { %p11360_p10 = scmp.ne.s32.totalorder %s11814_s29, %s11359_s25  ;;  %s11364_s1 = sshll.u32 %s11641_s28, 4  ;;  %s11365_s1 = int_to_ptr.vmem [resolvable:$false] %s11364_s1 }
  0x3e   : > { %s11366_s17 = scalar_lea.vmem %s11365_s1, 8192  ;;  %p11367_p2 = scmp.lt.s32.totalorder %s11814_s29, %s11365_s1 }
  0x3f   : > { %p11362_p11 = pnand %p11360_p10, %p11822_p1  ;;  %p11368_p12 = scmp.lt.s32.totalorder %s11366_s17, %s11359_s25 }
  0x41   : > { %p11363_p0 = pneg %p11362_p11  ;;  %p11369_p4 = por %p11368_p12, %p11367_p2 }
  0x43   : > { %p11370_p5 = pnand %p11369_p4, %p11363_p0 }
  0x45   : > { %11373 = shalt.err (!%p11370_p5)
}
  0x46   : > { %s11642_s19 = smov 256   ;;  %s11643_s27 = smov 16  }
  0x47   : > { %10321 = dma.hbm_to_vmem [thread:$0]  (!%p11798_p13), %s11812_s21, 4096, %s11814_s29, %s11816_s30, %s11642_s19, %s11642_s19, %s11643_s27  }
  0x48   : > { %s15295_s20 = sshll.u32 %s11634_s18, 12  ;;  %s15296_s13 = sld [smem:[#allocation93_spill]] }
  0x49   : > { %s15297_s17 = sshll.u32 %s11796_s23, 8  ;;  %p7911_p12 = scmp.ge.s32.totalorder %s11634_s18, 1 }
  0x4a   : > { %s561_s11 = scalar_lea.vmem [#allocation11], %s15297_s17  ;;  %p582_p3 = scmp.lt.s32.totalorder %s11634_s18, 3 }
  0x4b   : > { %s568_s16 = sshll.u32 %s561_s11, 4  ;;  %s10297_s15 = smul.u32 192, %s11796_s23  ;;  %s11856_s16 = int_to_ptr.vmem [resolvable:$true] %s568_s16 }
  0x4c   : > { %p11860_p6 = pnand %p7911_p12, %p582_p3  ;;  %s10298_s21 = smul.u32 3072, %s11634_s18 }
  0x4d   : > { %s15299_s5 = sld [smem:[#allocation88_spill]]  ;;  %s479_s11 = scalar_lea.vmem [#allocation6], %s10297_s15 }
  0x4e   : > { %s11851_s1 = scalar_lea.hbm %s15296_s13, %s15295_s20  ;;  %s486_s20 = sshll.u32 %s479_s11, 4  ;;  %s11870_s20 = int_to_ptr.vmem [resolvable:$true] %s486_s20 }
  0x4f   : > { %s15298_s14 = scalar_select %p11860_p6, 1, 0 }
  0x50   : > { %s476_s25 = scalar_lea.sflag [#allocation7], %s11796_s23 }
  0x53   : > { %s11868_s27 = scalar_lea.hbm %s15299_s5, %s10298_s21  ;;  %s11379_s29 = scalar_lea.hbm %s15299_s5, 6144 }
  0x54   : > { %s11374_s28 = scalar_lea.hbm %s11868_s27, 3072  ;;  %p11380_p10 = scmp.lt.u32.totalorder %s11868_s27, %s15299_s5 }
  0x55   : > { %p11375_p7 = scmp.ne.s32.totalorder %s11868_s27, %s11374_s28  ;;  %p11381_p11 = scmp.lt.u32.totalorder %s11379_s29, %s11374_s28 }
  0x56   : > { %p11383_p2 = scmp.lt.u32.totalorder %s11374_s28, %s11868_s27 }
  0x57   : > { %p11377_p8 = pnand %p11375_p7, %p11822_p1  ;;  %p11382_p0 = por %p11381_p11, %p11380_p10 }
  0x59   : > { %p11378_p9 = pneg %p11377_p8  ;;  %p11384_p4 = por %p11383_p2, %p11382_p0 }
  0x5b   : > { %p11385_p5 = pnand %p11384_p4, %p11378_p9 }
  0x5d   : > { %11388 = shalt.err (!%p11385_p5)
}
  0x5e   : > { %s11389_s15 = scalar_lea.vmem %s11870_s20, 3072  ;;  %s11644_s11 = smov [#allocation6]  }
  0x5f   : > { %p11390_p12 = scmp.ne.s32.totalorder %s11870_s20, %s11389_s15  ;;  %s11394_s18 = sshll.u32 %s11644_s11, 4  ;;  %s11395_s18 = int_to_ptr.vmem [resolvable:$false] %s11394_s18 }
  0x60   : > { %s11396_s17 = scalar_lea.vmem %s11395_s18, 6144  ;;  %p11397_p8 = scmp.lt.s32.totalorder %s11870_s20, %s11395_s18 }
  0x61   : > { %p11392_p3 = pnand %p11390_p12, %p11822_p1  ;;  %p11398_p6 = scmp.lt.s32.totalorder %s11396_s17, %s11389_s15 }
  0x63   : > { %p11393_p7 = pneg %p11392_p3  ;;  %p11399_p10 = por %p11398_p6, %p11397_p8 }
  0x65   : > { %p11400_p11 = pnand %p11399_p10, %p11393_p7 }
  0x67   : > { %11403 = shalt.err (!%p11400_p11)
}
  0x68   : > { %s11645_s28 = smov 192   ;;  %s11646_s29 = smov 12  }
  0x69   : > { %10318 = dma.hbm_to_vmem [thread:$0]  (!%p11798_p13), %s11868_s27, 3072, %s11870_s20, %s476_s25, %s11645_s28, %s11645_s28, %s11646_s29  }
  0x6a   : > { %s11404_s21 = scalar_lea.hbm %s11851_s1, 4096  ;;  %s11409_s11 = scalar_lea.hbm %s15296_s13, 8192 }
  0x6b   : > { %p11405_p9 = scmp.ne.s32.totalorder %s11851_s1, %s11404_s21  ;;  %p11410_p2 = scmp.lt.u32.totalorder %s11851_s1, %s15296_s13 }
  0x6c   : > { %p11411_p4 = scmp.lt.u32.totalorder %s11409_s11, %s11404_s21  ;;  %p11413_p12 = scmp.lt.u32.totalorder %s11404_s21, %s11851_s1 }
  0x6d   : > { %p11407_p6 = pnand %p11405_p9, %p11822_p1 }
  0x6e   : > { %p11412_p5 = por %p11411_p4, %p11410_p2 }
  0x6f   : > { %p11408_p0 = pneg %p11407_p6 }
  0x70   : > { %p11414_p3 = por %p11413_p12, %p11412_p5 }
  0x72   : > { %p11415_p7 = pnand %p11414_p3, %p11408_p0 }
  0x74   : > { %11418 = shalt.err (!%p11415_p7)
}
  0x75   : > { %s11419_s23 = scalar_lea.vmem %s11856_s16, 4096  ;;  %s11647_s27 = smov [#allocation11]  }
  0x76   : > { %p11420_p8 = scmp.ne.s32.totalorder %s11856_s16, %s11419_s23  ;;  %s11424_s20 = sshll.u32 %s11647_s27, 4  ;;  %s11425_s20 = int_to_ptr.vmem [resolvable:$false] %s11424_s20 }
  0x77   : > { %s11426_s25 = scalar_lea.vmem %s11425_s20, 8192  ;;  %p11427_p9 = scmp.lt.s32.totalorder %s11856_s16, %s11425_s20 }
  0x78   : > { %p11422_p10 = pnand %p11420_p8, %p11822_p1  ;;  %p11428_p6 = scmp.lt.s32.totalorder %s11426_s25, %s11419_s23 }
  0x7a   : > { %p11423_p11 = pneg %p11422_p10  ;;  %p11429_p2 = por %p11428_p6, %p11427_p9 }
  0x7c   : > { %p11430_p4 = pnand %p11429_p2, %p11423_p11 }
  0x7e   : > { %11433 = shalt.err (!%p11430_p4)
}
  0x7f   : > { %s11648_s28 = smov 64   ;;  %s11649_s29 = smov 4  }
  0x80   : > { %10324 = dma.hbm_to_vmem [thread:$0]  (!%p11798_p13), %s11851_s1, 4096, %s11856_s16, %s11816_s30, %s11648_s28, %s11648_s28, %s11649_s29  }
  0x81   : > { %p15300_p1 = scmp.ne.s32.totalorder %s15298_s14, 0 }
  0x83   : > { %586 = sbr.rel (%p15300_p1) target bundleno = 3405 (0xd4d), region = 80 }
  0x8a   : > { %s588_s26 = sand.u32 1, %s11626_s0   ;;  %p15301_p0 = scmp.ne.s32.totalorder %s15291_s22, 0 }
  0x8b   : > { %s10299_s21 = smul.u32 192, %s588_s26  ;;  %s589_s19 = scalar_lea.sflag [#allocation7], %s588_s26 }
  0x8d   : > { %s11921_s15 = scalar_lea.vmem [#allocation6], %s10299_s21 }
  0x8e   : > { %11607 = dma.done.wait (%p15301_p0), %s589_s19, 3072  }
  0x8f   : > { %11609 = vsyncadd (%p15301_p0), %s589_s19, 4294964224  ;;  %s597_s11 = sand.u32 1, %s11774_s2   ;;  %s7912_s24 = sshll.u32 %s588_s26, 8 }
  0x90   : > { %s598_s16 = scalar_lea.sflag [#allocation10], %s597_s11  ;;  %s11928_s30 = scalar_lea.vmem [#allocation9], %s7912_s24 }
  0x91   : > { %11611 = dma.done.wait (%p15301_p0), %s598_s16, 8192  }
  0x92   : > { %11613 = vsyncadd (%p15301_p0), %s598_s16, 4294959104  ;;  %p693_p13 = scmp.lt.s32.totalorder %s11774_s2, 1  ;;  %s15302_s7 = sld [smem:[#allocation90_spill]] }
  0x93   : > { %s15303_s6 = sld [smem:[#allocation89_spill]]  ;;  %s15304_s12 = sld [smem:[#allocation92_spill]] }
  0x94   : > { %s11936_s14 = scalar_select %p693_p13, %s11774_s2, 1 }
  0x95   : > { %p7917_p5 = scmp.ne.s32.totalorder %s11774_s2, 0 }
  0x96   : > { %s10300_s20 = smul.u32 3, %s11936_s14  ;;  %s8266_s25 = sshll.u32 %s11936_s14, 6 }
  0x97   : > { %s7916_s28 = sshll.u32 %s11936_s14, 2  ;;  %727 = sbr.rel (%p7917_p5) target bundleno = 305 (0x131), region = 96 }
  0x98   : > { %s11951_s26 = scalar_lea.vmem %s15302_s7, %s8266_s25  ;;  %s728_s5 = sld [smem:[#allocation5]] (!%p7917_p5) }
  0x99   : > { %s11960_s18 = scalar_lea.vmem %s15303_s6, %s10300_s20  ;;  %s11974_s7 = scalar_lea.vmem %s15304_s12, %s7916_s28 }
  0x9a   : > { %15305 = sst [smem:[#allocation36_spill]] %s11974_s7  ;;  %s11980_s20 = scalar_lea.vmem [#allocation11], %s7912_s24 }
  0x9b   : > { %s11650_s17 = smov (!%p7917_p5), [#allocation2]   ;;  %s11983_s27 = sld [smem:[#allocation5 + $0x1]] (!%p7917_p5) }
  0x9c   : > { %s738_s1 = sshll.u32 (!%p7917_p5), %s11650_s17, 4  ;;  %s11651_s23 = smov (!%p7917_p5), [#allocation2 + $0x1]   ;;  %s11985_s1 = int_to_ptr.vmem [resolvable:$true] %s738_s1 }
  0x9d   : > { %s754_s28 = sshll.u32 (!%p7917_p5), %s11651_s23, 4  ;;  %s11987_s25 = sld [smem:[#allocation5 + $0x2]] (!%p7917_p5)  ;;  %s11989_s28 = int_to_ptr.vmem [resolvable:$true] %s754_s28 }
  0x9e   : > { %s11652_s11 = smov [#allocation2 + $0x2]   ;;  %s11991_s29 = sld [smem:[#allocation5 + $0x3]] }
  0x9f   : > { %s770_s24 = sshll.u32 %s11652_s11, 4  ;;  %s7918_s21 = sshll.u32 %s728_s5, 4  ;;  %s11993_s24 = int_to_ptr.vmem [resolvable:$true] %s770_s24 }
  0xa0   : > { %s15307_s16 = sld [smem:[#allocation87_spill]] }
  0xa1   : > { %s7920_s22 = sshll.u32 %s11983_s27, 4 }
  0xa6   : > { %s730_s13 = scalar_lea.hbm %s15307_s16, %s7918_s21  ;;  %s12002_s0 = scalar_lea.hbm %s15307_s16, 8192 }
  0xa7   : > { %s11434_s6 = scalar_lea.hbm %s730_s13, 16  ;;  %p11437_p3 = scmp.lt.u32.totalorder %s730_s13, %s15307_s16 }
  0xa8   : > { %p11435_p12 = scmp.ne.s32.totalorder %s730_s13, %s11434_s6  ;;  %p11438_p7 = scmp.lt.u32.totalorder %s12002_s0, %s11434_s6 }
  0xa9   : > { %p11440_p10 = scmp.lt.u32.totalorder %s11434_s6, %s730_s13 }
  0xaa   : > { %p11439_p8 = por %p11438_p7, %p11437_p3 }
  0xac   : > { %p11441_p11 = por %p11440_p10, %p11439_p8 }
  0xae   : > { %p11442_p9 = pnand %p11441_p11, %p11435_p12 }
  0xb0   : > { %11445 = shalt.err (!%p11442_p9)  }
  0xb1   : > { %s11446_s5 = scalar_lea.vmem %s11985_s1, 16  ;;  %s12011_s12 = scalar_lea.vmem %s11985_s1, 2048 }
  0xb2   : > { %p11447_p6 = scmp.ne.s32.totalorder %s11985_s1, %s11446_s5  ;;  %p11451_p2 = scmp.lt.s32.totalorder %s11985_s1, %s11985_s1 }
  0xb3   : > { %p11452_p4 = scmp.lt.s32.totalorder %s12011_s12, %s11446_s5 }
  0xb5   : > { %p11453_p1 = por %p11452_p4, %p11451_p2 }
  0xb7   : > { %p11454_p0 = pnand %p11453_p1, %p11447_p6 }
  0xb9   : > { %11457 = shalt.err (!%p11454_p0)  }
  0xba   : > { %741 = dma.hbm_to_vmem [thread:$0]  %s730_s13, 16, %s11985_s1, [#allocation3] }
  0xbb   : > { %s744_s2 = scalar_lea.hbm %s15307_s16, %s7920_s22  ;;  %s7922_s27 = sshll.u32 %s11987_s25, 4 }
  0xbc   : > { %s11458_s11 = scalar_lea.hbm %s744_s2, 16  ;;  %p11461_p5 = scmp.lt.u32.totalorder %s744_s2, %s15307_s16 }
  0xbd   : > { %p11459_p13 = scmp.ne.s32.totalorder %s744_s2, %s11458_s11  ;;  %p11462_p12 = scmp.lt.u32.totalorder %s12002_s0, %s11458_s11 }
  0xbe   : > { %p11464_p7 = scmp.lt.u32.totalorder %s11458_s11, %s744_s2 }
  0xbf   : > { %p11463_p3 = por %p11462_p12, %p11461_p5 }
  0xc1   : > { %p11465_p8 = por %p11464_p7, %p11463_p3 }
  0xc3   : > { %p11466_p10 = pnand %p11465_p8, %p11459_p13 }
  0xc5   : > { %11469 = shalt.err (!%p11466_p10)  }
  0xc6   : > { %s11470_s13 = scalar_lea.vmem %s11989_s28, 16  ;;  %p11475_p9 = scmp.lt.s32.totalorder %s11989_s28, %s11985_s1 }
  0xc7   : > { %p11471_p11 = scmp.ne.s32.totalorder %s11989_s28, %s11470_s13  ;;  %p11476_p6 = scmp.lt.s32.totalorder %s12011_s12, %s11470_s13 }
  0xc9   : > { %p11477_p2 = por %p11476_p6, %p11475_p9 }
  0xcb   : > { %p11478_p4 = pnand %p11477_p2, %p11471_p11 }
  0xcd   : > { %11481 = shalt.err (!%p11478_p4)  }
  0xce   : > { %757 = dma.hbm_to_vmem [thread:$0]  %s744_s2, 16, %s11989_s28, [#allocation3 + $0x1] }
  0xcf   : > { %s760_s17 = scalar_lea.hbm %s15307_s16, %s7922_s27  ;;  %s7924_s23 = sshll.u32 %s11991_s29, 4 }
  0xd0   : > { %s11482_s5 = scalar_lea.hbm %s760_s17, 16  ;;  %p11485_p0 = scmp.lt.u32.totalorder %s760_s17, %s15307_s16 }
  0xd1   : > { %p11483_p1 = scmp.ne.s32.totalorder %s760_s17, %s11482_s5  ;;  %p11486_p13 = scmp.lt.u32.totalorder %s12002_s0, %s11482_s5 }
  0xd2   : > { %p11488_p12 = scmp.lt.u32.totalorder %s11482_s5, %s760_s17 }
  0xd3   : > { %p11487_p5 = por %p11486_p13, %p11485_p0 }
  0xd5   : > { %p11489_p3 = por %p11488_p12, %p11487_p5 }
  0xd7   : > { %p11490_p7 = pnand %p11489_p3, %p11483_p1 }
  0xd9   : > { %11493 = shalt.err (!%p11490_p7)  }
  0xda   : > { %s11494_s28 = scalar_lea.vmem %s11993_s24, 16  ;;  %p11499_p10 = scmp.lt.s32.totalorder %s11993_s24, %s11985_s1 }
  0xdb   : > { %p11495_p8 = scmp.ne.s32.totalorder %s11993_s24, %s11494_s28  ;;  %p11500_p11 = scmp.lt.s32.totalorder %s12011_s12, %s11494_s28 }
  0xdd   : > { %p11501_p9 = por %p11500_p11, %p11499_p10 }
  0xdf   : > { %p11502_p6 = pnand %p11501_p9, %p11495_p8 }
  0xe1   : > { %11505 = shalt.err (!%p11502_p6)  }
  0xe2   : > { %773 = dma.hbm_to_vmem [thread:$0]  %s760_s17, 16, %s11993_s24, [#allocation3 + $0x2] }
  0xe3   : > { %s776_s27 = scalar_lea.hbm %s15307_s16, %s7924_s23  ;;  %s11653_s11 = smov [#allocation2 + $0x3]  }
  0xe4   : > { %s786_s21 = sshll.u32 %s11653_s11, 4  ;;  %s11506_s19 = scalar_lea.hbm %s776_s27, 16  ;;  %s787_s21 = int_to_ptr.vmem [resolvable:$true] %s786_s21 }
  0xe5   : > { %p11507_p2 = scmp.ne.s32.totalorder %s776_s27, %s11506_s19  ;;  %p11509_p4 = scmp.lt.u32.totalorder %s776_s27, %s15307_s16 }
  0xe6   : > { %p11510_p1 = scmp.lt.u32.totalorder %s12002_s0, %s11506_s19  ;;  %p11512_p13 = scmp.lt.u32.totalorder %s11506_s19, %s776_s27 }
  0xe8   : > { %p11511_p0 = por %p11510_p1, %p11509_p4 }
  0xea   : > { %p11513_p5 = por %p11512_p13, %p11511_p0 }
  0xec   : > { %p11514_p12 = pnand %p11513_p5, %p11507_p2 }
  0xee   : > { %11517 = shalt.err (!%p11514_p12)  }
  0xef   : > { %s11518_s24 = scalar_lea.vmem %s787_s21, 16  ;;  %p11523_p7 = scmp.lt.s32.totalorder %s787_s21, %s11985_s1 }
  0xf0   : > { %p11519_p3 = scmp.ne.s32.totalorder %s787_s21, %s11518_s24  ;;  %p11524_p8 = scmp.lt.s32.totalorder %s12011_s12, %s11518_s24 }
  0xf2   : > { %p11525_p10 = por %p11524_p8, %p11523_p7 }
  0xf4   : > { %p11526_p11 = pnand %p11525_p10, %p11519_p3 }
  0xf6   : > { %11529 = shalt.err (!%p11526_p11)  }
  0xf7   : > { %789 = dma.hbm_to_vmem [thread:$0]  %s776_s27, 16, %s787_s21, [#allocation3 + $0x3] }
  0xf8   : > { %s12054_s25 = smov 0  }
  0xf9 LB: >> { %s796_s16 = sand.u32 3, %s11638_s25  ;;  %s11638_s25 = sphi %s12054_s25, %s795_s25  }
  0xfa   : >> { %s12060_s17 = scalar_lea.sflag [#allocation3], %s796_s16 }
  0xfb   : >> { %11614 = dma.done.wait %s12060_s17, 16 }
  0xfc   : >> { %11615 = vsyncadd %s12060_s17, 4294967280  ;;  %s801_s23 = sadd.s32 4, %s11638_s25  ;;  %s7802_s7 = scalar_lea.vmem [#allocation2], %s11638_s25 }
  0xfd   : >> { %p12065_p9 = scmp.lt.s32.totalorder %s801_s23, 128  ;;  %s7803_s28 = scalar_lea.vmem %s7802_s7, 4 [#allocation2] }
  0xfe   : >> { %s817_s2 = sshll.u32 %s7803_s28, 4  ;;  %s15309_s19 = sld [smem:[#allocation87_spill]]  ;;  %s818_s2 = int_to_ptr.vmem [resolvable:$true] %s817_s2 }
  0xff   : >> { %s10308_s6 = scalar_select %p12065_p9, [#allocation5], [#allocation25] }
 0x100   : >> { %s15454_s23 = smov (!%p12065_p9, %s801_s23), 0 }
 0x101   : >> { %s806_s29 = sld [smem:[%s10308_s6 + %s15454_s23]] }
 0x107   : >> { %s7926_s27 = sshll.u32 %s806_s29, 4 }
 0x108   : >> { %s808_s13 = scalar_lea.hbm %s15309_s19, %s7926_s27 }
 0x109   : >> { %s11530_s22 = scalar_lea.hbm %s808_s13, 16  ;;  %p11535_p1 = scmp.lt.u32.totalorder %s808_s13, %s15309_s19 }
 0x10a   : >> { %p11531_p6 = scmp.ne.s32.totalorder %s808_s13, %s11530_s22  ;;  %p11536_p0 = scmp.lt.u32.totalorder %s12002_s0, %s11530_s22 }
 0x10b   : >> { %p11538_p5 = scmp.lt.u32.totalorder %s11530_s22, %s808_s13 }
 0x10c   : >> { %p11532_p2 = pnand %p11531_p6, %p12065_p9  ;;  %p11537_p13 = por %p11536_p0, %p11535_p1 }
 0x10e   : >> { %p11533_p4 = pneg %p11532_p2  ;;  %p11539_p12 = por %p11538_p5, %p11537_p13 }
 0x110   : >> { %p11540_p3 = pnand %p11539_p12, %p11533_p4 }
 0x112   : >> { %11543 = shalt.err (!%p11540_p3)  }
 0x113   : >> { %s11544_s23 = scalar_lea.vmem %s818_s2, 16  ;;  %p11551_p11 = scmp.lt.s32.totalorder %s818_s2, %s11985_s1 }
 0x114   : >> { %p11545_p7 = scmp.ne.s32.totalorder %s818_s2, %s11544_s23  ;;  %p11552_p6 = scmp.lt.s32.totalorder %s12011_s12, %s11544_s23 }
 0x116   : >> { %p11546_p8 = pnand %p11545_p7, %p12065_p9  ;;  %p11553_p2 = por %p11552_p6, %p11551_p11 }
 0x118   : >> { %p11547_p10 = pneg %p11546_p8 }
 0x11a   : >> { %p11554_p0 = pnand %p11553_p2, %p11547_p10 }
 0x11c   : >> { %11557 = shalt.err (!%p11554_p0)  }
 0x11d   : >> { %10310 = dma.hbm_to_vmem [thread:$0]  (%p12065_p9), %s808_s13, 16, %s818_s2, %s12060_s17 }
 0x11e   : >> { %s795_s25 = sadd.s32 1, %s11638_s25  }
 0x11f   : >> { %p792_p4 = scmp.ge.s32.totalorder %s795_s25, 128  }
 0x120   : > { %v821_v0 = vld [vmem:[#allocation2] sm:$0xff] (%p792_p4)  ;;  %s15310_s28 = sld [smem:[#allocation86_spill]] (%p792_p4)  ;;  %v822_v2 = vld [vmem:[#allocation2 + $0x8] sm:$0xff] (%p792_p4)  ;;  %v823_v5 = vld [vmem:[#allocation2 + $0x10] sm:$0xff] (%p792_p4) }
 0x121   : > { %794 = sbr.rel (!%p792_p4) target bundleno = 249 (0xf9), region = 223  ;;  %v824_v9 = vld [vmem:[#allocation2 + $0x18] sm:$0xff] (%p792_p4)  ;;  %v825_v11 = vld [vmem:[#allocation2 + $0x20] sm:$0xff] (%p792_p4)  ;;  %v826_v14 = vld [vmem:[#allocation2 + $0x28] sm:$0xff] (%p792_p4) }
 0x122   : > { %v827_v18 = vld [vmem:[#allocation2 + $0x30] sm:$0xff] (%p792_p4)  ;;  %v828_v20 = vld [vmem:[#allocation2 + $0x38] sm:$0xff] (%p792_p4)  ;;  %v829_v23 = vld [vmem:[#allocation2 + $0x40] sm:$0xff] (%p792_p4) }
 0x123   : > { %v830_v27 = vld [vmem:[#allocation2 + $0x48] sm:$0xff] (%p792_p4)  ;;  %v831_v29 = vld [vmem:[#allocation2 + $0x50] sm:$0xff] (%p792_p4)  ;;  %v832_v32 = vld [vmem:[#allocation2 + $0x58] sm:$0xff] (%p792_p4) }
 0x124   : > { %v833_v36 = vld [vmem:[#allocation2 + $0x60] sm:$0xff] (%p792_p4)  ;;  %v834_v38 = vld [vmem:[#allocation2 + $0x68] sm:$0xff] (%p792_p4)  ;;  %v835_v41 = vld [vmem:[#allocation2 + $0x70] sm:$0xff] (%p792_p4) }
 0x125   : > { %v836_v45 = vld [vmem:[#allocation2 + $0x78] sm:$0xff] (%p792_p4) }
 0x126   : > { %v837_v1 = vld [vmem:[%s15310_s28] sm:$0xff] (%p792_p4)  ;;  %v838_v4 = vld [vmem:[%s15310_s28 + $0x8] sm:$0xff] (%p792_p4)  ;;  %v839_v6 = vld [vmem:[%s15310_s28 + $0x10] sm:$0xff] (%p792_p4) }
 0x127   : > { %v853_v3 = vadd.f32 (%p792_p4), %v837_v1, %v821_v0  ;;  %v854_v7 = vadd.f32 (%p792_p4), %v838_v4, %v822_v2  ;;  %v855_v8 = vadd.f32 (%p792_p4), %v839_v6, %v823_v5  ;;  %v840_v10 = vld [vmem:[%s15310_s28 + $0x18] sm:$0xff] (%p792_p4)  ;;  %v841_v13 = vld [vmem:[%s15310_s28 + $0x20] sm:$0xff] (%p792_p4)  ;;  %v842_v15 = vld [vmem:[%s15310_s28 + $0x28] sm:$0xff] (%p792_p4) }
 0x128   : > { %v856_v12 = vadd.f32 %v840_v10, %v824_v9  ;;  %v857_v16 = vadd.f32 %v841_v13, %v825_v11  ;;  %v858_v17 = vadd.f32 %v842_v15, %v826_v14  ;;  %v843_v19 = vld [vmem:[%s15310_s28 + $0x30] sm:$0xff]  ;;  %v844_v22 = vld [vmem:[%s15310_s28 + $0x38] sm:$0xff]  ;;  %v845_v24 = vld [vmem:[%s15310_s28 + $0x40] sm:$0xff] }
 0x129   : > { %869 = vst [vmem:[#allocation2] sm:$0xff] %v853_v3  ;;  %870 = vst [vmem:[#allocation2 + $0x8] sm:$0xff] %v854_v7  ;;  %v859_v21 = vadd.f32 %v843_v19, %v827_v18  ;;  %v860_v25 = vadd.f32 %v844_v22, %v828_v20  ;;  %v861_v26 = vadd.f32 %v845_v24, %v829_v23  ;;  %v846_v28 = vld [vmem:[%s15310_s28 + $0x48] sm:$0xff]  ;;  %v847_v31 = vld [vmem:[%s15310_s28 + $0x50] sm:$0xff] }
 0x12a   : > { %871 = vst [vmem:[#allocation2 + $0x10] sm:$0xff] %v855_v8  ;;  %872 = vst [vmem:[#allocation2 + $0x18] sm:$0xff] %v856_v12  ;;  %v862_v30 = vadd.f32 %v846_v28, %v830_v27  ;;  %v848_v33 = vld [vmem:[%s15310_s28 + $0x58] sm:$0xff]  ;;  %v863_v34 = vadd.f32 %v847_v31, %v831_v29  ;;  %v849_v37 = vld [vmem:[%s15310_s28 + $0x60] sm:$0xff] }
 0x12b   : > { %873 = vst [vmem:[#allocation2 + $0x20] sm:$0xff] %v857_v16  ;;  %874 = vst [vmem:[#allocation2 + $0x28] sm:$0xff] %v858_v17  ;;  %v864_v35 = vadd.f32 %v848_v33, %v832_v32  ;;  %v865_v39 = vadd.f32 %v849_v37, %v833_v36  ;;  %v850_v40 = vld [vmem:[%s15310_s28 + $0x68] sm:$0xff]  ;;  %v851_v42 = vld [vmem:[%s15310_s28 + $0x70] sm:$0xff] }
 0x12c   : > { %875 = vst [vmem:[#allocation2 + $0x30] sm:$0xff] %v859_v21  ;;  %876 = vst [vmem:[#allocation2 + $0x38] sm:$0xff] %v860_v25  ;;  %v866_v43 = vadd.f32 %v850_v40, %v834_v38  ;;  %v867_v44 = vadd.f32 %v851_v42, %v835_v41  ;;  %v852_v46 = vld [vmem:[%s15310_s28 + $0x78] sm:$0xff] }
 0x12d   : > { %877 = vst [vmem:[#allocation2 + $0x40] sm:$0xff] %v861_v26  ;;  %878 = vst [vmem:[#allocation2 + $0x48] sm:$0xff] %v862_v30  ;;  %v868_v47 = vadd.f32 %v852_v46, %v836_v45 }
 0x12e   : > { %879 = vst [vmem:[#allocation2 + $0x50] sm:$0xff] %v863_v34  ;;  %880 = vst [vmem:[#allocation2 + $0x58] sm:$0xff] %v864_v35 }
 0x12f   : > { %881 = vst [vmem:[#allocation2 + $0x60] sm:$0xff] %v865_v39  ;;  %882 = vst [vmem:[#allocation2 + $0x68] sm:$0xff] %v866_v43 }
 0x130   : > { %883 = vst [vmem:[#allocation2 + $0x70] sm:$0xff] %v867_v44  ;;  %884 = vst [vmem:[#allocation2 + $0x78] sm:$0xff] %v868_v47 }
 0x131 PF: > { %v885_v48 = vld [vmem:[#allocation2] sm:$0xff]  ;;  %v887_v49 = vld [vmem:[#allocation2 + $0x10] sm:$0xff]  ;;  %v886_v50 = vld [vmem:[#allocation2 + $0x8] sm:$0xff]  ;;  %s15311_s13 = scalar_lea.vmem %s15179_s3, %s11936_s14  ;;  %s15312_s16 = scalar_lea.vmem %s15180_s4, %s11936_s14  ;;  %vm1911_vm0 = vcmask 261120   ;;  %vm3163_vm5 = vcmask 523264  }
 0x132   : > { %903 = vadd.xlane.f32.xlu0 %v885_v48  ;;  %907 = vadd.xlane.f32.xlu1 %v887_v49  ;;  %v888_v51 = vld [vmem:[#allocation2 + $0x18] sm:$0xff]  ;;  %v12141_v52 = vld [vmem:[#allocation2 + $0x20] sm:$0xff]  ;;  %v12143_v53 = vld [vmem:[#allocation2 + $0x28] sm:$0xff]  ;;  %s11656_s23 = smov 64   ;;  %s11657_s6 = smov 32  }
 0x133   : > { %v12145_v54 = vld [vmem:[#allocation2 + $0x30] sm:$0xff]  ;;  %v12147_v55 = vld [vmem:[#allocation2 + $0x38] sm:$0xff]  ;;  %v10630_v1 = vld [vmem:[%s11921_s15] ss:$12 sps:$4 sm:$0xff]   ;;  %s15425_s29 = scalar_lea.vmem %s15184_s8, %s11936_s14  ;;  %s15430_s17 = scalar_lea.vmem %s15185_s9, %s11936_s14 }
 0x134   : > { %v12151_v56 = vld [vmem:[#allocation2 + $0x40] sm:$0xff]  ;;  %v12153_v57 = vld [vmem:[#allocation2 + $0x48] sm:$0xff]  ;;  %v10638_v7 = vld [vmem:[%s11921_s15 + $0x30] ss:$12 sps:$4 sm:$0xff]   ;;  %s15431_s1 = scalar_lea.vmem %s15186_s10, %s11936_s14  ;;  %s15437_s2 = sld [smem:[#allocation94_spill]] }
 0x135   : > { %v12157_v58 = vld [vmem:[#allocation2 + $0x50] sm:$0xff]  ;;  %v12159_v59 = vld [vmem:[#allocation2 + $0x58] sm:$0xff]  ;;  %v10637_v4 = vld [vmem:[%s11921_s15 + $0x20] ss:$12 sps:$4 sm:$0xff]  }
 0x136   : > { %905 = vadd.xlane.f32.xlu0 %v886_v50  ;;  %909 = vadd.xlane.f32.xlu1 %v888_v51  ;;  %v12163_v60 = vld [vmem:[#allocation2 + $0x60] sm:$0xff]  ;;  %v12165_v61 = vld [vmem:[#allocation2 + $0x68] sm:$0xff]  ;;  %vm12387_vm1 = vmpackc.low %vm1911_vm0, %vm1911_vm0 }
 0x137   : > { %v12169_v62 = vld [vmem:[#allocation2 + $0x70] sm:$0xff]  ;;  %v12173_v63 = vld [vmem:[#allocation2 + $0x78] sm:$0xff] }
 0x138   : > { %v10628_v0 = vld [vmem:[%s11921_s15 + $0x4] ss:$12 sps:$4 sm:$0xff]   ;;  %v10631_v2 = vld [vmem:[%s11921_s15 + $0x1c] ss:$12 sps:$4 sm:$0xff]   ;;  %v10635_v6 = vld [vmem:[%s11921_s15 + $0x34] ss:$12 sps:$4 sm:$0xff]  }
 0x139   : > { %v10633_v3 = vld [vmem:[%s11921_s15 + $0x8] ss:$12 sps:$4 sm:$0xff]   ;;  %9626 = vmatprep.subr.bf16.mxu0 %v10628_v0  ;;  %v10634_v5 = vld [vmem:[%s11921_s15 + $0x18] ss:$12 sps:$4 sm:$0xff]  }
 0x13a   : > { %911 = vadd.xlane.f32.xlu0 %v12141_v52  ;;  %913 = vadd.xlane.f32.xlu1 %v12143_v53  ;;  %s15438_s11 = scalar_lea.vmem %s15437_s2, %s11936_s14  ;;  %s15443_s14 = sld [smem:[#allocation33_spill]] }
 0x13b   : > { %9628 = vmatpush1.bf16.msra.mxu0 %v10630_v1  ;;  %9658 = vmatprep.subr.bf16.mxu1 %v10633_v3 }
 0x13c   : > { %9630 = vmatprep.subr.bf16.mxu0 %v10631_v2  ;;  %9660 = vmatpush3.bf16.msra.mxu1 %v10633_v3 }
 0x13d   : > { %9662 = vmatprep.subr.bf16.mxu1 %v10637_v4 }
 0x13e   : > { %915 = vadd.xlane.f32.xlu0 %v12145_v54  ;;  %917 = vadd.xlane.f32.xlu1 %v12147_v55 }
 0x13f   : > { %9632 = vmatpush1.bf16.msra.mxu0 %v10634_v5  ;;  %v10645_v5 = vld [vmem:[%s11921_s15 + $0x50] ss:$12 sps:$4 sm:$0xff]  }
 0x140   : > { %9634 = vmatprep.subr.bf16.mxu0 %v10635_v6  ;;  %9664 = vmatpush3.bf16.msra.mxu1 %v10637_v4  ;;  %v10643_v4 = vld [vmem:[%s11921_s15 + $0x64] ss:$12 sps:$4 sm:$0xff]   ;;  %v10646_v6 = vld [vmem:[%s11921_s15 + $0x60] ss:$12 sps:$4 sm:$0xff]   ;;  %p8253_p9 = scmp.ne.s32.totalorder %s15443_s14, 1 }
 0x141   : > { %s15444_s19 = sld [smem:[#allocation95_spill]] (!%p8253_p9)  ;;  %s15445_s24 = sld [smem:[#allocation96_spill]] (!%p8253_p9) }
 0x142   : > { %919 = vadd.xlane.f32.xlu0 %v12151_v56  ;;  %921 = vadd.xlane.f32.xlu1 %v12153_v57 }
 0x143   : > { %9636 = vmatpush1.bf16.msra.mxu0 %v10638_v7 }
 0x146   : > { %923 = vadd.xlane.f32.xlu0 %v12157_v58  ;;  %925 = vadd.xlane.f32.xlu1 %v12159_v59 }
 0x14a   : > { %927 = vadd.xlane.f32.xlu0 %v12163_v60  ;;  %929 = vadd.xlane.f32.xlu1 %v12165_v61 }
 0x14e   : > { %931 = vadd.xlane.f32.xlu0 %v12169_v62  ;;  %933 = vadd.xlane.f32.xlu1 %v12173_v63 }
 0x1bf   : > { %v904_v8 = vpop.xlane.xlu0 %903  ;;  %v908_v9 = vpop.xlane.xlu1 %907 }
 0x1c0   : > { %v936_v10 = vmul.f32 0.0078125, %v904_v8  ;;  %v938_v11 = vmul.f32 0.0078125, %v908_v9 }
 0x1c2   : > { %v12185_v12 = vsub.f32 %v885_v48, %v936_v10  ;;  %v12187_v13 = vsub.f32 %v887_v49, %v938_v11  ;;  %v10639_v48 = vld [vmem:[%s11921_s15 + $0x4c] ss:$12 sps:$4 sm:$0xff]  }
 0x1c3   : > { %v906_v14 = vpop.xlane.xlu0 %905  ;;  %v910_v15 = vpop.xlane.xlu1 %909  ;;  %v10641_v49 = vld [vmem:[%s11921_s15 + $0x38] ss:$12 sps:$4 sm:$0xff]   ;;  %9638 = vmatprep.subr.bf16.mxu0 %v10639_v48 }
 0x1c4   : > { %v937_v16 = vmul.f32 0.0078125, %v906_v14  ;;  %v968_v17 = vmul.f32 %v12185_v12, %v12185_v12  ;;  %v939_v18 = vmul.f32 0.0078125, %v910_v15  ;;  %v970_v19 = vmul.f32 %v12187_v13, %v12187_v13  ;;  %9666 = vmatprep.subr.bf16.mxu1 %v10641_v49  ;;  %v10647_v15 = vld [vmem:[%s11921_s15 + $0x7c] ss:$12 sps:$4 sm:$0xff]  }
 0x1c5   : > { %9668 = vmatpush3.bf16.msra.mxu1 %v10641_v49 }
 0x1c6   : > { %984 = vadd.xlane.f32.xlu0 %v968_v17  ;;  %v12193_v20 = vsub.f32 %v886_v50, %v937_v16  ;;  %v12195_v21 = vsub.f32 %v888_v51, %v939_v18  ;;  %9670 = vmatprep.subr.bf16.mxu1 %v10645_v5  ;;  %v10650_v16 = vld [vmem:[%s11921_s15 + $0x78] ss:$12 sps:$4 sm:$0xff]  }
 0x1c7   : > { %v912_v22 = vpop.xlane.xlu0 %911  ;;  %v914_v23 = vpop.xlane.xlu1 %913 }
 0x1c8   : > { %v940_v24 = vmul.f32 0.0078125, %v912_v22  ;;  %v969_v25 = vmul.f32 %v12193_v20, %v12193_v20  ;;  %v941_v26 = vmul.f32 0.0078125, %v914_v23  ;;  %v971_v27 = vmul.f32 %v12195_v21, %v12195_v21  ;;  %v10651_v22 = vld [vmem:[%s11921_s15 + $0x94] ss:$12 sps:$4 sm:$0xff]  }
 0x1c9   : > { %9672 = vmatpush3.bf16.msra.mxu1 %v10645_v5  ;;  %v10653_v23 = vld [vmem:[%s11921_s15 + $0x80] ss:$12 sps:$4 sm:$0xff]  }
 0x1ca   : > { %988 = vadd.xlane.f32.xlu0 %v970_v19  ;;  %986 = vadd.xlane.f32.xlu1 %v969_v25  ;;  %v12202_v28 = vsub.f32 %v12141_v52, %v940_v24  ;;  %v12205_v29 = vsub.f32 %v12143_v53, %v941_v26  ;;  %v10642_v53 = vld [vmem:[%s11921_s15 + $0x48] ss:$12 sps:$4 sm:$0xff]   ;;  %v10654_v24 = vld [vmem:[%s11921_s15 + $0x90] ss:$12 sps:$4 sm:$0xff]   ;;  %v10657_v25 = vld [vmem:[%s11921_s15 + $0x98] ss:$12 sps:$4 sm:$0xff]  }
 0x1cb   : > { %v916_v30 = vpop.xlane.xlu0 %915  ;;  %v918_v31 = vpop.xlane.xlu1 %917  ;;  %9640 = vmatpush1.bf16.msra.mxu0 %v10642_v53  ;;  %v10658_v26 = vld [vmem:[%s11921_s15 + $0xa8] ss:$12 sps:$4 sm:$0xff]  }
 0x1cc   : > { %v942_v32 = vmul.f32 0.0078125, %v916_v30  ;;  %v972_v33 = vmul.f32 %v12202_v28, %v12202_v28  ;;  %v943_v34 = vmul.f32 0.0078125, %v918_v31  ;;  %v973_v35 = vmul.f32 %v12205_v29, %v12205_v29  ;;  %9642 = vmatprep.subr.bf16.mxu0 %v10643_v4 }
 0x1cd   : > { %v15210_v30 = vmov 0.0  }
 0x1ce   : > { %990 = vadd.xlane.f32.xlu1 %v971_v27  ;;  %992 = vadd.xlane.f32.xlu0 %v972_v33  ;;  %v12212_v36 = vsub.f32 %v12145_v54, %v942_v32  ;;  %v12215_v37 = vsub.f32 %v12147_v55, %v943_v34  ;;  %v10659_v27 = vld [vmem:[%s11921_s15 + $0xb0] ss:$12 sps:$4 sm:$0xff]  }
 0x1cf   : > { %v920_v38 = vpop.xlane.xlu0 %919  ;;  %v922_v39 = vpop.xlane.xlu1 %921  ;;  %9644 = vmatpush1.bf16.msra.mxu0 %v10646_v6  ;;  %1285 = vmatprep.mubr.f32.mxu0 %v15210_v30 }
 0x1d0   : > { %v944_v40 = vmul.f32 0.0078125, %v920_v38  ;;  %v974_v41 = vmul.f32 %v12212_v36, %v12212_v36  ;;  %v945_v42 = vmul.f32 0.0078125, %v922_v39  ;;  %v975_v43 = vmul.f32 %v12215_v37, %v12215_v37  ;;  %9646 = vmatprep.subr.bf16.mxu0 %v10647_v15 }
 0x1d2   : > { %994 = vadd.xlane.f32.xlu1 %v973_v35  ;;  %996 = vadd.xlane.f32.xlu0 %v974_v41  ;;  %v12222_v44 = vsub.f32 %v12151_v56, %v944_v40  ;;  %v12225_v45 = vsub.f32 %v12153_v57, %v945_v42 }
 0x1d3   : > { %v924_v46 = vpop.xlane.xlu0 %923  ;;  %v926_v47 = vpop.xlane.xlu1 %925  ;;  %9648 = vmatpush1.bf16.msra.mxu0 %v10650_v16 }
 0x1d4   : > { %v946_v50 = vmul.f32 0.0078125, %v924_v46  ;;  %v976_v51 = vmul.f32 %v12222_v44, %v12222_v44  ;;  %v947_v52 = vmul.f32 0.0078125, %v926_v47  ;;  %v977_v54 = vmul.f32 %v12225_v45, %v12225_v45  ;;  %9650 = vmatprep.subr.bf16.mxu0 %v10651_v22 }
 0x1d6   : > { %998 = vadd.xlane.f32.xlu1 %v975_v43  ;;  %1000 = vadd.xlane.f32.xlu0 %v976_v51  ;;  %v12235_v55 = vsub.f32 %v12157_v58, %v946_v50  ;;  %v12238_v56 = vsub.f32 %v12159_v59, %v947_v52 }
 0x1d7   : > { %v928_v57 = vpop.xlane.xlu0 %927  ;;  %v930_v0 = vpop.xlane.xlu1 %929  ;;  %9652 = vmatpush1.bf16.msra.mxu0 %v10654_v24 }
 0x1d8   : > { %v948_v1 = vmul.f32 0.0078125, %v928_v57  ;;  %v978_v2 = vmul.f32 %v12235_v55, %v12235_v55  ;;  %v949_v3 = vmul.f32 0.0078125, %v930_v0  ;;  %v979_v58 = vmul.f32 %v12238_v56, %v12238_v56 }
 0x1da   : > { %1002 = vadd.xlane.f32.xlu1 %v977_v54  ;;  %1004 = vadd.xlane.f32.xlu0 %v978_v2  ;;  %v12248_v59 = vsub.f32 %v12163_v60, %v948_v1  ;;  %v12251_v7 = vsub.f32 %v12165_v61, %v949_v3  ;;  %v10649_v60 = vld [vmem:[%s11921_s15 + $0x68] ss:$12 sps:$4 sm:$0xff]   ;;  %v12283_v1 = vld [vmem:[%s15311_s13] ss:$0 sm:$0xff] }
 0x1db   : > { %v932_v8 = vpop.xlane.xlu0 %931  ;;  %v934_v9 = vpop.xlane.xlu1 %933  ;;  %9674 = vmatprep.subr.bf16.mxu1 %v10649_v60 }
 0x1dc   : > { %v950_v10 = vmul.f32 0.0078125, %v932_v8  ;;  %v980_v11 = vmul.f32 %v12248_v59, %v12248_v59  ;;  %v951_v14 = vmul.f32 0.0078125, %v934_v9  ;;  %v981_v61 = vmul.f32 %v12251_v7, %v12251_v7  ;;  %9676 = vmatpush3.bf16.msra.mxu1 %v10649_v60 }
 0x1dd   : > { %9678 = vmatprep.subr.bf16.mxu1 %v10653_v23 }
 0x1de   : > { %1006 = vadd.xlane.f32.xlu1 %v979_v58  ;;  %1008 = vadd.xlane.f32.xlu0 %v980_v11  ;;  %v12261_v17 = vsub.f32 %v12169_v62, %v950_v10  ;;  %v12264_v18 = vsub.f32 %v12173_v63, %v951_v14  ;;  %v10655_v63 = vld [vmem:[%s11921_s15 + $0xac] ss:$12 sps:$4 sm:$0xff]   ;;  %v12291_v58 = vld [vmem:[%s15312_s16] ss:$0 sm:$0xff] }
 0x1df   : > { %9654 = vmatprep.subr.bf16.mxu0 %v10655_v63 }
 0x1e0   : > { %v982_v19 = vmul.f32 %v12261_v17, %v12261_v17  ;;  %v983_v62 = vmul.f32 %v12264_v18, %v12264_v18  ;;  %9680 = vmatpush3.bf16.msra.mxu1 %v10653_v23  ;;  %9656 = vmatpush1.bf16.msra.mxu0 %v10658_v26 }
 0x1e1   : > { %9682 = vmatprep.subr.bf16.mxu1 %v10657_v25 }
 0x1e2   : > { %1010 = vadd.xlane.f32.xlu1 %v981_v61  ;;  %1012 = vadd.xlane.f32.xlu0 %v982_v19 }
 0x1e4   : > { %9684 = vmatpush3.bf16.msra.mxu1 %v10657_v25 }
 0x1e5   : > { %9686 = vmatprep.subr.bf16.mxu1 %v10659_v27 }
 0x1e6   : > { %1014 = vadd.xlane.f32.xlu1 %v983_v62 }
 0x1e8   : > { %9688 = vmatpush3.bf16.msra.mxu1 %v10659_v27 }
 0x253   : > { %v985_v31 = vpop.xlane.xlu0 %984 }
 0x254   : > { %v1016_v32 = vmul.f32 0.0078125, %v985_v31 }
 0x256   : > { %v1032_v33 = vadd.f32 1e-05, %v1016_v32 }
 0x257   : > { %v987_v34 = vpop.xlane.xlu1 %986  ;;  %v989_v35 = vpop.xlane.xlu0 %988 }
 0x258   : > { %10708 = vrsqrt.f32 %v1032_v33  ;;  %v1017_v38 = vmul.f32 0.0078125, %v987_v34  ;;  %v1018_v39 = vmul.f32 0.0078125, %v989_v35 }
 0x25a   : > { %v1033_v40 = vadd.f32 1e-05, %v1017_v38  ;;  %v1034_v41 = vadd.f32 1e-05, %v1018_v39 }
 0x25b   : > { %v991_v42 = vpop.xlane.xlu1 %990  ;;  %v993_v43 = vpop.xlane.xlu0 %992 }
 0x25c   : > { %10710 = vrsqrt.f32 %v1033_v40  ;;  %v1019_v46 = vmul.f32 0.0078125, %v991_v42  ;;  %v1020_v47 = vmul.f32 0.0078125, %v993_v43 }
 0x25d   : > { %10712 = vrsqrt.f32 %v1034_v41 }
 0x25e   : > { %v1035_v48 = vadd.f32 1e-05, %v1019_v46  ;;  %v1036_v49 = vadd.f32 1e-05, %v1020_v47 }
 0x25f   : > { %v995_v50 = vpop.xlane.xlu1 %994  ;;  %v997_v51 = vpop.xlane.xlu0 %996 }
 0x260   : > { %10714 = vrsqrt.f32 %v1035_v48  ;;  %v1021_v52 = vmul.f32 0.0078125, %v995_v50  ;;  %v1022_v53 = vmul.f32 0.0078125, %v997_v51 }
 0x261   : > { %10716 = vrsqrt.f32 %v1036_v49 }
 0x262   : > { %v10709_v54 = vpop.eup %10708  ;;  %v1037_v57 = vadd.f32 1e-05, %v1021_v52  ;;  %v1038_v0 = vadd.f32 1e-05, %v1022_v53 }
 0x263   : > { %v999_v2 = vpop.xlane.xlu1 %998  ;;  %v1001_v3 = vpop.xlane.xlu0 %1000  ;;  %v1064_v4 = vmul.f32 %v10709_v54, %v12185_v12 }
 0x264   : > { %10718 = vrsqrt.f32 %v1037_v57  ;;  %v1023_v5 = vmul.f32 0.0078125, %v999_v2  ;;  %v1024_v6 = vmul.f32 0.0078125, %v1001_v3 }
 0x265   : > { %10720 = vrsqrt.f32 %v1038_v0  ;;  %v1086_v8 = vmul.f32 %v12283_v1, %v1064_v4 }
 0x266   : > { %v10711_v9 = vpop.eup %10710  ;;  %v1039_v10 = vadd.f32 1e-05, %v1023_v5  ;;  %v1040_v11 = vadd.f32 1e-05, %v1024_v6 }
 0x267   : > { %v10713_v14 = vpop.eup %10712  ;;  %v1003_v15 = vpop.xlane.xlu1 %1002  ;;  %v1108_v12 = vadd.f32 %v12291_v58, %v1086_v8  ;;  %v1065_v16 = vmul.f32 %v10711_v9, %v12193_v20 }
 0x268   : > { %v1005_v60 = vpop.xlane.xlu0 %1004  ;;  %10722 = vrsqrt.f32 %v1039_v10  ;;  %v1025_v61 = vmul.f32 0.0078125, %v1003_v15  ;;  %v1066_v22 = vmul.f32 %v10713_v14, %v12187_v13 }
 0x269   : > { %v1026_v19 = vmul.f32 0.0078125, %v1005_v60  ;;  %10724 = vrsqrt.f32 %v1040_v11  ;;  %1286 = vmatmul.mubr.f32.vlgmr.msra.gmra.mrb[0].mxu0 %v1108_v12  ;;  %9025 = vmatprep.mubr.f32.mxu1 %v1108_v12  ;;  %v1087_v23 = vmul.f32 %v12283_v1, %v1065_v16 }
 0x26a   : > { %v10715_v24 = vpop.eup %10714  ;;  %v1041_v62 = vadd.f32 1e-05, %v1025_v61  ;;  %1291 = vmatprep.mubr.f32.mxu0 %v15210_v30  ;;  %v1088_v25 = vmul.f32 %v12283_v1, %v1066_v22 }
 0x26b   : > { %v1042_v63 = vadd.f32 1e-05, %v1026_v19  ;;  %v10717_v26 = vpop.eup %10716  ;;  %v1007_v27 = vpop.xlane.xlu1 %1006  ;;  %v1109_v31 = vadd.f32 %v12291_v58, %v1087_v23  ;;  %v1067_v32 = vmul.f32 %v10715_v24, %v12195_v21 }
 0x26c   : > { %v1009_v20 = vpop.xlane.xlu0 %1008  ;;  %10726 = vrsqrt.f32 %v1041_v62  ;;  %v1027_v13 = vmul.f32 0.0078125, %v1007_v27  ;;  %v1110_v34 = vadd.f32 %v12291_v58, %v1088_v25  ;;  %v1068_v38 = vmul.f32 %v10717_v26, %v12202_v28 }
 0x26d   : > { %v1028_v33 = vmul.f32 0.0078125, %v1009_v20  ;;  %10728 = vrsqrt.f32 %v1042_v63  ;;  %1292 = vmatmul.mubr.f32.gmra.mrb[2].mxu0 %v1109_v31  ;;  %9026 = vmatmul.mubr.f32.vlgmr.msra.gmra.mrb[0].mxu1 %v1109_v31  ;;  %v1089_v35 = vmul.f32 %v12283_v1, %v1067_v32 }
 0x26e   : > { %v10719_v39 = vpop.eup %10718  ;;  %v1043_v40 = vadd.f32 1e-05, %v1027_v13  ;;  %9028 = vmatprep.mubr.f32.mxu1 %v1110_v34  ;;  %1297 = vmatprep.mubr.f32.mxu0 %v15210_v30  ;;  %v1090_v47 = vmul.f32 %v12283_v1, %v1068_v38 }
 0x26f   : > { %v1044_v41 = vadd.f32 1e-05, %v1028_v33  ;;  %v10721_v42 = vpop.eup %10720  ;;  %v1011_v21 = vpop.xlane.xlu1 %1010  ;;  %v1111_v46 = vadd.f32 %v12291_v58, %v1089_v35  ;;  %v1069_v48 = vmul.f32 %v10719_v39, %v12205_v29  ;;  %v1204_v35 = vld [vmem:[%s11960_s18] sm:$0x7]  ;;  %s11655_s18 = smov 96  }
 0x270   : > { %v1013_v43 = vpop.xlane.xlu0 %1012  ;;  %10730 = vrsqrt.f32 %v1043_v40  ;;  %v1029_v49 = vmul.f32 0.0078125, %v1011_v21  ;;  %v1070_v28 = vmul.f32 %v10721_v42, %v12212_v36  ;;  %v1112_v51 = vadd.f32 %v12291_v58, %v1090_v47 }
 0x271   : > { %v1030_v50 = vmul.f32 0.0078125, %v1013_v43  ;;  %10732 = vrsqrt.f32 %v1044_v41  ;;  %1298 = vmatmul.mubr.f32.gmra.mrb[4].mxu0 %v1110_v34  ;;  %9029 = vmatmul.mubr.f32.gmra.mrb[2].mxu1 %v1111_v46  ;;  %v1091_v52 = vmul.f32 %v12283_v1, %v1069_v48 }
 0x272   : > { %v10723_v53 = vpop.eup %10722  ;;  %v1045_v54 = vadd.f32 1e-05, %v1029_v49  ;;  %1303 = vmatprep.mubr.f32.mxu0 %v15210_v30  ;;  %v1092_v0 = vmul.f32 %v12283_v1, %v1070_v28  ;;  %9031 = vmatprep.mubr.f32.mxu1 %v1112_v51 }
 0x273   : > { %v1046_v57 = vadd.f32 1e-05, %v1030_v50  ;;  %v10725_v29 = vpop.eup %10724  ;;  %v1015_v2 = vpop.xlane.xlu1 %1014  ;;  %v1113_v3 = vadd.f32 %v12291_v58, %v1091_v52  ;;  %v1071_v36 = vmul.f32 %v10723_v53, %v12215_v37 }
 0x274   : > { %10734 = vrsqrt.f32 %v1045_v54  ;;  %v1031_v4 = vmul.f32 0.0078125, %v1015_v2  ;;  %v1114_v5 = vadd.f32 %v12291_v58, %v1092_v0  ;;  %v1072_v6 = vmul.f32 %v10725_v29, %v12222_v44 }
 0x275   : > { %10736 = vrsqrt.f32 %v1046_v57  ;;  %1304 = vmatmul.mubr.f32.gmra.mrb[6].mxu0 %v1111_v46  ;;  %9032 = vmatmul.mubr.f32.gmra.mrb[4].mxu1 %v1113_v3  ;;  %v1093_v8 = vmul.f32 %v12283_v1, %v1071_v36 }
 0x276   : > { %v10727_v9 = vpop.eup %10726  ;;  %v1047_v10 = vadd.f32 1e-05, %v1031_v4  ;;  %9034 = vmatprep.mubr.f32.mxu1 %v1114_v5  ;;  %1309 = vmatprep.mubr.f32.mxu0 %v15210_v30  ;;  %v1094_v11 = vmul.f32 %v12283_v1, %v1072_v6 }
 0x277   : > { %v10729_v14 = vpop.eup %10728  ;;  %v1115_v37 = vadd.f32 %v12291_v58, %v1093_v8  ;;  %v1073_v15 = vmul.f32 %v10727_v9, %v12225_v45 }
 0x278   : > { %10738 = vrsqrt.f32 %v1047_v10  ;;  %v1116_v44 = vadd.f32 %v12291_v58, %v1094_v11  ;;  %v1074_v60 = vmul.f32 %v10729_v14, %v12235_v55 }
 0x279   : > { %1310 = vmatmul.mubr.f32.gmra.mrb[8].mxu0 %v1112_v51  ;;  %9035 = vmatmul.mubr.f32.gmra.mrb[6].mxu1 %v1115_v37  ;;  %v1095_v12 = vmul.f32 %v12283_v1, %v1073_v15 }
 0x27a   : > { %v10731_v16 = vpop.eup %10730  ;;  %9037 = vmatprep.mubr.f32.mxu1 %v1116_v44  ;;  %1315 = vmatprep.mubr.f32.mxu0 %v15210_v30  ;;  %v1096_v61 = vmul.f32 %v12283_v1, %v1074_v60 }
 0x27b   : > { %v10733_v19 = vpop.eup %10732  ;;  %v1117_v22 = vadd.f32 %v12291_v58, %v1095_v12  ;;  %v1075_v45 = vmul.f32 %v10731_v16, %v12238_v56 }
 0x27c   : > { %v1118_v23 = vadd.f32 %v12291_v58, %v1096_v61  ;;  %v1076_v24 = vmul.f32 %v10733_v19, %v12248_v59 }
 0x27d   : > { %1316 = vmatmul.mubr.f32.gmra.mrb[10].mxu0 %v1113_v3  ;;  %9038 = vmatmul.mubr.f32.gmra.mrb[8].mxu1 %v1117_v22  ;;  %v1097_v55 = vmul.f32 %v12283_v1, %v1075_v45 }
 0x27e   : > { %v10735_v62 = vpop.eup %10734  ;;  %9040 = vmatprep.mubr.f32.mxu1 %v1118_v23  ;;  %1321 = vmatprep.mubr.f32.mxu0 %v15210_v30  ;;  %v1098_v63 = vmul.f32 %v12283_v1, %v1076_v24 }
 0x27f   : > { %v10737_v25 = vpop.eup %10736  ;;  %v1119_v26 = vadd.f32 %v12291_v58, %v1097_v55  ;;  %v1077_v27 = vmul.f32 %v10735_v62, %v12251_v7 }
 0x280   : > { %v1120_v56 = vadd.f32 %v12291_v58, %v1098_v63  ;;  %v1078_v20 = vmul.f32 %v10737_v25, %v12261_v17 }
 0x281   : > { %1322 = vmatmul.mubr.f32.gmra.mrb[12].mxu0 %v1114_v5  ;;  %9041 = vmatmul.mubr.f32.gmra.mrb[10].mxu1 %v1119_v26  ;;  %v1099_v59 = vmul.f32 %v12283_v1, %v1077_v27 }
 0x282   : > { %v10739_v31 = vpop.eup %10738  ;;  %9043 = vmatprep.mubr.f32.mxu1 %v1120_v56  ;;  %1327 = vmatprep.mubr.f32.mxu0 %v15210_v30  ;;  %v1100_v32 = vmul.f32 %v12283_v1, %v1078_v20 }
 0x283   : > { %v1121_v13 = vadd.f32 %v12291_v58, %v1099_v59  ;;  %v1079_v33 = vmul.f32 %v10739_v31, %v12264_v18  ;;  %v1206_v18 = vlaneseq }
 0x284   : > { %v1122_v7 = vadd.f32 %v12291_v58, %v1100_v32 }
 0x285   : > { %1328 = vmatmul.mubr.f32.gmra.mrb[14].mxu0 %v1115_v37  ;;  %9044 = vmatmul.mubr.f32.gmra.mrb[12].mxu1 %v1121_v13  ;;  %v1101_v17 = vmul.f32 %v12283_v1, %v1079_v33  ;;  %v12356_v1 = vshrl.u32 %v1206_v18, 7 }
 0x286   : > { %9046 = vmatprep.mubr.f32.mxu1 %v1122_v7  ;;  %1333 = vmatprep.mubr.f32.mxu0 %v15210_v30 }
 0x287   : > { %v1123_v34 = vadd.f32 %v12291_v58, %v1101_v17  ;;  %15313 = vst [vmem:[#allocation37_spill] sm:$0xff] %v12356_v1  ;;  %v15209_v58 = vsub.s32 0, %v12356_v1  ;;  %v15207_v39 = vsub.s32 2, %v12356_v1  ;;  %v15208_v40 = vsub.s32 1, %v12356_v1 }
 0x289   : > { %1334 = vmatmul.mubr.f32.gmra.mrb[16].mxu0 %v1116_v44  ;;  %9047 = vmatmul.mubr.f32.gmra.mrb[14].mxu1 %v1123_v34  ;;  %v12362_v38 = vrot.slane %v1204_v35, %v15209_v58  ;;  %v12371_v43 = vrot.slane %v1204_v35, %v15207_v39  ;;  %v12375_v46 = vrot.slane %v1204_v35, %v15208_v40 }
 0x28a   : > { %1339 = vmatprep.mubr.f32.mxu0 %v15210_v30 }
 0x28d   : > { %1340 = vmatmul.mubr.f32.gmra.mrb[18].mxu0 %v1117_v22 }
 0x28e   : > { %1345 = vmatprep.mubr.f32.mxu0 %v15210_v30 }
 0x291   : > { %1346 = vmatmul.mubr.f32.gmra.mrb[20].mxu0 %v1118_v23 }
 0x292   : > { %1351 = vmatprep.mubr.f32.mxu0 %v15210_v30 }
 0x295   : > { %1352 = vmatmul.mubr.f32.gmra.mrb[22].mxu0 %v1119_v26 }
 0x296   : > { %1357 = vmatprep.mubr.f32.mxu0 %v15210_v30 }
 0x299   : > { %1358 = vmatmul.mubr.f32.gmra.mrb[24].mxu0 %v1120_v56 }
 0x29a   : > { %1363 = vmatprep.mubr.f32.mxu0 %v15210_v30 }
 0x29d   : > { %1364 = vmatmul.mubr.f32.gmra.mrb[26].mxu0 %v1121_v13 }
 0x29e   : > { %1369 = vmatprep.mubr.f32.mxu0 %v15210_v30 }
 0x2a1   : > { %1370 = vmatmul.mubr.f32.gmra.mrb[28].mxu0 %v1122_v7 }
 0x2a2   : > { %1375 = vmatprep.mubr.f32.mxu0 %v15210_v30 }
 0x2a5   : > { %1376 = vmatmul.mubr.f32.gmra.mrb[30].mxu0 %v1123_v34 }
 0x33c   : > { %v1287_v41 = vpop.f32.mrb[0].mxu0 }
 0x33d   : > { %v12367_v42 = vadd.f32 %v1287_v41, %v12362_v38  ;;  %v1289_v21 = vpop.f32.mrb[1].mxu0 }
 0x33e   : > { %v1290_v51 = vadd.f32 %v1289_v21, %v12375_v46 }
 0x33f   : > { %1543 = vrot.lane.b32.xlu1 %v12367_v42, %s11655_s18  ;;  %9065 = vmatprep.mubr.msk.f32.mxu1 %vm1911_vm0, %v12367_v42 }
 0x340   : > { %v1293_v47 = vpop.f32.mrb[2].mxu0  ;;  %v9027_v48 = vpop.f32.mrb[0].mxu1 }
 0x341   : > { %v1454_v49 = vadd.f32 %v9027_v48, %v12371_v43  ;;  %v1295_v50 = vpop.f32.mrb[3].mxu0  ;;  %v1448_v28 = vpop.f32.mrb[1].mxu1  ;;  %v12405_v9 = vadd.f32 %v1293_v47, %v12362_v38 }
 0x342   : > { %v1296_v52 = vadd.f32 %v1295_v50, %v12375_v46  ;;  %v1449_v53 = vadd.f32 %v1448_v28, %v12371_v43 }
 0x344   : > { %v1299_v57 = vpop.f32.mrb[4].mxu0  ;;  %v9030_v0 = vpop.f32.mrb[2].mxu1  ;;  %v12391_v29 = vpack.i.bf16 %v1296_v52, %v1290_v51  ;;  %v9689_v2 = vpack.c.bf16 %v1296_v52, %v1290_v51  ;;  %v12397_v6 = vpack.i.bf16 %v1454_v49, %v1449_v53  ;;  %v12411_v10 = vpack.c.bf16 %v1454_v49, %v1449_v53 }
 0x345   : > { %v12394_v3 = vadd.f32 %v1299_v57, %v12362_v38  ;;  %v1464_v36 = vadd.f32 %v9030_v0, %v12371_v43  ;;  %v1301_v4 = vpop.f32.mrb[5].mxu0  ;;  %v1458_v5 = vpop.f32.mrb[3].mxu1 }
 0x346   : > { %v1459_v8 = vadd.f32 %v1458_v5, %v12371_v43  ;;  %10389 = vrot.lane.b32.xlu0 %v12391_v29, %s11655_s18  ;;  %9691 = vmatprep.subr.msk.bf16.mxu1 %vm12387_vm1, %v9689_v2  ;;  %v1302_v16 = vadd.f32 %v1301_v4, %v12375_v46 }
 0x347   : > { %9694 = vmatpush3.bf16.xpose.msk.msra.mxu1 %vm12387_vm1, %v9689_v2  ;;  %1547 = vrot.lane.b32.xlu1 %v12394_v3, %s11655_s18 }
 0x348   : > { %v1305_v11 = vpop.f32.mrb[6].mxu0  ;;  %v9033_v14 = vpop.f32.mrb[4].mxu1  ;;  %v12413_v37 = vpack.i.bf16 %v1464_v36, %v1459_v8  ;;  %v12415_v15 = vpack.c.bf16 %v1464_v36, %v1459_v8 }
 0x349   : > { %v1474_v44 = vadd.f32 %v9033_v14, %v12371_v43  ;;  %v1307_v60 = vpop.f32.mrb[7].mxu0  ;;  %v1468_v12 = vpop.f32.mrb[5].mxu1  ;;  %v12424_v22 = vadd.f32 %v1305_v11, %v12362_v38 }
 0x34a   : > { %v1308_v61 = vadd.f32 %v1307_v60, %v12375_v46  ;;  %v1469_v19 = vadd.f32 %v1468_v12, %v12371_v43  ;;  %1545 = vrot.lane.b32.xlu0 %v12405_v9, %s11655_s18 }
 0x34c   : > { %v1311_v45 = vpop.f32.mrb[8].mxu0  ;;  %v9036_v23 = vpop.f32.mrb[6].mxu1  ;;  %v9695_v24 = vpack.c.bf16 %v1308_v61, %v1302_v16  ;;  %v12426_v55 = vpack.i.bf16 %v1308_v61, %v1302_v16  ;;  %v12429_v26 = vpack.i.bf16 %v1474_v44, %v1469_v19  ;;  %v12443_v20 = vpack.c.bf16 %v1474_v44, %v1469_v19 }
 0x34d   : > { %v1484_v62 = vadd.f32 %v9036_v23, %v12371_v43  ;;  %v1313_v63 = vpop.f32.mrb[9].mxu0  ;;  %v1478_v25 = vpop.f32.mrb[7].mxu1  ;;  %v12437_v56 = vadd.f32 %v1311_v45, %v12362_v38 }
 0x34e   : > { %v1479_v27 = vadd.f32 %v1478_v25, %v12371_v43  ;;  %1549 = vrot.lane.b32.xlu0 %v12424_v22, %s11655_s18  ;;  %9697 = vmatprep.subr.msk.bf16.mxu1 %vm12387_vm1, %v9695_v24  ;;  %v1314_v34 = vadd.f32 %v1313_v63, %v12375_v46 }
 0x34f   : > { %10394 = vrot.lane.b32.xlu1 %v12426_v55, %s11655_s18  ;;  %9700 = vmatpush3.bf16.xpose.msk.msra.mxu1 %vm12387_vm1, %v9695_v24 }
 0x350   : > { %v12445_v59 = vpop.f32.mrb[10].mxu0  ;;  %v9039_v31 = vpop.f32.mrb[8].mxu1  ;;  %v12447_v32 = vpack.i.bf16 %v1484_v62, %v1479_v27  ;;  %v12449_v13 = vpack.c.bf16 %v1484_v62, %v1479_v27 }
 0x351   : > { %v1494_v33 = vadd.f32 %v9039_v31, %v12371_v43  ;;  %v1319_v7 = vpop.f32.mrb[11].mxu0  ;;  %v1488_v17 = vpop.f32.mrb[9].mxu1 }
 0x352   : > { %v1320_v35 = vadd.f32 %v1319_v7, %v12375_v46  ;;  %v1489_v41 = vadd.f32 %v1488_v17, %v12371_v43  ;;  %1551 = vrot.lane.b32.xlu0 %v12437_v56, %s11655_s18 }
 0x354   : > { %v1323_v21 = vpop.f32.mrb[12].mxu0  ;;  %v9042_v47 = vpop.f32.mrb[10].mxu1  ;;  %v12457_v48 = vpack.i.bf16 %v1320_v35, %v1314_v34  ;;  %v9701_v49 = vpack.c.bf16 %v1320_v35, %v1314_v34  ;;  %v12460_v52 = vpack.i.bf16 %v1494_v33, %v1489_v41  ;;  %v12467_v57 = vpack.c.bf16 %v1494_v33, %v1489_v41 }
 0x355   : > { %v1504_v50 = vadd.f32 %v9042_v47, %v12371_v43  ;;  %v1325_v28 = vpop.f32.mrb[13].mxu0  ;;  %v1498_v51 = vpop.f32.mrb[11].mxu1  ;;  %v12495_v31 = vadd.f32 %v1323_v21, %v12362_v38 }
 0x356   : > { %15316 = vst [vmem:[#allocation38_spill] sm:$0xff] %v12460_v52  ;;  %v1499_v53 = vadd.f32 %v1498_v51, %v12371_v43  ;;  %10399 = vrot.lane.b32.xlu1 %v12457_v48, %s11655_s18  ;;  %9703 = vmatprep.subr.msk.bf16.mxu1 %vm12387_vm1, %v9701_v49  ;;  %15317 = vst [vmem:[#allocation39_spill] sm:$0xff] %v12467_v57  ;;  %v1326_v14 = vadd.f32 %v1325_v28, %v12375_v46 }
 0x357   : > { %9706 = vmatpush3.bf16.xpose.msk.msra.mxu1 %vm12387_vm1, %v9701_v49 }
 0x358   : > { %v1329_v0 = vpop.f32.mrb[14].mxu0  ;;  %v9045_v2 = vpop.f32.mrb[12].mxu1  ;;  %v12471_v36 = vpack.i.bf16 %v1504_v50, %v1499_v53  ;;  %v12473_v4 = vpack.c.bf16 %v1504_v50, %v1499_v53  ;;  %v12521_v50 = vadd.f32 %v12445_v59, %v12362_v38 }
 0x359   : > { %v1514_v5 = vadd.f32 %v9045_v2, %v12371_v43  ;;  %v1331_v8 = vpop.f32.mrb[15].mxu0  ;;  %v1508_v11 = vpop.f32.mrb[13].mxu1 }
 0x35a   : > { %15318 = vst [vmem:[#allocation40_spill] sm:$0xff] %v12471_v36  ;;  %15319 = vst [vmem:[#allocation41_spill] sm:$0xff] %v12473_v4  ;;  %v1332_v44 = vadd.f32 %v1331_v8, %v12375_v46  ;;  %v1509_v60 = vadd.f32 %v1508_v11, %v12371_v43 }
 0x35c   : > { %v1335_v12 = vpop.f32.mrb[16].mxu0  ;;  %v9048_v16 = vpop.f32.mrb[14].mxu1  ;;  %v12479_v61 = vpack.i.bf16 %v1332_v44, %v1326_v14  ;;  %v9707_v19 = vpack.c.bf16 %v1332_v44, %v1326_v14  ;;  %v12485_v63 = vpack.i.bf16 %v1514_v5, %v1509_v60  ;;  %v12492_v27 = vpack.c.bf16 %v1514_v5, %v1509_v60 }
 0x35d   : > { %v12482_v45 = vadd.f32 %v1335_v12, %v12362_v38  ;;  %v1524_v23 = vadd.f32 %v9048_v16, %v12371_v43  ;;  %v1337_v24 = vpop.f32.mrb[17].mxu0  ;;  %v1518_v62 = vpop.f32.mrb[15].mxu1  ;;  %v12547_v44 = vadd.f32 %v1329_v0, %v12362_v38 }
 0x35e   : > { %15320 = vst [vmem:[#allocation42_spill] sm:$0xff] %v12485_v63  ;;  %v1519_v25 = vadd.f32 %v1518_v62, %v12371_v43  ;;  %10404 = vrot.lane.b32.xlu0 %v12479_v61, %s11655_s18  ;;  %9709 = vmatprep.subr.msk.bf16.mxu1 %vm12387_vm1, %v9707_v19  ;;  %15321 = vst [vmem:[#allocation43_spill] sm:$0xff] %v12492_v27  ;;  %v1338_v34 = vadd.f32 %v1337_v24, %v12375_v46 }
 0x35f   : > { %9712 = vmatpush3.bf16.xpose.msk.msra.mxu1 %vm12387_vm1, %v9707_v19  ;;  %9093 = vmatprep.mubr.msk.f32.mxu0 %vm1911_vm0, %v12482_v45 }
 0x360   : > { %v1341_v33 = vpop.f32.mrb[18].mxu0  ;;  %v12501_v7 = vpack.i.bf16 %v1524_v23, %v1519_v25  ;;  %v12503_v43 = vpack.c.bf16 %v1524_v23, %v1519_v25 }
 0x361   : > { %v1343_v17 = vpop.f32.mrb[19].mxu0  ;;  %v12561_v0 = vadd.f32 %v1341_v33, %v12362_v38 }
 0x362   : > { %15322 = vst [vmem:[#allocation44_spill] sm:$0xff] %v12501_v7  ;;  %15323 = vst [vmem:[#allocation45_spill] sm:$0xff] %v12503_v43  ;;  %v1344_v35 = vadd.f32 %v1343_v17, %v12375_v46  ;;  %1555 = vrot.lane.b32.xlu0 %v12495_v31, %s11655_s18 }
 0x364   : > { %v1347_v41 = vpop.f32.mrb[20].mxu0  ;;  %v12509_v21 = vpack.i.bf16 %v1344_v35, %v1338_v34  ;;  %v9713_v47 = vpack.c.bf16 %v1344_v35, %v1338_v34 }
 0x365   : > { %v1349_v49 = vpop.f32.mrb[21].mxu0  ;;  %v12577_v33 = vadd.f32 %v1347_v41, %v12362_v38 }
 0x366   : > { %10409 = vrot.lane.b32.xlu1 %v12509_v21, %s11655_s18  ;;  %9715 = vmatprep.subr.msk.bf16.mxu0 %vm12387_vm1, %v9713_v47  ;;  %v1350_v53 = vadd.f32 %v1349_v49, %v12375_v46 }
 0x367   : > { %1559 = vrot.lane.b32.xlu0 %v12482_v45, %s11655_s18  ;;  %9066 = vmatmul.mubr.msk.f32.vlgmr.msra.gmra.mrb[16].mxu1 %vm1911_vm0, %v12405_v9 }
 0x368   : > { %9068 = vmatprep.mubr.msk.f32.mxu1 %vm1911_vm0, %v12394_v3  ;;  %9718 = vmatpush3.bf16.xpose.msk.msra.mxu0 %vm12387_vm1, %v9713_v47  ;;  %v1353_v28 = vpop.f32.mrb[22].mxu0 }
 0x369   : > { %v1355_v51 = vpop.f32.mrb[23].mxu0  ;;  %v12580_v35 = vadd.f32 %v1353_v28, %v12362_v38 }
 0x36a   : > { %v1356_v2 = vadd.f32 %v1355_v51, %v12375_v46  ;;  %1553 = vrot.lane.b32.xlu1 %v12521_v50, %s11655_s18 }
 0x36b   : > { %9069 = vmatmul.mubr.msk.f32.gmra.mrb[18].mxu1 %vm1911_vm0, %v12424_v22 }
 0x36c   : > { %9071 = vmatprep.mubr.msk.f32.mxu1 %vm1911_vm0, %v12437_v56  ;;  %v1359_v59 = vpop.f32.mrb[24].mxu0  ;;  %v12535_v5 = vpack.i.bf16 %v1356_v2, %v1350_v53  ;;  %v9719_v8 = vpack.c.bf16 %v1356_v2, %v1350_v53 }
 0x36d   : > { %v12538_v11 = vadd.f32 %v1359_v59, %v12362_v38  ;;  %v1361_v14 = vpop.f32.mrb[25].mxu0 }
 0x36e   : > { %10414 = vrot.lane.b32.xlu1 %v12535_v5, %s11655_s18  ;;  %9721 = vmatprep.subr.msk.bf16.mxu0 %vm12387_vm1, %v9719_v8  ;;  %v1362_v19 = vadd.f32 %v1361_v14, %v12375_v46 }
 0x36f   : > { %9072 = vmatmul.mubr.msk.f32.gmra.mrb[20].mxu1 %vm1911_vm0, %v12521_v50 }
 0x370   : > { %9074 = vmatprep.mubr.msk.f32.mxu1 %vm1911_vm0, %v12495_v31  ;;  %9724 = vmatpush3.bf16.xpose.msk.msra.mxu0 %vm12387_vm1, %v9719_v8  ;;  %v1365_v60 = vpop.f32.mrb[26].mxu0 }
 0x371   : > { %v12554_v12 = vadd.f32 %v1365_v60, %v12362_v38  ;;  %v1367_v16 = vpop.f32.mrb[27].mxu0 }
 0x372   : > { %v1368_v23 = vadd.f32 %v1367_v16, %v12375_v46  ;;  %1557 = vrot.lane.b32.xlu1 %v12547_v44, %s11655_s18 }
 0x373   : > { %9075 = vmatmul.mubr.msk.f32.gmra.mrb[22].mxu1 %vm1911_vm0, %v12547_v44 }
 0x374   : > { %v1371_v24 = vpop.f32.mrb[28].mxu0  ;;  %v12565_v62 = vpack.i.bf16 %v1368_v23, %v1362_v19  ;;  %v9725_v25 = vpack.c.bf16 %v1368_v23, %v1362_v19 }
 0x375   : > { %v12568_v17 = vadd.f32 %v1371_v24, %v12362_v38  ;;  %v1373_v34 = vpop.f32.mrb[29].mxu0 }
 0x376   : > { %1561 = vrot.lane.b32.xlu1 %v12561_v0, %s11655_s18  ;;  %10419 = vrot.lane.b32.xlu0 %v12565_v62, %s11655_s18  ;;  %v1374_v53 = vadd.f32 %v1373_v34, %v12375_v46 }
 0x377   : > { %9727 = vmatprep.subr.msk.bf16.mxu0 %vm12387_vm1, %v9725_v25 }
 0x378   : > { %9730 = vmatpush3.bf16.xpose.msk.msra.mxu0 %vm12387_vm1, %v9725_v25  ;;  %v1377_v47 = vpop.f32.mrb[30].mxu0 }
 0x379   : > { %v12585_v49 = vadd.f32 %v1377_v47, %v12362_v38  ;;  %v1379_v51 = vpop.f32.mrb[31].mxu0 }
 0x37a   : > { %v1380_v2 = vadd.f32 %v1379_v51, %v12375_v46  ;;  %1565 = vrot.lane.b32.xlu1 %v12580_v35, %s11655_s18  ;;  %1563 = vrot.lane.b32.xlu0 %v12577_v33, %s11655_s18 }
 0x37c   : > { %v12593_v41 = vpack.i.bf16 %v1380_v2, %v1374_v53  ;;  %v9731_v28 = vpack.c.bf16 %v1380_v2, %v1374_v53 }
 0x37e   : > { %1567 = vrot.lane.b32.xlu0 %v12538_v11, %s11655_s18  ;;  %10424 = vrot.lane.b32.xlu1 %v12593_v41, %s11655_s18 }
 0x37f   : > { %9733 = vmatprep.subr.msk.bf16.mxu0 %vm12387_vm1, %v9731_v28 }
 0x380   : > { %9736 = vmatpush3.bf16.xpose.msk.msra.mxu0 %vm12387_vm1, %v9731_v28 }
 0x382   : > { %1569 = vrot.lane.b32.xlu1 %v12554_v12, %s11655_s18  ;;  %1571 = vrot.lane.b32.xlu0 %v12568_v17, %s11655_s18 }
 0x386   : > { %1573 = vrot.lane.b32.xlu1 %v12585_v49, %s11655_s18  ;;  %10429 = vrot.lane.b32.xlu0 %v12391_v29, %s11656_s23 }
 0x387   : > { %9094 = vmatmul.mubr.msk.f32.vlgmr.msra.gmra.mrb[32].mxu0 %vm1911_vm0, %v12561_v0 }
 0x388   : > { %9096 = vmatprep.mubr.msk.f32.mxu0 %vm1911_vm0, %v12577_v33 }
 0x38a   : > { %10434 = vrot.lane.b32.xlu1 %v12426_v55, %s11656_s23  ;;  %10439 = vrot.lane.b32.xlu0 %v12457_v48, %s11656_s23 }
 0x38b   : > { %9097 = vmatmul.mubr.msk.f32.gmra.mrb[34].mxu0 %vm1911_vm0, %v12580_v35 }
 0x38c   : > { %9099 = vmatprep.mubr.msk.f32.mxu0 %vm1911_vm0, %v12538_v11 }
 0x38e   : > { %10444 = vrot.lane.b32.xlu1 %v12509_v21, %s11656_s23  ;;  %10449 = vrot.lane.b32.xlu0 %v12479_v61, %s11656_s23 }
 0x38f   : > { %9100 = vmatmul.mubr.msk.f32.gmra.mrb[36].mxu0 %vm1911_vm0, %v12554_v12 }
 0x390   : > { %9102 = vmatprep.mubr.msk.f32.mxu0 %vm1911_vm0, %v12568_v17 }
 0x392   : > { %10454 = vrot.lane.b32.xlu1 %v12535_v5, %s11656_s23  ;;  %10459 = vrot.lane.b32.xlu0 %v12565_v62, %s11656_s23 }
 0x393   : > { %9103 = vmatmul.mubr.msk.f32.gmra.mrb[38].mxu0 %vm1911_vm0, %v12585_v49 }
 0x396   : > { %10464 = vrot.lane.b32.xlu1 %v12391_v29, %s11657_s6  ;;  %1575 = vrot.lane.b32.xlu0 %v12367_v42, %s11656_s23 }
 0x39a   : > { %1577 = vrot.lane.b32.xlu1 %v12405_v9, %s11656_s23  ;;  %1579 = vrot.lane.b32.xlu0 %v12394_v3, %s11656_s23 }
 0x39e   : > { %1581 = vrot.lane.b32.xlu1 %v12424_v22, %s11656_s23  ;;  %1583 = vrot.lane.b32.xlu0 %v12437_v56, %s11656_s23 }
 0x3a2   : > { %10469 = vrot.lane.b32.xlu1 %v12426_v55, %s11657_s6  ;;  %1587 = vrot.lane.b32.xlu0 %v12495_v31, %s11656_s23 }
 0x3a6   : > { %1585 = vrot.lane.b32.xlu1 %v12521_v50, %s11656_s23  ;;  %10474 = vrot.lane.b32.xlu0 %v12457_v48, %s11657_s6 }
 0x3aa   : > { %1589 = vrot.lane.b32.xlu1 %v12547_v44, %s11656_s23  ;;  %1593 = vrot.lane.b32.xlu0 %v12561_v0, %s11656_s23 }
 0x3ae   : > { %1591 = vrot.lane.b32.xlu1 %v12482_v45, %s11656_s23  ;;  %1597 = vrot.lane.b32.xlu0 %v12580_v35, %s11656_s23 }
 0x3b1   : > { %v1544_v38 = vpop.permute.xlu1 %1543 }
 0x3b2   : > { %9121 = vmatprep.mubr.msk.f32.mxu1 %vm1911_vm0, %v1544_v38  ;;  %1595 = vrot.lane.b32.xlu1 %v12577_v33, %s11656_s23 }
 0x3b3   : > { %1599 = vrot.lane.b32.xlu0 %v12538_v11, %s11656_s23 }
 0x3b6   : > { %10479 = vrot.lane.b32.xlu1 %v12479_v61, %s11657_s6 }
 0x3b7   : > { %1603 = vrot.lane.b32.xlu0 %v12568_v17, %s11656_s23 }
 0x3b8   : > { %v10390_v46 = vpop.permute.xlu0 %10389 }
 0x3b9   : > { %v10392_v29 = vunpack.i.h.bf16 %v10390_v46  ;;  %v10391_v55 = vunpack.i.l.bf16 %v10390_v46  ;;  %v1548_v59 = vpop.permute.xlu1 %1547 }
 0x3ba   : > { %1601 = vrot.lane.b32.xlu1 %v12554_v12, %s11656_s23 }
 0x3bb   : > { %v9737_v48 = vpack.c.bf16 %v10392_v29, %v10391_v55  ;;  %10484 = vrot.lane.b32.xlu0 %v12509_v21, %s11657_s6 }
 0x3bc   : > { %v1546_v61 = vpop.permute.xlu0 %1545 }
 0x3bd   : > { %9739 = vmatprep.subr.msk.bf16.mxu1 %vm12387_vm1, %v9737_v48 }
 0x3be   : > { %1605 = vrot.lane.b32.xlu1 %v12585_v49, %s11656_s23  ;;  %9742 = vmatpush3.bf16.xpose.msk.msra.mxu1 %vm12387_vm1, %v9737_v48 }
 0x3bf   : > { %10489 = vrot.lane.b32.xlu0 %v12593_v41, %s11656_s23 }
 0x3c0   : > { %v1550_v16 = vpop.permute.xlu0 %1549 }
 0x3c1   : > { %v10395_v8 = vpop.permute.xlu1 %10394 }
 0x3c2   : > { %v10397_v14 = vunpack.i.h.bf16 %v10395_v8  ;;  %v10396_v60 = vunpack.i.l.bf16 %v10395_v8  ;;  %1607 = vrot.lane.b32.xlu1 %v12367_v42, %s11657_s6 }
 0x3c3   : > { %1609 = vrot.lane.b32.xlu0 %v12405_v9, %s11657_s6 }
 0x3c4   : > { %v9743_v21 = vpack.c.bf16 %v10397_v14, %v10396_v60  ;;  %v1552_v24 = vpop.permute.xlu0 %1551 }
 0x3c6   : > { %9745 = vmatprep.subr.msk.bf16.mxu1 %vm12387_vm1, %v9743_v21  ;;  %10494 = vrot.lane.b32.xlu1 %v12535_v5, %s11657_s6 }
 0x3c7   : > { %1611 = vrot.lane.b32.xlu0 %v12394_v3, %s11657_s6  ;;  %9748 = vmatpush3.bf16.xpose.msk.msra.mxu1 %vm12387_vm1, %v9743_v21 }
 0x3c8   : > { %v10400_v19 = vpop.permute.xlu1 %10399 }
 0x3c9   : > { %v10402_v23 = vunpack.i.h.bf16 %v10400_v19  ;;  %v10401_v42 = vunpack.i.l.bf16 %v10400_v19 }
 0x3ca   : > { %1613 = vrot.lane.b32.xlu1 %v12424_v22, %s11657_s6 }
 0x3cb   : > { %v9749_v9 = vpack.c.bf16 %v10402_v23, %v10401_v42  ;;  %10499 = vrot.lane.b32.xlu0 %v12565_v62, %s11657_s6 }
 0x3cd   : > { %9751 = vmatprep.subr.msk.bf16.mxu1 %vm12387_vm1, %v9749_v9 }
 0x3ce   : > { %1615 = vrot.lane.b32.xlu1 %v12437_v56, %s11657_s6 }
 0x3cf   : > { %1617 = vrot.lane.b32.xlu0 %v12521_v50, %s11657_s6  ;;  %9754 = vmatpush3.bf16.xpose.msk.msra.mxu1 %vm12387_vm1, %v9749_v9 }
 0x3d0   : > { %v10405_v3 = vpop.permute.xlu0 %10404 }
 0x3d1   : > { %v10407_v5 = vunpack.i.h.bf16 %v10405_v3  ;;  %v10406_v22 = vunpack.i.l.bf16 %v10405_v3 }
 0x3d2   : > { %1621 = vrot.lane.b32.xlu1 %v12547_v44, %s11657_s6 }
 0x3d3   : > { %v9755_v62 = vpack.c.bf16 %v10407_v5, %v10406_v22  ;;  %1619 = vrot.lane.b32.xlu0 %v12495_v31, %s11657_s6 }
 0x3d4   : > { %v1556_v25 = vpop.permute.xlu0 %1555 }
 0x3d5   : > { %9757 = vmatprep.subr.msk.bf16.mxu1 %vm12387_vm1, %v9755_v62 }
 0x3d6   : > { %1625 = vrot.lane.b32.xlu1 %v12561_v0, %s11657_s6 }
 0x3d7   : > { %1623 = vrot.lane.b32.xlu0 %v12482_v45, %s11657_s6  ;;  %9760 = vmatpush3.bf16.xpose.msk.msra.mxu1 %vm12387_vm1, %v9755_v62 }
 0x3d8   : > { %v10410_v56 = vpop.permute.xlu1 %10409 }
 0x3d9   : > { %v10412_v50 = vunpack.i.h.bf16 %v10410_v56  ;;  %v10411_v44 = vunpack.i.l.bf16 %v10410_v56  ;;  %v1560_v34 = vpop.permute.xlu0 %1559 }
 0x3da   : > { %9149 = vmatprep.mubr.msk.f32.mxu0 %vm1911_vm0, %v1560_v34  ;;  %1629 = vrot.lane.b32.xlu1 %v12580_v35, %s11657_s6 }
 0x3db   : > { %v9761_v31 = vpack.c.bf16 %v10412_v50, %v10411_v44  ;;  %1627 = vrot.lane.b32.xlu0 %v12577_v33, %s11657_s6 }
 0x3dc   : > { %v1554_v0 = vpop.permute.xlu1 %1553 }
 0x3dd   : > { %9763 = vmatprep.subr.msk.bf16.mxu0 %vm12387_vm1, %v9761_v31 }
 0x3de   : > { %9122 = vmatmul.mubr.msk.f32.vlgmr.msra.gmra.mrb[24].mxu1 %vm1911_vm0, %v1546_v61  ;;  %1633 = vrot.lane.b32.xlu1 %v12554_v12, %s11657_s6 }
 0x3df   : > { %9766 = vmatpush3.bf16.xpose.msk.msra.mxu0 %vm12387_vm1, %v9761_v31  ;;  %1631 = vrot.lane.b32.xlu0 %v12538_v11, %s11657_s6 }
 0x3e0   : > { %9124 = vmatprep.mubr.msk.f32.mxu1 %vm1911_vm0, %v1548_v59  ;;  %v10415_v45 = vpop.permute.xlu1 %10414 }
 0x3e1   : > { %v10417_v35 = vunpack.i.h.bf16 %v10415_v45  ;;  %v10416_v33 = vunpack.i.l.bf16 %v10415_v45 }
 0x3e2   : > { %9125 = vmatmul.mubr.msk.f32.gmra.mrb[26].mxu1 %vm1911_vm0, %v1550_v16  ;;  %1637 = vrot.lane.b32.xlu1 %v12585_v49, %s11657_s6 }
 0x3e3   : > { %v9767_v47 = vpack.c.bf16 %v10417_v35, %v10416_v33  ;;  %1635 = vrot.lane.b32.xlu0 %v12568_v17, %s11657_s6  ;;  %9127 = vmatprep.mubr.msk.f32.mxu1 %vm1911_vm0, %v1552_v24 }
 0x3e4   : > { %v1558_v12 = vpop.permute.xlu1 %1557 }
 0x3e5   : > { %9769 = vmatprep.subr.msk.bf16.mxu0 %vm12387_vm1, %v9767_v47 }
 0x3e6   : > { %9128 = vmatmul.mubr.msk.f32.gmra.mrb[28].mxu1 %vm1911_vm0, %v1554_v0  ;;  %10509 = vrot.lane.b32.xlu1 %v12413_v37, %s11655_s18 }
 0x3e7   : > { %9772 = vmatpush3.bf16.xpose.msk.msra.mxu0 %vm12387_vm1, %v9767_v47  ;;  %10504 = vrot.lane.b32.xlu0 %v12397_v6, %s11655_s18 }
 0x3e8   : > { %9130 = vmatprep.mubr.msk.f32.mxu1 %vm1911_vm0, %v1556_v25  ;;  %v1562_v11 = vpop.permute.xlu1 %1561  ;;  %v10420_v17 = vpop.permute.xlu0 %10419 }
 0x3e9   : > { %v10422_v49 = vunpack.i.h.bf16 %v10420_v17  ;;  %v10421_v51 = vunpack.i.l.bf16 %v10420_v17 }
 0x3ea   : > { %9131 = vmatmul.mubr.msk.f32.gmra.mrb[30].mxu1 %vm1911_vm0, %v1558_v12  ;;  %10519 = vrot.lane.b32.xlu1 %v12447_v32, %s11655_s18 }
 0x3eb   : > { %v9773_v53 = vpack.c.bf16 %v10422_v49, %v10421_v51  ;;  %10514 = vrot.lane.b32.xlu0 %v12429_v26, %s11655_s18 }
 0x3ec   : > { %v1566_v2 = vpop.permute.xlu1 %1565  ;;  %v1564_v28 = vpop.permute.xlu0 %1563 }
 0x3ed   : > { %9775 = vmatprep.subr.msk.bf16.mxu0 %vm12387_vm1, %v9773_v53 }
 0x3ee   : > { %10529 = vrot.lane.b32.xlu1 %v12593_v41, %s11657_s6 }
 0x3ef   : > { %10524 = vrot.lane.b32.xlu0 %v12460_v52, %s11655_s18  ;;  %9778 = vmatpush3.bf16.xpose.msk.msra.mxu0 %vm12387_vm1, %v9773_v53 }
 0x3f0   : > { %v10425_v38 = vpop.permute.xlu1 %10424  ;;  %v1568_v46 = vpop.permute.xlu0 %1567 }
 0x3f1   : > { %v10427_v29 = vunpack.i.h.bf16 %v10425_v38  ;;  %v10426_v55 = vunpack.i.l.bf16 %v10425_v38 }
 0x3f2   : > { %10534 = vrot.lane.b32.xlu1 %v12471_v36, %s11655_s18 }
 0x3f3   : > { %v9779_v48 = vpack.c.bf16 %v10427_v29, %v10426_v55  ;;  %10539 = vrot.lane.b32.xlu0 %v12485_v63, %s11655_s18 }
 0x3f4   : > { %v1570_v59 = vpop.permute.xlu1 %1569  ;;  %v1572_v61 = vpop.permute.xlu0 %1571 }
 0x3f5   : > { %9781 = vmatprep.subr.msk.bf16.mxu0 %vm12387_vm1, %v9779_v48 }
 0x3f6   : > { %10544 = vrot.lane.b32.xlu1 %v12501_v7, %s11655_s18 }
 0x3f7   : > { %10549 = vrot.lane.b32.xlu0 %v12397_v6, %s11656_s23  ;;  %9784 = vmatpush3.bf16.xpose.msk.msra.mxu0 %vm12387_vm1, %v9779_v48 }
 0x3f8   : > { %v1574_v41 = vpop.permute.xlu1 %1573  ;;  %v10430_v8 = vpop.permute.xlu0 %10429 }
 0x3f9   : > { %v10432_v14 = vunpack.i.h.bf16 %v10430_v8  ;;  %v10431_v60 = vunpack.i.l.bf16 %v10430_v8 }
 0x3fa   : > { %10554 = vrot.lane.b32.xlu1 %v12413_v37, %s11656_s23 }
 0x3fb   : > { %v9785_v21 = vpack.c.bf16 %v10432_v14, %v10431_v60  ;;  %10559 = vrot.lane.b32.xlu0 %v12429_v26, %s11656_s23 }
 0x3fc   : > { %v10435_v16 = vpop.permute.xlu1 %10434  ;;  %v10440_v19 = vpop.permute.xlu0 %10439 }
 0x3fd   : > { %v10437_v23 = vunpack.i.h.bf16 %v10435_v16  ;;  %v10436_v42 = vunpack.i.l.bf16 %v10435_v16  ;;  %9787 = vmatprep.subr.msk.bf16.mxu1 %vm12387_vm1, %v9785_v21  ;;  %v10442_v62 = vunpack.i.h.bf16 %v10440_v19  ;;  %v10441_v25 = vunpack.i.l.bf16 %v10440_v19 }
 0x3fe   : > { %9150 = vmatmul.mubr.msk.f32.vlgmr.msra.gmra.mrb[40].mxu0 %vm1911_vm0, %v1562_v11  ;;  %10564 = vrot.lane.b32.xlu1 %v12447_v32, %s11656_s23 }
 0x3ff   : > { %v9791_v9 = vpack.c.bf16 %v10437_v23, %v10436_v42  ;;  %10569 = vrot.lane.b32.xlu0 %v12460_v52, %s11656_s23  ;;  %9152 = vmatprep.mubr.msk.f32.mxu0 %vm1911_vm0, %v1564_v28  ;;  %v9797_v0 = vpack.c.bf16 %v10442_v62, %v10441_v25 }
 0x400   : > { %9790 = vmatpush3.bf16.xpose.msk.msra.mxu1 %vm12387_vm1, %v9785_v21  ;;  %v10445_v24 = vpop.permute.xlu1 %10444  ;;  %v10450_v3 = vpop.permute.xlu0 %10449 }
 0x401   : > { %v10447_v5 = vunpack.i.h.bf16 %v10445_v24  ;;  %v10446_v22 = vunpack.i.l.bf16 %v10445_v24  ;;  %9793 = vmatprep.subr.msk.bf16.mxu1 %vm12387_vm1, %v9791_v9  ;;  %v10451_v47 = vunpack.i.l.bf16 %v10450_v3 }
 0x402   : > { %9153 = vmatmul.mubr.msk.f32.gmra.mrb[42].mxu0 %vm1911_vm0, %v1566_v2  ;;  %10579 = vrot.lane.b32.xlu1 %v12485_v63, %s11656_s23 }
 0x403   : > { %v9809_v56 = vpack.c.bf16 %v10447_v5, %v10446_v22  ;;  %10574 = vrot.lane.b32.xlu0 %v12471_v36, %s11656_s23  ;;  %9155 = vmatprep.mubr.msk.f32.mxu0 %vm1911_vm0, %v1568_v46 }
 0x404   : > { %v10455_v50 = vpop.permute.xlu1 %10454  ;;  %v10460_v44 = vpop.permute.xlu0 %10459 }
 0x405   : > { %v10457_v34 = vunpack.i.h.bf16 %v10455_v50  ;;  %v10456_v31 = vunpack.i.l.bf16 %v10455_v50  ;;  %9811 = vmatprep.subr.msk.bf16.mxu0 %vm12387_vm1, %v9809_v56  ;;  %v10462_v12 = vunpack.i.h.bf16 %v10460_v44  ;;  %v10461_v11 = vunpack.i.l.bf16 %v10460_v44 }
 0x406   : > { %9156 = vmatmul.mubr.msk.f32.gmra.mrb[44].mxu0 %vm1911_vm0, %v1570_v59  ;;  %10584 = vrot.lane.b32.xlu1 %v12501_v7, %s11656_s23 }
 0x407   : > { %v9815_v45 = vpack.c.bf16 %v10457_v34, %v10456_v31  ;;  %10589 = vrot.lane.b32.xlu0 %v12397_v6, %s11657_s6  ;;  %9158 = vmatprep.mubr.msk.f32.mxu0 %vm1911_vm0, %v1572_v61  ;;  %v10452_v6 = vunpack.i.h.bf16 %v10450_v3  ;;  %v9821_v53 = vpack.c.bf16 %v10462_v12, %v10461_v11  ;;  %v3076_v11 = vadd.s32 24, %v12356_v1 }
 0x408   : > { %9796 = vmatpush3.bf16.xpose.msk.msra.mxu1 %vm12387_vm1, %v9791_v9  ;;  %9814 = vmatpush3.bf16.xpose.msk.msra.mxu0 %vm12387_vm1, %v9809_v56  ;;  %v10465_v35 = vpop.permute.xlu1 %10464  ;;  %v1576_v33 = vpop.permute.xlu0 %1575 }
 0x409   : > { %9799 = vmatprep.subr.msk.bf16.mxu1 %vm12387_vm1, %v9797_v0  ;;  %9177 = vmatprep.mubr.msk.f32.mxu1 %vm1911_vm0, %v1576_v33  ;;  %v9803_v51 = vpack.c.bf16 %v10452_v6, %v10451_v47 }
 0x40a   : > { %9159 = vmatmul.mubr.msk.f32.gmra.mrb[46].mxu0 %vm1911_vm0, %v1574_v41  ;;  %9817 = vmatprep.subr.msk.bf16.mxu0 %vm12387_vm1, %v9815_v45 }
 0x40b   : > { %10599 = vrot.lane.b32.xlu1 %v12429_v26, %s11657_s6  ;;  %10594 = vrot.lane.b32.xlu0 %v12413_v37, %s11657_s6  ;;  %v10467_v37 = vunpack.i.h.bf16 %v10465_v35  ;;  %v10466_v26 = vunpack.i.l.bf16 %v10465_v35  ;;  %v12874_v35 = vand.u32 127, %v1206_v18 }
 0x40c   : > { %v1578_v17 = vpop.permute.xlu1 %1577  ;;  %v1580_v49 = vpop.permute.xlu0 %1579 }
 0x40d   : > { %v9833_v29 = vpack.c.bf16 %v10467_v37, %v10466_v26  ;;  %vm3083_vm3 = vcmp.le.s32.totalorder %v12874_v35, %v12356_v1  ;;  %vm3086_vm4 = vcmp.le.s32.totalorder %v12874_v35, %v3076_v11  ;;  %v3078_v26 = vadd.s32 40, %v12356_v1 }
 0x40e   : > { %v3079_v11 = vadd.s32 48, %v12356_v1 }
 0x40f   : > { %10604 = vrot.lane.b32.xlu1 %v12447_v32, %s11657_s6  ;;  %vm3088_vm6 = vcmp.le.s32.totalorder %v12874_v35, %v3078_v26 }
 0x410   : > { %9802 = vmatpush3.bf16.xpose.msk.msra.mxu1 %vm12387_vm1, %v9797_v0  ;;  %9820 = vmatpush3.bf16.xpose.msk.msra.mxu0 %vm12387_vm1, %v9815_v45  ;;  %v1582_v2 = vpop.permute.xlu1 %1581  ;;  %v1584_v28 = vpop.permute.xlu0 %1583  ;;  %v3074_v45 = vadd.s32 8, %v12356_v1  ;;  %vm3089_vm10 = vcmp.le.s32.totalorder %v12874_v35, %v3079_v11 }
 0x411   : > { %9805 = vmatprep.subr.msk.bf16.mxu1 %vm12387_vm1, %v9803_v51  ;;  %9823 = vmatprep.subr.msk.bf16.mxu0 %vm12387_vm1, %v9821_v53 }
 0x412   : > { %vm3084_vm2 = vcmp.le.s32.totalorder %v12874_v35, %v3074_v45 }
 0x414   : > { %v10470_v38 = vpop.permute.xlu1 %10469  ;;  %v1588_v46 = vpop.permute.xlu0 %1587 }
 0x415   : > { %v10472_v48 = vunpack.i.h.bf16 %v10470_v38  ;;  %v10471_v59 = vunpack.i.l.bf16 %v10470_v38 }
 0x417   : > { %v9839_v8 = vpack.c.bf16 %v10472_v48, %v10471_v59  ;;  %v3075_v59 = vadd.s32 16, %v12356_v1 }
 0x418   : > { %9808 = vmatpush3.bf16.xpose.msk.msra.mxu1 %vm12387_vm1, %v9803_v51  ;;  %9826 = vmatpush3.bf16.xpose.msk.msra.mxu0 %vm12387_vm1, %v9821_v53  ;;  %v1586_v32 = vpop.permute.xlu1 %1585  ;;  %v10475_v55 = vpop.permute.xlu0 %10474  ;;  %v11658_v51 = vmov -1e+30  }
 0x419   : > { %9835 = vmatprep.subr.msk.bf16.mxu1 %vm12387_vm1, %v9833_v29  ;;  %v10477_v21 = vunpack.i.h.bf16 %v10475_v55  ;;  %v10476_v16 = vunpack.i.l.bf16 %v10475_v55  ;;  %v12891_v53 = vsel %vm3084_vm2, 0.0, %v11658_v51  ;;  %v12894_v37 = vsel %vm3083_vm3, 0.0, %v11658_v51 }
 0x41a   : > { %vm3085_vm7 = vcmp.le.s32.totalorder %v12874_v35, %v3075_v59  ;;  %v12996_v59 = vsel %vm3089_vm10, 0.0, %v11658_v51 }
 0x41b   : > { %v9845_v42 = vpack.c.bf16 %v10477_v21, %v10476_v16 }
 0x41c   : > { %v1590_v61 = vpop.permute.xlu1 %1589  ;;  %v12838_v41 = vpop.permute.xlu0 %1593 }
 0x41f   : > { %9178 = vmatmul.mubr.msk.f32.vlgmr.msra.gmra.mrb[32].mxu1 %vm1911_vm0, %v1578_v17 }
 0x420   : > { %9180 = vmatprep.mubr.msk.f32.mxu1 %vm1911_vm0, %v1580_v49  ;;  %9838 = vmatpush3.bf16.xpose.msk.msra.mxu1 %vm12387_vm1, %v9833_v29  ;;  %v1592_v14 = vpop.permute.xlu1 %1591  ;;  %v12844_v60 = vpop.permute.xlu0 %1597 }
 0x421   : > { %9841 = vmatprep.subr.msk.bf16.mxu1 %vm12387_vm1, %v9839_v8  ;;  %9205 = vmatprep.mubr.msk.f32.mxu0 %vm1911_vm0, %v1592_v14  ;;  %v12906_v14 = vsel %vm3086_vm4, 0.0, %v11658_v51 }
 0x423   : > { %9181 = vmatmul.mubr.msk.f32.gmra.mrb[34].mxu1 %vm1911_vm0, %v1582_v2 }
 0x424   : > { %9183 = vmatprep.mubr.msk.f32.mxu1 %vm1911_vm0, %v1584_v28  ;;  %v12851_v19 = vpop.permute.xlu1 %1595 }
 0x425   : > { %v12853_v23 = vpop.permute.xlu0 %1599 }
 0x427   : > { %9184 = vmatmul.mubr.msk.f32.gmra.mrb[36].mxu1 %vm1911_vm0, %v1586_v32 }
 0x428   : > { %9186 = vmatprep.mubr.msk.f32.mxu1 %vm1911_vm0, %v1588_v46  ;;  %9844 = vmatpush3.bf16.xpose.msk.msra.mxu1 %vm12387_vm1, %v9839_v8  ;;  %v10480_v9 = vpop.permute.xlu1 %10479 }
 0x429   : > { %9847 = vmatprep.subr.msk.bf16.mxu1 %vm12387_vm1, %v9845_v42  ;;  %v12861_v24 = vpop.permute.xlu0 %1603  ;;  %v10482_v3 = vunpack.i.h.bf16 %v10480_v9  ;;  %v10481_v5 = vunpack.i.l.bf16 %v10480_v9  ;;  %v3080_v9 = vadd.s32 56, %v12356_v1 }
 0x42b   : > { %9187 = vmatmul.mubr.msk.f32.gmra.mrb[38].mxu1 %vm1911_vm0, %v1590_v61  ;;  %v9851_v25 = vpack.c.bf16 %v10482_v3, %v10481_v5  ;;  %vm3090_vm8 = vcmp.le.s32.totalorder %v12874_v35, %v3080_v9 }
 0x42c   : > { %v12864_v22 = vpop.permute.xlu1 %1601 }
 0x42d   : > { %v10485_v62 = vpop.permute.xlu0 %10484 }
 0x42e   : > { %v10487_v44 = vunpack.i.h.bf16 %v10485_v62  ;;  %v10486_v34 = vunpack.i.l.bf16 %v10485_v62  ;;  %v3077_v62 = vadd.s32 32, %v12356_v1 }
 0x430   : > { %9850 = vmatpush3.bf16.xpose.msk.msra.mxu1 %vm12387_vm1, %v9845_v42  ;;  %v12868_v56 = vpop.permute.xlu1 %1605  ;;  %v9857_v12 = vpack.c.bf16 %v10487_v44, %v10486_v34  ;;  %v12934_v44 = vsel %vm3088_vm6, 0.0, %v11658_v51  ;;  %vm3087_vm9 = vcmp.le.s32.totalorder %v12874_v35, %v3077_v62 }
 0x431   : > { %9853 = vmatprep.subr.msk.bf16.mxu1 %vm12387_vm1, %v9851_v25  ;;  %v10490_v50 = vpop.permute.xlu0 %10489  ;;  %v12970_v26 = vsel %vm3087_vm9, 0.0, %v11658_v51 }
 0x432   : > { %v10492_v31 = vunpack.i.h.bf16 %v10490_v50  ;;  %v10491_v0 = vunpack.i.l.bf16 %v10490_v50 }
 0x434   : > { %v9827_v33 = vpack.c.bf16 %v10492_v31, %v10491_v0  ;;  %v1608_v6 = vpop.permute.xlu1 %1607  ;;  %v12940_v0 = vsel %vm3085_vm7, 0.0, %v11658_v51 }
 0x435   : > { %v1610_v47 = vpop.permute.xlu0 %1609  ;;  %9233 = vmatprep.mubr.msk.f32.mxu1 %vm1911_vm0, %v1608_v6 }
 0x436   : > { %9829 = vmatprep.subr.msk.bf16.mxu0 %vm12387_vm1, %v9827_v33 }
 0x437   : > { %9832 = vmatpush3.bf16.xpose.msk.msra.mxu0 %vm12387_vm1, %v9827_v33 }
 0x438   : > { %9856 = vmatpush3.bf16.xpose.msk.msra.mxu1 %vm12387_vm1, %v9851_v25  ;;  %9859 = vmatprep.subr.msk.bf16.mxu0 %vm12387_vm1, %v9857_v12  ;;  %v10495_v18 = vpop.permute.xlu1 %10494 }
 0x439   : > { %9882 = vmatprep.subr.bf16.mxu1 %v12411_v10  ;;  %v1612_v17 = vpop.permute.xlu0 %1611  ;;  %v10497_v38 = vunpack.i.h.bf16 %v10495_v18  ;;  %v10496_v46 = vunpack.i.l.bf16 %v10495_v18 }
 0x43a   : > { %v9067_v49 = vpop.f32.mrb[16].mxu1 }
 0x43b   : > { %v3009_v2 = vmul.f32 0.17677669, %v9067_v49  ;;  %v2010_v28 = vpop.f32.mrb[17].mxu1  ;;  %v9863_v3 = vpack.c.bf16 %v10497_v38, %v10496_v46 }
 0x43c   : > { %v3008_v29 = vmul.f32 0.17677669, %v2010_v28  ;;  %v1614_v32 = vpop.permute.xlu1 %1613 }
 0x43d   : > { %v12899_v55 = vadd.f32 %v12891_v53, %v3009_v2  ;;  %v10500_v48 = vpop.permute.xlu0 %10499 }
 0x43e   : > { %v12903_v61 = vadd.f32 %v12894_v37, %v3008_v29  ;;  %v9070_v8 = vpop.f32.mrb[18].mxu1  ;;  %9206 = vmatmul.mubr.msk.f32.vlgmr.msra.gmra.mrb[48].mxu0 %vm1911_vm0, %v12838_v41  ;;  %v10502_v6 = vunpack.i.h.bf16 %v10500_v48 }
 0x43f   : > { %v3011_v21 = vmul.f32 0.17677669, %v9070_v8  ;;  %9234 = vmatmul.mubr.msk.f32.vlgmr.msra.gmra.mrb[40].mxu1 %vm1911_vm0, %v1610_v47  ;;  %v2020_v16 = vpop.f32.mrb[19].mxu1  ;;  %9208 = vmatprep.mubr.msk.f32.mxu0 %vm1911_vm0, %v12851_v19  ;;  %v3167_v42 = vsel %vm3163_vm5, %v12899_v55, -inf  ;;  %v10501_v47 = vunpack.i.l.bf16 %v10500_v48 }
 0x440   : > { %9236 = vmatprep.mubr.msk.f32.mxu1 %vm1911_vm0, %v1612_v17  ;;  %9862 = vmatpush3.bf16.xpose.msk.msra.mxu0 %vm12387_vm1, %v9857_v12  ;;  %v1616_v41 = vpop.permute.xlu1 %1615  ;;  %v3164_v5 = vsel %vm3163_vm5, %v12903_v61, -inf  ;;  %v3010_v34 = vmul.f32 0.17677669, %v2020_v16 }
 0x441   : > { %v12924_v19 = vadd.f32 %v12906_v14, %v3011_v21  ;;  %9884 = vmatpush3.bf16.msra.mxu1 %v12411_v10  ;;  %3168 = vmax.xlane.f32.xlu1 %v3167_v42  ;;  %v1618_v25 = vpop.permute.xlu0 %1617  ;;  %v9869_v46 = vpack.c.bf16 %v10502_v6, %v10501_v47 }
 0x442   : > { %9865 = vmatprep.subr.msk.bf16.mxu0 %vm12387_vm1, %v9863_v3  ;;  %9886 = vmatprep.subr.bf16.mxu1 %v12415_v15  ;;  %v9073_v50 = vpop.f32.mrb[20].mxu1  ;;  %v12961_v17 = vadd.f32 %v12940_v0, %v3010_v34 }
 0x443   : > { %3165 = vmax.xlane.f32.xlu0 %v3164_v5  ;;  %v3013_v31 = vmul.f32 0.17677669, %v9073_v50  ;;  %9209 = vmatmul.mubr.msk.f32.gmra.mrb[50].mxu0 %vm1911_vm0, %v12844_v60  ;;  %v2030_v10 = vpop.f32.mrb[21].mxu1  ;;  %v3173_v33 = vsel %vm3163_vm5, %v12924_v19, -inf }
 0x444   : > { %9237 = vmatmul.mubr.msk.f32.gmra.mrb[42].mxu1 %vm1911_vm0, %v1614_v32  ;;  %9211 = vmatprep.mubr.msk.f32.mxu0 %vm1911_vm0, %v12853_v23  ;;  %v1622_v45 = vpop.permute.xlu1 %1621  ;;  %v12958_v23 = vsel %vm3090_vm8, 0.0, %v11658_v51  ;;  %v3012_v49 = vmul.f32 0.17677669, %v2030_v10  ;;  %v3170_v35 = vsel %vm3163_vm5, %v12961_v17, -inf }
 0x445   : > { %v12949_v60 = vadd.f32 %v12934_v44, %v3013_v31  ;;  %9239 = vmatprep.mubr.msk.f32.mxu1 %vm1911_vm0, %v1616_v41  ;;  %9888 = vmatpush3.bf16.msra.mxu1 %v12415_v15  ;;  %v1620_v12 = vpop.permute.xlu0 %1619 }
 0x446   : > { %9890 = vmatprep.subr.bf16.mxu1 %v12443_v20  ;;  %v9076_v18 = vpop.f32.mrb[22].mxu1  ;;  %v12986_v32 = vadd.f32 %v12970_v26, %v3012_v49 }
 0x447   : > { %3174 = vmax.xlane.f32.xlu0 %v3173_v33  ;;  %v3015_v2 = vmul.f32 0.17677669, %v9076_v18  ;;  %9212 = vmatmul.mubr.msk.f32.gmra.mrb[52].mxu0 %vm1911_vm0, %v12864_v22  ;;  %v2040_v15 = vpop.f32.mrb[23].mxu1  ;;  %v3179_v28 = vsel %vm3163_vm5, %v12949_v60, -inf }
 0x448   : > { %9240 = vmatmul.mubr.msk.f32.gmra.mrb[44].mxu1 %vm1911_vm0, %v1618_v25  ;;  %9214 = vmatprep.mubr.msk.f32.mxu0 %vm1911_vm0, %v12861_v24  ;;  %v12975_v38 = vpop.permute.xlu1 %1625  ;;  %v3014_v24 = vmul.f32 0.17677669, %v2040_v15  ;;  %v3176_v51 = vsel %vm3163_vm5, %v12986_v32, -inf }
 0x449   : > { %v12978_v29 = vadd.f32 %v12958_v23, %v3015_v2  ;;  %9242 = vmatprep.mubr.msk.f32.mxu1 %vm1911_vm0, %v1620_v12  ;;  %9868 = vmatpush3.bf16.xpose.msk.msra.mxu0 %vm12387_vm1, %v9863_v3  ;;  %v1624_v22 = vpop.permute.xlu0 %1623 }
 0x44a   : > { %9892 = vmatpush3.bf16.msra.mxu1 %v12443_v20  ;;  %3180 = vmax.xlane.f32.xlu1 %v3179_v28  ;;  %v13008_v21 = vadd.f32 %v12996_v59, %v3014_v24 }
 0x44b   : > { %9871 = vmatprep.subr.msk.bf16.mxu0 %vm12387_vm1, %v9869_v46  ;;  %9894 = vmatprep.subr.bf16.mxu1 %v12449_v13  ;;  %v3185_v48 = vsel %vm3163_vm5, %v12978_v29, -inf }
 0x44c   : > { %3171 = vmax.xlane.f32.xlu0 %v3170_v35  ;;  %9215 = vmatmul.mubr.msk.f32.gmra.mrb[54].mxu0 %vm1911_vm0, %v12868_v56  ;;  %v13000_v20 = vpop.permute.xlu1 %1629 }
 0x44d   : > { %9243 = vmatmul.mubr.msk.f32.gmra.mrb[46].mxu1 %vm1911_vm0, %v1622_v45  ;;  %9261 = vmatprep.mubr.msk.f32.mxu0 %vm1911_vm0, %v1624_v22  ;;  %v13004_v8 = vpop.permute.xlu0 %1627 }
 0x44e   : > { %9896 = vmatpush3.bf16.msra.mxu1 %v12449_v13  ;;  %3186 = vmax.xlane.f32.xlu1 %v3185_v48  ;;  %v3182_v13 = vsel %vm3163_vm5, %v13008_v21, -inf }
 0x44f   : > { %9898 = vmatprep.subr.bf16.mxu1 %v12467_v57 }
 0x450   : > { %3177 = vmax.xlane.f32.xlu0 %v3176_v51  ;;  %v13013_v56 = vpop.permute.xlu1 %1633 }
 0x451   : > { %9874 = vmatpush3.bf16.xpose.msk.msra.mxu0 %vm12387_vm1, %v9869_v46  ;;  %v13017_v16 = vpop.permute.xlu0 %1631 }
 0x454   : > { %3183 = vmax.xlane.f32.xlu0 %v3182_v13  ;;  %v13021_v42 = vpop.permute.xlu1 %1637 }
 0x455   : > { %v13023_v9 = vpop.permute.xlu0 %1635 }
 0x458   : > { %v10510_v3 = vpop.permute.xlu1 %10509 }
 0x459   : > { %v10505_v41 = vpop.permute.xlu0 %10504 }
 0x45a   : > { %v9095_v5 = vpop.f32.mrb[32].mxu0  ;;  %v10507_v18 = vunpack.i.h.bf16 %v10505_v41  ;;  %v10506_v49 = vunpack.i.l.bf16 %v10505_v41 }
 0x45b   : > { %v3017_v62 = vmul.f32 0.17677669, %v9095_v5  ;;  %v2147_v25 = vpop.f32.mrb[33].mxu0 }
 0x45c   : > { %v3016_v50 = vmul.f32 0.17677669, %v2147_v25  ;;  %v13025_v34 = vpop.permute.xlu1 %10519  ;;  %v9913_v51 = vpack.c.bf16 %v10507_v18, %v10506_v49 }
 0x45d   : > { %v13028_v31 = vadd.f32 %v12891_v53, %v3017_v62  ;;  %v10515_v12 = vpop.permute.xlu0 %10514 }
 0x45e   : > { %v9098_v10 = vpop.f32.mrb[34].mxu0  ;;  %v13031_v45 = vadd.f32 %v12894_v37, %v3016_v50  ;;  %v10517_v18 = vunpack.i.h.bf16 %v10515_v12  ;;  %v10516_v49 = vunpack.i.l.bf16 %v10515_v12  ;;  %v10521_v12 = vunpack.i.l.bf16 %v13025_v34 }
 0x45f   : > { %v3019_v33 = vmul.f32 0.17677669, %v9098_v10  ;;  %v2157_v6 = vpop.f32.mrb[35].mxu0  ;;  %v3191_v47 = vsel %vm3163_vm5, %v13028_v31, -inf  ;;  %v10512_v10 = vunpack.i.h.bf16 %v10510_v3 }
 0x460   : > { %3192 = vmax.xlane.f32.xlu0 %v3191_v47  ;;  %v10530_v11 = vpop.permute.xlu1 %10529  ;;  %v3018_v22 = vmul.f32 0.17677669, %v2157_v6  ;;  %v3188_v48 = vsel %vm3163_vm5, %v13031_v45, -inf }
 0x461   : > { %v10532_v2 = vunpack.i.h.bf16 %v10530_v11  ;;  %v10531_v15 = vunpack.i.l.bf16 %v10530_v11  ;;  %v13036_v46 = vadd.f32 %v12906_v14, %v3019_v33  ;;  %v13042_v13 = vpop.permute.xlu0 %10524  ;;  %v10511_v33 = vunpack.i.l.bf16 %v10510_v3 }
 0x462   : > { %v9101_v28 = vpop.f32.mrb[36].mxu0  ;;  %15324 = vst [vmem:[#allocation46_spill] sm:$0xff] %v13042_v13  ;;  %v13047_v5 = vadd.f32 %v12940_v0, %v3018_v22  ;;  %v10522_v22 = vunpack.i.h.bf16 %v13025_v34 }
 0x463   : > { %v9875_v24 = vpack.c.bf16 %v10532_v2, %v10531_v15  ;;  %v2167_v35 = vpop.f32.mrb[37].mxu0  ;;  %v3021_v62 = vmul.f32 0.17677669, %v9101_v28  ;;  %v3197_v50 = vsel %vm3163_vm5, %v13036_v46, -inf  ;;  %v9917_v2 = vpack.c.bf16 %v10512_v10, %v10511_v33 }
 0x464   : > { %3189 = vmax.xlane.f32.xlu0 %v3188_v48  ;;  %v3020_v47 = vmul.f32 0.17677669, %v2167_v35  ;;  %v3194_v54 = vsel %vm3163_vm5, %v13047_v5, -inf }
 0x465   : > { %9877 = vmatprep.subr.msk.bf16.mxu0 %vm12387_vm1, %v9875_v24  ;;  %v13052_v6 = vadd.f32 %v12934_v44, %v3021_v62  ;;  %v13056_v11 = vpop.permute.xlu0 %10539 }
 0x466   : > { %v9104_v41 = vpop.f32.mrb[38].mxu0  ;;  %9880 = vmatpush3.bf16.xpose.msk.msra.mxu0 %vm12387_vm1, %v9875_v24  ;;  %15325 = vst [vmem:[#allocation47_spill] sm:$0xff] %v13056_v11  ;;  %v13063_v3 = vadd.f32 %v12970_v26, %v3020_v47 }
 0x467   : > { %v2177_v25 = vpop.f32.mrb[39].mxu0  ;;  %9914 = vmatprep.subr.bf16.mxu0 %v9913_v51  ;;  %v3023_v15 = vmul.f32 0.17677669, %v9104_v41  ;;  %v3203_v28 = vsel %vm3163_vm5, %v13052_v6, -inf }
 0x468   : > { %3198 = vmax.xlane.f32.xlu0 %v3197_v50  ;;  %v3022_v35 = vmul.f32 0.17677669, %v2177_v25  ;;  %v3200_v48 = vsel %vm3163_vm5, %v13063_v3, -inf }
 0x469   : > { %v10550_v24 = vpop.permute.xlu0 %10549 }
 0x46a   : > { %v10551_v34 = vunpack.i.l.bf16 %v10550_v24 }
 0x46c   : > { %3195 = vmax.xlane.f32.xlu0 %v3194_v54 }
 0x46d   : > { %9262 = vmatmul.mubr.msk.f32.vlgmr.msra.gmra.mrb[56].mxu0 %vm1911_vm0, %v12975_v38  ;;  %v9921_v38 = vpack.c.bf16 %v10517_v18, %v10516_v49 }
 0x46e   : > { %9264 = vmatprep.mubr.msk.f32.mxu0 %vm1911_vm0, %v13004_v8  ;;  %9916 = vmatpush3.bf16.msra.mxu0 %v9913_v51  ;;  %v13074_v8 = vadd.f32 %v12958_v23, %v3023_v15  ;;  %v10552_v51 = vunpack.i.h.bf16 %v10550_v24 }
 0x46f   : > { %9918 = vmatprep.subr.bf16.mxu0 %v9917_v2 }
 0x470   : > { %3204 = vmax.xlane.f32.xlu0 %v3203_v28  ;;  %v3209_v41 = vsel %vm3163_vm5, %v13074_v8, -inf  ;;  %v13089_v62 = vpack.c.bf16 %v10552_v51, %v10551_v34  ;;  %v13112_v34 = vpop.permute.xlu1 %10534 }
 0x471   : > { %9265 = vmatmul.mubr.msk.f32.gmra.mrb[58].mxu0 %vm1911_vm0, %v13000_v20  ;;  %v9925_v20 = vpack.c.bf16 %v10522_v22, %v10521_v12  ;;  %15327 = vst [vmem:[#allocation49_spill] sm:$0xff] %v13112_v34 }
 0x472   : > { %9267 = vmatprep.mubr.msk.f32.mxu0 %vm1911_vm0, %v13017_v16  ;;  %9920 = vmatpush3.bf16.msra.mxu0 %v9917_v2  ;;  %v13083_v16 = vadd.f32 %v12996_v59, %v3022_v35  ;;  %15326 = vst [vmem:[#allocation48_spill] sm:$0xff] %v13089_v62 }
 0x473   : > { %9922 = vmatprep.subr.bf16.mxu0 %v9921_v38 }
 0x474   : > { %3201 = vmax.xlane.f32.xlu0 %v3200_v48 }
 0x475   : > { %9268 = vmatmul.mubr.msk.f32.gmra.mrb[60].mxu0 %vm1911_vm0, %v13013_v56  ;;  %v3206_v56 = vsel %vm3163_vm5, %v13083_v16, -inf }
 0x476   : > { %9270 = vmatprep.mubr.msk.f32.mxu0 %vm1911_vm0, %v13023_v9  ;;  %9924 = vmatpush3.bf16.msra.mxu0 %v9921_v38 }
 0x477   : > { %9926 = vmatprep.subr.bf16.mxu0 %v9925_v20 }
 0x478   : > { %3210 = vmax.xlane.f32.xlu0 %v3209_v41 }
 0x479   : > { %9271 = vmatmul.mubr.msk.f32.gmra.mrb[62].mxu0 %vm1911_vm0, %v13021_v42 }
 0x47a   : > { %9928 = vmatpush3.bf16.msra.mxu0 %v9925_v20 }
 0x47b   : > { %9946 = vmatprep.subr.bf16.mxu0 %v13089_v62 }
 0x47c   : > { %3207 = vmax.xlane.f32.xlu0 %v3206_v56 }
 0x4b1   : > { %v9123_v9 = vpop.f32.mrb[24].mxu1 }
 0x4b2   : > { %v3025_v25 = vmul.f32 0.17677669, %v9123_v9  ;;  %v2284_v50 = vpop.f32.mrb[25].mxu1 }
 0x4b3   : > { %v3024_v10 = vmul.f32 0.17677669, %v2284_v50 }
 0x4b4   : > { %v13095_v33 = vadd.f32 %v12891_v53, %v3025_v25 }
 0x4b5   : > { %v9126_v47 = vpop.f32.mrb[26].mxu1  ;;  %v13098_v54 = vadd.f32 %v12894_v37, %v3024_v10  ;;  %v13124_v10 = vpop.permute.xlu1 %10544 }
 0x4b6   : > { %v3027_v42 = vmul.f32 0.17677669, %v9126_v47  ;;  %v2294_v18 = vpop.f32.mrb[27].mxu1  ;;  %v3215_v49 = vsel %vm3163_vm5, %v13095_v33, -inf  ;;  %15328 = vst [vmem:[#allocation50_spill] sm:$0xff] %v13124_v10 }
 0x4b7   : > { %3216 = vmax.xlane.f32.xlu1 %v3215_v49  ;;  %v3026_v28 = vmul.f32 0.17677669, %v2294_v18  ;;  %v3212_v12 = vsel %vm3163_vm5, %v13098_v54, -inf }
 0x4b8   : > { %v13103_v15 = vadd.f32 %v12906_v14, %v3027_v42 }
 0x4b9   : > { %v9129_v2 = vpop.f32.mrb[28].mxu1  ;;  %v13108_v24 = vadd.f32 %v12940_v0, %v3026_v28  ;;  %v13131_v49 = vpop.permute.xlu1 %10554 }
 0x4ba   : > { %v2304_v22 = vpop.f32.mrb[29].mxu1  ;;  %v3029_v35 = vmul.f32 0.17677669, %v9129_v2  ;;  %v3221_v51 = vsel %vm3163_vm5, %v13103_v15, -inf  ;;  %15329 = vst [vmem:[#allocation51_spill] sm:$0xff] %v13131_v49 }
 0x4bb   : > { %3213 = vmax.xlane.f32.xlu1 %v3212_v12  ;;  %v3028_v41 = vmul.f32 0.17677669, %v2304_v22  ;;  %v3218_v56 = vsel %vm3163_vm5, %v13108_v24, -inf  ;;  %v13138_v22 = vpop.permute.xlu0 %10559 }
 0x4bc   : > { %v13115_v20 = vadd.f32 %v12934_v44, %v3029_v35  ;;  %15330 = vst [vmem:[#allocation52_spill] sm:$0xff] %v13138_v22 }
 0x4bd   : > { %v9132_v38 = vpop.f32.mrb[30].mxu1  ;;  %v13120_v9 = vadd.f32 %v12970_v26, %v3028_v41 }
 0x4be   : > { %v2314_v48 = vpop.f32.mrb[31].mxu1  ;;  %v3031_v25 = vmul.f32 0.17677669, %v9132_v38  ;;  %v3227_v50 = vsel %vm3163_vm5, %v13115_v20, -inf }
 0x4bf   : > { %3222 = vmax.xlane.f32.xlu1 %v3221_v51  ;;  %v3030_v42 = vmul.f32 0.17677669, %v2314_v48  ;;  %v3224_v18 = vsel %vm3163_vm5, %v13120_v9, -inf  ;;  %v13142_v51 = vpop.permute.xlu1 %10564 }
 0x4c0   : > { %v13127_v47 = vadd.f32 %v12958_v23, %v3031_v25  ;;  %15331 = vst [vmem:[#allocation53_spill] sm:$0xff] %v13142_v51 }
 0x4c1   : > { %v13134_v2 = vadd.f32 %v12996_v59, %v3030_v42  ;;  %v13150_v42 = vpop.permute.xlu0 %10569 }
 0x4c2   : > { %v3233_v28 = vsel %vm3163_vm5, %v13127_v47, -inf  ;;  %15332 = vst [vmem:[#allocation54_spill] sm:$0xff] %v13150_v42 }
 0x4c3   : > { %3219 = vmax.xlane.f32.xlu1 %v3218_v56  ;;  %v3230_v48 = vsel %vm3163_vm5, %v13134_v2, -inf }
 0x4c5   : > { %v13158_v39 = vpop.permute.xlu0 %10574 }
 0x4c6   : > { %15334 = vst [vmem:[#allocation56_spill] sm:$0xff] %v13158_v39 }
 0x4c7   : > { %3228 = vmax.xlane.f32.xlu1 %v3227_v50 }
 0x4c9   : > { %v13164_v30 = vpop.permute.xlu0 %10589 }
 0x4ca   : > { %15336 = vst [vmem:[#allocation58_spill] sm:$0xff] %v13164_v30 }
 0x4cb   : > { %3225 = vmax.xlane.f32.xlu1 %v3224_v18 }
 0x4cf   : > { %3234 = vmax.xlane.f32.xlu1 %v3233_v28 }
 0x4d1   : > { %v9151_v12 = vpop.f32.mrb[40].mxu0 }
 0x4d2   : > { %v3033_v38 = vmul.f32 0.17677669, %v9151_v12  ;;  %v2421_v35 = vpop.f32.mrb[41].mxu0 }
 0x4d3   : > { %v3032_v41 = vmul.f32 0.17677669, %v2421_v35  ;;  %3231 = vmax.xlane.f32.xlu1 %v3230_v48  ;;  %v13156_v35 = vpop.permute.xlu1 %10579 }
 0x4d4   : > { %v13145_v56 = vadd.f32 %v12891_v53, %v3033_v38  ;;  %15333 = vst [vmem:[#allocation55_spill] sm:$0xff] %v13156_v35 }
 0x4d5   : > { %v13148_v25 = vadd.f32 %v12894_v37, %v3032_v41  ;;  %v9154_v50 = vpop.f32.mrb[42].mxu0 }
 0x4d6   : > { %v2431_v18 = vpop.f32.mrb[43].mxu0  ;;  %v3239_v28 = vsel %vm3163_vm5, %v13145_v56, -inf  ;;  %v3035_v39 = vmul.f32 0.17677669, %v9154_v50 }
 0x4d7   : > { %3240 = vmax.xlane.f32.xlu1 %v3239_v28  ;;  %v3236_v12 = vsel %vm3163_vm5, %v13148_v25, -inf  ;;  %v13162_v58 = vpop.permute.xlu1 %10584  ;;  %v13168_v28 = vpop.permute.xlu0 %10594  ;;  %v3034_v42 = vmul.f32 0.17677669, %v2431_v18 }
 0x4d8   : > { %3237 = vmax.xlane.f32.xlu0 %v3236_v12  ;;  %15335 = vst [vmem:[#allocation57_spill] sm:$0xff] %v13162_v58  ;;  %15338 = vst [vmem:[#allocation60_spill] sm:$0xff] %v13168_v28 }
 0x4d9   : > { %v9157_v48 = vpop.f32.mrb[44].mxu0  ;;  %v13185_v50 = vadd.f32 %v12940_v0, %v3034_v42 }
 0x4da   : > { %v2441_v38 = vpop.f32.mrb[45].mxu0  ;;  %v3037_v18 = vmul.f32 0.17677669, %v9157_v48 }
 0x4db   : > { %v13166_v1 = vpop.permute.xlu1 %10599  ;;  %v3166_v12 = vpop.xlane.xlu0 %3165 }
 0x4dc   : > { %15337 = vst [vmem:[#allocation59_spill] sm:$0xff] %v13166_v1 }
 0x4dd   : > { %v9160_v41 = vpop.f32.mrb[46].mxu0 }
 0x4de   : > { %v13160_v40 = vpop.f32.mrb[47].mxu0 }
 0x4df   : > { %v13170_v7 = vpop.permute.xlu1 %10604  ;;  %v3175_v51 = vpop.xlane.xlu0 %3174 }
 0x4e0   : > { %15339 = vst [vmem:[#allocation61_spill] sm:$0xff] %v13170_v7  ;;  %v13180_v7 = vadd.f32 %v12906_v14, %v3035_v39 }
 0x4e2   : > { %v3245_v34 = vsel %vm3163_vm5, %v13180_v7, -inf }
 0x4e3   : > { %v3169_v63 = vpop.xlane.xlu1 %3168 }
 0x4e4   : > { %v3357_v35 = vsub.f32 %v12899_v55, %v3169_v63 }
 0x4e6   : > { %v3422_v30 = vmul.f32 1.442695, %v3357_v35 }
 0x4e8   : > { %10740 = vpow2.f32 %v3422_v30 }
 0x4f2   : > { %v9179_v62 = vpop.f32.mrb[32].mxu1  ;;  %v13214_v52 = vpop.eup %10740 }
 0x4f3   : > { %v3041_v22 = vmul.f32 0.17677669, %v9179_v62  ;;  %v2558_v49 = vpop.f32.mrb[33].mxu1  ;;  %v3172_v62 = vpop.xlane.xlu0 %3171  ;;  %15340 = vst [vmem:[#allocation62_spill] sm:$0xff] %v13214_v52 }
 0x4f4   : > { %v3040_v10 = vmul.f32 0.17677669, %v2558_v49 }
 0x4f5   : > { %v13174_v58 = vadd.f32 %v12891_v53, %v3041_v22 }
 0x4f6   : > { %v13177_v1 = vadd.f32 %v12894_v37, %v3040_v10  ;;  %v9182_v28 = vpop.f32.mrb[34].mxu1  ;;  %v3356_v10 = vsub.f32 %v12903_v61, %v3166_v12  ;;  %v3359_v61 = vsub.f32 %v12924_v19, %v3175_v51  ;;  %v3358_v51 = vsub.f32 %v12961_v17, %v3172_v62 }
 0x4f7   : > { %v3043_v11 = vmul.f32 0.17677669, %v9182_v28  ;;  %v2568_v63 = vpop.f32.mrb[35].mxu1  ;;  %v3263_v55 = vsel %vm3163_vm5, %v13174_v58, -inf  ;;  %v3178_v48 = vpop.xlane.xlu0 %3177 }
 0x4f8   : > { %v3042_v49 = vmul.f32 0.17677669, %v2568_v63  ;;  %3264 = vmax.xlane.f32.xlu1 %v3263_v55  ;;  %v3260_v22 = vsel %vm3163_vm5, %v13177_v1, -inf  ;;  %v3242_v55 = vsel %vm3163_vm5, %v13185_v50, -inf  ;;  %v3420_v30 = vmul.f32 1.442695, %v3356_v10  ;;  %v3181_v10 = vpop.xlane.xlu1 %3180 }
 0x4f9   : > { %3261 = vmax.xlane.f32.xlu0 %v3260_v22  ;;  %v13191_v35 = vadd.f32 %v12906_v14, %v3043_v11  ;;  %v13202_v11 = vadd.f32 %v12934_v44, %v3037_v18  ;;  %v3426_v19 = vmul.f32 1.442695, %v3359_v61  ;;  %v3039_v18 = vmul.f32 0.17677669, %v9160_v41 }
 0x4fa   : > { %v9185_v39 = vpop.f32.mrb[36].mxu1  ;;  %v13196_v42 = vadd.f32 %v12940_v0, %v3042_v49  ;;  %v3036_v49 = vmul.f32 0.17677669, %v2441_v38  ;;  %10742 = vpow2.f32 %v3420_v30  ;;  %v3361_v17 = vsub.f32 %v12949_v60, %v3181_v10 }
 0x4fb   : > { %v2578_v28 = vpop.f32.mrb[37].mxu1  ;;  %v3045_v63 = vmul.f32 0.17677669, %v9185_v39  ;;  %v3269_v36 = vsel %vm3163_vm5, %v13191_v35, -inf  ;;  %10744 = vpow2.f32 %v3426_v19  ;;  %v3424_v62 = vmul.f32 1.442695, %v3358_v51 }
 0x4fc   : > { %3246 = vmax.xlane.f32.xlu1 %v3245_v34  ;;  %v3266_v34 = vsel %vm3163_vm5, %v13196_v42, -inf  ;;  %v13217_v38 = vadd.f32 %v12970_v26, %v3036_v49  ;;  %v13223_v41 = vadd.f32 %v12958_v23, %v3039_v18  ;;  %v3551_v30 = vsel %vm3163_vm5, %v13214_v52, 0.0  ;;  %v3187_v51 = vpop.xlane.xlu1 %3186 }
 0x4fd   : > { %3243 = vmax.xlane.f32.xlu0 %v3242_v55  ;;  %v13207_v39 = vadd.f32 %v12934_v44, %v3045_v63  ;;  %v3251_v55 = vsel %vm3163_vm5, %v13202_v11, -inf  ;;  %v3184_v63 = vpop.xlane.xlu0 %3183  ;;  %v3430_v19 = vmul.f32 1.442695, %v3361_v17  ;;  %10746 = vpow2.f32 %v3424_v62 }
 0x4fe   : > { %v9188_v12 = vpop.f32.mrb[38].mxu1  ;;  %v3360_v60 = vsub.f32 %v12986_v32, %v3178_v48  ;;  %v3257_v10 = vsel %vm3163_vm5, %v13223_v41, -inf  ;;  %v3363_v17 = vsub.f32 %v12978_v29, %v3187_v51  ;;  %v3362_v29 = vsub.f32 %v13008_v21, %v3184_v63 }
 0x4ff   : > { %v2588_v22 = vpop.f32.mrb[39].mxu1  ;;  %10748 = vpow2.f32 %v3430_v19 }
 0x500   : > { %3270 = vmax.xlane.f32.xlu1 %v3269_v36  ;;  %v3044_v36 = vmul.f32 0.17677669, %v2578_v28  ;;  %v3047_v28 = vmul.f32 0.17677669, %v9188_v12  ;;  %v3428_v32 = vmul.f32 1.442695, %v3360_v60 }
 0x501   : > { %3267 = vmax.xlane.f32.xlu0 %v3266_v34  ;;  %v3275_v34 = vsel %vm3163_vm5, %v13207_v39, -inf  ;;  %v13227_v61 = vpop.xlane.xlu0 %3192  ;;  %v3434_v19 = vmul.f32 1.442695, %v3363_v17  ;;  %v3432_v21 = vmul.f32 1.442695, %v3362_v29 }
 0x502   : > { %v13230_v49 = vadd.f32 %v12970_v26, %v3044_v36  ;;  %v13241_v36 = vadd.f32 %v12958_v23, %v3047_v28  ;;  %v3046_v28 = vmul.f32 0.17677669, %v2588_v22  ;;  %10750 = vpow2.f32 %v3428_v32 }
 0x503   : > { %10752 = vpow2.f32 %v3434_v19 }
 0x504   : > { %3252 = vmax.xlane.f32.xlu1 %v3251_v55  ;;  %15341 = vst [vmem:[#allocation63_spill] sm:$0xff] %v13230_v49  ;;  %v3248_v55 = vsel %vm3163_vm5, %v13217_v38, -inf  ;;  %v13237_v18 = vpop.eup %10742  ;;  %15343 = vst [vmem:[#allocation65_spill] sm:$0xff] %v13241_v36  ;;  %v3272_v12 = vsel %vm3163_vm5, %v13230_v49, -inf  ;;  %v13263_v22 = vadd.f32 %v12996_v59, %v3046_v28  ;;  %10754 = vpow2.f32 %v3432_v21 }
 0x505   : > { %3276 = vmax.xlane.f32.xlu0 %v3275_v34  ;;  %15342 = vst [vmem:[#allocation64_spill] sm:$0xff] %v13237_v18  ;;  %v3038_v34 = vmul.f32 0.17677669, %v13160_v40  ;;  %v3190_v48 = vpop.xlane.xlu0 %3189  ;;  %v3548_v62 = vsel %vm3163_vm5, %v13237_v18, 0.0 }
 0x506   : > { %15347 = vst [vmem:[#allocation69_spill] sm:$0xff] %v13263_v22 }
 0x507   : > { %v13251_v40 = vadd.f32 %v12996_v59, %v3038_v34 }
 0x508   : > { %3552 = vadd.xlane.f32.xlu1 %v3551_v30  ;;  %v13248_v30 = vpop.eup %10744 }
 0x509   : > { %3249 = vmax.xlane.f32.xlu0 %v3248_v55  ;;  %15344 = vst [vmem:[#allocation66_spill] sm:$0xff] %v13248_v30  ;;  %15345 = vst [vmem:[#allocation67_spill] sm:$0xff] %v13251_v40  ;;  %v3281_v55 = vsel %vm3163_vm5, %v13241_v36, -inf  ;;  %v3557_v49 = vsel %vm3163_vm5, %v13248_v30, 0.0  ;;  %v13258_v43 = vpop.eup %10746  ;;  %v13260_v34 = vpop.xlane.xlu0 %3198  ;;  %v3254_v17 = vsel %vm3163_vm5, %v13251_v40, -inf }
 0x50a   : > { %15346 = vst [vmem:[#allocation68_spill] sm:$0xff] %v13258_v43  ;;  %v3554_v13 = vsel %vm3163_vm5, %v13258_v43, 0.0  ;;  %v13269_v27 = vpop.eup %10748 }
 0x50b   : > { %15348 = vst [vmem:[#allocation70_spill] sm:$0xff] %v13269_v27  ;;  %v3563_v43 = vsel %vm3163_vm5, %v13269_v27, 0.0 }
 0x50c   : > { %3258 = vmax.xlane.f32.xlu1 %v3257_v10  ;;  %v13280_v57 = vpop.eup %10750 }
 0x50d   : > { %3273 = vmax.xlane.f32.xlu0 %v3272_v12  ;;  %v3196_v19 = vpop.xlane.xlu0 %3195  ;;  %15350 = vst [vmem:[#allocation72_spill] sm:$0xff] %v13280_v57  ;;  %v3560_v52 = vsel %vm3163_vm5, %v13280_v57, 0.0  ;;  %v13292_v27 = vpop.eup %10752 }
 0x50e   : > { %15352 = vst [vmem:[#allocation74_spill] sm:$0xff] %v13292_v27  ;;  %v3569_v57 = vsel %vm3163_vm5, %v13292_v27, 0.0 }
 0x510   : > { %3549 = vadd.xlane.f32.xlu1 %v3548_v62 }
 0x511   : > { %3282 = vmax.xlane.f32.xlu0 %v3281_v55  ;;  %v9207_v10 = vpop.f32.mrb[48].mxu0 }
 0x512   : > { %v9235_v60 = vpop.f32.mrb[40].mxu1  ;;  %v2695_v51 = vpop.f32.mrb[49].mxu0  ;;  %v3049_v62 = vmul.f32 0.17677669, %v9207_v10 }
 0x513   : > { %v2832_v12 = vpop.f32.mrb[41].mxu1  ;;  %v3048_v28 = vmul.f32 0.17677669, %v2695_v51 }
 0x514   : > { %3558 = vadd.xlane.f32.xlu1 %v3557_v49  ;;  %v13272_v30 = vadd.f32 %v12891_v53, %v3049_v62  ;;  %v3278_v49 = vsel %vm3163_vm5, %v13263_v22, -inf  ;;  %v3056_v51 = vmul.f32 0.17677669, %v2832_v12 }
 0x515   : > { %3255 = vmax.xlane.f32.xlu0 %v3254_v17  ;;  %v13283_v62 = vadd.f32 %v12894_v37, %v3048_v28 }
 0x516   : > { %v9210_v63 = vpop.f32.mrb[50].mxu0  ;;  %15349 = vst [vmem:[#allocation71_spill] sm:$0xff] %v13272_v30  ;;  %v3287_v21 = vsel %vm3163_vm5, %v13272_v30, -inf  ;;  %v13295_v18 = vadd.f32 %v12894_v37, %v3056_v51  ;;  %v3057_v30 = vmul.f32 0.17677669, %v9235_v60  ;;  %v13307_v51 = vpop.eup %10754 }
 0x517   : > { %v9238_v32 = vpop.f32.mrb[42].mxu1  ;;  %v2705_v55 = vpop.f32.mrb[51].mxu0  ;;  %15351 = vst [vmem:[#allocation73_spill] sm:$0xff] %v13283_v62  ;;  %v3051_v28 = vmul.f32 0.17677669, %v9210_v63 }
 0x518   : > { %v2842_v10 = vpop.f32.mrb[43].mxu1  ;;  %3555 = vadd.xlane.f32.xlu1 %v3554_v13  ;;  %v3059_v36 = vmul.f32 0.17677669, %v9238_v32  ;;  %v3366_v32 = vsub.f32 %v13047_v5, %v3196_v19  ;;  %v3365_v5 = vsub.f32 %v13028_v31, %v13227_v61 }
 0x519   : > { %3279 = vmax.xlane.f32.xlu0 %v3278_v49  ;;  %v3364_v49 = vsub.f32 %v13031_v45, %v3190_v48  ;;  %v13310_v63 = vadd.f32 %v12906_v14, %v3051_v28  ;;  %v3050_v28 = vmul.f32 0.17677669, %v2705_v55 }
 0x51a   : > { %v9213_v29 = vpop.f32.mrb[52].mxu0  ;;  %v13320_v27 = vadd.f32 %v12906_v14, %v3059_v36  ;;  %v3438_v31 = vmul.f32 1.442695, %v3365_v5 }
 0x51b   : > { %v9241_v17 = vpop.f32.mrb[44].mxu1  ;;  %v13276_v4 = vpop.f32.mrb[53].mxu0  ;;  %v3436_v48 = vmul.f32 1.442695, %v3364_v49  ;;  %15353 = vst [vmem:[#allocation75_spill] sm:$0xff] %v13310_v63  ;;  %v3566_v49 = vsel %vm3163_vm5, %v13307_v51, 0.0 }
 0x51c   : > { %v13285_v13 = vpop.f32.mrb[45].mxu1  ;;  %3564 = vadd.xlane.f32.xlu1 %v3563_v43  ;;  %v3284_v43 = vsel %vm3163_vm5, %v13283_v62, -inf  ;;  %v3053_v60 = vmul.f32 0.17677669, %v9213_v29  ;;  %v13331_v29 = vadd.f32 %v12940_v0, %v3050_v28  ;;  %v3317_v36 = vsel %vm3163_vm5, %v13320_v27, -inf }
 0x51d   : > { %3288 = vmax.xlane.f32.xlu0 %v3287_v21  ;;  %v13301_v21 = vpop.xlane.xlu0 %3204  ;;  %10756 = vpow2.f32 %v3436_v48  ;;  %v3061_v28 = vmul.f32 0.17677669, %v9241_v17 }
 0x51e   : > { %v13326_v48 = vadd.f32 %v12934_v44, %v3053_v60 }
 0x51f   : > { %v9216_v22 = vpop.f32.mrb[54].mxu0  ;;  %v13354_v17 = vadd.f32 %v12934_v44, %v3061_v28 }
 0x520   : > { %v9244_v12 = vpop.f32.mrb[46].mxu1  ;;  %v13297_v40 = vpop.f32.mrb[55].mxu0  ;;  %3561 = vadd.xlane.f32.xlu1 %v3560_v52  ;;  %v3308_v52 = vsel %vm3163_vm5, %v13295_v18, -inf  ;;  %v3055_v19 = vmul.f32 0.17677669, %v9216_v22  ;;  %v3299_v60 = vsel %vm3163_vm5, %v13326_v48, -inf }
 0x521   : > { %v13303_v45 = vpop.f32.mrb[47].mxu1  ;;  %3285 = vmax.xlane.f32.xlu0 %v3284_v43  ;;  %v3202_v62 = vpop.xlane.xlu0 %3201  ;;  %v13315_v43 = vadd.f32 %v12891_v53, %v3057_v30 }
 0x522   : > { %v13349_v22 = vadd.f32 %v12958_v23, %v3055_v19  ;;  %v3323_v19 = vsel %vm3163_vm5, %v13354_v17, -inf }
 0x523   : > { %v3311_v30 = vsel %vm3163_vm5, %v13315_v43, -inf }
 0x524   : > { %3570 = vadd.xlane.f32.xlu1 %v3569_v57  ;;  %v3293_v57 = vsel %vm3163_vm5, %v13310_v63, -inf  ;;  %15354 = vst [vmem:[#allocation76_spill] sm:$0xff] %v13349_v22 }
 0x525   : > { %3309 = vmax.xlane.f32.xlu0 %v3308_v52  ;;  %v3058_v52 = vmul.f32 0.17677669, %v2842_v10  ;;  %v3211_v55 = vpop.xlane.xlu0 %3210 }
 0x527   : > { %v13340_v63 = vpop.eup %10756  ;;  %v13343_v10 = vadd.f32 %v12940_v0, %v3058_v52 }
 0x528   : > { %3567 = vadd.xlane.f32.xlu1 %v3566_v49  ;;  %v3440_v49 = vmul.f32 1.442695, %v3366_v32  ;;  %v3063_v32 = vmul.f32 0.17677669, %v9244_v12  ;;  %v3572_v52 = vsel %vm3163_vm5, %v13340_v63, 0.0 }
 0x529   : > { %3294 = vmax.xlane.f32.xlu0 %v3293_v57  ;;  %v3368_v57 = vsub.f32 %v13063_v3, %v3202_v62  ;;  %v3371_v62 = vsub.f32 %v13074_v8, %v3211_v55  ;;  %v3208_v61 = vpop.xlane.xlu0 %3207 }
 0x52a   : > { %10758 = vpow2.f32 %v3440_v49  ;;  %v3314_v49 = vsel %vm3163_vm5, %v13343_v10, -inf  ;;  %v3370_v55 = vsub.f32 %v13083_v16, %v3208_v61  ;;  %v13361_v12 = vadd.f32 %v12958_v23, %v3063_v32 }
 0x52b   : > { %v3444_v3 = vmul.f32 1.442695, %v3368_v57  ;;  %v3450_v8 = vmul.f32 1.442695, %v3371_v62  ;;  %v3305_v57 = vsel %vm3163_vm5, %v13349_v22, -inf  ;;  %v3367_v16 = vsub.f32 %v13036_v46, %v13260_v34 }
 0x52c   : > { %3312 = vmax.xlane.f32.xlu1 %v3311_v30  ;;  %v3290_v30 = vsel %vm3163_vm5, %v13331_v29, -inf  ;;  %v3329_v28 = vsel %vm3163_vm5, %v13361_v12, -inf  ;;  %v3054_v61 = vmul.f32 0.17677669, %v13297_v40  ;;  %v3062_v40 = vmul.f32 0.17677669, %v13303_v45 }
 0x52d   : > { %3318 = vmax.xlane.f32.xlu0 %v3317_v36  ;;  %v3052_v36 = vmul.f32 0.17677669, %v13276_v4  ;;  %10760 = vpow2.f32 %v3444_v3  ;;  %v3060_v4 = vmul.f32 0.17677669, %v13285_v13  ;;  %v3442_v62 = vmul.f32 1.442695, %v3367_v16 }
 0x52e   : > { %10762 = vpow2.f32 %v3438_v31  ;;  %v3369_v31 = vsub.f32 %v13052_v6, %v13301_v21  ;;  %v13409_v45 = vadd.f32 %v12996_v59, %v3062_v40 }
 0x52f   : > { %v13366_v5 = vadd.f32 %v12970_v26, %v3052_v36  ;;  %10764 = vpow2.f32 %v3450_v8  ;;  %v13378_v3 = vadd.f32 %v12970_v26, %v3060_v4 }
 0x530   : > { %3300 = vmax.xlane.f32.xlu1 %v3299_v60  ;;  %v3448_v60 = vmul.f32 1.442695, %v3370_v55  ;;  %v3446_v8 = vmul.f32 1.442695, %v3369_v31  ;;  %v13398_v55 = vadd.f32 %v12996_v59, %v3054_v61  ;;  %15357 = vst [vmem:[#allocation79_spill] sm:$0xff] %v13409_v45  ;;  %v3326_v40 = vsel %vm3163_vm5, %v13409_v45, -inf }
 0x531   : > { %3291 = vmax.xlane.f32.xlu0 %v3290_v30  ;;  %15355 = vst [vmem:[#allocation77_spill] sm:$0xff] %v13378_v3  ;;  %v3296_v13 = vsel %vm3163_vm5, %v13366_v5, -inf  ;;  %v3320_v32 = vsel %vm3163_vm5, %v13378_v3, -inf }
 0x532   : > { %10766 = vpow2.f32 %v3448_v60  ;;  %15356 = vst [vmem:[#allocation78_spill] sm:$0xff] %v13398_v55  ;;  %v3302_v61 = vsel %vm3163_vm5, %v13398_v55, -inf }
 0x533   : > { %10768 = vpow2.f32 %v3442_v62 }
 0x534   : > { %3573 = vadd.xlane.f32.xlu1 %v3572_v52  ;;  %v13375_v30 = vpop.eup %10758  ;;  %10770 = vpow2.f32 %v3446_v8 }
 0x535   : > { %3315 = vmax.xlane.f32.xlu0 %v3314_v49  ;;  %v3578_v46 = vsel %vm3163_vm5, %v13375_v30, 0.0 }
 0x537   : > { %v13386_v34 = vpop.eup %10760 }
 0x538   : > { %3306 = vmax.xlane.f32.xlu1 %v3305_v57  ;;  %v13391_v36 = vpop.eup %10762  ;;  %v3584_v6 = vsel %vm3163_vm5, %v13386_v34, 0.0 }
 0x539   : > { %3324 = vmax.xlane.f32.xlu0 %v3323_v19  ;;  %v13395_v21 = vpop.eup %10764  ;;  %v3575_v4 = vsel %vm3163_vm5, %v13391_v36, 0.0 }
 0x53a   : > { %v3593_v62 = vsel %vm3163_vm5, %v13395_v21, 0.0 }
 0x53c   : > { %3330 = vmax.xlane.f32.xlu1 %v3329_v28  ;;  %v13406_v31 = vpop.eup %10766 }
 0x53d   : > { %3297 = vmax.xlane.f32.xlu0 %v3296_v13  ;;  %v3590_v8 = vsel %vm3163_vm5, %v13406_v31, 0.0 }
 0x540   : > { %3579 = vadd.xlane.f32.xlu1 %v3578_v46  ;;  %v9263_v52 = vpop.f32.mrb[56].mxu0 }
 0x541   : > { %3321 = vmax.xlane.f32.xlu0 %v3320_v32  ;;  %v2969_v49 = vpop.f32.mrb[57].mxu0  ;;  %v3065_v28 = vmul.f32 0.17677669, %v9263_v52 }
 0x543   : > { %v13414_v52 = vadd.f32 %v12891_v53, %v3065_v28  ;;  %v3064_v28 = vmul.f32 0.17677669, %v2969_v49 }
 0x544   : > { %3585 = vadd.xlane.f32.xlu1 %v3584_v6  ;;  %v3217_v57 = vpop.xlane.xlu1 %3216  ;;  %v9266_v19 = vpop.f32.mrb[58].mxu0 }
 0x545   : > { %v3373_v60 = vsub.f32 %v13095_v33, %v3217_v57  ;;  %3576 = vadd.xlane.f32.xlu0 %v3575_v4  ;;  %v2979_v16 = vpop.f32.mrb[59].mxu0  ;;  %v13420_v4 = vpop.eup %10768  ;;  %v3335_v53 = vsel %vm3163_vm5, %v13414_v52, -inf }
 0x546   : > { %v13427_v55 = vpop.eup %10770 }
 0x547   : > { %v3454_v13 = vmul.f32 1.442695, %v3373_v60 }
 0x548   : > { %3594 = vadd.xlane.f32.xlu1 %v3593_v62  ;;  %v3214_v46 = vpop.xlane.xlu1 %3213  ;;  %v9269_v32 = vpop.f32.mrb[60].mxu0 }
 0x549   : > { %10772 = vpow2.f32 %v3454_v13  ;;  %3303 = vmax.xlane.f32.xlu0 %v3302_v61  ;;  %v2989_v33 = vpop.f32.mrb[61].mxu0 }
 0x54c   : > { %3591 = vadd.xlane.f32.xlu1 %v3590_v8  ;;  %v3223_v6 = vpop.xlane.xlu1 %3222  ;;  %v9272_v57 = vpop.f32.mrb[62].mxu0  ;;  %v3581_v8 = vsel %vm3163_vm5, %v13420_v4, 0.0 }
 0x54d   : > { %v3375_v60 = vsub.f32 %v13103_v15, %v3223_v6  ;;  %3327 = vmax.xlane.f32.xlu0 %v3326_v40  ;;  %v2999_v13 = vpop.f32.mrb[63].mxu0  ;;  %v13432_v15 = vadd.f32 %v12894_v37, %v3064_v28  ;;  %v3067_v6 = vmul.f32 0.17677669, %v9266_v19 }
 0x54f   : > { %v3458_v62 = vmul.f32 1.442695, %v3375_v60  ;;  %v3587_v60 = vsel %vm3163_vm5, %v13427_v55, 0.0  ;;  %v3332_v37 = vsel %vm3163_vm5, %v13432_v15, -inf }
 0x550   : > { %3336 = vmax.xlane.f32.xlu1 %v3335_v53  ;;  %v3220_v61 = vpop.xlane.xlu1 %3219 }
 0x551   : > { %10774 = vpow2.f32 %v3458_v62  ;;  %3582 = vadd.xlane.f32.xlu0 %v3581_v8  ;;  %v13440_v62 = vadd.f32 %v12906_v14, %v3067_v6  ;;  %v3066_v8 = vmul.f32 0.17677669, %v2979_v16 }
 0x553   : > { %v13429_v45 = vpop.eup %10772  ;;  %v13447_v28 = vadd.f32 %v12940_v0, %v3066_v8  ;;  %v3068_v0 = vmul.f32 0.17677669, %v2989_v33 }
 0x554   : > { %15358 = vst [vmem:[#allocation80_spill] sm:$0xff] %v13429_v45  ;;  %v3229_v40 = vpop.xlane.xlu1 %3228  ;;  %v3599_v49 = vsel %vm3163_vm5, %v13429_v45, 0.0  ;;  %v3069_v45 = vmul.f32 0.17677669, %v9269_v32 }
 0x555   : > { %v3377_v53 = vsub.f32 %v13115_v20, %v3229_v40  ;;  %3588 = vadd.xlane.f32.xlu0 %v3587_v60  ;;  %3600 = vadd.xlane.f32.xlu1 %v3599_v49  ;;  %v3341_v40 = vsel %vm3163_vm5, %v13440_v62, -inf  ;;  %v3338_v32 = vsel %vm3163_vm5, %v13447_v28, -inf }
 0x556   : > { %v13456_v60 = vadd.f32 %v12934_v44, %v3069_v45  ;;  %v3071_v44 = vmul.f32 0.17677669, %v9272_v57 }
 0x557   : > { %v3462_v22 = vmul.f32 1.442695, %v3377_v53 }
 0x558   : > { %v3226_v3 = vpop.xlane.xlu1 %3225  ;;  %v3347_v45 = vsel %vm3163_vm5, %v13456_v60, -inf }
 0x559   : > { %10776 = vpow2.f32 %v3462_v22  ;;  %3333 = vmax.xlane.f32.xlu0 %v3332_v37  ;;  %v3372_v22 = vsub.f32 %v13098_v54, %v3214_v46  ;;  %v3374_v37 = vsub.f32 %v13108_v24, %v3220_v61  ;;  %v13465_v54 = vadd.f32 %v12970_v26, %v3068_v0 }
 0x55a   : > { %v3376_v33 = vsub.f32 %v13120_v9, %v3226_v3  ;;  %v13473_v24 = vadd.f32 %v12958_v23, %v3071_v44  ;;  %v3070_v61 = vmul.f32 0.17677669, %v2999_v13 }
 0x55b   : > { %v13444_v19 = vpop.eup %10774  ;;  %v3344_v57 = vsel %vm3163_vm5, %v13465_v54, -inf }
 0x55c   : > { %v3235_v20 = vpop.xlane.xlu1 %3234  ;;  %v3605_v14 = vsel %vm3163_vm5, %v13444_v19, 0.0  ;;  %v3353_v9 = vsel %vm3163_vm5, %v13473_v24, -inf }
 0x55d   : > { %v3379_v16 = vsub.f32 %v13127_v47, %v3235_v20  ;;  %3342 = vmax.xlane.f32.xlu0 %v3341_v40  ;;  %3606 = vadd.xlane.f32.xlu1 %v3605_v14  ;;  %v3452_v47 = vmul.f32 1.442695, %v3372_v22  ;;  %v3460_v14 = vmul.f32 1.442695, %v3376_v33  ;;  %v13481_v22 = vadd.f32 %v12996_v59, %v3070_v61 }
 0x55f   : > { %v3466_v6 = vmul.f32 1.442695, %v3379_v16 }
 0x560   : > { %v3232_v49 = vpop.xlane.xlu1 %3231 }
 0x561   : > { %10778 = vpow2.f32 %v3466_v6  ;;  %v3378_v53 = vsub.f32 %v13134_v2, %v3232_v49  ;;  %3339 = vmax.xlane.f32.xlu0 %v3338_v32  ;;  %v3456_v2 = vmul.f32 1.442695, %v3374_v37  ;;  %v3350_v6 = vsel %vm3163_vm5, %v13481_v22, -inf }
 0x563   : > { %v13461_v8 = vpop.eup %10776  ;;  %v3464_v20 = vmul.f32 1.442695, %v3378_v53 }
 0x564   : > { %v3611_v46 = vsel %vm3163_vm5, %v13461_v8, 0.0  ;;  %v3241_v26 = vpop.xlane.xlu1 %3240 }
 0x565   : > { %10780 = vpow2.f32 %v3464_v20  ;;  %3348 = vmax.xlane.f32.xlu0 %v3347_v45  ;;  %3612 = vadd.xlane.f32.xlu1 %v3611_v46  ;;  %v3381_v16 = vsub.f32 %v13145_v56, %v3241_v26  ;;  %v3238_v44 = vpop.xlane.xlu0 %3237 }
 0x566   : > { %10782 = vpow2.f32 %v3452_v47  ;;  %v3380_v45 = vsub.f32 %v13148_v25, %v3238_v44 }
 0x567   : > { %10784 = vpow2.f32 %v3456_v2  ;;  %v3470_v13 = vmul.f32 1.442695, %v3381_v16 }
 0x568   : > { %10786 = vpow2.f32 %v3460_v14  ;;  %v3468_v61 = vmul.f32 1.442695, %v3380_v45 }
 0x569   : > { %3345 = vmax.xlane.f32.xlu0 %v3344_v57  ;;  %10788 = vpow2.f32 %v3470_v13 }
 0x56b   : > { %v13477_v40 = vpop.eup %10778 }
 0x56c   : > { %v3617_v23 = vsel %vm3163_vm5, %v13477_v40, 0.0 }
 0x56d   : > { %3354 = vmax.xlane.f32.xlu0 %v3353_v9  ;;  %3618 = vadd.xlane.f32.xlu1 %v3617_v23 }
 0x56f   : > { %v13487_v3 = vpop.eup %10780 }
 0x570   : > { %v3614_v56 = vsel %vm3163_vm5, %v13487_v3, 0.0  ;;  %v13493_v59 = vpop.eup %10782 }
 0x571   : > { %3351 = vmax.xlane.f32.xlu0 %v3350_v6  ;;  %3615 = vadd.xlane.f32.xlu1 %v3614_v56  ;;  %v3596_v0 = vsel %vm3163_vm5, %v13493_v59, 0.0  ;;  %v13497_v49 = vpop.eup %10784 }
 0x572   : > { %v3602_v32 = vsel %vm3163_vm5, %v13497_v49, 0.0  ;;  %v13501_v53 = vpop.eup %10786 }
 0x573   : > { %v3608_v47 = vsel %vm3163_vm5, %v13501_v53, 0.0  ;;  %v13505_v37 = vpop.eup %10788 }
 0x574   : > { %v3623_v20 = vsel %vm3163_vm5, %v13505_v37, 0.0 }
 0x575   : > { %3597 = vadd.xlane.f32.xlu0 %v3596_v0 }
 0x579   : > { %3603 = vadd.xlane.f32.xlu0 %v3602_v32 }
 0x57d   : > { %3609 = vadd.xlane.f32.xlu0 %v3608_v47 }
 0x581   : > { %3624 = vadd.xlane.f32.xlu0 %v3623_v20 }
 0x585   : > { %v3265_v46 = vpop.xlane.xlu1 %3264 }
 0x586   : > { %v3389_v2 = vsub.f32 %v13174_v58, %v3265_v46  ;;  %v3262_v33 = vpop.xlane.xlu0 %3261 }
 0x587   : > { %v3388_v57 = vsub.f32 %v13177_v1, %v3262_v33 }
 0x588   : > { %v3486_v26 = vmul.f32 1.442695, %v3389_v2 }
 0x589   : > { %v3247_v14 = vpop.xlane.xlu1 %3246  ;;  %v3484_v9 = vmul.f32 1.442695, %v3388_v57 }
 0x58a   : > { %10790 = vpow2.f32 %v3486_v26  ;;  %v3244_v16 = vpop.xlane.xlu0 %3243  ;;  %v3383_v23 = vsub.f32 %v13180_v7, %v3247_v14 }
 0x58b   : > { %10792 = vpow2.f32 %v3468_v61  ;;  %v3382_v44 = vsub.f32 %v13185_v50, %v3244_v16 }
 0x58c   : > { %10794 = vpow2.f32 %v3484_v9  ;;  %v3474_v25 = vmul.f32 1.442695, %v3383_v23 }
 0x58d   : > { %v3271_v13 = vpop.xlane.xlu1 %3270 }
 0x58e   : > { %v3268_v6 = vpop.xlane.xlu0 %3267  ;;  %v3391_v58 = vsub.f32 %v13191_v35, %v3271_v13 }
 0x58f   : > { %v3390_v56 = vsub.f32 %v13196_v42, %v3268_v6 }
 0x590   : > { %v3490_v7 = vmul.f32 1.442695, %v3391_v58 }
 0x591   : > { %v3488_v0 = vmul.f32 1.442695, %v3390_v56  ;;  %v3253_v32 = vpop.xlane.xlu1 %3252 }
 0x592   : > { %v3385_v47 = vsub.f32 %v13202_v11, %v3253_v32  ;;  %v3277_v1 = vpop.xlane.xlu0 %3276  ;;  %v3472_v11 = vmul.f32 1.442695, %v3382_v44 }
 0x593   : > { %10796 = vpow2.f32 %v3488_v0  ;;  %v3393_v35 = vsub.f32 %v13207_v39, %v3277_v1 }
 0x594   : > { %v13516_v20 = vpop.eup %10790  ;;  %10798 = vpow2.f32 %v3474_v25  ;;  %v3478_v45 = vmul.f32 1.442695, %v3385_v47 }
 0x595   : > { %v3553_v46 = vpop.xlane.xlu1 %3552  ;;  %v3647_v42 = vsel %vm3163_vm5, %v13516_v20, 0.0  ;;  %v13521_v2 = vpop.eup %10792  ;;  %v3494_v57 = vmul.f32 1.442695, %v3393_v35 }
 0x596   : > { %10800 = vpow2.f32 %v3478_v45  ;;  %v3250_v33 = vpop.xlane.xlu0 %3249  ;;  %3648 = vadd.xlane.f32.xlu1 %v3647_v42  ;;  %v3620_v26 = vsel %vm3163_vm5, %v13521_v2, 0.0  ;;  %v13526_v50 = vpop.eup %10794  ;;  %v15362_v45 = vld [vmem:[#allocation65_spill] sm:$0xff] }
 0x597   : > { %10802 = vpow2.f32 %v3490_v7  ;;  %v3384_v16 = vsub.f32 %v13217_v38, %v3250_v33  ;;  %v3644_v23 = vsel %vm3163_vm5, %v13526_v50, 0.0 }
 0x598   : > { %10804 = vpow2.f32 %v3472_v11 }
 0x599   : > { %v3259_v61 = vpop.xlane.xlu1 %3258  ;;  %10806 = vpow2.f32 %v3494_v57  ;;  %v3476_v58 = vmul.f32 1.442695, %v3384_v16 }
 0x59a   : > { %v13528_v14 = vpop.xlane.xlu0 %3273  ;;  %3621 = vadd.xlane.f32.xlu1 %v3620_v26  ;;  %10808 = vrcp.f32 %v3553_v46  ;;  %v3387_v38 = vsub.f32 %v13223_v41, %v3259_v61  ;;  %v15365_v26 = vld [vmem:[#allocation67_spill] sm:$0xff] }
 0x59c   : > { %v3482_v7 = vmul.f32 1.442695, %v3387_v38 }
 0x59d   : > { %v13531_v9 = vpop.eup %10796  ;;  %v3550_v39 = vpop.xlane.xlu1 %3549 }
 0x59e   : > { %v13535_v13 = vpop.eup %10798  ;;  %v3283_v6 = vpop.xlane.xlu0 %3282  ;;  %3645 = vadd.xlane.f32.xlu1 %v3644_v23  ;;  %v3650_v56 = vsel %vm3163_vm5, %v13531_v9, 0.0  ;;  %10810 = vrcp.f32 %v3550_v39 }
 0x59f   : > { %15359 = vst [vmem:[#allocation81_spill] sm:$0xff] %v13535_v13  ;;  %3651 = vadd.xlane.f32.xlu0 %v3650_v56  ;;  %v3629_v32 = vsel %vm3163_vm5, %v13535_v13, 0.0  ;;  %10812 = vpow2.f32 %v3476_v58  ;;  %v3395_v46 = vsub.f32 %v15362_v45, %v3283_v6  ;;  %v15366_v58 = vld [vmem:[#allocation64_spill] sm:$0xff] }
 0x5a0   : > { %v13539_v25 = vpop.eup %10800 }
 0x5a1   : > { %15360 = vst [vmem:[#allocation82_spill] sm:$0xff] %v13539_v25  ;;  %v3559_v0 = vpop.xlane.xlu1 %3558  ;;  %v3635_v47 = vsel %vm3163_vm5, %v13539_v25, 0.0  ;;  %v13546_v1 = vpop.eup %10802  ;;  %v3498_v61 = vmul.f32 1.442695, %v3395_v46  ;;  %v15381_v25 = vld [vmem:[#allocation70_spill] sm:$0xff] }
 0x5a2   : > { %15361 = vst [vmem:[#allocation83_spill] sm:$0xff] %v13546_v1  ;;  %v3256_v44 = vpop.xlane.xlu0 %3255  ;;  %3630 = vadd.xlane.f32.xlu1 %v3629_v32  ;;  %10814 = vrcp.f32 %v3559_v0  ;;  %v3653_v41 = vsel %vm3163_vm5, %v13546_v1, 0.0  ;;  %v13551_v35 = vpop.eup %10804  ;;  %v15367_v0 = vld [vmem:[#allocation62_spill] sm:$0xff] }
 0x5a3   : > { %3636 = vadd.xlane.f32.xlu0 %v3635_v47  ;;  %15363 = vst [vmem:[#allocation65_spill] sm:$0xff] %v13551_v35  ;;  %v13555_v11 = vpop.eup %10806  ;;  %v3386_v57 = vsub.f32 %v15365_v26, %v3256_v44  ;;  %v3626_v23 = vsel %vm3163_vm5, %v13551_v35, 0.0  ;;  %v15370_v26 = vld [vmem:[#allocation41_spill] sm:$0xff] }
 0x5a4   : > { %15364 = vst [vmem:[#allocation84_spill] sm:$0xff] %v13555_v11  ;;  %v10809_v16 = vpop.eup %10808  ;;  %v3659_v44 = vsel %vm3163_vm5, %v13555_v11, 0.0  ;;  %v15379_v11 = vld [vmem:[#allocation72_spill] sm:$0xff] }
 0x5a5   : > { %v3556_v42 = vpop.xlane.xlu1 %3555  ;;  %v3805_v32 = vmul.f32 %v10809_v16, %v15367_v0  ;;  %v3480_v47 = vmul.f32 1.442695, %v3386_v57 }
 0x5a6   : > { %10816 = vrcp.f32 %v3556_v42  ;;  %v13553_v33 = vpop.xlane.xlu0 %3279  ;;  %3654 = vadd.xlane.f32.xlu1 %v3653_v41  ;;  %v15369_v41 = vld [vmem:[#allocation39_spill] sm:$0xff] }
 0x5a7   : > { %10818 = vpow2.f32 %v3482_v7 }
 0x5a8   : > { %v10811_v6 = vpop.eup %10810  ;;  %10820 = vpow2.f32 %v3498_v61 }
 0x5a9   : > { %v3565_v39 = vpop.xlane.xlu1 %3564  ;;  %v3804_v38 = vmul.f32 %v10811_v6, %v15366_v58  ;;  %v13567_v45 = vpop.eup %10812 }
 0x5aa   : > { %v13560_v56 = vpop.xlane.xlu0 %3288  ;;  %3627 = vadd.xlane.f32.xlu1 %v3626_v23  ;;  %10822 = vrcp.f32 %v3565_v39  ;;  %15368 = vst [vmem:[#allocation67_spill] sm:$0xff] %v13567_v45  ;;  %v3632_v16 = vsel %vm3163_vm5, %v13567_v45, 0.0  ;;  %v15371_v39 = vld [vmem:[#allocation68_spill] sm:$0xff] }
 0x5ab   : > { %9289 = vmatprep.mubr.msk.f32.mxu1 %vm3163_vm5, %v3804_v38  ;;  %v15373_v38 = vld [vmem:[#allocation66_spill] sm:$0xff] }
 0x5ac   : > { %9290 = vmatmul.mubr.msk.f32.vlgmr.msra.gmra.mrb[48].mxu1 %vm3163_vm5, %v3805_v32  ;;  %v10815_v42 = vpop.eup %10814  ;;  %v15374_v32 = vld [vmem:[#allocation43_spill] sm:$0xff] }
 0x5ad   : > { %v3562_v7 = vpop.xlane.xlu1 %3561  ;;  %9900 = vmatpush3.bf16.msra.mxu1 %v15369_v41  ;;  %v3807_v0 = vmul.f32 %v10815_v42, %v15373_v38  ;;  %v15376_v41 = vld [vmem:[#allocation46_spill] sm:$0xff] }
 0x5ae   : > { %10824 = vrcp.f32 %v3562_v7  ;;  %v13570_v46 = vpop.xlane.xlu0 %3285  ;;  %3660 = vadd.xlane.f32.xlu1 %v3659_v44  ;;  %9902 = vmatprep.subr.bf16.mxu1 %v15370_v26  ;;  %v15378_v38 = vld [vmem:[#allocation38_spill] sm:$0xff] }
 0x5af   : > { %10826 = vpow2.f32 %v3480_v47 }
 0x5b0   : > { %v10817_v61 = vpop.eup %10816 }
 0x5b1   : > { %v3571_v57 = vpop.xlane.xlu1 %3570  ;;  %v3806_v23 = vmul.f32 %v10817_v61, %v15371_v39  ;;  %v13577_v6 = vpop.eup %10818  ;;  %9904 = vmatpush3.bf16.msra.mxu1 %v15370_v26  ;;  %v10527_v61 = vunpack.i.h.bf16 %v15376_v41 }
 0x5b2   : > { %15372 = vst [vmem:[#allocation64_spill] sm:$0xff] %v13577_v6  ;;  %v13579_v58 = vpop.xlane.xlu0 %3309  ;;  %3633 = vadd.xlane.f32.xlu1 %v3632_v16  ;;  %9906 = vmatprep.subr.bf16.mxu1 %v15374_v32  ;;  %10828 = vrcp.f32 %v3571_v57  ;;  %v3641_v7 = vsel %vm3163_vm5, %v13577_v6, 0.0  ;;  %v13588_v44 = vpop.eup %10820  ;;  %v10526_v16 = vunpack.i.l.bf16 %v15376_v41 }
 0x5b3   : > { %9292 = vmatprep.mubr.msk.f32.mxu1 %vm3163_vm5, %v3806_v23  ;;  %15375 = vst [vmem:[#allocation62_spill] sm:$0xff] %v13588_v44  ;;  %v15377_v23 = vld [vmem:[#allocation45_spill] sm:$0xff] }
 0x5b4   : > { %9293 = vmatmul.mubr.msk.f32.gmra.mrb[50].mxu1 %vm3163_vm5, %v3807_v0  ;;  %v10823_v26 = vpop.eup %10822  ;;  %v3665_v0 = vsel %vm3163_vm5, %v13588_v44, 0.0  ;;  %v15383_v44 = vld [vmem:[#allocation74_spill] sm:$0xff] }
 0x5b5   : > { %v3568_v47 = vpop.xlane.xlu1 %3567  ;;  %9908 = vmatpush3.bf16.msra.mxu1 %v15374_v32  ;;  %v3809_v32 = vmul.f32 %v10823_v26, %v15381_v25  ;;  %v15382_v26 = vld [vmem:[#allocation63_spill] sm:$0xff] }
 0x5b6   : > { %10830 = vrcp.f32 %v3568_v47  ;;  %v13592_v42 = vpop.xlane.xlu0 %3294  ;;  %3642 = vadd.xlane.f32.xlu1 %v3641_v7  ;;  %9910 = vmatprep.subr.bf16.mxu1 %v15377_v23  ;;  %v13603_v47 = vpack.c.bf16 %v10527_v61, %v10526_v16 }
 0x5b8   : > { %v10825_v39 = vpop.eup %10824 }
 0x5b9   : > { %v3313_v57 = vpop.xlane.xlu1 %3312  ;;  %10609 = vrot.lane.b32.xlu0 %v15378_v38, %s11657_s6  ;;  %v3808_v6 = vmul.f32 %v10825_v39, %v15379_v11  ;;  %v13601_v41 = vpop.eup %10826  ;;  %9912 = vmatpush3.bf16.msra.mxu1 %v15377_v23 }
 0x5ba   : > { %15380 = vst [vmem:[#allocation39_spill] sm:$0xff] %v13601_v41  ;;  %v3319_v7 = vpop.xlane.xlu0 %3318  ;;  %3666 = vadd.xlane.f32.xlu1 %v3665_v0  ;;  %9930 = vmatprep.subr.bf16.mxu1 %v13603_v47  ;;  %v3638_v11 = vsel %vm3163_vm5, %v13601_v41, 0.0  ;;  %v3405_v45 = vsub.f32 %v13315_v43, %v3313_v57  ;;  %v15385_v43 = vld [vmem:[#allocation40_spill] sm:$0xff] }
 0x5bb   : > { %9295 = vmatprep.mubr.msk.f32.mxu1 %vm3163_vm5, %v3808_v6  ;;  %v3392_v6 = vsub.f32 %v15382_v26, %v13528_v14 }
 0x5bc   : > { %9296 = vmatmul.mubr.msk.f32.gmra.mrb[52].mxu1 %vm3163_vm5, %v3809_v32  ;;  %v10829_v61 = vpop.eup %10828 }
 0x5bd   : > { %v13610_v38 = vpop.xlane.xlu1 %3300  ;;  %v3811_v32 = vmul.f32 %v10829_v61, %v15383_v44 }
 0x5be   : > { %v13614_v39 = vpop.xlane.xlu0 %3291  ;;  %3639 = vadd.xlane.f32.xlu1 %v3638_v11  ;;  %v3492_v11 = vmul.f32 1.442695, %v3392_v6 }
 0x5c0   : > { %v10831_v16 = vpop.eup %10830 }
 0x5c1   : > { %v3574_v0 = vpop.xlane.xlu1 %3573  ;;  %v3810_v25 = vmul.f32 %v10831_v16, %v13307_v51  ;;  %v15384_v51 = vld [vmem:[#allocation73_spill] sm:$0xff]  ;;  %v3518_v16 = vmul.f32 1.442695, %v3405_v45 }
 0x5c2   : > { %v13619_v23 = vpop.xlane.xlu0 %3315  ;;  %10832 = vrcp.f32 %v3574_v0  ;;  %v3396_v14 = vsub.f32 %v15384_v51, %v13570_v46  ;;  %v3407_v0 = vsub.f32 %v13320_v27, %v3319_v7 }
 0x5c3   : > { %9298 = vmatprep.mubr.msk.f32.mxu1 %vm3163_vm5, %v3810_v25  ;;  %10834 = vpow2.f32 %v3492_v11 }
 0x5c4   : > { %9299 = vmatmul.mubr.msk.f32.gmra.mrb[54].mxu1 %vm3163_vm5, %v3811_v32  ;;  %v3500_v61 = vmul.f32 1.442695, %v3396_v14  ;;  %10836 = vpow2.f32 %v3518_v16  ;;  %v3522_v46 = vmul.f32 1.442695, %v3407_v0 }
 0x5c5   : > { %v13624_v41 = vpop.xlane.xlu1 %3306 }
 0x5c6   : > { %v3325_v13 = vpop.xlane.xlu0 %3324  ;;  %10838 = vpow2.f32 %v3500_v61 }
 0x5c7   : > { %v3409_v45 = vsub.f32 %v13354_v17, %v3325_v13 }
 0x5c9   : > { %v3331_v35 = vpop.xlane.xlu1 %3330  ;;  %v3526_v7 = vmul.f32 1.442695, %v3409_v45 }
 0x5ca   : > { %v3298_v26 = vpop.xlane.xlu0 %3297  ;;  %v3411_v17 = vsub.f32 %v13361_v12, %v3331_v35 }
 0x5cc   : > { %v10833_v44 = vpop.eup %10832  ;;  %v3530_v12 = vmul.f32 1.442695, %v3411_v17 }
 0x5cd   : > { %v3580_v1 = vpop.xlane.xlu1 %3579  ;;  %v3812_v6 = vmul.f32 %v10833_v44, %v13340_v63  ;;  %v13637_v11 = vpop.eup %10834  ;;  %v3400_v63 = vsub.f32 %v13366_v5, %v3298_v26  ;;  %v15388_v5 = vld [vmem:[#allocation69_spill] sm:$0xff] }
 0x5ce   : > { %v13630_v25 = vpop.xlane.xlu0 %3321  ;;  %10840 = vrcp.f32 %v3580_v1  ;;  %15386 = vst [vmem:[#allocation41_spill] sm:$0xff] %v13637_v11  ;;  %v3656_v14 = vsel %vm3163_vm5, %v13637_v11, 0.0  ;;  %v13644_v16 = vpop.eup %10836  ;;  %v3394_v26 = vsub.f32 %v15388_v5, %v13553_v33 }
 0x5cf   : > { %10614 = vrot.lane.b32.xlu1 %v15385_v43, %s11657_s6  ;;  %9317 = vmatprep.mubr.msk.f32.mxu1 %vm3163_vm5, %v3812_v6  ;;  %15387 = vst [vmem:[#allocation68_spill] sm:$0xff] %v13644_v16  ;;  %v3508_v1 = vmul.f32 1.442695, %v3400_v63  ;;  %v3695_v61 = vsel %vm3163_vm5, %v13644_v16, 0.0  ;;  %v15389_v43 = vld [vmem:[#allocation49_spill] sm:$0xff] }
 0x5d0   : > { %v13651_v0 = vpop.eup %10838  ;;  %v10536_v45 = vunpack.i.l.bf16 %v15389_v43  ;;  %v3496_v11 = vmul.f32 1.442695, %v3394_v26 }
 0x5d1   : > { %v3586_v57 = vpop.xlane.xlu1 %3585  ;;  %v3668_v16 = vsel %vm3163_vm5, %v13651_v0, 0.0 }
 0x5d2   : > { %v3577_v32 = vpop.xlane.xlu0 %3576 }
 0x5d3   : > { %10842 = vrcp.f32 %v3577_v32 }
 0x5d4   : > { %10844 = vpow2.f32 %v3522_v46  ;;  %v10537_v46 = vunpack.i.h.bf16 %v15389_v43 }
 0x5d5   : > { %v3595_v27 = vpop.xlane.xlu1 %3594  ;;  %10846 = vpow2.f32 %v3526_v7 }
 0x5d6   : > { %v13640_v51 = vpop.xlane.xlu0 %3303  ;;  %10848 = vpow2.f32 %v3508_v1 }
 0x5d7   : > { %10850 = vrcp.f32 %v3586_v57 }
 0x5d8   : > { %3657 = vadd.xlane.f32.xlu0 %v3656_v14  ;;  %v10841_v6 = vpop.eup %10840 }
 0x5d9   : > { %v3592_v13 = vpop.xlane.xlu1 %3591  ;;  %v3814_v17 = vmul.f32 %v10841_v6, %v13375_v30  ;;  %v15392_v6 = vld [vmem:[#allocation50_spill] sm:$0xff] }
 0x5da   : > { %v13647_v44 = vpop.xlane.xlu0 %3327 }
 0x5dc   : > { %3696 = vadd.xlane.f32.xlu0 %v3695_v61  ;;  %v15390_v61 = vld [vmem:[#allocation47_spill] sm:$0xff] }
 0x5dd   : > { %v3337_v35 = vpop.xlane.xlu1 %3336  ;;  %v10843_v32 = vpop.eup %10842  ;;  %v10542_v5 = vunpack.i.h.bf16 %v15390_v61  ;;  %v10541_v1 = vunpack.i.l.bf16 %v15390_v61 }
 0x5de   : > { %v3413_v7 = vsub.f32 %v13414_v52, %v3337_v35  ;;  %v3583_v63 = vpop.xlane.xlu0 %3582  ;;  %v3813_v14 = vmul.f32 %v10843_v32, %v13391_v36  ;;  %v13661_v33 = vpop.eup %10844  ;;  %v15391_v52 = vld [vmem:[#allocation71_spill] sm:$0xff]  ;;  %v9933_v36 = vpack.c.bf16 %v10537_v46, %v10536_v45 }
 0x5df   : > { %10852 = vrcp.f32 %v3583_v63  ;;  %v3397_v43 = vsub.f32 %v15391_v52, %v13560_v56  ;;  %v3701_v30 = vsel %vm3163_vm5, %v13661_v33, 0.0  ;;  %v10547_v56 = vunpack.i.h.bf16 %v15392_v6  ;;  %v15393_v63 = vld [vmem:[#allocation54_spill] sm:$0xff] }
 0x5e0   : > { %3669 = vadd.xlane.f32.xlu0 %v3668_v16  ;;  %10854 = vpow2.f32 %v3530_v12  ;;  %9318 = vmatmul.mubr.msk.f32.vlgmr.msra.gmra.mrb[56].mxu1 %vm3163_vm5, %v3813_v14  ;;  %v3534_v57 = vmul.f32 1.442695, %v3413_v7  ;;  %v13673_v16 = vpop.eup %10846  ;;  %v10546_v12 = vunpack.i.l.bf16 %v15392_v6  ;;  %v9937_v46 = vpack.c.bf16 %v10542_v5, %v10541_v1 }
 0x5e1   : > { %10856 = vrcp.f32 %v3592_v13  ;;  %9932 = vmatpush3.bf16.msra.mxu1 %v13603_v47  ;;  %9320 = vmatprep.mubr.msk.f32.mxu1 %vm3163_vm5, %v3814_v17  ;;  %v3502_v13 = vmul.f32 1.442695, %v3397_v43  ;;  %v3404_v47 = vsub.f32 %v13295_v18, %v13579_v58  ;;  %v3707_v32 = vsel %vm3163_vm5, %v13673_v16, 0.0  ;;  %v13682_v7 = vpop.eup %10848 }
 0x5e2   : > { %v3589_v26 = vpop.xlane.xlu0 %3588  ;;  %9934 = vmatprep.subr.bf16.mxu1 %v9933_v36  ;;  %v10571_v14 = vunpack.i.l.bf16 %v15393_v63  ;;  %v9941_v61 = vpack.c.bf16 %v10547_v56, %v10546_v12  ;;  %v10851_v18 = vpop.eup %10850  ;;  %v3398_v12 = vsub.f32 %v13331_v29, %v13614_v39 }
 0x5e3   : > { %10858 = vrcp.f32 %v3589_v26  ;;  %v3516_v58 = vmul.f32 1.442695, %v3404_v47 }
 0x5e4   : > { %10860 = vpow2.f32 %v3496_v11  ;;  %3702 = vadd.xlane.f32.xlu0 %v3701_v30  ;;  %v10572_v11 = vunpack.i.h.bf16 %v15393_v63  ;;  %v3816_v30 = vmul.f32 %v10851_v18, %v13386_v34 }
 0x5e5   : > { %10862 = vrcp.f32 %v3595_v27  ;;  %9936 = vmatpush3.bf16.msra.mxu1 %v9933_v36  ;;  %v15394_v27 = vld [vmem:[#allocation75_spill] sm:$0xff]  ;;  %v3680_v36 = vsel %vm3163_vm5, %v13682_v7, 0.0 }
 0x5e6   : > { %10864 = vpow2.f32 %v3534_v57  ;;  %v3334_v45 = vpop.xlane.xlu0 %3333  ;;  %9938 = vmatprep.subr.bf16.mxu1 %v9937_v46  ;;  %v3399_v5 = vsub.f32 %v15394_v27, %v13592_v42  ;;  %v13695_v42 = vpack.c.bf16 %v10572_v11, %v10571_v14 }
 0x5e7   : > { %v3412_v35 = vsub.f32 %v13432_v15, %v3334_v45  ;;  %10866 = vpow2.f32 %v3502_v13 }
 0x5e8   : > { %3708 = vadd.xlane.f32.xlu0 %v3707_v32  ;;  %v3506_v56 = vmul.f32 1.442695, %v3399_v5  ;;  %v3406_v32 = vsub.f32 %v13343_v10, %v13619_v23  ;;  %v3401_v23 = vsub.f32 %v13326_v48, %v13610_v38  ;;  %v15395_v38 = vld [vmem:[#allocation77_spill] sm:$0xff] }
 0x5e9   : > { %v3532_v17 = vmul.f32 1.442695, %v3412_v35  ;;  %v10853_v1 = vpop.eup %10852  ;;  %9940 = vmatpush3.bf16.msra.mxu1 %v9937_v46  ;;  %v3504_v35 = vmul.f32 1.442695, %v3398_v12 }
 0x5ea   : > { %v3343_v15 = vpop.xlane.xlu0 %3342  ;;  %v13688_v52 = vpop.eup %10854  ;;  %9942 = vmatprep.subr.bf16.mxu1 %v9941_v61  ;;  %v3815_v57 = vmul.f32 %v10853_v1, %v13420_v4  ;;  %v3510_v48 = vmul.f32 1.442695, %v3401_v23  ;;  %v15398_v23 = vld [vmem:[#allocation79_spill] sm:$0xff] }
 0x5eb   : > { %10868 = vpow2.f32 %v3532_v17  ;;  %v3415_v43 = vsub.f32 %v13440_v62, %v3343_v15  ;;  %v10857_v26 = vpop.eup %10856  ;;  %v3713_v29 = vsel %vm3163_vm5, %v13688_v52, 0.0  ;;  %v3408_v15 = vsub.f32 %v15395_v38, %v13630_v25  ;;  %v15396_v25 = vld [vmem:[#allocation76_spill] sm:$0xff] }
 0x5ec   : > { %3681 = vadd.xlane.f32.xlu0 %v3680_v36  ;;  %10870 = vpow2.f32 %v3516_v58  ;;  %9321 = vmatmul.mubr.msk.f32.gmra.mrb[58].mxu1 %vm3163_vm5, %v3815_v57  ;;  %v3818_v45 = vmul.f32 %v10857_v26, %v13406_v31 }
 0x5ed   : > { %v10859_v6 = vpop.eup %10858  ;;  %v3538_v13 = vmul.f32 1.442695, %v3415_v43  ;;  %9944 = vmatpush3.bf16.msra.mxu1 %v9941_v61  ;;  %9323 = vmatprep.mubr.msk.f32.mxu1 %vm3163_vm5, %v3816_v30  ;;  %v3520_v61 = vmul.f32 1.442695, %v3406_v32  ;;  %v3524_v12 = vmul.f32 1.442695, %v3408_v15 }
 0x5ee   : > { %v13700_v62 = vpop.eup %10860  ;;  %v3340_v4 = vpop.xlane.xlu0 %3339  ;;  %v3817_v47 = vmul.f32 %v10859_v6, %v13427_v55  ;;  %9962 = vmatprep.subr.bf16.mxu1 %v13695_v42 }
 0x5ef   : > { %v10863_v34 = vpop.eup %10862  ;;  %10872 = vpow2.f32 %v3538_v13  ;;  %v3414_v46 = vsub.f32 %v13447_v28, %v3340_v4  ;;  %v3662_v28 = vsel %vm3163_vm5, %v13700_v62, 0.0 }
 0x5f0   : > { %v13708_v39 = vpop.eup %10864  ;;  %3714 = vadd.xlane.f32.xlu0 %v3713_v29  ;;  %10874 = vpow2.f32 %v3506_v56  ;;  %9324 = vmatmul.mubr.msk.f32.gmra.mrb[60].mxu1 %vm3163_vm5, %v3817_v47  ;;  %v3819_v14 = vmul.f32 %v10863_v34, %v13395_v21  ;;  %v3601_v21 = vpop.xlane.xlu1 %3600  ;;  %v3403_v56 = vsub.f32 %v15396_v25, %v13624_v41 }
 0x5f1   : > { %v3536_v55 = vmul.f32 1.442695, %v3414_v46  ;;  %9326 = vmatprep.mubr.msk.f32.mxu1 %vm3163_vm5, %v3818_v45  ;;  %v13719_v11 = vpop.eup %10866  ;;  %v3719_v31 = vsel %vm3163_vm5, %v13708_v39, 0.0  ;;  %v15397_v45 = vld [vmem:[#allocation78_spill] sm:$0xff] }
 0x5f2   : > { %v13715_v63 = vpop.xlane.xlu0 %3348  ;;  %v3671_v58 = vsel %vm3163_vm5, %v13719_v11, 0.0  ;;  %v3514_v29 = vmul.f32 1.442695, %v3403_v56 }
 0x5f3   : > { %10876 = vpow2.f32 %v3536_v55  ;;  %3663 = vadd.xlane.f32.xlu1 %v3662_v28 }
 0x5f4   : > { %3720 = vadd.xlane.f32.xlu0 %v3719_v31  ;;  %10878 = vpow2.f32 %v3504_v35  ;;  %9327 = vmatmul.mubr.msk.f32.gmra.mrb[62].mxu1 %vm3163_vm5, %v3819_v14  ;;  %v3402_v35 = vsub.f32 %v15397_v45, %v13640_v51  ;;  %v15401_v45 = vld [vmem:[#allocation52_spill] sm:$0xff] }
 0x5f5   : > { %v13724_v10 = vpop.eup %10868  ;;  %10880 = vpow2.f32 %v3520_v61  ;;  %v3410_v61 = vsub.f32 %v15398_v23, %v13647_v44  ;;  %v15402_v23 = vld [vmem:[#allocation48_spill] sm:$0xff] }
 0x5f6   : > { %v3346_v18 = vpop.xlane.xlu0 %3345  ;;  %v3716_v27 = vsel %vm3163_vm5, %v13724_v10, 0.0  ;;  %v13733_v5 = vpop.eup %10870  ;;  %v3512_v14 = vmul.f32 1.442695, %v3402_v35  ;;  %v10562_v35 = vunpack.i.h.bf16 %v15401_v45 }
 0x5f7   : > { %v3416_v17 = vsub.f32 %v13465_v54, %v3346_v18  ;;  %3672 = vadd.xlane.f32.xlu1 %v3671_v58  ;;  %v3692_v57 = vsel %vm3163_vm5, %v13733_v5, 0.0  ;;  %v3607_v54 = vpop.xlane.xlu1 %3606 }
 0x5f8   : > { %3717 = vadd.xlane.f32.xlu0 %v3716_v27 }
 0x5f9   : > { %v13736_v1 = vpop.eup %10872  ;;  %v3540_v43 = vmul.f32 1.442695, %v3416_v17  ;;  %v3528_v17 = vmul.f32 1.442695, %v3410_v61 }
 0x5fa   : > { %v13740_v36 = vpop.xlane.xlu0 %3354  ;;  %v3725_v26 = vsel %vm3163_vm5, %v13736_v1, 0.0  ;;  %v13746_v30 = vpop.eup %10874 }
 0x5fb   : > { %10882 = vpow2.f32 %v3540_v43  ;;  %3693 = vadd.xlane.f32.xlu1 %v3692_v57  ;;  %v3677_v4 = vsel %vm3163_vm5, %v13746_v30, 0.0  ;;  %v3613_v46 = vpop.xlane.xlu1 %3612  ;;  %v15399_v57 = vld [vmem:[#allocation51_spill] sm:$0xff] }
 0x5fc   : > { %3726 = vadd.xlane.f32.xlu0 %v3725_v26  ;;  %10884 = vpow2.f32 %v3510_v48  ;;  %v3417_v48 = vsub.f32 %v13456_v60, %v13715_v63  ;;  %v10557_v26 = vunpack.i.h.bf16 %v15399_v57  ;;  %v10556_v25 = vunpack.i.l.bf16 %v15399_v57 }
 0x5fd   : > { %v13748_v6 = vpop.eup %10876  ;;  %10886 = vpow2.f32 %v3524_v12 }
 0x5fe   : > { %v13752_v13 = vpop.xlane.xlu0 %3351  ;;  %v3722_v47 = vsel %vm3163_vm5, %v13748_v6, 0.0  ;;  %v13758_v34 = vpop.eup %10878  ;;  %10888 = vrcp.f32 %v3601_v21  ;;  %v3542_v56 = vmul.f32 1.442695, %v3417_v48 }
 0x5ff   : > { %3678 = vadd.xlane.f32.xlu1 %v3677_v4  ;;  %v3674_v32 = vsel %vm3163_vm5, %v13758_v34, 0.0  ;;  %v13764_v55 = vpop.eup %10880  ;;  %v3619_v28 = vpop.xlane.xlu1 %3618 }
 0x600   : > { %3723 = vadd.xlane.f32.xlu0 %v3722_v47  ;;  %v3698_v51 = vsel %vm3163_vm5, %v13764_v55, 0.0  ;;  %v15400_v47 = vld [vmem:[#allocation80_spill] sm:$0xff] }
 0x602   : > { %v3598_v41 = vpop.xlane.xlu0 %3597 }
 0x603   : > { %3675 = vadd.xlane.f32.xlu1 %v3674_v32  ;;  %10890 = vrcp.f32 %v3598_v41  ;;  %v3616_v21 = vpop.xlane.xlu1 %3615  ;;  %v10561_v41 = vunpack.i.l.bf16 %v15401_v45  ;;  %v9949_v32 = vpack.c.bf16 %v10557_v26, %v10556_v25  ;;  %v3418_v45 = vsub.f32 %v13481_v22, %v13752_v13 }
 0x604   : > { %10892 = vpow2.f32 %v3514_v29 }
 0x605   : > { %v13766_v31 = vpop.eup %10882  ;;  %10894 = vrcp.f32 %v3607_v54 }
 0x606   : > { %v3604_v18 = vpop.xlane.xlu0 %3603  ;;  %v3728_v58 = vsel %vm3163_vm5, %v13766_v31, 0.0  ;;  %v13774_v27 = vpop.eup %10884 }
 0x607   : > { %10896 = vrcp.f32 %v3604_v18  ;;  %3699 = vadd.xlane.f32.xlu1 %v3698_v51  ;;  %3729 = vadd.xlane.f32.xlu0 %v3728_v58  ;;  %v3683_v38 = vsel %vm3163_vm5, %v13774_v27, 0.0  ;;  %v13780_v15 = vpop.eup %10886  ;;  %v9953_v58 = vpack.c.bf16 %v10562_v35, %v10561_v41 }
 0x608   : > { %10898 = vpow2.f32 %v3512_v14  ;;  %v10889_v43 = vpop.eup %10888  ;;  %v3704_v60 = vsel %vm3163_vm5, %v13780_v15, 0.0 }
 0x609   : > { %10900 = vrcp.f32 %v3613_v46  ;;  %v3821_v46 = vmul.f32 %v10889_v43, %v15400_v47 }
 0x60a   : > { %v3610_v44 = vpop.xlane.xlu0 %3609 }
 0x60b   : > { %10902 = vrcp.f32 %v3610_v44  ;;  %3684 = vadd.xlane.f32.xlu1 %v3683_v38 }
 0x60c   : > { %10904 = vrcp.f32 %v3616_v21 }
 0x60d   : > { %v10891_v54 = vpop.eup %10890  ;;  %10906 = vpow2.f32 %v3528_v17  ;;  %v15403_v17 = vld [vmem:[#allocation53_spill] sm:$0xff] }
 0x60e   : > { %v13786_v63 = vpop.eup %10892  ;;  %10908 = vrcp.f32 %v3619_v28  ;;  %v3820_v12 = vmul.f32 %v10891_v54, %v13493_v59  ;;  %v10567_v48 = vunpack.i.h.bf16 %v15403_v17  ;;  %v10566_v44 = vunpack.i.l.bf16 %v15403_v17  ;;  %v15404_v54 = vld [vmem:[#allocation58_spill] sm:$0xff] }
 0x60f   : > { %3705 = vadd.xlane.f32.xlu1 %v3704_v60  ;;  %v10895_v4 = vpop.eup %10894  ;;  %10910 = vpow2.f32 %v3542_v56  ;;  %v3689_v28 = vsel %vm3163_vm5, %v13786_v63, 0.0  ;;  %v10592_v25 = vunpack.i.h.bf16 %v15404_v54  ;;  %v10591_v56 = vunpack.i.l.bf16 %v15404_v54  ;;  %v15409_v54 = vld [vmem:[#allocation60_spill] sm:$0xff] }
 0x610   : > { %9345 = vmatprep.mubr.msk.f32.mxu0 %vm3163_vm5, %v3820_v12  ;;  %v3823_v18 = vmul.f32 %v10895_v4, %v13444_v19  ;;  %v9957_v60 = vpack.c.bf16 %v10567_v48, %v10566_v44 }
 0x611   : > { %v10897_v29 = vpop.eup %10896  ;;  %9346 = vmatmul.mubr.msk.f32.vlgmr.msra.gmra.mrb[64].mxu0 %vm3163_vm5, %v3821_v46  ;;  %v9977_v4 = vpack.c.bf16 %v10592_v25, %v10591_v56  ;;  %v10597_v25 = vunpack.i.h.bf16 %v15409_v54 }
 0x612   : > { %v3822_v14 = vmul.f32 %v10897_v29, %v13497_v49  ;;  %v13797_v59 = vpop.eup %10898  ;;  %9948 = vmatpush3.bf16.msra.mxu0 %v15402_v23  ;;  %v3625_v29 = vpop.xlane.xlu0 %3624  ;;  %v15406_v23 = vld [vmem:[#allocation44_spill] sm:$0xff] }
 0x613   : > { %3690 = vadd.xlane.f32.xlu1 %v3689_v28  ;;  %v10901_v61 = vpop.eup %10900  ;;  %9950 = vmatprep.subr.bf16.mxu0 %v9949_v32  ;;  %v3686_v49 = vsel %vm3163_vm5, %v13797_v59, 0.0  ;;  %10912 = vrcp.f32 %v3625_v29  ;;  %v15411_v29 = vld [vmem:[#allocation59_spill] sm:$0xff] }
 0x614   : > { %9348 = vmatprep.mubr.msk.f32.mxu0 %vm3163_vm5, %v3822_v14  ;;  %v3825_v19 = vmul.f32 %v10901_v61, %v13461_v8 }
 0x615   : > { %v10903_v51 = vpop.eup %10902  ;;  %9349 = vmatmul.mubr.msk.f32.gmra.mrb[66].mxu0 %vm3163_vm5, %v3823_v18  ;;  %v15407_v18 = vld [vmem:[#allocation56_spill] sm:$0xff] }
 0x616   : > { %v10905_v21 = vpop.eup %10904  ;;  %v3824_v38 = vmul.f32 %v10903_v51, %v13501_v53  ;;  %9952 = vmatpush3.bf16.msra.mxu0 %v9949_v32  ;;  %v10577_v51 = vunpack.i.h.bf16 %v15407_v18  ;;  %v10576_v22 = vunpack.i.l.bf16 %v15407_v18 }
 0x617   : > { %3687 = vadd.xlane.f32.xlu1 %v3686_v49  ;;  %v13808_v43 = vpop.eup %10906  ;;  %9954 = vmatprep.subr.bf16.mxu0 %v9953_v58  ;;  %v3826_v26 = vmul.f32 %v10905_v21, %v13487_v3  ;;  %v15405_v3 = vld [vmem:[#allocation42_spill] sm:$0xff]  ;;  %v15408_v49 = vld [vmem:[#allocation55_spill] sm:$0xff] }
 0x618   : > { %9351 = vmatprep.mubr.msk.f32.mxu0 %vm3163_vm5, %v3824_v38  ;;  %v10909_v57 = vpop.eup %10908  ;;  %v3710_v53 = vsel %vm3163_vm5, %v13808_v43, 0.0  ;;  %v10582_v38 = vunpack.i.h.bf16 %v15408_v49 }
 0x619   : > { %9352 = vmatmul.mubr.msk.f32.gmra.mrb[68].mxu0 %vm3163_vm5, %v3825_v19  ;;  %v13819_v12 = vpop.eup %10910  ;;  %v3827_v8 = vmul.f32 %v10909_v57, %v13477_v40  ;;  %v3544_v40 = vmul.f32 1.442695, %v3418_v45  ;;  %v10581_v19 = vunpack.i.l.bf16 %v15408_v49  ;;  %v9965_v57 = vpack.c.bf16 %v10577_v51, %v10576_v22 }
 0x61a   : > { %9956 = vmatpush3.bf16.msra.mxu0 %v9953_v58  ;;  %9354 = vmatprep.mubr.msk.f32.mxu0 %vm3163_vm5, %v3826_v26  ;;  %v3731_v47 = vsel %vm3163_vm5, %v13819_v12, 0.0  ;;  %v10602_v45 = vunpack.i.h.bf16 %v15411_v29 }
 0x61b   : > { %9958 = vmatprep.subr.bf16.mxu0 %v9957_v60  ;;  %3711 = vadd.xlane.f32.xlu1 %v3710_v53 }
 0x61d   : > { %10619 = vrot.lane.b32.xlu0 %v15405_v3, %s11657_s6  ;;  %9355 = vmatmul.mubr.msk.f32.gmra.mrb[70].mxu0 %vm3163_vm5, %v3827_v8  ;;  %v10913_v14 = vpop.eup %10912  ;;  %v15410_v3 = vld [vmem:[#allocation57_spill] sm:$0xff] }
 0x61e   : > { %9960 = vmatpush3.bf16.msra.mxu0 %v9957_v60  ;;  %v3829_v21 = vmul.f32 %v10913_v14, %v13505_v37  ;;  %v15412_v14 = vld [vmem:[#allocation61_spill] sm:$0xff] }
 0x61f   : > { %9978 = vmatprep.subr.bf16.mxu0 %v9977_v4  ;;  %3732 = vadd.xlane.f32.xlu1 %v3731_v47  ;;  %v10587_v47 = vunpack.i.h.bf16 %v15410_v3 }
 0x623   : > { %v3649_v46 = vpop.xlane.xlu1 %3648 }
 0x627   : > { %v3622_v35 = vpop.xlane.xlu1 %3621 }
 0x628   : > { %10914 = vrcp.f32 %v3622_v35  ;;  %v10601_v35 = vunpack.i.l.bf16 %v15411_v29 }
 0x629   : > { %10916 = vrcp.f32 %v3649_v46  ;;  %v10586_v46 = vunpack.i.l.bf16 %v15410_v3 }
 0x62b   : > { %v3646_v41 = vpop.xlane.xlu1 %3645 }
 0x62c   : > { %10918 = vrcp.f32 %v3646_v41  ;;  %v3652_v32 = vpop.xlane.xlu0 %3651  ;;  %v9973_v41 = vpack.c.bf16 %v10587_v47, %v10586_v46 }
 0x62d   : > { %10920 = vrcp.f32 %v3652_v32  ;;  %v9985_v32 = vpack.c.bf16 %v10602_v45, %v10601_v35  ;;  %v15418_v45 = vld [vmem:[#allocation39_spill] sm:$0xff] }
 0x62e   : > { %10922 = vpow2.f32 %v3544_v40 }
 0x62f   : > { %v3631_v28 = vpop.xlane.xlu1 %3630 }
 0x630   : > { %10624 = vrot.lane.b32.xlu1 %v15406_v23, %s11657_s6  ;;  %v3637_v48 = vpop.xlane.xlu0 %3636  ;;  %v10607_v23 = vunpack.i.h.bf16 %v15412_v14 }
 0x632   : > { %v10915_v61 = vpop.eup %10914 }
 0x633   : > { %v3655_v13 = vpop.xlane.xlu1 %3654  ;;  %v3828_v58 = vmul.f32 %v10915_v61, %v13521_v2  ;;  %v10917_v17 = vpop.eup %10916  ;;  %v10596_v2 = vunpack.i.l.bf16 %v15409_v54  ;;  %v10606_v61 = vunpack.i.l.bf16 %v15412_v14 }
 0x634   : > { %10924 = vrcp.f32 %v3655_v13  ;;  %v3837_v60 = vmul.f32 %v10917_v17, %v13516_v20  ;;  %v10610_v20 = vpop.permute.xlu0 %10609  ;;  %v15413_v13 = vld [vmem:[#allocation83_spill] sm:$0xff] }
 0x635   : > { %9373 = vmatprep.mubr.msk.f32.mxu1 %vm3163_vm5, %v3828_v58  ;;  %10926 = vrcp.f32 %v3631_v28  ;;  %v10612_v18 = vunpack.i.h.bf16 %v10610_v20  ;;  %v10611_v51 = vunpack.i.l.bf16 %v10610_v20  ;;  %v9989_v49 = vpack.c.bf16 %v10607_v23, %v10606_v61  ;;  %v15420_v61 = vld [vmem:[#allocation41_spill] sm:$0xff] }
 0x636   : > { %v10919_v44 = vpop.eup %10918  ;;  %9374 = vmatmul.mubr.msk.f32.vlgmr.msra.gmra.mrb[64].mxu1 %vm3163_vm5, %v3829_v21 }
 0x637   : > { %v10921_v26 = vpop.eup %10920  ;;  %9964 = vmatpush3.bf16.msra.mxu1 %v13695_v42  ;;  %v3628_v37 = vpop.xlane.xlu1 %3627  ;;  %v3836_v56 = vmul.f32 %v10919_v44, %v13526_v50  ;;  %v9969_v50 = vpack.c.bf16 %v10582_v38, %v10581_v19  ;;  %v13862_v44 = vpack.c.bf16 %v10612_v18, %v10611_v51  ;;  %v15415_v19 = vld [vmem:[#allocation81_spill] sm:$0xff]  ;;  %v15421_v51 = vld [vmem:[#allocation84_spill] sm:$0xff] }
 0x638   : > { %10928 = vrcp.f32 %v3628_v37  ;;  %9966 = vmatprep.subr.bf16.mxu1 %v9965_v57  ;;  %v3838_v53 = vmul.f32 %v10921_v26, %v13531_v9  ;;  %v13845_v8 = vpop.eup %10922  ;;  %v9981_v9 = vpack.c.bf16 %v10597_v25, %v10596_v2  ;;  %v15416_v37 = vld [vmem:[#allocation67_spill] sm:$0xff] }
 0x639   : > { %9401 = vmatprep.mubr.msk.f32.mxu0 %vm3163_vm5, %v3836_v56  ;;  %v3734_v40 = vsel %vm3163_vm5, %v13845_v8, 0.0  ;;  %10930 = vrcp.f32 %v3637_v48 }
 0x63a   : > { %9402 = vmatmul.mubr.msk.f32.vlgmr.msra.gmra.mrb[72].mxu0 %vm3163_vm5, %v3837_v60  ;;  %v15417_v60 = vld [vmem:[#allocation82_spill] sm:$0xff] }
 0x63b   : > { %9968 = vmatpush3.bf16.msra.mxu1 %v9965_v57  ;;  %9980 = vmatpush3.bf16.msra.mxu0 %v9977_v4  ;;  %v3661_v42 = vpop.xlane.xlu1 %3660  ;;  %v3419_v4 = vsub.f32 %v13473_v24, %v13740_v36  ;;  %v15414_v36 = vld [vmem:[#allocation65_spill] sm:$0xff] }
 0x63c   : > { %9404 = vmatprep.mubr.msk.f32.mxu0 %vm3163_vm5, %v3838_v53  ;;  %9970 = vmatprep.subr.bf16.mxu1 %v9969_v50 }
 0x63d   : > { %9982 = vmatprep.subr.bf16.mxu0 %v9981_v9  ;;  %3735 = vadd.xlane.f32.xlu0 %v3734_v40  ;;  %v3546_v38 = vmul.f32 1.442695, %v3419_v4 }
 0x63e   : > { %v10925_v28 = vpop.eup %10924 }
 0x63f   : > { %9972 = vmatpush3.bf16.msra.mxu1 %v9969_v50  ;;  %9984 = vmatpush3.bf16.msra.mxu0 %v9981_v9  ;;  %v3634_v22 = vpop.xlane.xlu1 %3633  ;;  %v3839_v58 = vmul.f32 %v10925_v28, %v15413_v13  ;;  %v10927_v21 = vpop.eup %10926  ;;  %v15419_v50 = vld [vmem:[#allocation64_spill] sm:$0xff]  ;;  %v13880_v9 = vld [vmem:[%s11951_s26 + $0x10] sm:$0xff]  }
 0x640   : > { %10932 = vrcp.f32 %v3634_v22  ;;  %9974 = vmatprep.subr.bf16.mxu1 %v9973_v41  ;;  %9986 = vmatprep.subr.bf16.mxu0 %v9985_v32  ;;  %v3831_v57 = vmul.f32 %v10927_v21, %v15415_v19 }
 0x641   : > { %9405 = vmatmul.mubr.msk.f32.gmra.mrb[74].mxu0 %vm3163_vm5, %v3839_v58  ;;  %10934 = vpow2.f32 %v3546_v38 }
 0x642   : > { %v10929_v17 = vpop.eup %10928 }
 0x643   : > { %9976 = vmatpush3.bf16.msra.mxu1 %v9973_v41  ;;  %9988 = vmatpush3.bf16.msra.mxu0 %v9985_v32  ;;  %v3643_v24 = vpop.xlane.xlu1 %3642  ;;  %v3830_v48 = vmul.f32 %v10929_v17, %v15414_v36  ;;  %v10931_v54 = vpop.eup %10930 }
 0x644   : > { %9990 = vmatprep.subr.bf16.mxu0 %v9989_v49  ;;  %9994 = vmatprep.subr.bf16.mxu1 %v13862_v44  ;;  %10936 = vrcp.f32 %v3643_v24  ;;  %v3833_v53 = vmul.f32 %v10931_v54, %v15417_v60  ;;  %v15422_v60 = vld [vmem:[#allocation62_spill] sm:$0xff] }
 0x645   : > { %9376 = vmatprep.mubr.msk.f32.mxu1 %vm3163_vm5, %v3830_v48 }
 0x646   : > { %9377 = vmatmul.mubr.msk.f32.gmra.mrb[66].mxu1 %vm3163_vm5, %v3831_v57 }
 0x647   : > { %9992 = vmatpush3.bf16.msra.mxu0 %v9989_v49  ;;  %v3667_v26 = vpop.xlane.xlu1 %3666 }
 0x648   : > { %10010 = vmatprep.subr.bf16.mxu0 %v13880_v9 }
 0x64a   : > { %v10933_v25 = vpop.eup %10932 }
 0x64b   : > { %v3640_v2 = vpop.xlane.xlu1 %3639  ;;  %v3832_v56 = vmul.f32 %v10933_v25, %v15416_v37  ;;  %v13873_v3 = vpop.eup %10934 }
 0x64c   : > { %10938 = vrcp.f32 %v3640_v2  ;;  %v3737_v47 = vsel %vm3163_vm5, %v13873_v3, 0.0 }
 0x64d   : > { %9379 = vmatprep.mubr.msk.f32.mxu1 %vm3163_vm5, %v3832_v56  ;;  %10940 = vrcp.f32 %v3661_v42 }
 0x64e   : > { %9380 = vmatmul.mubr.msk.f32.gmra.mrb[68].mxu1 %vm3163_vm5, %v3833_v53  ;;  %v10937_v46 = vpop.eup %10936 }
 0x64f   : > { %v3835_v20 = vmul.f32 %v10937_v46, %v15419_v50  ;;  %v10615_v21 = vpop.permute.xlu1 %10614 }
 0x650   : > { %v10616_v46 = vunpack.i.l.bf16 %v10615_v21 }
 0x654   : > { %3738 = vadd.xlane.f32.xlu1 %v3737_v47  ;;  %v10617_v47 = vunpack.i.h.bf16 %v10615_v21 }
 0x656   : > { %v10939_v29 = vpop.eup %10938 }
 0x657   : > { %v3834_v35 = vmul.f32 %v10939_v29, %v15418_v45  ;;  %v10941_v28 = vpop.eup %10940 }
 0x658   : > { %v3841_v4 = vmul.f32 %v10941_v28, %v15421_v51  ;;  %v8429_v51 = vld [vmem:[%s11951_s26 + $0x18] sm:$0xff]  }
 0x659   : > { %9382 = vmatprep.mubr.msk.f32.mxu1 %vm3163_vm5, %v3834_v35 }
 0x65a   : > { %9383 = vmatmul.mubr.msk.f32.gmra.mrb[70].mxu1 %vm3163_vm5, %v3835_v20 }
 0x665   : > { %v3658_v40 = vpop.xlane.xlu0 %3657 }
 0x666   : > { %10942 = vrcp.f32 %v3658_v40 }
 0x669   : > { %v3697_v41 = vpop.xlane.xlu0 %3696 }
 0x66d   : > { %v3670_v32 = vpop.xlane.xlu0 %3669 }
 0x66e   : > { %10944 = vrcp.f32 %v3670_v32 }
 0x66f   : > { %10946 = vrcp.f32 %v3667_v26 }
 0x670   : > { %v10943_v14 = vpop.eup %10942 }
 0x671   : > { %v3703_v23 = vpop.xlane.xlu0 %3702  ;;  %v3840_v18 = vmul.f32 %v10943_v14, %v15420_v61  ;;  %v15423_v61 = vld [vmem:[#allocation68_spill] sm:$0xff] }
 0x673   : > { %9407 = vmatprep.mubr.msk.f32.mxu0 %vm3163_vm5, %v3840_v18 }
 0x674   : > { %9408 = vmatmul.mubr.msk.f32.gmra.mrb[76].mxu0 %vm3163_vm5, %v3841_v4 }
 0x675   : > { %v13889_v22 = vpop.xlane.xlu0 %3708 }
 0x678   : > { %v10945_v13 = vpop.eup %10944 }
 0x679   : > { %v3682_v42 = vpop.xlane.xlu0 %3681  ;;  %v3844_v58 = vmul.f32 %v10945_v13, %v13651_v0  ;;  %v10947_v25 = vpop.eup %10946 }
 0x67a   : > { %v3843_v53 = vmul.f32 %v10947_v25, %v15422_v60 }
 0x67b   : > { %9429 = vmatprep.mubr.msk.f32.mxu1 %vm3163_vm5, %v3844_v58 }
 0x67d   : > { %v13893_v17 = vpop.xlane.xlu0 %3714 }
 0x67f   : > { %v13895_v38 = vpop.f32.mrb[48].mxu1 }
 0x680   : > { %v3664_v49 = vpop.xlane.xlu1 %3663  ;;  %v13899_v36 = vpop.f32.mrb[49].mxu1 }
 0x681   : > { %10948 = vrcp.f32 %v3664_v49  ;;  %v13897_v24 = vpop.xlane.xlu0 %3720 }
 0x684   : > { %v3673_v48 = vpop.xlane.xlu1 %3672 }
 0x685   : > { %10950 = vrcp.f32 %v3673_v48  ;;  %v13901_v19 = vpop.xlane.xlu0 %3717 }
 0x686   : > { %10952 = vrcp.f32 %v3697_v41  ;;  %v9997_v41 = vpack.c.bf16 %v10617_v47, %v10616_v46  ;;  %v13948_v47 = vld [vmem:[%s11951_s26] sm:$0xff]  }
 0x687   : > { %v13903_v57 = vpop.f32.mrb[50].mxu1 }
 0x688   : > { %v3694_v0 = vpop.xlane.xlu1 %3693  ;;  %v13905_v54 = vpop.f32.mrb[51].mxu1 }
 0x689   : > { %10954 = vrcp.f32 %v3694_v0  ;;  %v13907_v26 = vpop.xlane.xlu0 %3726 }
 0x68b   : > { %v10949_v2 = vpop.eup %10948 }
 0x68c   : > { %v3679_v37 = vpop.xlane.xlu1 %3678  ;;  %v3842_v56 = vmul.f32 %v10949_v2, %v13700_v62 }
 0x68d   : > { %v13912_v45 = vpop.xlane.xlu0 %3723  ;;  %10956 = vrcp.f32 %v3679_v37 }
 0x68e   : > { %9410 = vmatprep.mubr.msk.f32.mxu0 %vm3163_vm5, %v3842_v56 }
 0x68f   : > { %v10951_v29 = vpop.eup %10950  ;;  %v13914_v35 = vpop.f32.mrb[52].mxu1  ;;  %9411 = vmatmul.mubr.msk.f32.gmra.mrb[78].mxu0 %vm3163_vm5, %v3843_v53 }
 0x690   : > { %v3845_v50 = vmul.f32 %v10951_v29, %v13719_v11  ;;  %v3676_v20 = vpop.xlane.xlu1 %3675  ;;  %v13918_v40 = vpop.f32.mrb[53].mxu1 }
 0x691   : > { %10958 = vrcp.f32 %v3676_v20  ;;  %v10953_v62 = vpop.eup %10952 }
 0x692   : > { %10960 = vrcp.f32 %v3682_v42  ;;  %9430 = vmatmul.mubr.msk.f32.vlgmr.msra.gmra.mrb[72].mxu1 %vm3163_vm5, %v3845_v50  ;;  %v3853_v18 = vmul.f32 %v10953_v62, %v15423_v61 }
 0x693   : > { %v10955_v32 = vpop.eup %10954  ;;  %9996 = vmatpush3.bf16.msra.mxu1 %v13862_v44  ;;  %10962 = vrcp.f32 %v3703_v23 }
 0x694   : > { %9998 = vmatprep.subr.bf16.mxu1 %v9997_v41  ;;  %v3700_v28 = vpop.xlane.xlu1 %3699  ;;  %v13922_v14 = vpop.xlane.xlu0 %3729  ;;  %v3852_v11 = vmul.f32 %v10955_v32, %v13733_v5 }
 0x695   : > { %10964 = vrcp.f32 %v3700_v28 }
 0x696   : > { %9457 = vmatprep.mubr.msk.f32.mxu0 %vm3163_vm5, %v3852_v11 }
 0x697   : > { %10000 = vmatpush3.bf16.msra.mxu1 %v9997_v41  ;;  %v13928_v4 = vpop.f32.mrb[54].mxu1  ;;  %9458 = vmatmul.mubr.msk.f32.vlgmr.msra.gmra.mrb[80].mxu0 %vm3163_vm5, %v3853_v18  ;;  %v10957_v5 = vpop.eup %10956 }
 0x698   : > { %v3685_v13 = vpop.xlane.xlu1 %3684  ;;  %v13931_v44 = vpop.f32.mrb[55].mxu1  ;;  %10012 = vmatpush3.bf16.msra.mxu0 %v13880_v9  ;;  %v3847_v9 = vmul.f32 %v10957_v5, %v13746_v30 }
 0x699   : > { %10966 = vrcp.f32 %v3685_v13  ;;  %v10620_v23 = vpop.permute.xlu0 %10619  ;;  %10014 = vmatprep.subr.bf16.mxu0 %v8429_v51 }
 0x69a   : > { %v10622_v42 = vunpack.i.h.bf16 %v10620_v23  ;;  %v10621_v58 = vunpack.i.l.bf16 %v10620_v23  ;;  %10968 = vrcp.f32 %v13889_v22 }
 0x69b   : > { %v10959_v21 = vpop.eup %10958 }
 0x69c   : > { %v10961_v49 = vpop.eup %10960  ;;  %v10001_v48 = vpack.c.bf16 %v10622_v42, %v10621_v58  ;;  %v3706_v0 = vpop.xlane.xlu1 %3705  ;;  %v3846_v25 = vmul.f32 %v10959_v21, %v13758_v34  ;;  %10016 = vmatpush3.bf16.msra.mxu0 %v8429_v51 }
 0x69d   : > { %10970 = vrcp.f32 %v3706_v0  ;;  %v10963_v2 = vpop.eup %10962  ;;  %v3848_v56 = vmul.f32 %v10961_v49, %v13682_v7  ;;  %10018 = vmatprep.subr.bf16.mxu0 %v13948_v47 }
 0x69e   : > { %10002 = vmatprep.subr.bf16.mxu1 %v10001_v48  ;;  %9432 = vmatprep.mubr.msk.f32.mxu1 %vm3163_vm5, %v3846_v25  ;;  %v3855_v34 = vmul.f32 %v10963_v2, %v13661_v33  ;;  %10972 = vrcp.f32 %v13901_v19 }
 0x69f   : > { %v10965_v37 = vpop.eup %10964  ;;  %10004 = vmatpush3.bf16.msra.mxu1 %v10001_v48 }
 0x6a0   : > { %9433 = vmatmul.mubr.msk.f32.gmra.mrb[74].mxu1 %vm3163_vm5, %v3847_v9  ;;  %v3691_v22 = vpop.xlane.xlu1 %3690  ;;  %v3854_v60 = vmul.f32 %v10965_v37, %v13764_v55  ;;  %v8427_v9 = vld [vmem:[%s11951_s26 + $0x8] sm:$0xff]  }
 0x6a1   : > { %9435 = vmatprep.mubr.msk.f32.mxu1 %vm3163_vm5, %v3848_v56  ;;  %10974 = vrcp.f32 %v3691_v22  ;;  %v8430_v22 = vld [vmem:[%s11951_s26 + $0x20] sm:$0xff]  }
 0x6a2   : > { %9460 = vmatprep.mubr.msk.f32.mxu0 %vm3163_vm5, %v3854_v60 }
 0x6a3   : > { %v10967_v53 = vpop.eup %10966  ;;  %9461 = vmatmul.mubr.msk.f32.gmra.mrb[82].mxu0 %vm3163_vm5, %v3855_v34 }
 0x6a4   : > { %v3688_v30 = vpop.xlane.xlu1 %3687  ;;  %v3849_v7 = vmul.f32 %v10967_v53, %v13774_v27  ;;  %v10969_v55 = vpop.eup %10968 }
 0x6a5   : > { %10976 = vrcp.f32 %v3688_v30  ;;  %v3857_v29 = vmul.f32 %v10969_v55, %v13673_v16 }
 0x6a6   : > { %9436 = vmatmul.mubr.msk.f32.gmra.mrb[76].mxu1 %vm3163_vm5, %v3849_v7  ;;  %10978 = vrcp.f32 %v13893_v17  ;;  %v15424_v7 = vmov 0.0  }
 0x6a7   : > { %v10971_v33 = vpop.eup %10970 }
 0x6a8   : > { %v3856_v46 = vmul.f32 %v10971_v33, %v13780_v15  ;;  %v3712_v19 = vpop.xlane.xlu1 %3711  ;;  %v10973_v27 = vpop.eup %10972 }
 0x6a9   : > { %10980 = vrcp.f32 %v3712_v19 }
 0x6aa   : > { %9463 = vmatprep.mubr.msk.f32.mxu0 %vm3163_vm5, %v3856_v46  ;;  %10982 = vrcp.f32 %v13897_v24  ;;  %v3860_v24 = vmul.f32 %v10973_v27, %v13724_v10 }
 0x6ab   : > { %9464 = vmatmul.mubr.msk.f32.gmra.mrb[84].mxu0 %vm3163_vm5, %v3857_v29  ;;  %10984 = vrcp.f32 %v13912_v45  ;;  %v10975_v20 = vpop.eup %10974 }
 0x6ac   : > { %v3733_v50 = vpop.xlane.xlu1 %3732  ;;  %10986 = vrcp.f32 %v13907_v26  ;;  %v3851_v17 = vmul.f32 %v10975_v20, %v13786_v63 }
 0x6ad   : > { %10988 = vrcp.f32 %v13922_v14 }
 0x6ae   : > { %10990 = vrcp.f32 %v3733_v50 }
 0x6af   : > { %v10977_v62 = vpop.eup %10976 }
 0x6b0   : > { %v3850_v15 = vmul.f32 %v10977_v62, %v13797_v59  ;;  %v10625_v16 = vpop.permute.xlu1 %10624  ;;  %v10979_v45 = vpop.eup %10978 }
 0x6b1   : > { %v10627_v41 = vunpack.i.h.bf16 %v10625_v16  ;;  %v10626_v32 = vunpack.i.l.bf16 %v10625_v16  ;;  %v3859_v18 = vmul.f32 %v10979_v45, %v13688_v52 }
 0x6b2   : > { %9438 = vmatprep.mubr.msk.f32.mxu1 %vm3163_vm5, %v3850_v15 }
 0x6b3   : > { %9439 = vmatmul.mubr.msk.f32.gmra.mrb[78].mxu1 %vm3163_vm5, %v3851_v17  ;;  %v10981_v28 = vpop.eup %10980  ;;  %v10005_v11 = vpack.c.bf16 %v10627_v41, %v10626_v32  ;;  %v13966_v26 = vpop.f32.mrb[56].mxu1  ;;  %v8431_v17 = vld [vmem:[%s11951_s26 + $0x28] sm:$0xff]   ;;  %v8432_v41 = vld [vmem:[%s11951_s26 + $0x30] sm:$0xff]  }
 0x6b4   : > { %9485 = vmatprep.mubr.msk.f32.mxu1 %vm3163_vm5, %v3860_v24  ;;  %v10983_v59 = vpop.eup %10982  ;;  %v13969_v14 = vpop.f32.mrb[57].mxu1  ;;  %v3858_v63 = vmul.f32 %v10981_v28, %v13808_v43 }
 0x6b5   : > { %v10985_v61 = vpop.eup %10984  ;;  %10006 = vmatprep.subr.bf16.mxu1 %v10005_v11  ;;  %v3861_v10 = vmul.f32 %v10983_v59, %v13708_v39 }
 0x6b6   : > { %9466 = vmatprep.mubr.msk.f32.mxu0 %vm3163_vm5, %v3858_v63  ;;  %10008 = vmatpush3.bf16.msra.mxu1 %v10005_v11  ;;  %v10987_v51 = vpop.eup %10986  ;;  %v3862_v13 = vmul.f32 %v10985_v61, %v13748_v6 }
 0x6b7   : > { %9467 = vmatmul.mubr.msk.f32.gmra.mrb[86].mxu0 %vm3163_vm5, %v3859_v18  ;;  %v10989_v23 = vpop.eup %10988  ;;  %v3863_v43 = vmul.f32 %v10987_v51, %v13736_v1 }
 0x6b8   : > { %v10991_v5 = vpop.eup %10990  ;;  %v3864_v52 = vmul.f32 %v10989_v23, %v13766_v31 }
 0x6b9   : > { %9486 = vmatmul.mubr.msk.f32.vlgmr.msra.gmra.mrb[80].mxu1 %vm3163_vm5, %v3861_v10  ;;  %v3865_v42 = vmul.f32 %v10991_v5, %v13819_v12 }
 0x6ba   : > { %9488 = vmatprep.mubr.msk.f32.mxu1 %vm3163_vm5, %v3862_v13 }
 0x6bd   : > { %9489 = vmatmul.mubr.msk.f32.gmra.mrb[82].mxu1 %vm3163_vm5, %v3863_v43 }
 0x6be   : > { %9491 = vmatprep.mubr.msk.f32.mxu1 %vm3163_vm5, %v3864_v52 }
 0x6bf   : > { %v13983_v39 = vpop.f32.mrb[58].mxu1 }
 0x6c0   : > { %v13986_v58 = vpop.f32.mrb[59].mxu1 }
 0x6c1   : > { %9492 = vmatmul.mubr.msk.f32.gmra.mrb[84].mxu1 %vm3163_vm5, %v3865_v42 }
 0x6c3   : > { %v13989_v6 = vpop.f32.mrb[60].mxu1 }
 0x6c4   : > { %v13991_v21 = vpop.f32.mrb[61].mxu1 }
 0x6c7   : > { %v13993_v1 = vpop.f32.mrb[62].mxu1 }
 0x6c8   : > { %v13995_v31 = vpop.f32.mrb[63].mxu1 }
 0x6ca   : > { %v3736_v49 = vpop.xlane.xlu0 %3735 }
 0x6cb   : > { %10992 = vrcp.f32 %v3736_v49 }
 0x6d5   : > { %v10993_v48 = vpop.eup %10992 }
 0x6d6   : > { %v3866_v0 = vmul.f32 %v10993_v48, %v13845_v8  ;;  %v11285_v48 = vld [vmem:[#allocation2 + $0x8] sm:$0xff] }
 0x6d8   : > { %9494 = vmatprep.mubr.msk.f32.mxu1 %vm3163_vm5, %v3866_v0 }
 0x6e1   : > { %v3739_v12 = vpop.xlane.xlu1 %3738 }
 0x6e2   : > { %10994 = vrcp.f32 %v3739_v12 }
 0x6e4   : > { %v9347_v25 = vpop.f32.mrb[64].mxu0 }
 0x6e5   : > { %v4216_v2 = vpop.f32.mrb[65].mxu0 }
 0x6e6   : > { %9505 = vmatprep.mubr.msk.f32.mxu0 %vm1911_vm0, %v4216_v2  ;;  %v11286_v2 = vld [vmem:[#allocation2 + $0x18] sm:$0xff] }
 0x6e7   : > { %9506 = vmatmul.mubr.msk.f32.vlgmr.msra.gmra.mrb[88].mxu0 %vm1911_vm0, %v9347_v25 }
 0x6e8   : > { %v9350_v37 = vpop.f32.mrb[66].mxu0  ;;  %10020 = vmatpush3.bf16.msra.mxu0 %v13948_v47 }
 0x6e9   : > { %v4226_v56 = vpop.f32.mrb[67].mxu0  ;;  %10022 = vmatprep.subr.bf16.mxu0 %v8427_v9 }
 0x6ea   : > { %9508 = vmatprep.mubr.msk.f32.mxu0 %vm1911_vm0, %v4226_v56 }
 0x6eb   : > { %9509 = vmatmul.mubr.msk.f32.gmra.mrb[90].mxu0 %vm1911_vm0, %v9350_v37 }
 0x6ec   : > { %v10995_v8 = vpop.eup %10994  ;;  %v9353_v60 = vpop.f32.mrb[68].mxu0  ;;  %10024 = vmatpush3.bf16.msra.mxu0 %v8427_v9 }
 0x6ed   : > { %v4236_v34 = vpop.f32.mrb[69].mxu0  ;;  %v3867_v53 = vmul.f32 %v10995_v8, %v13873_v3  ;;  %10026 = vmatprep.subr.bf16.mxu0 %v8430_v22  ;;  %v11287_v8 = vld [vmem:[#allocation2 + $0x10] sm:$0xff] }
 0x6ee   : > { %9511 = vmatprep.mubr.msk.f32.mxu0 %vm1911_vm0, %v4236_v34 }
 0x6ef   : > { %9495 = vmatmul.mubr.msk.f32.gmra.mrb[86].mxu1 %vm3163_vm5, %v3867_v53  ;;  %9512 = vmatmul.mubr.msk.f32.gmra.mrb[92].mxu0 %vm1911_vm0, %v9353_v60  ;;  %v11288_v53 = vld [vmem:[#allocation2 + $0x28] sm:$0xff] }
 0x6f0   : > { %v9356_v30 = vpop.f32.mrb[70].mxu0  ;;  %6179 = vmatprep.mubr.f32.mxu1 %v15424_v7 }
 0x6f1   : > { %v4246_v47 = vpop.f32.mrb[71].mxu0 }
 0x6f2   : > { %9514 = vmatprep.mubr.msk.f32.mxu0 %vm1911_vm0, %v4246_v47 }
 0x6f3   : > { %9515 = vmatmul.mubr.msk.f32.gmra.mrb[94].mxu0 %vm1911_vm0, %v9356_v30 }
 0x709   : > { %v9375_v55 = vpop.f32.mrb[64].mxu1 }
 0x70a   : > { %v4345_v33 = vpop.f32.mrb[65].mxu1 }
 0x70b   : > { %9517 = vmatprep.mubr.msk.f32.mxu0 %vm1911_vm0, %v4345_v33 }
 0x70c   : > { %9518 = vmatmul.mubr.msk.f32.gmra.mrb[96].mxu0 %vm1911_vm0, %v9375_v55 }
 0x70d   : > { %v9403_v3 = vpop.f32.mrb[72].mxu0 }
 0x70e   : > { %v4474_v46 = vpop.f32.mrb[73].mxu0 }
 0x714   : > { %v9406_v19 = vpop.f32.mrb[74].mxu0 }
 0x715   : > { %v4484_v29 = vpop.f32.mrb[75].mxu0 }
 0x719   : > { %v9378_v27 = vpop.f32.mrb[66].mxu1 }
 0x71a   : > { %v4355_v50 = vpop.f32.mrb[67].mxu1 }
 0x71b   : > { %9520 = vmatprep.mubr.msk.f32.mxu0 %vm1911_vm0, %v4355_v50 }
 0x71c   : > { %9521 = vmatmul.mubr.msk.f32.gmra.mrb[98].mxu0 %vm1911_vm0, %v9378_v27 }
 0x721   : > { %v9381_v20 = vpop.f32.mrb[68].mxu1 }
 0x722   : > { %v4365_v62 = vpop.f32.mrb[69].mxu1 }
 0x723   : > { %9523 = vmatprep.mubr.msk.f32.mxu0 %vm1911_vm0, %v4365_v62 }
 0x724   : > { %9524 = vmatmul.mubr.msk.f32.gmra.mrb[100].mxu0 %vm1911_vm0, %v9381_v20 }
 0x72d   : > { %v9384_v15 = vpop.f32.mrb[70].mxu1 }
 0x72e   : > { %v4375_v16 = vpop.f32.mrb[71].mxu1 }
 0x72f   : > { %9526 = vmatprep.mubr.msk.f32.mxu0 %vm1911_vm0, %v4375_v16 }
 0x730   : > { %9527 = vmatmul.mubr.msk.f32.gmra.mrb[102].mxu0 %vm1911_vm0, %v9384_v15  ;;  %v11291_v15 = vld [vmem:[#allocation2 + $0x30] sm:$0xff] }
 0x731   : > { %9537 = vmatprep.mubr.msk.f32.mxu0 %vm1911_vm0, %v13899_v36 }
 0x734   : > { %9538 = vmatmul.mubr.msk.f32.vlgmr.msra.gmra.mrb[88].mxu0 %vm1911_vm0, %v13895_v38 }
 0x735   : > { %9540 = vmatprep.mubr.msk.f32.mxu0 %vm1911_vm0, %v13905_v54  ;;  %10028 = vmatpush3.bf16.msra.mxu0 %v8430_v22 }
 0x736   : > { %10030 = vmatprep.subr.bf16.mxu0 %v8431_v17 }
 0x738   : > { %9541 = vmatmul.mubr.msk.f32.gmra.mrb[90].mxu0 %vm1911_vm0, %v13903_v57  ;;  %v8433_v57 = vld [vmem:[%s11951_s26 + $0x38] sm:$0xff]  }
 0x739   : > { %9543 = vmatprep.mubr.msk.f32.mxu0 %vm1911_vm0, %v13918_v40  ;;  %10032 = vmatpush3.bf16.msra.mxu0 %v8431_v17 }
 0x73a   : > { %10034 = vmatprep.subr.bf16.mxu0 %v8432_v41 }
 0x73c   : > { %9544 = vmatmul.mubr.msk.f32.gmra.mrb[92].mxu0 %vm1911_vm0, %v13914_v35 }
 0x73d   : > { %9546 = vmatprep.mubr.msk.f32.mxu0 %vm1911_vm0, %v13931_v44 }
 0x740   : > { %9547 = vmatmul.mubr.msk.f32.gmra.mrb[94].mxu0 %vm1911_vm0, %v13928_v4 }
 0x741   : > { %9549 = vmatprep.mubr.msk.f32.mxu0 %vm1911_vm0, %v13969_v14 }
 0x744   : > { %9550 = vmatmul.mubr.msk.f32.gmra.mrb[96].mxu0 %vm1911_vm0, %v13966_v26 }
 0x745   : > { %9552 = vmatprep.mubr.msk.f32.mxu0 %vm1911_vm0, %v13986_v58 }
 0x747   : > { %v9409_v38 = vpop.f32.mrb[76].mxu0 }
 0x748   : > { %v4494_v36 = vpop.f32.mrb[77].mxu0  ;;  %9553 = vmatmul.mubr.msk.f32.gmra.mrb[98].mxu0 %vm1911_vm0, %v13983_v39 }
 0x749   : > { %9555 = vmatprep.mubr.msk.f32.mxu0 %vm1911_vm0, %v13991_v21  ;;  %v14093_v21 = vld [vmem:[%s15425_s29] ss:$0 sm:$0xff] }
 0x74c   : > { %9556 = vmatmul.mubr.msk.f32.gmra.mrb[100].mxu0 %vm1911_vm0, %v13989_v6 }
 0x74d   : > { %9558 = vmatprep.mubr.msk.f32.mxu0 %vm1911_vm0, %v13995_v31  ;;  %v11284_v31 = vld [vmem:[#allocation2] sm:$0xff] }
 0x750   : > { %9559 = vmatmul.mubr.msk.f32.gmra.mrb[102].mxu0 %vm1911_vm0, %v13993_v1 }
 0x751   : > { %9569 = vmatprep.mubr.msk.f32.mxu0 %vm1911_vm0, %v4474_v46 }
 0x754   : > { %9570 = vmatmul.mubr.msk.f32.vlgmr.msra.gmra.mrb[88].mxu0 %vm1911_vm0, %v9403_v3  ;;  %v11289_v3 = vld [vmem:[#allocation2 + $0x20] sm:$0xff] }
 0x755   : > { %9572 = vmatprep.mubr.msk.f32.mxu0 %vm1911_vm0, %v4484_v29  ;;  %10036 = vmatpush3.bf16.msra.mxu0 %v8432_v41  ;;  %v11290_v29 = vld [vmem:[#allocation2 + $0x38] sm:$0xff]  ;;  %v11292_v41 = vld [vmem:[#allocation2 + $0x48] sm:$0xff] }
 0x756   : > { %10038 = vmatprep.subr.bf16.mxu0 %v8433_v57 }
 0x758   : > { %9573 = vmatmul.mubr.msk.f32.gmra.mrb[90].mxu0 %vm1911_vm0, %v9406_v19 }
 0x759   : > { %9575 = vmatprep.mubr.msk.f32.mxu0 %vm1911_vm0, %v4494_v36  ;;  %10040 = vmatpush3.bf16.msra.mxu0 %v8433_v57 }
 0x75c   : > { %9576 = vmatmul.mubr.msk.f32.gmra.mrb[92].mxu0 %vm1911_vm0, %v9409_v38 }
 0x762   : > { %v9412_v54 = vpop.f32.mrb[78].mxu0 }
 0x763   : > { %v4504_v35 = vpop.f32.mrb[79].mxu0 }
 0x764   : > { %9578 = vmatprep.mubr.msk.f32.mxu0 %vm1911_vm0, %v4504_v35  ;;  %v11293_v35 = vld [vmem:[#allocation2 + $0x40] sm:$0xff] }
 0x765   : > { %v9431_v40 = vpop.f32.mrb[72].mxu1  ;;  %9579 = vmatmul.mubr.msk.f32.gmra.mrb[94].mxu0 %vm1911_vm0, %v9412_v54 }
 0x766   : > { %v4603_v4 = vpop.f32.mrb[73].mxu1 }
 0x767   : > { %9581 = vmatprep.mubr.msk.f32.mxu0 %vm1911_vm0, %v4603_v4 }
 0x769   : > { %9582 = vmatmul.mubr.msk.f32.gmra.mrb[96].mxu0 %vm1911_vm0, %v9431_v40 }
 0x76a   : > { %v9459_v44 = vpop.f32.mrb[80].mxu0 }
 0x76b   : > { %v4732_v32 = vpop.f32.mrb[81].mxu0 }
 0x773   : > { %v9434_v24 = vpop.f32.mrb[74].mxu1 }
 0x774   : > { %v4613_v45 = vpop.f32.mrb[75].mxu1 }
 0x775   : > { %9584 = vmatprep.mubr.msk.f32.mxu0 %vm1911_vm0, %v4613_v45 }
 0x776   : > { %9585 = vmatmul.mubr.msk.f32.gmra.mrb[98].mxu0 %vm1911_vm0, %v9434_v24  ;;  %v9462_v28 = vpop.f32.mrb[82].mxu0 }
 0x777   : > { %v4742_v11 = vpop.f32.mrb[83].mxu0 }
 0x779   : > { %v9437_v26 = vpop.f32.mrb[76].mxu1 }
 0x77a   : > { %v4623_v59 = vpop.f32.mrb[77].mxu1 }
 0x77b   : > { %9587 = vmatprep.mubr.msk.f32.mxu0 %vm1911_vm0, %v4623_v59 }
 0x77c   : > { %9588 = vmatmul.mubr.msk.f32.gmra.mrb[100].mxu0 %vm1911_vm0, %v9437_v26 }
 0x77e   : > { %v9465_v14 = vpop.f32.mrb[84].mxu0 }
 0x77f   : > { %v4752_v63 = vpop.f32.mrb[85].mxu0 }
 0x786   : > { %v9440_v61 = vpop.f32.mrb[78].mxu1 }
 0x787   : > { %v4633_v18 = vpop.f32.mrb[79].mxu1 }
 0x788   : > { %9590 = vmatprep.mubr.msk.f32.mxu0 %vm1911_vm0, %v4633_v18 }
 0x789   : > { %9591 = vmatmul.mubr.msk.f32.gmra.mrb[102].mxu0 %vm1911_vm0, %v9440_v61 }
 0x78a   : > { %9601 = vmatprep.mubr.msk.f32.mxu0 %vm1911_vm0, %v4732_v32  ;;  %v9468_v10 = vpop.f32.mrb[86].mxu0 }
 0x78b   : > { %v4762_v51 = vpop.f32.mrb[87].mxu0 }
 0x78c   : > { %v9487_v13 = vpop.f32.mrb[80].mxu1 }
 0x78d   : > { %9602 = vmatmul.mubr.msk.f32.vlgmr.msra.gmra.mrb[88].mxu0 %vm1911_vm0, %v9459_v44  ;;  %v4861_v23 = vpop.f32.mrb[81].mxu1  ;;  %v11294_v44 = vld [vmem:[#allocation2 + $0x58] sm:$0xff] }
 0x78e   : > { %9604 = vmatprep.mubr.msk.f32.mxu0 %vm1911_vm0, %v4742_v11  ;;  %v11295_v11 = vld [vmem:[#allocation2 + $0x50] sm:$0xff] }
 0x790   : > { %v9490_v43 = vpop.f32.mrb[82].mxu1 }
 0x791   : > { %9605 = vmatmul.mubr.msk.f32.gmra.mrb[90].mxu0 %vm1911_vm0, %v9462_v28  ;;  %v4871_v5 = vpop.f32.mrb[83].mxu1 }
 0x792   : > { %9607 = vmatprep.mubr.msk.f32.mxu0 %vm1911_vm0, %v4752_v63 }
 0x794   : > { %v9493_v52 = vpop.f32.mrb[84].mxu1 }
 0x795   : > { %9608 = vmatmul.mubr.msk.f32.gmra.mrb[92].mxu0 %vm1911_vm0, %v9465_v14  ;;  %v4881_v39 = vpop.f32.mrb[85].mxu1  ;;  %v11296_v14 = vld [vmem:[#allocation2 + $0x68] sm:$0xff] }
 0x796   : > { %9610 = vmatprep.mubr.msk.f32.mxu0 %vm1911_vm0, %v4762_v51  ;;  %v11297_v51 = vld [vmem:[#allocation2 + $0x60] sm:$0xff] }
 0x799   : > { %9611 = vmatmul.mubr.msk.f32.gmra.mrb[94].mxu0 %vm1911_vm0, %v9468_v10 }
 0x79a   : > { %9613 = vmatprep.mubr.msk.f32.mxu0 %vm1911_vm0, %v4861_v23 }
 0x79d   : > { %9614 = vmatmul.mubr.msk.f32.gmra.mrb[96].mxu0 %vm1911_vm0, %v9487_v13 }
 0x79e   : > { %9616 = vmatprep.mubr.msk.f32.mxu0 %vm1911_vm0, %v4871_v5  ;;  %v11298_v5 = vld [vmem:[#allocation2 + $0x78] sm:$0xff] }
 0x7a1   : > { %9617 = vmatmul.mubr.msk.f32.gmra.mrb[98].mxu0 %vm1911_vm0, %v9490_v43 }
 0x7a2   : > { %9619 = vmatprep.mubr.msk.f32.mxu0 %vm1911_vm0, %v4881_v39 }
 0x7a5   : > { %9620 = vmatmul.mubr.msk.f32.gmra.mrb[100].mxu0 %vm1911_vm0, %v9493_v52 }
 0x7c2   : > { %v9496_v42 = vpop.f32.mrb[86].mxu1 }
 0x7c3   : > { %v4891_v58 = vpop.f32.mrb[87].mxu1 }
 0x7c4   : > { %9622 = vmatprep.mubr.msk.f32.mxu0 %vm1911_vm0, %v4891_v58 }
 0x7c5   : > { %9623 = vmatmul.mubr.msk.f32.gmra.mrb[102].mxu0 %vm1911_vm0, %v9496_v42  ;;  %v11299_v42 = vld [vmem:[#allocation2 + $0x70] sm:$0xff] }
 0x860   : > { %v9603_v6 = vpop.f32.mrb[88].mxu0 }
 0x861   : > { %v5641_v1 = vpop.f32.mrb[89].mxu0  ;;  %v5737_v0 = vadd.f32 %v11285_v48, %v9603_v6  ;;  %v10663_v48 = vld [vmem:[%s11928_s30 + $0x24] ss:$16 sps:$4 sm:$0xff]  }
 0x862   : > { %v5736_v49 = vadd.f32 %v11284_v31, %v5641_v1  ;;  %v10660_v31 = vld [vmem:[%s11928_s30 + $0x4] ss:$16 sps:$4 sm:$0xff]  }
 0x863   : > { %v14103_v22 = vadd.f32 %v14093_v21, %v5737_v0  ;;  %10042 = vmatprep.subr.bf16.mxu1 %v10660_v31  ;;  %v10665_v0 = vld [vmem:[%s11928_s30 + $0x20] ss:$16 sps:$4 sm:$0xff]   ;;  %v10669_v31 = vld [vmem:[%s11928_s30 + $0x64] ss:$16 sps:$4 sm:$0xff]  }
 0x864   : > { %v14096_v12 = vadd.f32 %v14093_v21, %v5736_v49  ;;  %v9606_v25 = vpop.f32.mrb[90].mxu0  ;;  %v10662_v49 = vld [vmem:[%s11928_s30] ss:$16 sps:$4 sm:$0xff]  }
 0x865   : > { %v5739_v9 = vadd.f32 %v11286_v2, %v9606_v25  ;;  %v5651_v37 = vpop.f32.mrb[91].mxu0  ;;  %10044 = vmatpush1.bf16.msra.mxu1 %v10662_v49  ;;  %v10666_v25 = vld [vmem:[%s11928_s30 + $0x44] ss:$16 sps:$4 sm:$0xff]   ;;  %v10668_v2 = vld [vmem:[%s11928_s30 + $0x40] ss:$16 sps:$4 sm:$0xff]  }
 0x866   : > { %5777 = vadd.xlane.f32.xlu0 %v14096_v12  ;;  %v5738_v60 = vadd.f32 %v11287_v8, %v5651_v37  ;;  %10046 = vmatprep.subr.bf16.mxu1 %v10663_v48 }
 0x867   : > { %v14100_v56 = vadd.f32 %v14093_v21, %v5739_v9 }
 0x868   : > { %v9609_v34 = vpop.f32.mrb[92].mxu0  ;;  %v14111_v33 = vadd.f32 %v14093_v21, %v5738_v60 }
 0x869   : > { %v5741_v30 = vadd.f32 %v11288_v53, %v9609_v34  ;;  %5783 = vadd.xlane.f32.xlu1 %v14100_v56  ;;  %v5661_v47 = vpop.f32.mrb[93].mxu0  ;;  %10048 = vmatpush1.bf16.msra.mxu1 %v10665_v0  ;;  %v10671_v0 = vld [vmem:[%s11928_s30 + $0x60] ss:$16 sps:$4 sm:$0xff]  }
 0x86a   : > { %5779 = vadd.xlane.f32.xlu0 %v14103_v22  ;;  %v5740_v46 = vadd.f32 %v11289_v3, %v5661_v47  ;;  %10050 = vmatprep.subr.bf16.mxu1 %v10666_v25 }
 0x86b   : > { %v14108_v55 = vadd.f32 %v14093_v21, %v5741_v30 }
 0x86c   : > { %v9612_v19 = vpop.f32.mrb[94].mxu0  ;;  %v14119_v62 = vadd.f32 %v14093_v21, %v5740_v46 }
 0x86d   : > { %v5743_v27 = vadd.f32 %v11290_v29, %v9612_v19  ;;  %5787 = vadd.xlane.f32.xlu1 %v14108_v55  ;;  %v5671_v50 = vpop.f32.mrb[95].mxu0  ;;  %10052 = vmatpush1.bf16.msra.mxu1 %v10668_v2 }
 0x86e   : > { %5781 = vadd.xlane.f32.xlu0 %v14111_v33  ;;  %v5742_v16 = vadd.f32 %v11291_v15, %v5671_v50  ;;  %10054 = vmatprep.subr.bf16.mxu1 %v10669_v31 }
 0x86f   : > { %v14116_v20 = vadd.f32 %v14093_v21, %v5743_v27 }
 0x870   : > { %v9615_v17 = vpop.f32.mrb[96].mxu0  ;;  %v14127_v54 = vadd.f32 %v14093_v21, %v5742_v16 }
 0x871   : > { %v5745_v38 = vadd.f32 %v11292_v41, %v9615_v17  ;;  %5791 = vadd.xlane.f32.xlu1 %v14116_v20  ;;  %v5681_v36 = vpop.f32.mrb[97].mxu0  ;;  %10056 = vmatpush1.bf16.msra.mxu1 %v10671_v0 }
 0x872   : > { %5785 = vadd.xlane.f32.xlu0 %v14119_v62  ;;  %v5744_v40 = vadd.f32 %v11293_v35, %v5681_v36 }
 0x873   : > { %v14124_v57 = vadd.f32 %v14093_v21, %v5745_v38 }
 0x874   : > { %v9618_v4 = vpop.f32.mrb[98].mxu0  ;;  %v14135_v28 = vadd.f32 %v14093_v21, %v5744_v40 }
 0x875   : > { %v5747_v32 = vadd.f32 %v11294_v44, %v9618_v4  ;;  %5795 = vadd.xlane.f32.xlu1 %v14124_v57  ;;  %v5691_v24 = vpop.f32.mrb[99].mxu0 }
 0x876   : > { %5789 = vadd.xlane.f32.xlu0 %v14127_v54  ;;  %v5746_v26 = vadd.f32 %v11295_v11, %v5691_v24 }
 0x877   : > { %v14132_v45 = vadd.f32 %v14093_v21, %v5747_v32 }
 0x878   : > { %v9621_v59 = vpop.f32.mrb[100].mxu0  ;;  %v14143_v10 = vadd.f32 %v14093_v21, %v5746_v26 }
 0x879   : > { %v5749_v63 = vadd.f32 %v11296_v14, %v9621_v59  ;;  %5799 = vadd.xlane.f32.xlu1 %v14132_v45  ;;  %v5701_v61 = vpop.f32.mrb[101].mxu0 }
 0x87a   : > { %5793 = vadd.xlane.f32.xlu0 %v14135_v28  ;;  %v5748_v13 = vadd.f32 %v11297_v51, %v5701_v61 }
 0x87b   : > { %v14140_v18 = vadd.f32 %v14093_v21, %v5749_v63 }
 0x87c   : > { %v14148_v23 = vadd.f32 %v14093_v21, %v5748_v13 }
 0x87d   : > { %15426 = vst [vmem:[#allocation66_spill] sm:$0xff] %v14140_v18  ;;  %5803 = vadd.xlane.f32.xlu1 %v14140_v18 }
 0x87e   : > { %5797 = vadd.xlane.f32.xlu0 %v14143_v10  ;;  %15427 = vst [vmem:[#allocation43_spill] sm:$0xff] %v14148_v23 }
 0x882   : > { %5801 = vadd.xlane.f32.xlu0 %v14148_v23 }
 0x898   : > { %v9624_v43 = vpop.f32.mrb[102].mxu0 }
 0x899   : > { %v5751_v52 = vadd.f32 %v11298_v5, %v9624_v43  ;;  %v5711_v39 = vpop.f32.mrb[103].mxu0 }
 0x89a   : > { %v5750_v58 = vadd.f32 %v11299_v42, %v5711_v39 }
 0x89b   : > { %v14152_v6 = vadd.f32 %v14093_v21, %v5751_v52 }
 0x89c   : > { %v14155_v1 = vadd.f32 %v14093_v21, %v5750_v58 }
 0x89d   : > { %15428 = vst [vmem:[#allocation46_spill] sm:$0xff] %v14152_v6  ;;  %5807 = vadd.xlane.f32.xlu1 %v14152_v6 }
 0x89e   : > { %15429 = vst [vmem:[#allocation45_spill] sm:$0xff] %v14155_v1  ;;  %5805 = vadd.xlane.f32.xlu0 %v14155_v1 }
 0x8f3   : > { %v5778_v9 = vpop.xlane.xlu0 %5777 }
 0x8f4   : > { %v5809_v37 = vmul.f32 0.0078125, %v5778_v9 }
 0x8f6   : > { %v14166_v21 = vsub.f32 %v14096_v12, %v5809_v37  ;;  %v5784_v8 = vpop.xlane.xlu1 %5783 }
 0x8f7   : > { %v5812_v60 = vmul.f32 0.0078125, %v5784_v8  ;;  %v5780_v34 = vpop.xlane.xlu0 %5779 }
 0x8f8   : > { %v5810_v53 = vmul.f32 0.0078125, %v5780_v34  ;;  %v5841_v30 = vmul.f32 %v14166_v21, %v14166_v21 }
 0x8f9   : > { %v14174_v46 = vsub.f32 %v14100_v56, %v5812_v60  ;;  %v10672_v60 = vld [vmem:[%s11928_s30 + $0x84] ss:$16 sps:$4 sm:$0xff]  }
 0x8fa   : > { %v14171_v47 = vsub.f32 %v14103_v22, %v5810_v53  ;;  %v5788_v3 = vpop.xlane.xlu1 %5787  ;;  %5857 = vadd.xlane.f32.xlu0 %v5841_v30  ;;  %v10674_v53 = vld [vmem:[%s11928_s30 + $0x80] ss:$16 sps:$4 sm:$0xff]   ;;  %10058 = vmatprep.subr.bf16.mxu1 %v10672_v60 }
 0x8fb   : > { %v5782_v19 = vpop.xlane.xlu0 %5781  ;;  %v5814_v29 = vmul.f32 0.0078125, %v5788_v3  ;;  %v5844_v41 = vmul.f32 %v14174_v46, %v14174_v46  ;;  %10060 = vmatpush1.bf16.msra.mxu1 %v10674_v53 }
 0x8fc   : > { %v5811_v27 = vmul.f32 0.0078125, %v5782_v19  ;;  %v5842_v50 = vmul.f32 %v14171_v47, %v14171_v47 }
 0x8fd   : > { %v14184_v38 = vsub.f32 %v14108_v55, %v5814_v29 }
 0x8fe   : > { %v14179_v15 = vsub.f32 %v14111_v33, %v5811_v27  ;;  %v5792_v16 = vpop.xlane.xlu1 %5791  ;;  %5859 = vadd.xlane.f32.xlu1 %v5842_v50  ;;  %v10675_v50 = vld [vmem:[%s11928_s30 + $0xa4] ss:$16 sps:$4 sm:$0xff]  }
 0x8ff   : > { %v5786_v17 = vpop.xlane.xlu0 %5785  ;;  %v5816_v36 = vmul.f32 0.0078125, %v5792_v16  ;;  %v5846_v59 = vmul.f32 %v14184_v38, %v14184_v38  ;;  %v10677_v16 = vld [vmem:[%s11928_s30 + $0xa0] ss:$16 sps:$4 sm:$0xff]   ;;  %10062 = vmatprep.subr.bf16.mxu1 %v10675_v50 }
 0x900   : > { %v5813_v35 = vmul.f32 0.0078125, %v5786_v17  ;;  %v5843_v40 = vmul.f32 %v14179_v15, %v14179_v15  ;;  %10064 = vmatpush1.bf16.msra.mxu1 %v10677_v16 }
 0x901   : > { %v14192_v11 = vsub.f32 %v14116_v20, %v5816_v36  ;;  %v10678_v36 = vld [vmem:[%s11928_s30 + $0xc4] ss:$16 sps:$4 sm:$0xff]  }
 0x902   : > { %v14189_v4 = vsub.f32 %v14119_v62, %v5813_v35  ;;  %v5796_v44 = vpop.xlane.xlu1 %5795  ;;  %5863 = vadd.xlane.f32.xlu1 %v5844_v41  ;;  %5861 = vadd.xlane.f32.xlu0 %v5843_v40  ;;  %v10680_v35 = vld [vmem:[%s11928_s30 + $0xc0] ss:$16 sps:$4 sm:$0xff]   ;;  %v10681_v40 = vld [vmem:[%s11928_s30 + $0xe4] ss:$16 sps:$4 sm:$0xff]  }
 0x903   : > { %v5818_v32 = vmul.f32 0.0078125, %v5796_v44  ;;  %v5790_v24 = vpop.xlane.xlu0 %5789  ;;  %v5848_v52 = vmul.f32 %v14192_v11, %v14192_v11  ;;  %10066 = vmatprep.subr.bf16.mxu1 %v10678_v36  ;;  %v10683_v44 = vld [vmem:[%s11928_s30 + $0xe0] ss:$16 sps:$4 sm:$0xff]  }
 0x904   : > { %v5815_v26 = vmul.f32 0.0078125, %v5790_v24  ;;  %v5845_v14 = vmul.f32 %v14189_v4, %v14189_v4  ;;  %10068 = vmatpush1.bf16.msra.mxu1 %v10680_v35 }
 0x905   : > { %v14202_v51 = vsub.f32 %v14124_v57, %v5818_v32  ;;  %10070 = vmatprep.subr.bf16.mxu1 %v10681_v40  ;;  %v10684_v32 = vld [vmem:[%s11928_s30 + $0xc] ss:$16 sps:$4 sm:$0xff]  }
 0x906   : > { %v14199_v63 = vsub.f32 %v14127_v54, %v5815_v26  ;;  %v5800_v61 = vpop.xlane.xlu1 %5799  ;;  %5867 = vadd.xlane.f32.xlu1 %v5846_v59  ;;  %5865 = vadd.xlane.f32.xlu0 %v5845_v14 }
 0x907   : > { %v5794_v13 = vpop.xlane.xlu0 %5793  ;;  %v5820_v43 = vmul.f32 0.0078125, %v5800_v61  ;;  %v5850_v48 = vmul.f32 %v14202_v51, %v14202_v51 }
 0x908   : > { %v5817_v5 = vmul.f32 0.0078125, %v5794_v13  ;;  %v5847_v39 = vmul.f32 %v14199_v63, %v14199_v63  ;;  %10072 = vmatpush1.bf16.msra.mxu1 %v10683_v44 }
 0x909   : > { %v14216_v25 = vsub.f32 %v14132_v45, %v5820_v43  ;;  %10074 = vmatprep.subr.bf16.mxu1 %v10684_v32  ;;  %v14269_v32 = vld [vmem:[%s15431_s1] ss:$0 sm:$0xff] }
 0x90a   : > { %v14209_v42 = vsub.f32 %v14135_v28, %v5817_v5  ;;  %v5804_v58 = vpop.xlane.xlu1 %5803  ;;  %5871 = vadd.xlane.f32.xlu1 %v5848_v52  ;;  %5869 = vadd.xlane.f32.xlu0 %v5847_v39 }
 0x90b   : > { %v5798_v49 = vpop.xlane.xlu0 %5797  ;;  %v5822_v2 = vmul.f32 0.0078125, %v5804_v58  ;;  %v5852_v19 = vmul.f32 %v14216_v25, %v14216_v25 }
 0x90c   : > { %v5819_v9 = vmul.f32 0.0078125, %v5798_v49  ;;  %v5849_v37 = vmul.f32 %v14209_v42, %v14209_v42 }
 0x90d   : > { %v14226_v30 = vsub.f32 %v14140_v18, %v5822_v2 }
 0x90e   : > { %v14221_v8 = vsub.f32 %v14143_v10, %v5819_v9  ;;  %5875 = vadd.xlane.f32.xlu1 %v5850_v48  ;;  %5873 = vadd.xlane.f32.xlu0 %v5849_v37 }
 0x90f   : > { %v5802_v34 = vpop.xlane.xlu0 %5801  ;;  %v5854_v17 = vmul.f32 %v14226_v30, %v14226_v30 }
 0x910   : > { %v5821_v3 = vmul.f32 0.0078125, %v5802_v34  ;;  %v5851_v29 = vmul.f32 %v14221_v8, %v14221_v8 }
 0x912   : > { %v14233_v27 = vsub.f32 %v14148_v23, %v5821_v3  ;;  %5879 = vadd.xlane.f32.xlu1 %v5852_v19  ;;  %5877 = vadd.xlane.f32.xlu0 %v5851_v29 }
 0x914   : > { %v5853_v41 = vmul.f32 %v14233_v27, %v14233_v27 }
 0x916   : > { %5883 = vadd.xlane.f32.xlu1 %v5854_v17  ;;  %5881 = vadd.xlane.f32.xlu0 %v5853_v41  ;;  %v14261_v41 = vld [vmem:[%s15430_s17] ss:$0 sm:$0xff] }
 0x92a   : > { %v5808_v24 = vpop.xlane.xlu1 %5807 }
 0x92b   : > { %v5824_v26 = vmul.f32 0.0078125, %v5808_v24  ;;  %v5806_v59 = vpop.xlane.xlu0 %5805 }
 0x92c   : > { %v5823_v14 = vmul.f32 0.0078125, %v5806_v59  ;;  %v10686_v59 = vld [vmem:[%s11928_s30 + $0x8] ss:$16 sps:$4 sm:$0xff]  }
 0x92d   : > { %v14247_v61 = vsub.f32 %v14152_v6, %v5824_v26 }
 0x92e   : > { %v14250_v13 = vsub.f32 %v14155_v1, %v5823_v14 }
 0x92f   : > { %v5856_v43 = vmul.f32 %v14247_v61, %v14247_v61 }
 0x930   : > { %v5855_v5 = vmul.f32 %v14250_v13, %v14250_v13 }
 0x931   : > { %5887 = vadd.xlane.f32.xlu1 %v5856_v43 }
 0x932   : > { %5885 = vadd.xlane.f32.xlu0 %v5855_v5 }
 0x987   : > { %v5858_v52 = vpop.xlane.xlu0 %5857 }
 0x988   : > { %v5889_v39 = vmul.f32 0.0078125, %v5858_v52  ;;  %v10687_v52 = vld [vmem:[%s11928_s30 + $0x2c] ss:$16 sps:$4 sm:$0xff]  }
 0x98a   : > { %v5905_v58 = vadd.f32 1e-05, %v5889_v39 }
 0x98b   : > { %v5860_v31 = vpop.xlane.xlu1 %5859 }
 0x98c   : > { %10996 = vrsqrt.f32 %v5905_v58  ;;  %v5890_v49 = vmul.f32 0.0078125, %v5860_v31 }
 0x98e   : > { %v5906_v48 = vadd.f32 1e-05, %v5890_v49  ;;  %v10689_v49 = vld [vmem:[%s11928_s30 + $0x28] ss:$16 sps:$4 sm:$0xff]  }
 0x98f   : > { %v5864_v0 = vpop.xlane.xlu1 %5863  ;;  %v5862_v2 = vpop.xlane.xlu0 %5861 }
 0x990   : > { %10998 = vrsqrt.f32 %v5906_v48  ;;  %v5892_v9 = vmul.f32 0.0078125, %v5864_v0  ;;  %v5891_v37 = vmul.f32 0.0078125, %v5862_v2 }
 0x992   : > { %v5908_v60 = vadd.f32 1e-05, %v5892_v9  ;;  %v5907_v34 = vadd.f32 1e-05, %v5891_v37 }
 0x993   : > { %v5868_v53 = vpop.xlane.xlu1 %5867  ;;  %v5866_v3 = vpop.xlane.xlu0 %5865 }
 0x994   : > { %11000 = vrsqrt.f32 %v5908_v60  ;;  %v5894_v19 = vmul.f32 0.0078125, %v5868_v53  ;;  %v5893_v29 = vmul.f32 0.0078125, %v5866_v3 }
 0x995   : > { %11002 = vrsqrt.f32 %v5907_v34 }
 0x996   : > { %v10997_v50 = vpop.eup %10996  ;;  %v5910_v16 = vadd.f32 1e-05, %v5894_v19  ;;  %v5909_v17 = vadd.f32 1e-05, %v5893_v29 }
 0x997   : > { %v5937_v36 = vmul.f32 %v10997_v50, %v14166_v21  ;;  %v5870_v35 = vpop.xlane.xlu0 %5869  ;;  %v5872_v40 = vpop.xlane.xlu1 %5871  ;;  %v10692_v50 = vld [vmem:[%s11928_s30 + $0x48] ss:$16 sps:$4 sm:$0xff]  }
 0x998   : > { %v5895_v44 = vmul.f32 0.0078125, %v5870_v35  ;;  %11004 = vrsqrt.f32 %v5909_v17  ;;  %v5896_v14 = vmul.f32 0.0078125, %v5872_v40 }
 0x999   : > { %v5959_v24 = vmul.f32 %v14261_v41, %v5937_v36  ;;  %11006 = vrsqrt.f32 %v5910_v16  ;;  %v10693_v36 = vld [vmem:[%s11928_s30 + $0x6c] ss:$16 sps:$4 sm:$0xff]  }
 0x99a   : > { %v10999_v26 = vpop.eup %10998  ;;  %v5911_v43 = vadd.f32 1e-05, %v5895_v44  ;;  %v5912_v0 = vadd.f32 1e-05, %v5896_v14 }
 0x99b   : > { %v14274_v21 = vadd.f32 %v14269_v32, %v5959_v24  ;;  %v5938_v5 = vmul.f32 %v10999_v26, %v14171_v47  ;;  %v5874_v39 = vpop.xlane.xlu0 %5873  ;;  %v10690_v47 = vld [vmem:[%s11928_s30 + $0x4c] ss:$16 sps:$4 sm:$0xff]   ;;  %v5876_v37 = vpop.xlane.xlu1 %5875  ;;  %v10695_v24 = vld [vmem:[%s11928_s30 + $0x68] ss:$16 sps:$4 sm:$0xff]  }
 0x99c   : > { %11008 = vrsqrt.f32 %v5911_v43  ;;  %v5897_v2 = vmul.f32 0.0078125, %v5874_v39  ;;  %v5898_v19 = vmul.f32 0.0078125, %v5876_v37 }
 0x99d   : > { %6180 = vmatmul.mubr.f32.vlgmr.msra.gmra.mrb[88].mxu1 %v14274_v21  ;;  %v5960_v58 = vmul.f32 %v14261_v41, %v5938_v5  ;;  %11010 = vrsqrt.f32 %v5912_v0  ;;  %v10699_v0 = vld [vmem:[%s11928_s30 + $0xac] ss:$16 sps:$4 sm:$0xff]  }
 0x99e   : > { %v11001_v31 = vpop.eup %11000  ;;  %10076 = vmatpush1.bf16.msra.mxu1 %v10686_v59  ;;  %6185 = vmatprep.mubr.f32.mxu1 %v15424_v7  ;;  %v5913_v29 = vadd.f32 1e-05, %v5897_v2  ;;  %v5914_v40 = vadd.f32 1e-05, %v5898_v19  ;;  %v10702_v19 = vld [vmem:[%s11928_s30 + $0xcc] ss:$16 sps:$4 sm:$0xff]  }
 0x99f   : > { %v11003_v48 = vpop.eup %11002  ;;  %v14283_v9 = vadd.f32 %v14269_v32, %v5960_v58  ;;  %10078 = vmatprep.subr.bf16.mxu1 %v10687_v52  ;;  %v5940_v34 = vmul.f32 %v11001_v31, %v14174_v46  ;;  %v5878_v17 = vpop.xlane.xlu0 %5877  ;;  %v10698_v58 = vld [vmem:[%s11928_s30 + $0x88] ss:$16 sps:$4 sm:$0xff]  }
 0x9a0   : > { %v5939_v60 = vmul.f32 %v11003_v48, %v14179_v15  ;;  %11012 = vrsqrt.f32 %v5913_v29  ;;  %v5899_v44 = vmul.f32 0.0078125, %v5878_v17  ;;  %v5880_v26 = vpop.xlane.xlu1 %5879  ;;  %v10704_v17 = vld [vmem:[%s11928_s30 + $0xc8] ss:$16 sps:$4 sm:$0xff]  }
 0x9a1   : > { %6186 = vmatmul.mubr.f32.gmra.mrb[90].mxu1 %v14283_v9  ;;  %v5962_v46 = vmul.f32 %v14261_v41, %v5940_v34  ;;  %11014 = vrsqrt.f32 %v5914_v40  ;;  %v5900_v52 = vmul.f32 0.0078125, %v5880_v26 }
 0x9a2   : > { %6191 = vmatprep.mubr.f32.mxu1 %v15424_v7  ;;  %v5961_v53 = vmul.f32 %v14261_v41, %v5939_v60  ;;  %10080 = vmatpush1.bf16.msra.mxu1 %v10689_v49  ;;  %v11005_v3 = vpop.eup %11004  ;;  %v5915_v39 = vadd.f32 1e-05, %v5899_v44  ;;  %v10701_v60 = vld [vmem:[%s11928_s30 + $0xa8] ss:$16 sps:$4 sm:$0xff]  }
 0x9a3   : > { %10082 = vmatprep.subr.bf16.mxu1 %v10690_v47  ;;  %v11007_v16 = vpop.eup %11006  ;;  %v5941_v35 = vmul.f32 %v11005_v3, %v14189_v4  ;;  %v14302_v59 = vadd.f32 %v14269_v32, %v5962_v46  ;;  %v10696_v4 = vld [vmem:[%s11928_s30 + $0x8c] ss:$16 sps:$4 sm:$0xff]   ;;  %v5882_v31 = vpop.xlane.xlu0 %5881  ;;  %v5916_v47 = vadd.f32 1e-05, %v5900_v52 }
 0x9a4   : > { %v14293_v15 = vadd.f32 %v14269_v32, %v5961_v53  ;;  %v5942_v43 = vmul.f32 %v11007_v16, %v14184_v38  ;;  %11016 = vrsqrt.f32 %v5915_v39  ;;  %v5901_v37 = vmul.f32 0.0078125, %v5882_v31  ;;  %v5884_v34 = vpop.xlane.xlu1 %5883 }
 0x9a5   : > { %v5963_v14 = vmul.f32 %v14261_v41, %v5941_v35  ;;  %11018 = vrsqrt.f32 %v5916_v47  ;;  %v10705_v35 = vld [vmem:[%s11928_s30 + $0xec] ss:$16 sps:$4 sm:$0xff]  }
 0x9a6   : > { %6192 = vmatmul.mubr.f32.gmra.mrb[92].mxu1 %v14293_v15  ;;  %v11009_v5 = vpop.eup %11008  ;;  %v5964_v38 = vmul.f32 %v14261_v41, %v5942_v43  ;;  %v5917_v16 = vadd.f32 1e-05, %v5901_v37 }
 0x9a7   : > { %6197 = vmatprep.mubr.f32.mxu1 %v15424_v7  ;;  %10084 = vmatpush1.bf16.msra.mxu1 %v10692_v50  ;;  %v14311_v49 = vadd.f32 %v14269_v32, %v5963_v14  ;;  %v5943_v48 = vmul.f32 %v11009_v5, %v14199_v63  ;;  %v11011_v2 = vpop.eup %11010  ;;  %v5902_v50 = vmul.f32 0.0078125, %v5884_v34 }
 0x9a8   : > { %10086 = vmatprep.subr.bf16.mxu1 %v10693_v36  ;;  %v14320_v53 = vadd.f32 %v14269_v32, %v5964_v38  ;;  %v5944_v3 = vmul.f32 %v11011_v2, %v14192_v11  ;;  %11020 = vrsqrt.f32 %v5917_v16 }
 0x9a9   : > { %v5965_v63 = vmul.f32 %v14261_v41, %v5943_v48  ;;  %v5918_v44 = vadd.f32 1e-05, %v5902_v50 }
 0x9aa   : > { %6198 = vmatmul.mubr.f32.gmra.mrb[94].mxu1 %v14302_v59  ;;  %v11013_v29 = vpop.eup %11012  ;;  %v5966_v36 = vmul.f32 %v14261_v41, %v5944_v3 }
 0x9ab   : > { %6203 = vmatprep.mubr.f32.mxu1 %v15424_v7  ;;  %10088 = vmatpush1.bf16.msra.mxu1 %v10695_v24  ;;  %v14329_v46 = vadd.f32 %v14269_v32, %v5965_v63  ;;  %v5945_v11 = vmul.f32 %v11013_v29, %v14209_v42  ;;  %v11015_v40 = vpop.eup %11014  ;;  %v10707_v24 = vld [vmem:[%s11928_s30 + $0xe8] ss:$16 sps:$4 sm:$0xff]   ;;  %11022 = vrsqrt.f32 %v5918_v44  ;;  %s15432_s30 = sld [smem:[#allocation36_spill]] }
 0x9ac   : > { %10090 = vmatprep.subr.bf16.mxu1 %v10696_v4  ;;  %v14338_v26 = vadd.f32 %v14269_v32, %v5966_v36  ;;  %v5946_v43 = vmul.f32 %v11015_v40, %v14202_v51 }
 0x9ad   : > { %v5967_v14 = vmul.f32 %v14261_v41, %v5945_v11 }
 0x9ae   : > { %6204 = vmatmul.mubr.f32.gmra.mrb[96].mxu1 %v14311_v49  ;;  %v11017_v42 = vpop.eup %11016  ;;  %v5968_v5 = vmul.f32 %v14261_v41, %v5946_v43  ;;  %v8439_v43 = vld [vmem:[%s11980_s20 + $0x30] sm:$0xff]  }
 0x9af   : > { %6209 = vmatprep.mubr.f32.mxu1 %v15424_v7  ;;  %10092 = vmatpush1.bf16.msra.mxu1 %v10698_v58  ;;  %v14345_v4 = vadd.f32 %v14269_v32, %v5967_v14  ;;  %v5947_v52 = vmul.f32 %v11017_v42, %v14221_v8  ;;  %v11019_v39 = vpop.eup %11018  ;;  %v8447_v14 = vld [vmem:[%s11980_s20 + $0x70] sm:$0xff]   ;;  %v8448_v42 = vld [vmem:[%s11980_s20 + $0x78] sm:$0xff]  }
 0x9b0   : > { %10094 = vmatprep.subr.bf16.mxu1 %v10699_v0  ;;  %v14352_v38 = vadd.f32 %v14269_v32, %v5968_v5  ;;  %v5948_v0 = vmul.f32 %v11019_v39, %v14216_v25  ;;  %v8457_v5 = vld [vmem:[%s11980_s20 + $0xc0] sm:$0xff]   ;;  %v14450_v39 = vld [vmem:[%s11980_s20 + $0xc8] sm:$0xff]  }
 0x9b1   : > { %v5969_v48 = vmul.f32 %v14261_v41, %v5947_v52  ;;  %v14446_v52 = vld [vmem:[%s11980_s20 + $0x80] sm:$0xff]  }
 0x9b2   : > { %6210 = vmatmul.mubr.f32.gmra.mrb[98].mxu1 %v14320_v53  ;;  %v11021_v2 = vpop.eup %11020  ;;  %v5970_v34 = vmul.f32 %v14261_v41, %v5948_v0  ;;  %v14478_v0 = vld [vmem:[%s11980_s20 + $0xa0] sm:$0xff]  }
 0x9b3   : > { %6215 = vmatprep.mubr.f32.mxu1 %v15424_v7  ;;  %10096 = vmatpush1.bf16.msra.mxu1 %v10701_v60  ;;  %v14359_v60 = vadd.f32 %v14269_v32, %v5969_v48  ;;  %v5949_v63 = vmul.f32 %v11021_v2, %v14233_v27  ;;  %v14474_v48 = vld [vmem:[%s11980_s20 + $0xe0] sm:$0xff]   ;;  %v14482_v2 = vld [vmem:[%s11980_s20 + $0xe8] sm:$0xff]  }
 0x9b4   : > { %10098 = vmatprep.subr.bf16.mxu1 %v10702_v19  ;;  %v14366_v25 = vadd.f32 %v14269_v32, %v5970_v34  ;;  %v14501_v34 = vld [vmem:[%s11980_s20 + $0xb8] sm:$0xff]  }
 0x9b5   : > { %v11023_v3 = vpop.eup %11022  ;;  %v5971_v19 = vmul.f32 %v14261_v41, %v5949_v63  ;;  %v14506_v63 = vld [vmem:[%s15432_s30] sm:$0xf] }
 0x9b6   : > { %6216 = vmatmul.mubr.f32.gmra.mrb[100].mxu1 %v14329_v46  ;;  %v5950_v29 = vmul.f32 %v11023_v3, %v14226_v30  ;;  %v15433_v3 = vld [vmem:[#allocation37_spill] sm:$0xff] }
 0x9b7   : > { %6221 = vmatprep.mubr.f32.mxu1 %v15424_v7  ;;  %10100 = vmatpush1.bf16.msra.mxu1 %v10704_v17  ;;  %v14373_v50 = vadd.f32 %v14269_v32, %v5971_v19 }
 0x9b8   : > { %10102 = vmatprep.subr.bf16.mxu1 %v10705_v35  ;;  %v5972_v27 = vmul.f32 %v14261_v41, %v5950_v29  ;;  %v15435_v29 = vsub.s32 1, %v15433_v3 }
 0x9ba   : > { %6222 = vmatmul.mubr.f32.gmra.mrb[102].mxu1 %v14338_v26  ;;  %v14379_v36 = vadd.f32 %v14269_v32, %v5972_v27 }
 0x9bb   : > { %6227 = vmatprep.mubr.f32.mxu1 %v15424_v7  ;;  %10104 = vmatpush1.bf16.msra.mxu1 %v10707_v24  ;;  %v8446_v24 = vld [vmem:[%s11980_s20 + $0x68] sm:$0xff]  }
 0x9bc   : > { %10169 = vmatprep.subr.bf16.mxu1 %v8457_v5 }
 0x9be   : > { %6228 = vmatmul.mubr.f32.gmra.mrb[104].mxu1 %v14345_v4  ;;  %v5888_v58 = vpop.xlane.xlu1 %5887 }
 0x9bf   : > { %6233 = vmatprep.mubr.f32.mxu1 %v15424_v7  ;;  %v5904_v51 = vmul.f32 0.0078125, %v5888_v58  ;;  %v5886_v31 = vpop.xlane.xlu0 %5885  ;;  %v14454_v58 = vld [vmem:[%s11980_s20 + $0x88] sm:$0xff]  }
 0x9c0   : > { %v5903_v47 = vmul.f32 0.0078125, %v5886_v31  ;;  %v14466_v31 = vld [vmem:[%s11980_s20 + $0xd8] sm:$0xff]  }
 0x9c1   : > { %v5920_v37 = vadd.f32 1e-05, %v5904_v51  ;;  %v14462_v51 = vld [vmem:[%s11980_s20 + $0x90] sm:$0xff]  }
 0x9c2   : > { %6234 = vmatmul.mubr.f32.gmra.mrb[106].mxu1 %v14352_v38  ;;  %v5919_v8 = vadd.f32 1e-05, %v5903_v47  ;;  %v14486_v47 = vld [vmem:[%s11980_s20 + $0xa8] sm:$0xff]  }
 0x9c3   : > { %6239 = vmatprep.mubr.f32.mxu1 %v15424_v7  ;;  %11024 = vrsqrt.f32 %v5920_v37  ;;  %v14490_v37 = vld [vmem:[%s11980_s20 + $0xf0] sm:$0xff]  }
 0x9c4   : > { %11026 = vrsqrt.f32 %v5919_v8  ;;  %v14494_v8 = vld [vmem:[%s11980_s20 + $0xb0] sm:$0xff]  }
 0x9c6   : > { %6240 = vmatmul.mubr.f32.gmra.mrb[108].mxu1 %v14359_v60 }
 0x9c7   : > { %6245 = vmatprep.mubr.f32.mxu1 %v15424_v7 }
 0x9ca   : > { %6246 = vmatmul.mubr.f32.gmra.mrb[110].mxu1 %v14366_v25 }
 0x9cb   : > { %6251 = vmatprep.mubr.f32.mxu1 %v15424_v7 }
 0x9cd   : > { %v11025_v16 = vpop.eup %11024 }
 0x9ce   : > { %6252 = vmatmul.mubr.f32.gmra.mrb[112].mxu1 %v14373_v50  ;;  %v11027_v17 = vpop.eup %11026  ;;  %v5952_v11 = vmul.f32 %v11025_v16, %v14247_v61  ;;  %v8441_v61 = vld [vmem:[%s11980_s20 + $0x40] sm:$0xff]  }
 0x9cf   : > { %6257 = vmatprep.mubr.f32.mxu1 %v15424_v7  ;;  %v5951_v30 = vmul.f32 %v11027_v17, %v14250_v13  ;;  %10106 = vmatprep.subr.bf16.mxu0 %v8441_v61 }
 0x9d0   : > { %v5974_v44 = vmul.f32 %v14261_v41, %v5952_v11 }
 0x9d1   : > { %v5973_v35 = vmul.f32 %v14261_v41, %v5951_v30  ;;  %v8300_v41 = vld [vmem:[%s11980_s20] sm:$0xff]  }
 0x9d2   : > { %6258 = vmatmul.mubr.f32.gmra.mrb[114].mxu1 %v14379_v36  ;;  %v14393_v13 = vadd.f32 %v14269_v32, %v5974_v44  ;;  %10108 = vmatpush3.bf16.msra.mxu0 %v8300_v41 }
 0x9d3   : > { %6263 = vmatprep.mubr.f32.mxu1 %v15424_v7  ;;  %v14387_v40 = vadd.f32 %v14269_v32, %v5973_v35  ;;  %v8442_v32 = vld [vmem:[%s11980_s20 + $0x48] sm:$0xff]  }
 0x9d4   : > { %10110 = vmatprep.subr.bf16.mxu0 %v8442_v32 }
 0x9d6   : > { %6264 = vmatmul.mubr.f32.gmra.mrb[116].mxu1 %v14387_v40 }
 0x9d7   : > { %6269 = vmatprep.mubr.f32.mxu1 %v15424_v7 }
 0x9da   : > { %6270 = vmatmul.mubr.f32.gmra.mrb[118].mxu1 %v14393_v13 }
 0x9db   : > { %6340 = vmatprep.mubr.f32.mxu1 %v15424_v7 }
 0x9de   : > { %6341 = vmatmul.mubr.f32.vlgmr.msra.gmra.mrb[120].mxu1 %v14274_v21  ;;  %v8434_v21 = vld [vmem:[%s11980_s20 + $0x8] sm:$0xff]  }
 0x9df   : > { %6346 = vmatprep.mubr.f32.mxu1 %v15424_v7  ;;  %10112 = vmatpush3.bf16.msra.mxu0 %v8434_v21 }
 0x9e0   : > { %10177 = vmatpush3.bf16.msra.mxu1 %v14446_v52 }
 0x9e1   : > { %10170 = vmatprep.subr.bf16.mxu1 %v14450_v39 }
 0x9e2   : > { %6347 = vmatmul.mubr.f32.gmra.mrb[122].mxu1 %v14283_v9  ;;  %v8443_v9 = vld [vmem:[%s11980_s20 + $0x50] sm:$0xff]  }
 0x9e3   : > { %6352 = vmatprep.mubr.f32.mxu1 %v15424_v7  ;;  %10114 = vmatprep.subr.bf16.mxu0 %v8443_v9 }
 0x9e4   : > { %10178 = vmatpush3.bf16.msra.mxu1 %v14454_v58 }
 0x9e6   : > { %6353 = vmatmul.mubr.f32.gmra.mrb[124].mxu1 %v14293_v15  ;;  %v8435_v15 = vld [vmem:[%s11980_s20 + $0x10] sm:$0xff]  }
 0x9e7   : > { %6358 = vmatprep.mubr.f32.mxu1 %v15424_v7  ;;  %10116 = vmatpush3.bf16.msra.mxu0 %v8435_v15 }
 0x9ea   : > { %6359 = vmatmul.mubr.f32.gmra.mrb[126].mxu1 %v14302_v59  ;;  %v8444_v59 = vld [vmem:[%s11980_s20 + $0x58] sm:$0xff]  }
 0x9eb   : > { %6364 = vmatprep.mubr.f32.mxu1 %v15424_v7  ;;  %10118 = vmatprep.subr.bf16.mxu0 %v8444_v59 }
 0x9ee   : > { %6365 = vmatmul.mubr.f32.gmra.mrb[128].mxu1 %v14311_v49  ;;  %v8436_v49 = vld [vmem:[%s11980_s20 + $0x18] sm:$0xff]  }
 0x9ef   : > { %6370 = vmatprep.mubr.f32.mxu1 %v15424_v7  ;;  %10120 = vmatpush3.bf16.msra.mxu0 %v8436_v49 }
 0x9f2   : > { %6371 = vmatmul.mubr.f32.gmra.mrb[130].mxu1 %v14320_v53  ;;  %v8445_v53 = vld [vmem:[%s11980_s20 + $0x60] sm:$0xff]  }
 0x9f3   : > { %6376 = vmatprep.mubr.f32.mxu1 %v15424_v7  ;;  %10122 = vmatprep.subr.bf16.mxu0 %v8445_v53 }
 0x9f6   : > { %6377 = vmatmul.mubr.f32.gmra.mrb[132].mxu1 %v14329_v46  ;;  %v8437_v46 = vld [vmem:[%s11980_s20 + $0x20] sm:$0xff]  }
 0x9f7   : > { %6382 = vmatprep.mubr.f32.mxu1 %v15424_v7  ;;  %10124 = vmatpush3.bf16.msra.mxu0 %v8437_v46 }
 0x9f8   : > { %10126 = vmatprep.subr.bf16.mxu0 %v8446_v24 }
 0x9fa   : > { %6383 = vmatmul.mubr.f32.gmra.mrb[134].mxu1 %v14338_v26  ;;  %v8438_v26 = vld [vmem:[%s11980_s20 + $0x28] sm:$0xff]  }
 0x9fb   : > { %6388 = vmatprep.mubr.f32.mxu1 %v15424_v7  ;;  %10128 = vmatpush3.bf16.msra.mxu0 %v8438_v26 }
 0x9fc   : > { %10130 = vmatprep.subr.bf16.mxu0 %v8447_v14 }
 0x9fe   : > { %6389 = vmatmul.mubr.f32.gmra.mrb[136].mxu1 %v14345_v4  ;;  %v8440_v4 = vld [vmem:[%s11980_s20 + $0x38] sm:$0xff]  }
 0x9ff   : > { %6394 = vmatprep.mubr.f32.mxu1 %v15424_v7  ;;  %10132 = vmatpush3.bf16.msra.mxu0 %v8439_v43 }
 0xa00   : > { %10134 = vmatprep.subr.bf16.mxu0 %v8448_v42 }
 0xa02   : > { %6395 = vmatmul.mubr.f32.gmra.mrb[138].mxu1 %v14352_v38  ;;  %v14470_v38 = vld [vmem:[%s11980_s20 + $0x98] sm:$0xff]  }
 0xa03   : > { %6400 = vmatprep.mubr.f32.mxu1 %v15424_v7  ;;  %10136 = vmatpush3.bf16.msra.mxu0 %v8440_v4 }
 0xa04   : > { %10138 = vmatprep.subr.bf16.mxu0 %v8457_v5 }
 0xa06   : > { %6401 = vmatmul.mubr.f32.gmra.mrb[140].mxu1 %v14359_v60  ;;  %v14498_v60 = vld [vmem:[%s11980_s20 + $0xf8] sm:$0xff]  }
 0xa07   : > { %6406 = vmatprep.mubr.f32.mxu1 %v15424_v7 }
 0xa0a   : > { %6407 = vmatmul.mubr.f32.gmra.mrb[142].mxu1 %v14366_v25  ;;  %v15434_v25 = vsub.s32 0, %v15433_v3 }
 0xa0b   : > { %6412 = vmatprep.mubr.f32.mxu1 %v15424_v7 }
 0xa0c   : > { %v14511_v19 = vrot.slane %v14506_v63, %v15434_v25 }
 0xa0e   : > { %6413 = vmatmul.mubr.f32.gmra.mrb[144].mxu1 %v14373_v50  ;;  %v14516_v50 = vrot.slane %v14506_v63, %v15435_v29 }
 0xa0f   : > { %6418 = vmatprep.mubr.f32.mxu1 %v15424_v7 }
 0xa12   : > { %6419 = vmatmul.mubr.f32.gmra.mrb[146].mxu1 %v14379_v36 }
 0xa13   : > { %6424 = vmatprep.mubr.f32.mxu1 %v15424_v7 }
 0xa16   : > { %6425 = vmatmul.mubr.f32.gmra.mrb[148].mxu1 %v14387_v40 }
 0xa17   : > { %6430 = vmatprep.mubr.f32.mxu1 %v15424_v7  ;;  %v14458_v7 = vld [vmem:[%s11980_s20 + $0xd0] sm:$0xff]  }
 0xa18   : > { %10171 = vmatprep.subr.bf16.mxu1 %v14458_v7 }
 0xa19   : > { %10179 = vmatpush3.bf16.msra.mxu1 %v14462_v51 }
 0xa1a   : > { %6431 = vmatmul.mubr.f32.gmra.mrb[150].mxu1 %v14393_v13  ;;  %10172 = vmatprep.subr.bf16.mxu1 %v14466_v31 }
 0xa1d   : > { %10180 = vmatpush3.bf16.msra.mxu1 %v14470_v38 }
 0xa1e   : > { %10173 = vmatprep.subr.bf16.mxu1 %v14474_v48 }
 0xa21   : > { %10181 = vmatpush3.bf16.msra.mxu1 %v14478_v0 }
 0xa22   : > { %10174 = vmatprep.subr.bf16.mxu1 %v14482_v2 }
 0xa25   : > { %10182 = vmatpush3.bf16.msra.mxu1 %v14486_v47 }
 0xa26   : > { %10175 = vmatprep.subr.bf16.mxu1 %v14490_v37 }
 0xa29   : > { %10183 = vmatpush3.bf16.msra.mxu1 %v14494_v8 }
 0xa2a   : > { %10176 = vmatprep.subr.bf16.mxu1 %v14498_v60 }
 0xa2d   : > { %10184 = vmatpush3.bf16.msra.mxu1 %v14501_v34 }
 0xa70   : > { %v6181_v27 = vpop.f32.mrb[88].mxu1 }
 0xa71   : > { %v14519_v16 = vadd.f32 %v6181_v27, %v14511_v19  ;;  %v6183_v17 = vpop.f32.mrb[89].mxu1 }
 0xa72   : > { %v14522_v36 = vadd.f32 %v6183_v17, %v14516_v50 }
 0xa73   : > { %v8188_v30 = vmul.f32 -1.702, %v14519_v16 }
 0xa74   : > { %v8189_v11 = vmul.f32 -1.702, %v14522_v36  ;;  %v6187_v35 = vpop.f32.mrb[90].mxu1 }
 0xa75   : > { %v6565_v40 = vmul.f32 1.442695, %v8188_v30  ;;  %v14527_v44 = vadd.f32 %v6187_v35, %v14511_v19  ;;  %v6189_v13 = vpop.f32.mrb[91].mxu1 }
 0xa76   : > { %v6567_v61 = vmul.f32 1.442695, %v8189_v11  ;;  %v14530_v41 = vadd.f32 %v6189_v13, %v14516_v50 }
 0xa77   : > { %11028 = vpow2.f32 %v6565_v40  ;;  %v8192_v32 = vmul.f32 -1.702, %v14527_v44 }
 0xa78   : > { %11030 = vpow2.f32 %v6567_v61  ;;  %v8193_v21 = vmul.f32 -1.702, %v14530_v41 }
 0xa79   : > { %v6573_v9 = vmul.f32 1.442695, %v8192_v32  ;;  %v6193_v15 = vpop.f32.mrb[92].mxu1 }
 0xa7a   : > { %v6575_v59 = vmul.f32 1.442695, %v8193_v21  ;;  %v14535_v49 = vadd.f32 %v6193_v15, %v14511_v19  ;;  %v6195_v53 = vpop.f32.mrb[93].mxu1 }
 0xa7b   : > { %11032 = vpow2.f32 %v6573_v9  ;;  %v14538_v46 = vadd.f32 %v6195_v53, %v14516_v50 }
 0xa7c   : > { %11034 = vpow2.f32 %v6575_v59  ;;  %v8196_v24 = vmul.f32 -1.702, %v14535_v49 }
 0xa7d   : > { %v8197_v26 = vmul.f32 -1.702, %v14538_v46  ;;  %v6199_v14 = vpop.f32.mrb[94].mxu1 }
 0xa7e   : > { %v6581_v43 = vmul.f32 1.442695, %v8196_v24  ;;  %v14543_v42 = vadd.f32 %v6199_v14, %v14511_v19  ;;  %v6201_v4 = vpop.f32.mrb[95].mxu1 }
 0xa7f   : > { %v6583_v5 = vmul.f32 1.442695, %v8197_v26  ;;  %v14546_v25 = vadd.f32 %v6201_v4, %v14516_v50 }
 0xa80   : > { %11036 = vpow2.f32 %v6581_v43  ;;  %v8200_v29 = vmul.f32 -1.702, %v14543_v42 }
 0xa81   : > { %v11029_v27 = vpop.eup %11028  ;;  %11038 = vpow2.f32 %v6583_v5  ;;  %v8201_v17 = vmul.f32 -1.702, %v14546_v25  ;;  %v6205_v30 = vpop.f32.mrb[96].mxu1 }
 0xa82   : > { %v11031_v11 = vpop.eup %11030  ;;  %v6693_v35 = vadd.f32 1.0, %v11029_v27  ;;  %v6589_v40 = vmul.f32 1.442695, %v8200_v29  ;;  %v14551_v13 = vadd.f32 %v6205_v30, %v14511_v19  ;;  %v6207_v61 = vpop.f32.mrb[97].mxu1 }
 0xa83   : > { %v6694_v32 = vadd.f32 1.0, %v11031_v11  ;;  %v6591_v21 = vmul.f32 1.442695, %v8201_v17  ;;  %v14554_v9 = vadd.f32 %v6207_v61, %v14516_v50 }
 0xa84   : > { %11040 = vrcp.f32 %v6693_v35  ;;  %v8204_v15 = vmul.f32 -1.702, %v14551_v13 }
 0xa85   : > { %v11033_v59 = vpop.eup %11032  ;;  %11042 = vrcp.f32 %v6694_v32  ;;  %v8205_v53 = vmul.f32 -1.702, %v14554_v9  ;;  %v6211_v24 = vpop.f32.mrb[98].mxu1 }
 0xa86   : > { %v11035_v26 = vpop.eup %11034  ;;  %v6697_v14 = vadd.f32 1.0, %v11033_v59  ;;  %11044 = vpow2.f32 %v6589_v40  ;;  %v6597_v43 = vmul.f32 1.442695, %v8204_v15  ;;  %v14559_v4 = vadd.f32 %v6211_v24, %v14511_v19  ;;  %v6213_v5 = vpop.f32.mrb[99].mxu1 }
 0xa87   : > { %v6698_v29 = vadd.f32 1.0, %v11035_v26  ;;  %11046 = vpow2.f32 %v6591_v21  ;;  %v6599_v27 = vmul.f32 1.442695, %v8205_v53  ;;  %v14562_v17 = vadd.f32 %v6213_v5, %v14516_v50 }
 0xa88   : > { %11048 = vrcp.f32 %v6697_v14  ;;  %v8208_v30 = vmul.f32 -1.702, %v14559_v4 }
 0xa89   : > { %11050 = vrcp.f32 %v6698_v29  ;;  %v8209_v11 = vmul.f32 -1.702, %v14562_v17  ;;  %v6217_v35 = vpop.f32.mrb[100].mxu1 }
 0xa8a   : > { %v11037_v61 = vpop.eup %11036  ;;  %11052 = vpow2.f32 %v6597_v43  ;;  %v6605_v40 = vmul.f32 1.442695, %v8208_v30  ;;  %v14567_v32 = vadd.f32 %v6217_v35, %v14511_v19  ;;  %v6219_v15 = vpop.f32.mrb[101].mxu1 }
 0xa8b   : > { %v11039_v59 = vpop.eup %11038  ;;  %v6701_v21 = vadd.f32 1.0, %v11037_v61  ;;  %11054 = vpow2.f32 %v6599_v27  ;;  %v6607_v53 = vmul.f32 1.442695, %v8209_v11  ;;  %v14570_v24 = vadd.f32 %v6219_v15, %v14516_v50 }
 0xa8c   : > { %v6702_v26 = vadd.f32 1.0, %v11039_v59  ;;  %11056 = vpow2.f32 %v6605_v40  ;;  %v8212_v14 = vmul.f32 -1.702, %v14567_v32 }
 0xa8d   : > { %11058 = vrcp.f32 %v6701_v21  ;;  %v8213_v5 = vmul.f32 -1.702, %v14570_v24  ;;  %v6223_v43 = vpop.f32.mrb[102].mxu1 }
 0xa8e   : > { %v11041_v29 = vpop.eup %11040  ;;  %11060 = vrcp.f32 %v6702_v26  ;;  %v6613_v30 = vmul.f32 1.442695, %v8212_v14  ;;  %v14575_v35 = vadd.f32 %v6223_v43, %v14511_v19  ;;  %v6225_v61 = vpop.f32.mrb[103].mxu1 }
 0xa8f   : > { %v11043_v27 = vpop.eup %11042  ;;  %11062 = vpow2.f32 %v6607_v53  ;;  %v6615_v11 = vmul.f32 1.442695, %v8213_v5  ;;  %v14578_v15 = vadd.f32 %v6225_v61, %v14516_v50  ;;  %v6885_v26 = vmul.f32 %v11041_v29, %v14519_v16 }
 0xa90   : > { %v11045_v40 = vpop.eup %11044  ;;  %v6886_v59 = vmul.f32 %v11043_v27, %v14522_v36  ;;  %11064 = vpow2.f32 %v6613_v30  ;;  %v8216_v21 = vmul.f32 -1.702, %v14575_v35 }
 0xa91   : > { %v11047_v6 = vpop.eup %11046  ;;  %v6705_v14 = vadd.f32 1.0, %v11045_v40  ;;  %11066 = vpow2.f32 %v6615_v11  ;;  %v8217_v43 = vmul.f32 -1.702, %v14578_v15  ;;  %v6229_v1 = vpop.f32.mrb[104].mxu1 }
 0xa92   : > { %v11049_v18 = vpop.eup %11048  ;;  %v6706_v53 = vadd.f32 1.0, %v11047_v6  ;;  %v6621_v5 = vmul.f32 1.442695, %v8216_v21  ;;  %v14585_v61 = vadd.f32 %v6229_v1, %v14511_v19  ;;  %v6231_v23 = vpop.f32.mrb[105].mxu1  ;;  %7141 = vmatprep.mubr.f32.mxu0 %v6886_v59 }
 0xa93   : > { %v11051_v36 = vpop.eup %11050  ;;  %11068 = vrcp.f32 %v6705_v14  ;;  %v6623_v30 = vmul.f32 1.442695, %v8217_v43  ;;  %v14588_v27 = vadd.f32 %v6231_v23, %v14516_v50  ;;  %7142 = vmatmul.mubr.f32.vlgmr.msra.gmra.mrb[104].mxu0 %v6885_v26  ;;  %v6889_v1 = vmul.f32 %v11049_v18, %v14527_v44 }
 0xa94   : > { %v11053_v16 = vpop.eup %11052  ;;  %v6890_v29 = vmul.f32 %v11051_v36, %v14530_v41  ;;  %11070 = vrcp.f32 %v6706_v53  ;;  %v8220_v11 = vmul.f32 -1.702, %v14585_v61  ;;  %10140 = vmatpush3.bf16.msra.mxu0 %v14446_v52 }
 0xa95   : > { %v11055_v6 = vpop.eup %11054  ;;  %v6709_v40 = vadd.f32 1.0, %v11053_v16  ;;  %11072 = vpow2.f32 %v6621_v5  ;;  %v8221_v59 = vmul.f32 -1.702, %v14588_v27  ;;  %v6235_v21 = vpop.f32.mrb[106].mxu1  ;;  %10142 = vmatprep.subr.bf16.mxu0 %v14450_v39 }
 0xa96   : > { %v11057_v23 = vpop.eup %11056  ;;  %v6710_v26 = vadd.f32 1.0, %v11055_v6  ;;  %11074 = vpow2.f32 %v6623_v30  ;;  %v6629_v14 = vmul.f32 1.442695, %v8220_v11  ;;  %v14597_v41 = vadd.f32 %v6235_v21, %v14511_v19  ;;  %v6237_v43 = vpop.f32.mrb[107].mxu1  ;;  %7146 = vmatprep.mubr.f32.mxu0 %v6890_v29 }
 0xa97   : > { %v11059_v52 = vpop.eup %11058  ;;  %11076 = vrcp.f32 %v6709_v40  ;;  %v6713_v53 = vadd.f32 1.0, %v11057_v23  ;;  %v6631_v18 = vmul.f32 1.442695, %v8221_v59  ;;  %v14600_v44 = vadd.f32 %v6237_v43, %v14516_v50  ;;  %7147 = vmatmul.mubr.f32.gmra.mrb[106].mxu0 %v6889_v1 }
 0xa98   : > { %v11061_v5 = vpop.eup %11060  ;;  %11078 = vrcp.f32 %v6710_v26  ;;  %v8224_v39 = vmul.f32 -1.702, %v14597_v41  ;;  %10144 = vmatpush3.bf16.msra.mxu0 %v14454_v58  ;;  %v6893_v6 = vmul.f32 %v11059_v52, %v14535_v49 }
 0xa99   : > { %v11063_v36 = vpop.eup %11062  ;;  %v6894_v30 = vmul.f32 %v11061_v5, %v14538_v46  ;;  %11080 = vrcp.f32 %v6713_v53  ;;  %v8225_v16 = vmul.f32 -1.702, %v14600_v44  ;;  %v6241_v29 = vpop.f32.mrb[108].mxu1  ;;  %10146 = vmatprep.subr.bf16.mxu0 %v14458_v7 }
 0xa9a   : > { %v11065_v11 = vpop.eup %11064  ;;  %v6714_v40 = vadd.f32 1.0, %v11063_v36  ;;  %11082 = vpow2.f32 %v6629_v14  ;;  %v14609_v1 = vadd.f32 %v6241_v29, %v14511_v19  ;;  %v6243_v59 = vpop.f32.mrb[109].mxu1  ;;  %v6637_v23 = vmul.f32 1.442695, %v8224_v39 }
 0xa9b   : > { %v11067_v21 = vpop.eup %11066  ;;  %v6717_v58 = vadd.f32 1.0, %v11065_v11  ;;  %11084 = vpow2.f32 %v6631_v18  ;;  %v14612_v46 = vadd.f32 %v6243_v59, %v14516_v50  ;;  %7151 = vmatprep.mubr.f32.mxu0 %v6894_v30  ;;  %v6639_v7 = vmul.f32 1.442695, %v8225_v16 }
 0xa9c   : > { %11086 = vrcp.f32 %v6714_v40  ;;  %v6718_v26 = vadd.f32 1.0, %v11067_v21  ;;  %v8228_v43 = vmul.f32 -1.702, %v14609_v1  ;;  %7152 = vmatmul.mubr.f32.gmra.mrb[108].mxu0 %v6893_v6 }
 0xa9d   : > { %v11069_v49 = vpop.eup %11068  ;;  %11088 = vrcp.f32 %v6717_v58  ;;  %v8229_v14 = vmul.f32 -1.702, %v14612_v46  ;;  %v6247_v52 = vpop.f32.mrb[110].mxu1  ;;  %10148 = vmatpush3.bf16.msra.mxu0 %v14462_v51 }
 0xa9e   : > { %v11071_v53 = vpop.eup %11070  ;;  %11090 = vrcp.f32 %v6718_v26  ;;  %v6645_v18 = vmul.f32 1.442695, %v8228_v43  ;;  %v14618_v5 = vadd.f32 %v6247_v52, %v14511_v19  ;;  %v6249_v39 = vpop.f32.mrb[111].mxu1  ;;  %10150 = vmatprep.subr.bf16.mxu0 %v14466_v31  ;;  %v6897_v30 = vmul.f32 %v11069_v49, %v14543_v42 }
 0xa9f   : > { %v11073_v36 = vpop.eup %11072  ;;  %v6898_v16 = vmul.f32 %v11071_v53, %v14546_v25  ;;  %11092 = vpow2.f32 %v6637_v23  ;;  %v14624_v29 = vadd.f32 %v6249_v39, %v14516_v50  ;;  %v6647_v6 = vmul.f32 1.442695, %v8229_v14 }
 0xaa0   : > { %v11075_v11 = vpop.eup %11074  ;;  %v6721_v51 = vadd.f32 1.0, %v11073_v36  ;;  %11094 = vpow2.f32 %v6639_v7  ;;  %v8232_v40 = vmul.f32 -1.702, %v14618_v5 }
 0xaa1   : > { %v11077_v59 = vpop.eup %11076  ;;  %v6722_v21 = vadd.f32 1.0, %v11075_v11  ;;  %11096 = vpow2.f32 %v6645_v18  ;;  %v8233_v31 = vmul.f32 -1.702, %v14624_v29  ;;  %7156 = vmatprep.mubr.f32.mxu0 %v6898_v16  ;;  %v6253_v58 = vpop.f32.mrb[112].mxu1  ;;  %10152 = vmatpush3.bf16.msra.mxu0 %v14470_v38 }
 0xaa2   : > { %v11079_v42 = vpop.eup %11078  ;;  %11098 = vrcp.f32 %v6721_v51  ;;  %v6653_v25 = vmul.f32 1.442695, %v8232_v40  ;;  %7157 = vmatmul.mubr.f32.gmra.mrb[110].mxu0 %v6897_v30  ;;  %v14630_v23 = vadd.f32 %v6253_v58, %v14511_v19  ;;  %v6255_v26 = vpop.f32.mrb[113].mxu1  ;;  %10154 = vmatprep.subr.bf16.mxu0 %v14474_v48  ;;  %v6901_v38 = vmul.f32 %v11077_v59, %v14551_v13 }
 0xaa3   : > { %v11081_v7 = vpop.eup %11080  ;;  %v6902_v43 = vmul.f32 %v11079_v42, %v14554_v9  ;;  %11100 = vrcp.f32 %v6722_v21  ;;  %v6655_v49 = vmul.f32 1.442695, %v8233_v31  ;;  %v14635_v14 = vadd.f32 %v6255_v26, %v14516_v50 }
 0xaa4   : > { %v11083_v52 = vpop.eup %11082  ;;  %11102 = vpow2.f32 %v6647_v6  ;;  %v8236_v53 = vmul.f32 -1.702, %v14630_v23  ;;  %v6905_v21 = vmul.f32 %v11081_v7, %v14559_v4  ;;  %v6109_v7 = vsub.s32 3, %v15433_v3 }
 0xaa5   : > { %v11085_v18 = vpop.eup %11084  ;;  %v6725_v39 = vadd.f32 1.0, %v11083_v52  ;;  %11104 = vpow2.f32 %v6653_v25  ;;  %v8237_v36 = vmul.f32 -1.702, %v14635_v14  ;;  %7161 = vmatprep.mubr.f32.mxu0 %v6902_v43  ;;  %v6259_v48 = vpop.f32.mrb[114].mxu1  ;;  %10156 = vmatpush3.bf16.msra.mxu0 %v14478_v0 }
 0xaa6   : > { %v11087_v9 = vpop.eup %11086  ;;  %v6726_v30 = vadd.f32 1.0, %v11085_v18  ;;  %11106 = vpow2.f32 %v6655_v49  ;;  %v6661_v16 = vmul.f32 1.442695, %v8236_v53  ;;  %7162 = vmatmul.mubr.f32.gmra.mrb[112].mxu0 %v6901_v38  ;;  %v14642_v11 = vadd.f32 %v6259_v48, %v14511_v19  ;;  %v6261_v13 = vpop.f32.mrb[115].mxu1  ;;  %10158 = vmatprep.subr.bf16.mxu0 %v14482_v2 }
 0xaa7   : > { %v11089_v51 = vpop.eup %11088  ;;  %v6906_v6 = vmul.f32 %v11087_v9, %v14562_v17  ;;  %11108 = vrcp.f32 %v6725_v39  ;;  %v6663_v40 = vmul.f32 1.442695, %v8237_v36  ;;  %v14647_v59 = vadd.f32 %v6261_v13, %v14516_v50 }
 0xaa8   : > { %v11091_v0 = vpop.eup %11090  ;;  %11110 = vrcp.f32 %v6726_v30  ;;  %v8240_v31 = vmul.f32 -1.702, %v14642_v11  ;;  %v6909_v49 = vmul.f32 %v11089_v51, %v14567_v32  ;;  %v15436_v30 = vsub.s32 2, %v15433_v3 }
 0xaa9   : > { %v11093_v58 = vpop.eup %11092  ;;  %v6910_v42 = vmul.f32 %v11091_v0, %v14570_v24  ;;  %11112 = vpow2.f32 %v6661_v16  ;;  %v8241_v2 = vmul.f32 -1.702, %v14647_v59  ;;  %7166 = vmatprep.mubr.f32.mxu0 %v6906_v6  ;;  %v6265_v25 = vpop.f32.mrb[116].mxu1  ;;  %10160 = vmatpush3.bf16.msra.mxu0 %v14486_v47 }
 0xaaa   : > { %v11095_v17 = vpop.eup %11094  ;;  %v6729_v26 = vadd.f32 1.0, %v11093_v58  ;;  %11114 = vpow2.f32 %v6663_v40  ;;  %7167 = vmatmul.mubr.f32.gmra.mrb[114].mxu0 %v6905_v21  ;;  %v14655_v43 = vadd.f32 %v6265_v25, %v14511_v19  ;;  %v6267_v4 = vpop.f32.mrb[117].mxu1  ;;  %10162 = vmatprep.subr.bf16.mxu0 %v14490_v37  ;;  %v6669_v38 = vmul.f32 1.442695, %v8240_v31 }
 0xaab   : > { %v11097_v24 = vpop.eup %11096  ;;  %v6730_v52 = vadd.f32 1.0, %v11095_v17  ;;  %v14661_v53 = vadd.f32 %v6267_v4, %v14516_v50  ;;  %7171 = vmatprep.mubr.f32.mxu0 %v6910_v42  ;;  %v6671_v39 = vmul.f32 1.442695, %v8241_v2  ;;  %v14668_v32 = vrot.slane %v14506_v63, %v15436_v30 }
 0xaac   : > { %v11099_v47 = vpop.eup %11098  ;;  %11116 = vrcp.f32 %v6729_v26  ;;  %v6733_v18 = vadd.f32 1.0, %v11097_v24  ;;  %v8244_v36 = vmul.f32 -1.702, %v14655_v43  ;;  %v14676_v40 = vrot.slane %v14506_v63, %v6109_v7 }
 0xaad   : > { %v11101_v48 = vpop.eup %11100  ;;  %11118 = vrcp.f32 %v6730_v52  ;;  %v8245_v9 = vmul.f32 -1.702, %v14661_v53  ;;  %v6271_v37 = vpop.f32.mrb[118].mxu1  ;;  %10164 = vmatpush3.bf16.msra.mxu0 %v14494_v8  ;;  %v6913_v0 = vmul.f32 %v11099_v47, %v14575_v35 }
 0xaae   : > { %v11103_v16 = vpop.eup %11102  ;;  %v6914_v13 = vmul.f32 %v11101_v48, %v14578_v15  ;;  %11120 = vrcp.f32 %v6733_v18  ;;  %7172 = vmatmul.mubr.f32.gmra.mrb[116].mxu0 %v6909_v49  ;;  %v14673_v51 = vadd.f32 %v6271_v37, %v14511_v19  ;;  %v6273_v6 = vpop.f32.mrb[119].mxu1  ;;  %10166 = vmatprep.subr.bf16.mxu0 %v14498_v60  ;;  %v6677_v58 = vmul.f32 1.442695, %v8244_v36 }
 0xaaf   : > { %v11105_v3 = vpop.eup %11104  ;;  %v6734_v21 = vadd.f32 1.0, %v11103_v16  ;;  %11122 = vpow2.f32 %v6669_v38  ;;  %v14681_v8 = vadd.f32 %v6273_v6, %v14516_v50  ;;  %v6679_v2 = vmul.f32 1.442695, %v8245_v9 }
 0xab0   : > { %v11107_v15 = vpop.eup %11106  ;;  %v6737_v31 = vadd.f32 1.0, %v11105_v3  ;;  %11124 = vpow2.f32 %v6671_v39  ;;  %v8248_v19 = vmul.f32 -1.702, %v14673_v51  ;;  %7176 = vmatprep.mubr.f32.mxu0 %v6914_v13 }
 0xab1   : > { %v11109_v42 = vpop.eup %11108  ;;  %11126 = vrcp.f32 %v6734_v21  ;;  %v6738_v63 = vadd.f32 1.0, %v11107_v15  ;;  %v8249_v60 = vmul.f32 -1.702, %v14681_v8  ;;  %v6342_v25 = vpop.f32.mrb[120].mxu1  ;;  %10168 = vmatpush3.bf16.msra.mxu0 %v14501_v34 }
 0xab2   : > { %v11111_v35 = vpop.eup %11110  ;;  %11128 = vrcp.f32 %v6737_v31  ;;  %7177 = vmatmul.mubr.f32.gmra.mrb[118].mxu0 %v6913_v0  ;;  %v14687_v50 = vadd.f32 %v6342_v25, %v14668_v32  ;;  %v6344_v17 = vpop.f32.mrb[121].mxu1  ;;  %v6917_v4 = vmul.f32 %v11109_v42, %v14585_v61  ;;  %v6685_v34 = vmul.f32 1.442695, %v8248_v19 }
 0xab3   : > { %v11113_v26 = vpop.eup %11112  ;;  %v6918_v7 = vmul.f32 %v11111_v35, %v14588_v27  ;;  %11130 = vrcp.f32 %v6738_v63  ;;  %v14692_v24 = vadd.f32 %v6344_v17, %v14676_v40  ;;  %v6687_v18 = vmul.f32 1.442695, %v8249_v60 }
 0xab4   : > { %v11115_v49 = vpop.eup %11114  ;;  %v6741_v52 = vadd.f32 1.0, %v11113_v26  ;;  %11132 = vpow2.f32 %v6677_v58  ;;  %v8190_v38 = vmul.f32 -1.702, %v14687_v50 }
 0xab5   : > { %v6742_v47 = vadd.f32 1.0, %v11115_v49  ;;  %11134 = vpow2.f32 %v6679_v2  ;;  %v8191_v39 = vmul.f32 -1.702, %v14692_v24  ;;  %7181 = vmatprep.mubr.f32.mxu0 %v6918_v7  ;;  %v6348_v36 = vpop.f32.mrb[122].mxu1 }
 0xab6   : > { %v11117_v61 = vpop.eup %11116  ;;  %11136 = vrcp.f32 %v6741_v52  ;;  %v6569_v27 = vmul.f32 1.442695, %v8190_v38  ;;  %7182 = vmatmul.mubr.f32.gmra.mrb[120].mxu0 %v6917_v4  ;;  %v14697_v48 = vadd.f32 %v6348_v36, %v14668_v32  ;;  %v6350_v9 = vpop.f32.mrb[123].mxu1 }
 0xab7   : > { %v11119_v37 = vpop.eup %11118  ;;  %11138 = vrcp.f32 %v6742_v47  ;;  %v6571_v30 = vmul.f32 1.442695, %v8191_v39  ;;  %v14700_v16 = vadd.f32 %v6350_v9, %v14676_v40  ;;  %v6921_v21 = vmul.f32 %v11117_v61, %v14597_v41 }
 0xab8   : > { %v11121_v13 = vpop.eup %11120  ;;  %v6922_v6 = vmul.f32 %v11119_v37, %v14600_v44  ;;  %11140 = vpow2.f32 %v6685_v34  ;;  %v8194_v3 = vmul.f32 -1.702, %v14697_v48 }
 0xab9   : > { %v11123_v0 = vpop.eup %11122  ;;  %11142 = vpow2.f32 %v6687_v18  ;;  %v8195_v15 = vmul.f32 -1.702, %v14700_v16  ;;  %v6354_v31 = vpop.f32.mrb[124].mxu1  ;;  %v6925_v7 = vmul.f32 %v11121_v13, %v14609_v1 }
 0xaba   : > { %v11125_v58 = vpop.eup %11124  ;;  %v6745_v19 = vadd.f32 1.0, %v11123_v0  ;;  %11144 = vpow2.f32 %v6569_v27  ;;  %v6577_v42 = vmul.f32 1.442695, %v8194_v3  ;;  %7186 = vmatprep.mubr.f32.mxu0 %v6922_v6  ;;  %v14707_v63 = vadd.f32 %v6354_v31, %v14668_v32  ;;  %v6356_v2 = vpop.f32.mrb[125].mxu1 }
 0xabb   : > { %v11127_v44 = vpop.eup %11126  ;;  %v6746_v60 = vadd.f32 1.0, %v11125_v58  ;;  %11146 = vpow2.f32 %v6571_v30  ;;  %v6579_v25 = vmul.f32 1.442695, %v8195_v15  ;;  %7187 = vmatmul.mubr.f32.gmra.mrb[122].mxu0 %v6921_v21  ;;  %v14710_v41 = vadd.f32 %v6356_v2, %v14676_v40 }
 0xabc   : > { %v11129_v35 = vpop.eup %11128  ;;  %v6926_v17 = vmul.f32 %v11127_v44, %v14612_v46  ;;  %11148 = vrcp.f32 %v6745_v19  ;;  %v8198_v26 = vmul.f32 -1.702, %v14707_v63 }
 0xabd   : > { %v11131_v4 = vpop.eup %11130  ;;  %11150 = vrcp.f32 %v6746_v60  ;;  %v8199_v49 = vmul.f32 -1.702, %v14710_v41  ;;  %v6360_v52 = vpop.f32.mrb[126].mxu1  ;;  %v6929_v30 = vmul.f32 %v11129_v35, %v14618_v5 }
 0xabe   : > { %v11133_v34 = vpop.eup %11132  ;;  %v6930_v38 = vmul.f32 %v11131_v4, %v14624_v29  ;;  %11152 = vpow2.f32 %v6577_v42  ;;  %v6585_v47 = vmul.f32 1.442695, %v8198_v26  ;;  %7191 = vmatprep.mubr.f32.mxu0 %v6926_v17  ;;  %v14718_v18 = vadd.f32 %v6360_v52, %v14668_v32  ;;  %v6362_v46 = vpop.f32.mrb[127].mxu1 }
 0xabf   : > { %v11135_v39 = vpop.eup %11134  ;;  %v6749_v36 = vadd.f32 1.0, %v11133_v34  ;;  %11154 = vpow2.f32 %v6579_v25  ;;  %v6587_v61 = vmul.f32 1.442695, %v8199_v49  ;;  %7192 = vmatmul.mubr.f32.gmra.mrb[124].mxu0 %v6925_v7  ;;  %v14721_v1 = vadd.f32 %v6362_v46, %v14676_v40 }
 0xac0   : > { %v11137_v27 = vpop.eup %11136  ;;  %v6750_v9 = vadd.f32 1.0, %v11135_v39  ;;  %11156 = vpow2.f32 %v6585_v47  ;;  %v8202_v29 = vmul.f32 -1.702, %v14718_v18  ;;  %7196 = vmatprep.mubr.f32.mxu0 %v6930_v38 }
 0xac1   : > { %v11139_v37 = vpop.eup %11138  ;;  %11158 = vrcp.f32 %v6749_v36  ;;  %v8203_v13 = vmul.f32 -1.702, %v14721_v1  ;;  %v6366_v6 = vpop.f32.mrb[128].mxu1  ;;  %v6933_v2 = vmul.f32 %v11137_v27, %v14630_v23 }
 0xac2   : > { %v11141_v3 = vpop.eup %11140  ;;  %v6934_v0 = vmul.f32 %v11139_v37, %v14635_v14  ;;  %11160 = vrcp.f32 %v6750_v9  ;;  %v6593_v21 = vmul.f32 1.442695, %v8202_v29  ;;  %v14728_v15 = vadd.f32 %v6366_v6, %v14668_v32  ;;  %v6368_v31 = vpop.f32.mrb[129].mxu1 }
 0xac3   : > { %v11143_v58 = vpop.eup %11142  ;;  %v6753_v19 = vadd.f32 1.0, %v11141_v3  ;;  %11162 = vpow2.f32 %v6587_v61  ;;  %7197 = vmatmul.mubr.f32.gmra.mrb[126].mxu0 %v6929_v30  ;;  %v14731_v42 = vadd.f32 %v6368_v31, %v14676_v40  ;;  %v6595_v35 = vmul.f32 1.442695, %v8203_v13 }
 0xac4   : > { %v11145_v5 = vpop.eup %11144  ;;  %v6754_v44 = vadd.f32 1.0, %v11143_v58  ;;  %11164 = vpow2.f32 %v6593_v21  ;;  %v8206_v14 = vmul.f32 -1.702, %v14728_v15  ;;  %7201 = vmatprep.mubr.f32.mxu0 %v6934_v0 }
 0xac5   : > { %v11147_v60 = vpop.eup %11146  ;;  %11166 = vrcp.f32 %v6753_v19  ;;  %v6695_v25 = vadd.f32 1.0, %v11145_v5  ;;  %v8207_v17 = vmul.f32 -1.702, %v14731_v42  ;;  %v6372_v26 = vpop.f32.mrb[130].mxu1 }
 0xac6   : > { %v11149_v4 = vpop.eup %11148  ;;  %11168 = vrcp.f32 %v6754_v44  ;;  %v6696_v7 = vadd.f32 1.0, %v11147_v60  ;;  %v6601_v49 = vmul.f32 1.442695, %v8206_v14  ;;  %v14737_v52 = vadd.f32 %v6372_v26, %v14668_v32  ;;  %v6374_v23 = vpop.f32.mrb[131].mxu1 }
 0xac7   : > { %v11151_v34 = vpop.eup %11150  ;;  %11170 = vrcp.f32 %v6695_v25  ;;  %7202 = vmatmul.mubr.f32.gmra.mrb[128].mxu0 %v6933_v2  ;;  %v14740_v38 = vadd.f32 %v6374_v23, %v14676_v40  ;;  %v6937_v61 = vmul.f32 %v11149_v4, %v14642_v11  ;;  %v6603_v13 = vmul.f32 1.442695, %v8207_v17 }
 0xac8   : > { %v11153_v47 = vpop.eup %11152  ;;  %v6938_v46 = vmul.f32 %v11151_v34, %v14647_v59  ;;  %11172 = vrcp.f32 %v6696_v7  ;;  %v8210_v39 = vmul.f32 -1.702, %v14737_v52 }
 0xac9   : > { %v11155_v36 = vpop.eup %11154  ;;  %v6699_v27 = vadd.f32 1.0, %v11153_v47  ;;  %11174 = vpow2.f32 %v6595_v35  ;;  %v8211_v9 = vmul.f32 -1.702, %v14740_v38  ;;  %v6378_v29 = vpop.f32.mrb[132].mxu1 }
 0xaca   : > { %v11157_v37 = vpop.eup %11156  ;;  %v6700_v30 = vadd.f32 1.0, %v11155_v36  ;;  %11176 = vpow2.f32 %v6601_v49  ;;  %7206 = vmatprep.mubr.f32.mxu0 %v6938_v46  ;;  %v14747_v6 = vadd.f32 %v6378_v29, %v14668_v32  ;;  %v6380_v59 = vpop.f32.mrb[133].mxu1  ;;  %v6609_v21 = vmul.f32 1.442695, %v8210_v39 }
 0xacb   : > { %v11159_v3 = vpop.eup %11158  ;;  %11178 = vrcp.f32 %v6699_v27  ;;  %v6703_v0 = vadd.f32 1.0, %v11157_v37  ;;  %7207 = vmatmul.mubr.f32.gmra.mrb[130].mxu0 %v6937_v61  ;;  %v14750_v11 = vadd.f32 %v6380_v59, %v14676_v40  ;;  %v6611_v2 = vmul.f32 1.442695, %v8211_v9 }
 0xacc   : > { %v11161_v31 = vpop.eup %11160  ;;  %11180 = vrcp.f32 %v6700_v30  ;;  %v8214_v58 = vmul.f32 -1.702, %v14747_v6  ;;  %v6941_v25 = vmul.f32 %v11159_v3, %v14655_v43 }
 0xacd   : > { %v11163_v19 = vpop.eup %11162  ;;  %v6942_v5 = vmul.f32 %v11161_v31, %v14661_v53  ;;  %11182 = vrcp.f32 %v6703_v0  ;;  %v8215_v44 = vmul.f32 -1.702, %v14750_v11  ;;  %v6384_v14 = vpop.f32.mrb[134].mxu1 }
 0xace   : > { %v11165_v60 = vpop.eup %11164  ;;  %v6704_v35 = vadd.f32 1.0, %v11163_v19  ;;  %11184 = vpow2.f32 %v6603_v13  ;;  %v14757_v17 = vadd.f32 %v6384_v14, %v14668_v32  ;;  %v6386_v26 = vpop.f32.mrb[135].mxu1  ;;  %v6617_v49 = vmul.f32 1.442695, %v8214_v58 }
 0xacf   : > { %v11167_v4 = vpop.eup %11166  ;;  %v6707_v7 = vadd.f32 1.0, %v11165_v60  ;;  %11186 = vpow2.f32 %v6609_v21  ;;  %7211 = vmatprep.mubr.f32.mxu0 %v6942_v5  ;;  %v14760_v53 = vadd.f32 %v6386_v26, %v14676_v40  ;;  %v6619_v34 = vmul.f32 1.442695, %v8215_v44 }
 0xad0   : > { %v11169_v23 = vpop.eup %11168  ;;  %11188 = vrcp.f32 %v6704_v35  ;;  %7212 = vmatmul.mubr.f32.gmra.mrb[132].mxu0 %v6941_v25  ;;  %v8218_v43 = vmul.f32 -1.702, %v14757_v17  ;;  %v6945_v27 = vmul.f32 %v11167_v4, %v14673_v51 }
 0xad1   : > { %v11171_v47 = vpop.eup %11170  ;;  %v6946_v46 = vmul.f32 %v11169_v23, %v14681_v8  ;;  %11190 = vrcp.f32 %v6707_v7  ;;  %v8219_v39 = vmul.f32 -1.702, %v14760_v53  ;;  %v6390_v36 = vpop.f32.mrb[136].mxu1 }
 0xad2   : > { %v11173_v61 = vpop.eup %11172  ;;  %11192 = vpow2.f32 %v6611_v2  ;;  %v6625_v9 = vmul.f32 1.442695, %v8218_v43  ;;  %v14767_v29 = vadd.f32 %v6390_v36, %v14668_v32  ;;  %v6392_v37 = vpop.f32.mrb[137].mxu1  ;;  %v6887_v5 = vmul.f32 %v11171_v47, %v14687_v50 }
 0xad3   : > { %v11175_v30 = vpop.eup %11174  ;;  %v6888_v13 = vmul.f32 %v11173_v61, %v14692_v24  ;;  %11194 = vpow2.f32 %v6617_v49  ;;  %7216 = vmatprep.mubr.f32.mxu0 %v6946_v46  ;;  %v14771_v8 = vadd.f32 %v6392_v37, %v14676_v40  ;;  %v6627_v0 = vmul.f32 1.442695, %v8219_v39 }
 0xad4   : > { %v11177_v59 = vpop.eup %11176  ;;  %v6708_v3 = vadd.f32 1.0, %v11175_v30  ;;  %11196 = vpow2.f32 %v6619_v34  ;;  %7217 = vmatmul.mubr.f32.gmra.mrb[134].mxu0 %v6945_v27  ;;  %v8222_v51 = vmul.f32 -1.702, %v14767_v29 }
 0xad5   : > { %v11179_v21 = vpop.eup %11178  ;;  %v6711_v31 = vadd.f32 1.0, %v11177_v59  ;;  %11198 = vpow2.f32 %v6625_v9  ;;  %v8223_v58 = vmul.f32 -1.702, %v14771_v8  ;;  %7286 = vmatprep.mubr.f32.mxu0 %v6888_v13  ;;  %v6396_v19 = vpop.f32.mrb[138].mxu1 }
 0xad6   : > { %v11181_v24 = vpop.eup %11180  ;;  %11200 = vrcp.f32 %v6708_v3  ;;  %v6633_v2 = vmul.f32 1.442695, %v8222_v51  ;;  %v14777_v44 = vadd.f32 %v6396_v19, %v14668_v32  ;;  %v6398_v14 = vpop.f32.mrb[139].mxu1  ;;  %v6891_v49 = vmul.f32 %v11179_v21, %v14697_v48 }
 0xad7   : > { %v11183_v60 = vpop.eup %11182  ;;  %v6892_v25 = vmul.f32 %v11181_v24, %v14700_v16  ;;  %11202 = vrcp.f32 %v6711_v31  ;;  %v6635_v35 = vmul.f32 1.442695, %v8223_v58  ;;  %v14781_v26 = vadd.f32 %v6398_v14, %v14676_v40 }
 0xad8   : > { %v11185_v4 = vpop.eup %11184  ;;  %11204 = vpow2.f32 %v6627_v0  ;;  %7287 = vmatmul.mubr.f32.vlgmr.msra.gmra.mrb[136].mxu0 %v6887_v5  ;;  %v8226_v7 = vmul.f32 -1.702, %v14777_v44  ;;  %v6895_v30 = vmul.f32 %v11183_v60, %v14707_v63 }
 0xad9   : > { %v11187_v50 = vpop.eup %11186  ;;  %v6712_v23 = vadd.f32 1.0, %v11185_v4  ;;  %11206 = vpow2.f32 %v6633_v2  ;;  %v8227_v34 = vmul.f32 -1.702, %v14781_v26  ;;  %7291 = vmatprep.mubr.f32.mxu0 %v6892_v25  ;;  %v6402_v43 = vpop.f32.mrb[140].mxu1 }
 0xada   : > { %v11189_v16 = vpop.eup %11188  ;;  %v6715_v47 = vadd.f32 1.0, %v11187_v50  ;;  %11208 = vpow2.f32 %v6635_v35  ;;  %v6641_v46 = vmul.f32 1.442695, %v8226_v7  ;;  %v14787_v39 = vadd.f32 %v6402_v43, %v14668_v32  ;;  %v6404_v36 = vpop.f32.mrb[141].mxu1 }
 0xadb   : > { %v11191_v61 = vpop.eup %11190  ;;  %v6896_v27 = vmul.f32 %v11189_v16, %v14710_v41  ;;  %11210 = vrcp.f32 %v6712_v23  ;;  %v6643_v9 = vmul.f32 1.442695, %v8227_v34  ;;  %v14791_v48 = vadd.f32 %v6404_v36, %v14676_v40 }
 0xadc   : > { %v11193_v37 = vpop.eup %11192  ;;  %11212 = vrcp.f32 %v6715_v47  ;;  %7292 = vmatmul.mubr.f32.gmra.mrb[138].mxu0 %v6891_v49  ;;  %v8230_v13 = vmul.f32 -1.702, %v14787_v39  ;;  %v6899_v23 = vmul.f32 %v11191_v61, %v14718_v18 }
 0xadd   : > { %v11195_v59 = vpop.eup %11194  ;;  %v6716_v3 = vadd.f32 1.0, %v11193_v37  ;;  %11214 = vpow2.f32 %v6641_v46  ;;  %v8231_v0 = vmul.f32 -1.702, %v14791_v48  ;;  %7296 = vmatprep.mubr.f32.mxu1 %v6896_v27  ;;  %v6408_v51 = vpop.f32.mrb[142].mxu1 }
 0xade   : > { %v11197_v41 = vpop.eup %11196  ;;  %v6719_v21 = vadd.f32 1.0, %v11195_v59  ;;  %11216 = vpow2.f32 %v6643_v9  ;;  %7297 = vmatmul.mubr.f32.vlgmr.msra.gmra.mrb[152].mxu1 %v6895_v30  ;;  %v14797_v31 = vadd.f32 %v6408_v51, %v14668_v32  ;;  %v6410_v58 = vpop.f32.mrb[143].mxu1  ;;  %v6649_v24 = vmul.f32 1.442695, %v8230_v13 }
 0xadf   : > { %v11199_v63 = vpop.eup %11198  ;;  %11218 = vrcp.f32 %v6716_v3  ;;  %v6720_v19 = vadd.f32 1.0, %v11197_v41  ;;  %v14800_v5 = vadd.f32 %v6410_v58, %v14676_v40  ;;  %v6651_v60 = vmul.f32 1.442695, %v8231_v0 }
 0xae0   : > { %v11201_v2 = vpop.eup %11200  ;;  %11220 = vrcp.f32 %v6719_v21  ;;  %v6723_v14 = vadd.f32 1.0, %v11199_v63  ;;  %v8234_v25 = vmul.f32 -1.702, %v14797_v31 }
 0xae1   : > { %v11203_v35 = vpop.eup %11202  ;;  %v6900_v4 = vmul.f32 %v11201_v2, %v14721_v1  ;;  %11222 = vrcp.f32 %v6720_v19  ;;  %v8235_v7 = vmul.f32 -1.702, %v14800_v5  ;;  %v6414_v50 = vpop.f32.mrb[144].mxu1 }
 0xae2   : > { %v11205_v49 = vpop.eup %11204  ;;  %11224 = vrcp.f32 %v6723_v14  ;;  %v14807_v34 = vadd.f32 %v6414_v50, %v14668_v32  ;;  %v6416_v43 = vpop.f32.mrb[145].mxu1  ;;  %v6657_v27 = vmul.f32 1.442695, %v8234_v25  ;;  %v6903_v21 = vmul.f32 %v11203_v35, %v14728_v15 }
 0xae3   : > { %v11207_v16 = vpop.eup %11206  ;;  %v6724_v47 = vadd.f32 1.0, %v11205_v49  ;;  %11226 = vpow2.f32 %v6649_v24  ;;  %7301 = vmatprep.mubr.f32.mxu1 %v6900_v4  ;;  %v14810_v46 = vadd.f32 %v6416_v43, %v14676_v40  ;;  %v6659_v37 = vmul.f32 1.442695, %v8235_v7 }
 0xae4   : > { %v11209_v1 = vpop.eup %11208  ;;  %v6727_v36 = vadd.f32 1.0, %v11207_v16  ;;  %11228 = vpow2.f32 %v6651_v60  ;;  %7302 = vmatmul.mubr.f32.gmra.mrb[154].mxu1 %v6899_v23  ;;  %v8238_v9 = vmul.f32 -1.702, %v14807_v34 }
 0xae5   : > { %v11211_v18 = vpop.eup %11210  ;;  %11230 = vrcp.f32 %v6724_v47  ;;  %v6728_v61 = vadd.f32 1.0, %v11209_v1  ;;  %v8239_v30 = vmul.f32 -1.702, %v14810_v46  ;;  %v6420_v13 = vpop.f32.mrb[146].mxu1 }
 0xae6   : > { %v11213_v59 = vpop.eup %11212  ;;  %v6904_v3 = vmul.f32 %v11211_v18, %v14731_v42  ;;  %11232 = vrcp.f32 %v6727_v36  ;;  %v14816_v0 = vadd.f32 %v6420_v13, %v14668_v32  ;;  %v6422_v51 = vpop.f32.mrb[147].mxu1  ;;  %v6665_v24 = vmul.f32 1.442695, %v8238_v9 }
 0xae7   : > { %v11215_v41 = vpop.eup %11214  ;;  %11234 = vrcp.f32 %v6728_v61  ;;  %v14820_v58 = vadd.f32 %v6422_v51, %v14676_v40  ;;  %v6667_v60 = vmul.f32 1.442695, %v8239_v30  ;;  %v6907_v43 = vmul.f32 %v11213_v59, %v14737_v52 }
 0xae8   : > { %v11217_v63 = vpop.eup %11216  ;;  %v6731_v19 = vadd.f32 1.0, %v11215_v41  ;;  %11236 = vpow2.f32 %v6657_v27  ;;  %7306 = vmatprep.mubr.f32.mxu1 %v6904_v3  ;;  %v8242_v2 = vmul.f32 -1.702, %v14816_v0 }
 0xae9   : > { %v11219_v42 = vpop.eup %11218  ;;  %v6732_v14 = vadd.f32 1.0, %v11217_v63  ;;  %11238 = vpow2.f32 %v6659_v37  ;;  %7307 = vmatmul.mubr.f32.gmra.mrb[156].mxu1 %v6903_v21  ;;  %v8243_v25 = vmul.f32 -1.702, %v14820_v58  ;;  %v6426_v4 = vpop.f32.mrb[148].mxu1 }
 0xaea   : > { %v11221_v15 = vpop.eup %11220  ;;  %v6908_v35 = vmul.f32 %v11219_v42, %v14740_v38  ;;  %11240 = vrcp.f32 %v6731_v19  ;;  %v6673_v7 = vmul.f32 1.442695, %v8242_v2  ;;  %v14826_v50 = vadd.f32 %v6426_v4, %v14668_v32  ;;  %v6428_v49 = vpop.f32.mrb[149].mxu1 }
 0xaeb   : > { %v11223_v23 = vpop.eup %11222  ;;  %11242 = vrcp.f32 %v6732_v14  ;;  %v6675_v16 = vmul.f32 1.442695, %v8243_v25  ;;  %v14830_v47 = vadd.f32 %v6428_v49, %v14676_v40  ;;  %v6911_v9 = vmul.f32 %v11221_v15, %v14747_v6 }
 0xaec   : > { %v11225_v1 = vpop.eup %11224  ;;  %v6912_v36 = vmul.f32 %v11223_v23, %v14750_v11  ;;  %11244 = vpow2.f32 %v6665_v24  ;;  %7311 = vmatprep.mubr.f32.mxu1 %v6908_v35  ;;  %v8246_v38 = vmul.f32 -1.702, %v14826_v50 }
 0xaed   : > { %v11227_v27 = vpop.eup %11226  ;;  %11246 = vpow2.f32 %v6667_v60  ;;  %7312 = vmatmul.mubr.f32.gmra.mrb[158].mxu1 %v6907_v43  ;;  %v8247_v18 = vmul.f32 -1.702, %v14830_v47  ;;  %v6432_v52 = vpop.f32.mrb[150].mxu1 }
 0xaee   : > { %v11229_v61 = vpop.eup %11228  ;;  %v6735_v37 = vadd.f32 1.0, %v11227_v27  ;;  %11248 = vpow2.f32 %v6673_v7  ;;  %v6681_v30 = vmul.f32 1.442695, %v8246_v38  ;;  %7316 = vmatprep.mubr.f32.mxu1 %v6912_v36  ;;  %v14837_v13 = vadd.f32 %v6432_v52, %v14668_v32  ;;  %v6434_v11 = vpop.f32.mrb[151].mxu1 }
 0xaef   : > { %v11231_v59 = vpop.eup %11230  ;;  %v6736_v3 = vadd.f32 1.0, %v11229_v61  ;;  %11250 = vpow2.f32 %v6675_v16  ;;  %v6683_v51 = vmul.f32 1.442695, %v8247_v18  ;;  %v14840_v6 = vadd.f32 %v6434_v11, %v14676_v40 }
 0xaf0   : > { %v11233_v41 = vpop.eup %11232  ;;  %v6916_v21 = vmul.f32 %v11231_v59, %v14760_v53  ;;  %11252 = vrcp.f32 %v6735_v37  ;;  %v8250_v63 = vmul.f32 -1.702, %v14837_v13  ;;  %v6915_v40 = vmul.f32 %v11225_v1, %v14757_v17 }
 0xaf1   : > { %v11235_v19 = vpop.eup %11234  ;;  %11254 = vrcp.f32 %v6736_v3  ;;  %7317 = vmatmul.mubr.f32.gmra.mrb[160].mxu1 %v6911_v9  ;;  %v8251_v32 = vmul.f32 -1.702, %v14840_v6  ;;  %v6919_v49 = vmul.f32 %v11233_v41, %v14767_v29 }
 0xaf2   : > { %v11237_v24 = vpop.eup %11236  ;;  %v6920_v2 = vmul.f32 %v11235_v19, %v14771_v8  ;;  %11256 = vpow2.f32 %v6681_v30  ;;  %v6689_v42 = vmul.f32 1.442695, %v8250_v63  ;;  %7321 = vmatprep.mubr.f32.mxu1 %v6916_v21 }
 0xaf3   : > { %v11239_v14 = vpop.eup %11238  ;;  %v6739_v60 = vadd.f32 1.0, %v11237_v24  ;;  %11258 = vpow2.f32 %v6683_v51  ;;  %v6691_v53 = vmul.f32 1.442695, %v8251_v32 }
 0xaf4   : > { %v11241_v25 = vpop.eup %11240  ;;  %v6740_v4 = vadd.f32 1.0, %v11239_v14  ;;  %11260 = vpow2.f32 %v6689_v42 }
 0xaf5   : > { %v11243_v15 = vpop.eup %11242  ;;  %11262 = vrcp.f32 %v6739_v60  ;;  %7322 = vmatmul.mubr.f32.gmra.mrb[162].mxu1 %v6915_v40 }
 0xaf6   : > { %v11245_v35 = vpop.eup %11244  ;;  %v6924_v7 = vmul.f32 %v11243_v15, %v14781_v26  ;;  %11264 = vrcp.f32 %v6740_v4  ;;  %7326 = vmatprep.mubr.f32.mxu1 %v6920_v2  ;;  %v6923_v26 = vmul.f32 %v11241_v25, %v14777_v44 }
 0xaf7   : > { %v11247_v8 = vpop.eup %11246  ;;  %v6743_v23 = vadd.f32 1.0, %v11245_v35  ;;  %11266 = vpow2.f32 %v6691_v53 }
 0xaf8   : > { %v11249_v17 = vpop.eup %11248  ;;  %v6744_v43 = vadd.f32 1.0, %v11247_v8 }
 0xaf9   : > { %v11251_v16 = vpop.eup %11250  ;;  %11268 = vrcp.f32 %v6743_v23  ;;  %7327 = vmatmul.mubr.f32.gmra.mrb[164].mxu1 %v6919_v49  ;;  %v6747_v36 = vadd.f32 1.0, %v11249_v17 }
 0xafa   : > { %v11253_v1 = vpop.eup %11252  ;;  %11270 = vrcp.f32 %v6744_v43  ;;  %v6748_v38 = vadd.f32 1.0, %v11251_v16  ;;  %7331 = vmatprep.mubr.f32.mxu1 %v6924_v7 }
 0xafb   : > { %v11255_v27 = vpop.eup %11254  ;;  %v6927_v11 = vmul.f32 %v11253_v1, %v14787_v39 }
 0xafc   : > { %v11257_v9 = vpop.eup %11256  ;;  %v6928_v18 = vmul.f32 %v11255_v27, %v14791_v48  ;;  %11272 = vrcp.f32 %v6748_v38 }
 0xafd   : > { %v11259_v29 = vpop.eup %11258  ;;  %7332 = vmatmul.mubr.f32.gmra.mrb[166].mxu1 %v6923_v26  ;;  %11274 = vrcp.f32 %v6747_v36  ;;  %v6751_v61 = vadd.f32 1.0, %v11257_v9 }
 0xafe   : > { %v11261_v52 = vpop.eup %11260  ;;  %v6752_v37 = vadd.f32 1.0, %v11259_v29  ;;  %7336 = vmatprep.mubr.f32.mxu1 %v6928_v18 }
 0xaff   : > { %v11263_v30 = vpop.eup %11262  ;;  %v6755_v44 = vadd.f32 1.0, %v11261_v52 }
 0xb00   : > { %v11265_v59 = vpop.eup %11264  ;;  %11276 = vrcp.f32 %v6752_v37  ;;  %v6931_v21 = vmul.f32 %v11263_v30, %v14797_v31 }
 0xb01   : > { %v11267_v3 = vpop.eup %11266  ;;  %v6932_v51 = vmul.f32 %v11265_v59, %v14800_v5  ;;  %7337 = vmatmul.mubr.f32.gmra.mrb[168].mxu1 %v6927_v11  ;;  %11278 = vrcp.f32 %v6751_v61 }
 0xb02   : > { %v6756_v48 = vadd.f32 1.0, %v11267_v3 }
 0xb03   : > { %v11269_v41 = vpop.eup %11268  ;;  %7341 = vmatprep.mubr.f32.mxu1 %v6932_v51 }
 0xb04   : > { %v11271_v63 = vpop.eup %11270  ;;  %11280 = vrcp.f32 %v6756_v48  ;;  %v6935_v39 = vmul.f32 %v11269_v41, %v14807_v34 }
 0xb05   : > { %v6936_v19 = vmul.f32 %v11271_v63, %v14810_v46  ;;  %7342 = vmatmul.mubr.f32.gmra.mrb[170].mxu1 %v6931_v21  ;;  %11282 = vrcp.f32 %v6755_v44 }
 0xb06   : > { %v11273_v32 = vpop.eup %11272 }
 0xb07   : > { %v6940_v24 = vmul.f32 %v11273_v32, %v14820_v58  ;;  %7346 = vmatprep.mubr.f32.mxu1 %v6936_v19  ;;  %v11275_v5 = vpop.eup %11274 }
 0xb08   : > { %v6939_v42 = vmul.f32 %v11275_v5, %v14816_v0 }
 0xb09   : > { %7347 = vmatmul.mubr.f32.gmra.mrb[172].mxu1 %v6935_v39 }
 0xb0a   : > { %v11277_v2 = vpop.eup %11276  ;;  %7351 = vmatprep.mubr.f32.mxu1 %v6940_v24 }
 0xb0b   : > { %v6944_v31 = vmul.f32 %v11277_v2, %v14830_v47  ;;  %v11279_v14 = vpop.eup %11278 }
 0xb0c   : > { %v6943_v46 = vmul.f32 %v11279_v14, %v14826_v50 }
 0xb0d   : > { %7352 = vmatmul.mubr.f32.gmra.mrb[174].mxu1 %v6939_v42 }
 0xb0e   : > { %v11281_v40 = vpop.eup %11280  ;;  %7356 = vmatprep.mubr.f32.mxu1 %v6944_v31 }
 0xb0f   : > { %v6948_v60 = vmul.f32 %v11281_v40, %v14840_v6  ;;  %v11283_v34 = vpop.eup %11282 }
 0xb10   : > { %v6947_v58 = vmul.f32 %v11283_v34, %v14837_v13 }
 0xb11   : > { %7357 = vmatmul.mubr.f32.gmra.mrb[176].mxu1 %v6943_v46 }
 0xb12   : > { %7361 = vmatprep.mubr.f32.mxu1 %v6948_v60 }
 0xb15   : > { %7362 = vmatmul.mubr.f32.gmra.mrb[178].mxu1 %v6947_v58 }
 0xb66   : > { %v8865_v53 = vpop.f32.mrb[104].mxu0 }
 0xb67   : > { %v8866_v25 = vpop.f32.mrb[105].mxu0 }
 0xb68   : > { %v8867_v4 = vadd.f32 %v8866_v25, %v8865_v53  ;;  %v14891_v25 = vld [vmem:[%s15438_s11] ss:$0 sm:$0xff] }
 0xb6a   : > { %v8868_v0 = vpop.f32.mrb[106].mxu0 }
 0xb6b   : > { %v8869_v15 = vpop.f32.mrb[107].mxu0 }
 0xb6c   : > { %v8870_v47 = vadd.f32 %v8869_v15, %v8868_v0 }
 0xb6f   : > { %v8871_v35 = vpop.f32.mrb[108].mxu0 }
 0xb70   : > { %v8872_v7 = vpop.f32.mrb[109].mxu0 }
 0xb71   : > { %v8873_v8 = vadd.f32 %v8872_v7, %v8871_v35 }
 0xb75   : > { %v8874_v49 = vpop.f32.mrb[110].mxu0 }
 0xb76   : > { %v8875_v23 = vpop.f32.mrb[111].mxu0 }
 0xb77   : > { %v8876_v50 = vadd.f32 %v8875_v23, %v8874_v49 }
 0xb79   : > { %v8877_v17 = vpop.f32.mrb[112].mxu0 }
 0xb7a   : > { %v8878_v6 = vpop.f32.mrb[113].mxu0 }
 0xb7b   : > { %v14862_v43 = vadd.f32 %v8878_v6, %v8877_v17 }
 0xb7d   : > { %v8880_v16 = vpop.f32.mrb[114].mxu0 }
 0xb7e   : > { %v8881_v1 = vpop.f32.mrb[115].mxu0 }
 0xb7f   : > { %v14864_v13 = vadd.f32 %v8881_v1, %v8880_v16 }
 0xb81   : > { %v8883_v36 = vpop.f32.mrb[116].mxu0 }
 0xb82   : > { %v8884_v38 = vpop.f32.mrb[117].mxu0 }
 0xb83   : > { %v14866_v27 = vadd.f32 %v8884_v38, %v8883_v36 }
 0xb85   : > { %v8886_v26 = vpop.f32.mrb[118].mxu0 }
 0xb86   : > { %v8887_v9 = vpop.f32.mrb[119].mxu0 }
 0xb87   : > { %v14868_v18 = vadd.f32 %v8887_v9, %v8886_v26 }
 0xb89   : > { %v8889_v29 = vpop.f32.mrb[120].mxu0 }
 0xb8a   : > { %v8890_v52 = vpop.f32.mrb[121].mxu0 }
 0xb8b   : > { %v14870_v61 = vadd.f32 %v8890_v52, %v8889_v29 }
 0xb8e   : > { %v8892_v37 = vpop.f32.mrb[122].mxu0 }
 0xb8f   : > { %v8893_v30 = vpop.f32.mrb[123].mxu0 }
 0xb90   : > { %v14872_v11 = vadd.f32 %v8893_v30, %v8892_v37 }
 0xb92   : > { %v8895_v59 = vpop.f32.mrb[124].mxu0 }
 0xb93   : > { %v8896_v3 = vpop.f32.mrb[125].mxu0 }
 0xb94   : > { %v14874_v51 = vadd.f32 %v8896_v3, %v8895_v59 }
 0xb96   : > { %v8898_v44 = vpop.f32.mrb[126].mxu0 }
 0xb97   : > { %v8899_v48 = vpop.f32.mrb[127].mxu0 }
 0xb98   : > { %v14876_v41 = vadd.f32 %v8899_v48, %v8898_v44 }
 0xb9a   : > { %v8901_v21 = vpop.f32.mrb[128].mxu0 }
 0xb9b   : > { %v8902_v63 = vpop.f32.mrb[129].mxu0 }
 0xb9c   : > { %v14878_v19 = vadd.f32 %v8902_v63, %v8901_v21 }
 0xb9e   : > { %v8904_v32 = vpop.f32.mrb[130].mxu0 }
 0xb9f   : > { %v8905_v39 = vpop.f32.mrb[131].mxu0 }
 0xba0   : > { %v14880_v24 = vadd.f32 %v8905_v39, %v8904_v32 }
 0xba3   : > { %v8907_v5 = vpop.f32.mrb[132].mxu0 }
 0xba4   : > { %v8908_v2 = vpop.f32.mrb[133].mxu0 }
 0xba5   : > { %v14882_v42 = vadd.f32 %v8908_v2, %v8907_v5 }
 0xba7   : > { %v8910_v31 = vpop.f32.mrb[134].mxu0 }
 0xba8   : > { %v8911_v14 = vpop.f32.mrb[135].mxu0 }
 0xba9   : > { %v14884_v40 = vadd.f32 %v8911_v14, %v8910_v31 }
 0xbab   : > { %v8945_v46 = vpop.f32.mrb[136].mxu0 }
 0xbac   : > { %v8946_v60 = vpop.f32.mrb[137].mxu0 }
 0xbad   : > { %v8947_v34 = vadd.f32 %v8946_v60, %v8945_v46 }
 0xbaf   : > { %v7289_v58 = vadd.f32 %v8947_v34, %v8867_v4  ;;  %v8948_v53 = vpop.f32.mrb[138].mxu0 }
 0xbb0   : > { %v8949_v0 = vpop.f32.mrb[139].mxu0 }
 0xbb1   : > { %v7367_v15 = vadd.f32 %v7289_v58, %v14096_v12  ;;  %v8950_v35 = vadd.f32 %v8949_v0, %v8948_v53  ;;  %v8951_v7 = vpop.f32.mrb[152].mxu1 }
 0xbb2   : > { %v8952_v49 = vpop.f32.mrb[153].mxu1 }
 0xbb3   : > { %v14895_v23 = vadd.f32 %v14891_v25, %v7367_v15  ;;  %v7294_v17 = vadd.f32 %v8950_v35, %v8870_v47  ;;  %v8953_v6 = vadd.f32 %v8952_v49, %v8951_v7 }
 0xbb5   : > { %7406 = vst [vmem:[#allocation2] sm:$0xff] %v14895_v23  ;;  %v7368_v4 = vadd.f32 %v7294_v17, %v14103_v22  ;;  %v7299_v16 = vadd.f32 %v8953_v6, %v8873_v8  ;;  %7428 = vadd.xlane.f32.xlu0 (!%p8253_p9), %v14895_v23 }
 0xbb7   : > { %v14900_v1 = vadd.f32 %v14891_v25, %v7368_v4  ;;  %v7369_v36 = vadd.f32 %v7299_v16, %v14111_v33  ;;  %v8954_v38 = vpop.f32.mrb[154].mxu1 }
 0xbb8   : > { %v8955_v12 = vpop.f32.mrb[155].mxu1 }
 0xbb9   : > { %7407 = vst [vmem:[#allocation2 + $0x8] sm:$0xff] %v14900_v1  ;;  %v14905_v26 = vadd.f32 %v14891_v25, %v7369_v36  ;;  %v8956_v9 = vadd.f32 %v8955_v12, %v8954_v38  ;;  %7430 = vadd.xlane.f32.xlu0 (!%p8253_p9), %v14900_v1 }
 0xbbb   : > { %7408 = vst [vmem:[#allocation2 + $0x10] sm:$0xff] %v14905_v26  ;;  %v7304_v47 = vadd.f32 %v8956_v9, %v8876_v50  ;;  %7432 = vadd.xlane.f32.xlu1 (!%p8253_p9), %v14905_v26 }
 0xbbc   : > { %v8957_v29 = vpop.f32.mrb[156].mxu1 }
 0xbbd   : > { %v7370_v22 = vadd.f32 %v7304_v47, %v14100_v56  ;;  %v8958_v8 = vpop.f32.mrb[157].mxu1 }
 0xbbe   : > { %v8959_v52 = vadd.f32 %v8958_v8, %v8957_v29  ;;  %v15439_v8 = vld [vmem:[#allocation43_spill] sm:$0xff] }
 0xbbf   : > { %v14910_v37 = vadd.f32 %v14891_v25, %v7370_v22 }
 0xbc0   : > { %v7309_v33 = vadd.f32 %v8959_v52, %v14862_v43  ;;  %v8960_v30 = vpop.f32.mrb[158].mxu1 }
 0xbc1   : > { %7409 = vst [vmem:[#allocation2 + $0x18] sm:$0xff] %v14910_v37  ;;  %v8961_v59 = vpop.f32.mrb[159].mxu1  ;;  %7434 = vadd.xlane.f32.xlu1 (!%p8253_p9), %v14910_v37 }
 0xbc2   : > { %v7371_v3 = vadd.f32 %v7309_v33, %v14119_v62  ;;  %v8962_v44 = vadd.f32 %v8961_v59, %v8960_v30 }
 0xbc4   : > { %v14916_v48 = vadd.f32 %v14891_v25, %v7371_v3  ;;  %v7314_v50 = vadd.f32 %v8962_v44, %v14864_v13  ;;  %v8963_v56 = vpop.f32.mrb[160].mxu1  ;;  %v15440_v3 = vld [vmem:[#allocation66_spill] sm:$0xff] }
 0xbc5   : > { %v8964_v21 = vpop.f32.mrb[161].mxu1 }
 0xbc6   : > { %7410 = vst [vmem:[#allocation2 + $0x20] sm:$0xff] %v14916_v48  ;;  %v7372_v63 = vadd.f32 %v7314_v50, %v14108_v55  ;;  %v8965_v32 = vadd.f32 %v8964_v21, %v8963_v56  ;;  %7436 = vadd.xlane.f32.xlu0 (!%p8253_p9), %v14916_v48 }
 0xbc8   : > { %v14922_v43 = vadd.f32 %v14891_v25, %v7372_v63  ;;  %v7319_v39 = vadd.f32 %v8965_v32, %v14866_v27  ;;  %v8966_v5 = vpop.f32.mrb[162].mxu1  ;;  %v15441_v32 = vld [vmem:[#allocation45_spill] sm:$0xff] }
 0xbc9   : > { %v8967_v62 = vpop.f32.mrb[163].mxu1 }
 0xbca   : > { %7411 = vst [vmem:[#allocation2 + $0x28] sm:$0xff] %v14922_v43  ;;  %v7373_v2 = vadd.f32 %v7319_v39, %v14127_v54  ;;  %v8968_v31 = vadd.f32 %v8967_v62, %v8966_v5  ;;  %7438 = vadd.xlane.f32.xlu1 (!%p8253_p9), %v14922_v43 }
 0xbcc   : > { %v14928_v13 = vadd.f32 %v14891_v25, %v7373_v2  ;;  %v7324_v14 = vadd.f32 %v8968_v31, %v14868_v18  ;;  %v8969_v46 = vpop.f32.mrb[164].mxu1  ;;  %v15442_v2 = vld [vmem:[#allocation46_spill] sm:$0xff] }
 0xbcd   : > { %v8970_v55 = vpop.f32.mrb[165].mxu1 }
 0xbce   : > { %7412 = vst [vmem:[#allocation2 + $0x30] sm:$0xff] %v14928_v13  ;;  %v7374_v60 = vadd.f32 %v7324_v14, %v14116_v20  ;;  %v8971_v34 = vadd.f32 %v8970_v55, %v8969_v46  ;;  %7440 = vadd.xlane.f32.xlu0 (!%p8253_p9), %v14928_v13 }
 0xbd0   : > { %v14934_v27 = vadd.f32 %v14891_v25, %v7374_v60  ;;  %v7329_v58 = vadd.f32 %v8971_v34, %v14870_v61  ;;  %v8972_v53 = vpop.f32.mrb[166].mxu1 }
 0xbd1   : > { %v8973_v54 = vpop.f32.mrb[167].mxu1 }
 0xbd2   : > { %7413 = vst [vmem:[#allocation2 + $0x38] sm:$0xff] %v14934_v27  ;;  %v7375_v0 = vadd.f32 %v7329_v58, %v14135_v28  ;;  %v8974_v15 = vadd.f32 %v8973_v54, %v8972_v53  ;;  %7442 = vadd.xlane.f32.xlu1 (!%p8253_p9), %v14934_v27 }
 0xbd4   : > { %v14940_v18 = vadd.f32 %v14891_v25, %v7375_v0  ;;  %v7334_v35 = vadd.f32 %v8974_v15, %v14872_v11  ;;  %v8975_v7 = vpop.f32.mrb[168].mxu1 }
 0xbd5   : > { %v8976_v20 = vpop.f32.mrb[169].mxu1 }
 0xbd6   : > { %7414 = vst [vmem:[#allocation2 + $0x40] sm:$0xff] %v14940_v18  ;;  %v7376_v49 = vadd.f32 %v7334_v35, %v14124_v57  ;;  %v8977_v17 = vadd.f32 %v8976_v20, %v8975_v7  ;;  %7444 = vadd.xlane.f32.xlu0 (!%p8253_p9), %v14940_v18 }
 0xbd8   : > { %v14946_v61 = vadd.f32 %v14891_v25, %v7376_v49  ;;  %v7339_v6 = vadd.f32 %v8977_v17, %v14874_v51  ;;  %v8978_v4 = vpop.f32.mrb[170].mxu1 }
 0xbd9   : > { %v8979_v28 = vpop.f32.mrb[171].mxu1 }
 0xbda   : > { %7415 = vst [vmem:[#allocation2 + $0x48] sm:$0xff] %v14946_v61  ;;  %v7377_v16 = vadd.f32 %v7339_v6, %v14143_v10  ;;  %v8980_v36 = vadd.f32 %v8979_v28, %v8978_v4  ;;  %7446 = vadd.xlane.f32.xlu1 (!%p8253_p9), %v14946_v61 }
 0xbdc   : > { %v14952_v11 = vadd.f32 %v14891_v25, %v7377_v16  ;;  %v7344_v38 = vadd.f32 %v8980_v36, %v14876_v41  ;;  %v8981_v12 = vpop.f32.mrb[172].mxu1 }
 0xbdd   : > { %v8982_v57 = vpop.f32.mrb[173].mxu1 }
 0xbde   : > { %7416 = vst [vmem:[#allocation2 + $0x50] sm:$0xff] %v14952_v11  ;;  %v7378_v9 = vadd.f32 %v7344_v38, %v14132_v45  ;;  %v8983_v47 = vadd.f32 %v8982_v57, %v8981_v12  ;;  %7448 = vadd.xlane.f32.xlu0 (!%p8253_p9), %v14952_v11 }
 0xbe0   : > { %v14958_v51 = vadd.f32 %v14891_v25, %v7378_v9  ;;  %v7349_v29 = vadd.f32 %v8983_v47, %v14878_v19  ;;  %v8984_v22 = vpop.f32.mrb[174].mxu1 }
 0xbe1   : > { %v8985_v10 = vpop.f32.mrb[175].mxu1 }
 0xbe2   : > { %7417 = vst [vmem:[#allocation2 + $0x58] sm:$0xff] %v14958_v51  ;;  %v7379_v52 = vadd.f32 %v7349_v29, %v15439_v8  ;;  %v8986_v33 = vadd.f32 %v8985_v10, %v8984_v22  ;;  %7450 = vadd.xlane.f32.xlu1 (!%p8253_p9), %v14958_v51 }
 0xbe4   : > { %v14964_v41 = vadd.f32 %v14891_v25, %v7379_v52  ;;  %v7354_v30 = vadd.f32 %v8986_v33, %v14880_v24  ;;  %v8987_v59 = vpop.f32.mrb[176].mxu1 }
 0xbe5   : > { %v8988_v45 = vpop.f32.mrb[177].mxu1 }
 0xbe6   : > { %7418 = vst [vmem:[#allocation2 + $0x60] sm:$0xff] %v14964_v41  ;;  %v7380_v44 = vadd.f32 %v7354_v30, %v15440_v3  ;;  %v8989_v50 = vadd.f32 %v8988_v45, %v8987_v59  ;;  %7452 = vadd.xlane.f32.xlu0 (!%p8253_p9), %v14964_v41 }
 0xbe8   : > { %v14970_v19 = vadd.f32 %v14891_v25, %v7380_v44  ;;  %v7359_v56 = vadd.f32 %v8989_v50, %v14882_v42  ;;  %v8990_v21 = vpop.f32.mrb[178].mxu1 }
 0xbe9   : > { %v8991_v63 = vpop.f32.mrb[179].mxu1 }
 0xbea   : > { %7419 = vst [vmem:[#allocation2 + $0x68] sm:$0xff] %v14970_v19  ;;  %v7381_v39 = vadd.f32 %v7359_v56, %v15441_v32  ;;  %v8992_v5 = vadd.f32 %v8991_v63, %v8990_v21  ;;  %7454 = vadd.xlane.f32.xlu1 (!%p8253_p9), %v14970_v19 }
 0xbec   : > { %v14976_v24 = vadd.f32 %v14891_v25, %v7381_v39  ;;  %v7364_v62 = vadd.f32 %v8992_v5, %v14884_v40  ;;  %7425 = sbr.rel (%p8253_p9) target bundleno = 3370 (0xd2a), region = 131 }
 0xbee   : > { %7420 = vst [vmem:[#allocation2 + $0x70] sm:$0xff] %v14976_v24  ;;  %v7382_v31 = vadd.f32 %v7364_v62, %v15442_v2  ;;  %7456 = vadd.xlane.f32.xlu0 (!%p8253_p9), %v14976_v24 }
 0xbf0   : > { %v14982_v14 = vadd.f32 %v14891_v25, %v7382_v31 }
 0xbf2   : > { %7421 = vst [vmem:[#allocation2 + $0x78] sm:$0xff] %v14982_v14  ;;  %7458 = vadd.xlane.f32.xlu1 (!%p8253_p9), %v14982_v14 }
 0xc42   : > { %v7429_v42 = vpop.xlane.xlu0 %7428 }
 0xc43   : > { %v7460_v25 = vmul.f32 0.0078125, %v7429_v42 }
 0xc45   : > { %v15003_v55 = vsub.f32 %v14895_v23, %v7460_v25 }
 0xc46   : > { %v7431_v34 = vpop.xlane.xlu0 %7430 }
 0xc47   : > { %v7461_v53 = vmul.f32 0.0078125, %v7431_v34  ;;  %v7492_v54 = vmul.f32 %v15003_v55, %v15003_v55 }
 0xc48   : > { %v7433_v40 = vpop.xlane.xlu1 %7432 }
 0xc49   : > { %v7462_v46 = vmul.f32 0.0078125, %v7433_v40  ;;  %v15011_v15 = vsub.f32 %v14900_v1, %v7461_v53  ;;  %7508 = vadd.xlane.f32.xlu0 %v7492_v54 }
 0xc4b   : > { %v15006_v60 = vsub.f32 %v14905_v26, %v7462_v46  ;;  %v7493_v49 = vmul.f32 %v15011_v15, %v15011_v15 }
 0xc4d   : > { %v7494_v23 = vmul.f32 %v15006_v60, %v15006_v60  ;;  %7510 = vadd.xlane.f32.xlu1 %v7493_v49 }
 0xc4e   : > { %v7435_v58 = vpop.xlane.xlu1 %7434 }
 0xc4f   : > { %v7463_v0 = vmul.f32 0.0078125, %v7435_v58  ;;  %7512 = vadd.xlane.f32.xlu0 %v7494_v23 }
 0xc51   : > { %v15014_v35 = vsub.f32 %v14910_v37, %v7463_v0 }
 0xc53   : > { %v7437_v7 = vpop.xlane.xlu0 %7436  ;;  %v7495_v37 = vmul.f32 %v15014_v35, %v15014_v35 }
 0xc54   : > { %v7464_v20 = vmul.f32 0.0078125, %v7437_v7 }
 0xc55   : > { %7514 = vadd.xlane.f32.xlu1 %v7495_v37 }
 0xc56   : > { %v15021_v6 = vsub.f32 %v14916_v48, %v7464_v20 }
 0xc57   : > { %v7439_v26 = vpop.xlane.xlu1 %7438 }
 0xc58   : > { %v7465_v17 = vmul.f32 0.0078125, %v7439_v26  ;;  %v7496_v36 = vmul.f32 %v15021_v6, %v15021_v6 }
 0xc5a   : > { %v15024_v1 = vsub.f32 %v14922_v43, %v7465_v17  ;;  %7516 = vadd.xlane.f32.xlu0 %v7496_v36 }
 0xc5b   : > { %v7441_v4 = vpop.xlane.xlu0 %7440 }
 0xc5c   : > { %v7466_v16 = vmul.f32 0.0078125, %v7441_v4  ;;  %v7497_v43 = vmul.f32 %v15024_v1, %v15024_v1 }
 0xc5e   : > { %v15031_v12 = vsub.f32 %v14928_v13, %v7466_v16  ;;  %7518 = vadd.xlane.f32.xlu1 %v7497_v43 }
 0xc5f   : > { %v7443_v28 = vpop.xlane.xlu1 %7442 }
 0xc60   : > { %v7467_v38 = vmul.f32 0.0078125, %v7443_v28  ;;  %v7498_v29 = vmul.f32 %v15031_v12, %v15031_v12 }
 0xc62   : > { %v15034_v48 = vsub.f32 %v14934_v27, %v7467_v38  ;;  %7520 = vadd.xlane.f32.xlu0 %v7498_v29  ;;  %v15085_v38 = vld [vmem:[%s15444_s19] ss:$0 sm:$0xff] }
 0xc63   : > { %v7445_v57 = vpop.xlane.xlu0 %7444 }
 0xc64   : > { %v7468_v47 = vmul.f32 0.0078125, %v7445_v57  ;;  %v7499_v27 = vmul.f32 %v15034_v48, %v15034_v48 }
 0xc66   : > { %v15041_v10 = vsub.f32 %v14940_v18, %v7468_v47  ;;  %7522 = vadd.xlane.f32.xlu1 %v7499_v27 }
 0xc67   : > { %v7447_v9 = vpop.xlane.xlu1 %7446 }
 0xc68   : > { %v7469_v22 = vmul.f32 0.0078125, %v7447_v9  ;;  %v7500_v30 = vmul.f32 %v15041_v10, %v15041_v10 }
 0xc6a   : > { %v15044_v13 = vsub.f32 %v14946_v61, %v7469_v22  ;;  %7524 = vadd.xlane.f32.xlu0 %v7500_v30  ;;  %v15091_v22 = vld [vmem:[%s15445_s24] ss:$0 sm:$0xff] }
 0xc6b   : > { %v7449_v8 = vpop.xlane.xlu0 %7448 }
 0xc6c   : > { %v7470_v33 = vmul.f32 0.0078125, %v7449_v8  ;;  %v7501_v61 = vmul.f32 %v15044_v13, %v15044_v13 }
 0xc6e   : > { %v15051_v45 = vsub.f32 %v14952_v11, %v7470_v33  ;;  %7526 = vadd.xlane.f32.xlu1 %v7501_v61 }
 0xc6f   : > { %v7451_v52 = vpop.xlane.xlu1 %7450 }
 0xc70   : > { %v7471_v59 = vmul.f32 0.0078125, %v7451_v52  ;;  %v7502_v56 = vmul.f32 %v15051_v45, %v15051_v45 }
 0xc72   : > { %v15054_v18 = vsub.f32 %v14958_v51, %v7471_v59  ;;  %7528 = vadd.xlane.f32.xlu0 %v7502_v56 }
 0xc73   : > { %v7453_v3 = vpop.xlane.xlu0 %7452 }
 0xc74   : > { %v7472_v50 = vmul.f32 0.0078125, %v7453_v3  ;;  %v7503_v51 = vmul.f32 %v15054_v18, %v15054_v18 }
 0xc76   : > { %v15061_v63 = vsub.f32 %v14964_v41, %v7472_v50  ;;  %7530 = vadd.xlane.f32.xlu1 %v7503_v51 }
 0xc77   : > { %v7455_v44 = vpop.xlane.xlu1 %7454 }
 0xc78   : > { %v7473_v21 = vmul.f32 0.0078125, %v7455_v44  ;;  %v7504_v62 = vmul.f32 %v15061_v63, %v15061_v63 }
 0xc7a   : > { %v15064_v11 = vsub.f32 %v14970_v19, %v7473_v21  ;;  %7532 = vadd.xlane.f32.xlu0 %v7504_v62 }
 0xc7b   : > { %v7457_v32 = vpop.xlane.xlu0 %7456 }
 0xc7c   : > { %v7474_v5 = vmul.f32 0.0078125, %v7457_v32  ;;  %v7505_v19 = vmul.f32 %v15064_v11, %v15064_v11 }
 0xc7e   : > { %v15071_v31 = vsub.f32 %v14976_v24, %v7474_v5  ;;  %7534 = vadd.xlane.f32.xlu1 %v7505_v19 }
 0xc7f   : > { %v7459_v39 = vpop.xlane.xlu1 %7458 }
 0xc80   : > { %v7475_v2 = vmul.f32 0.0078125, %v7459_v39  ;;  %v7506_v42 = vmul.f32 %v15071_v31, %v15071_v31 }
 0xc82   : > { %v15074_v41 = vsub.f32 %v14982_v14, %v7475_v2  ;;  %7536 = vadd.xlane.f32.xlu0 %v7506_v42 }
 0xc84   : > { %v7507_v40 = vmul.f32 %v15074_v41, %v15074_v41 }
 0xc86   : > { %7538 = vadd.xlane.f32.xlu1 %v7507_v40 }
 0xcd6   : > { %v7509_v25 = vpop.xlane.xlu0 %7508 }
 0xcd7   : > { %v7540_v24 = vmul.f32 0.0078125, %v7509_v25 }
 0xcd9   : > { %v7556_v46 = vadd.f32 1e-05, %v7540_v24 }
 0xcda   : > { %v7511_v34 = vpop.xlane.xlu1 %7510 }
 0xcdb   : > { %11300 = vrsqrt.f32 %v7556_v46  ;;  %v7541_v14 = vmul.f32 0.0078125, %v7511_v34 }
 0xcdc   : > { %v7513_v58 = vpop.xlane.xlu0 %7512 }
 0xcdd   : > { %v7542_v53 = vmul.f32 0.0078125, %v7513_v58  ;;  %v7557_v54 = vadd.f32 1e-05, %v7541_v14 }
 0xcdf   : > { %v7558_v0 = vadd.f32 1e-05, %v7542_v53  ;;  %11302 = vrsqrt.f32 %v7557_v54 }
 0xce1   : > { %11304 = vrsqrt.f32 %v7558_v0 }
 0xce2   : > { %v7515_v23 = vpop.xlane.xlu1 %7514 }
 0xce3   : > { %v7543_v26 = vmul.f32 0.0078125, %v7515_v23 }
 0xce5   : > { %v7559_v49 = vadd.f32 1e-05, %v7543_v26  ;;  %v11301_v36 = vpop.eup %11300 }
 0xce6   : > { %v7588_v9 = vmul.f32 %v11301_v36, %v15003_v55 }
 0xce7   : > { %v7517_v7 = vpop.xlane.xlu0 %7516  ;;  %11306 = vrsqrt.f32 %v7559_v49 }
 0xce8   : > { %v7544_v20 = vmul.f32 0.0078125, %v7517_v7  ;;  %v7610_v52 = vmul.f32 %v15085_v38, %v7588_v9 }
 0xce9   : > { %v11303_v33 = vpop.eup %11302 }
 0xcea   : > { %v7560_v17 = vadd.f32 1e-05, %v7544_v20  ;;  %v7632_v3 = vadd.f32 %v15091_v22, %v7610_v52  ;;  %v7589_v55 = vmul.f32 %v11303_v33, %v15011_v15 }
 0xceb   : > { %v7519_v37 = vpop.xlane.xlu1 %7518  ;;  %v11305_v61 = vpop.eup %11304 }
 0xcec   : > { %v7545_v28 = vmul.f32 0.0078125, %v7519_v37  ;;  %11308 = vrsqrt.f32 %v7560_v17  ;;  %v7590_v56 = vmul.f32 %v11305_v61, %v15006_v60  ;;  %7648 = vst [vmem:[#allocation12] sm:$0xff] %v7632_v3  ;;  %v7611_v32 = vmul.f32 %v15085_v38, %v7589_v55 }
 0xcee   : > { %v7561_v43 = vadd.f32 1e-05, %v7545_v28  ;;  %v7612_v5 = vmul.f32 %v15085_v38, %v7590_v56  ;;  %v7633_v42 = vadd.f32 %v15091_v22, %v7611_v32 }
 0xcef   : > { %v7521_v4 = vpop.xlane.xlu0 %7520 }
 0xcf0   : > { %v7546_v16 = vmul.f32 0.0078125, %v7521_v4  ;;  %11310 = vrsqrt.f32 %v7561_v43  ;;  %v7634_v60 = vadd.f32 %v15091_v22, %v7612_v5  ;;  %7649 = vst [vmem:[#allocation12 + $0x8] sm:$0xff] %v7633_v42 }
 0xcf1   : > { %v11307_v39 = vpop.eup %11306 }
 0xcf2   : > { %v7562_v57 = vadd.f32 1e-05, %v7546_v16  ;;  %v7591_v15 = vmul.f32 %v11307_v39, %v15014_v35  ;;  %7650 = vst [vmem:[#allocation12 + $0x10] sm:$0xff] %v7634_v60 }
 0xcf3   : > { %v7523_v47 = vpop.xlane.xlu1 %7522 }
 0xcf4   : > { %v7547_v27 = vmul.f32 0.0078125, %v7523_v47  ;;  %11312 = vrsqrt.f32 %v7562_v57  ;;  %v7613_v34 = vmul.f32 %v15085_v38, %v7591_v15 }
 0xcf6   : > { %v7563_v30 = vadd.f32 1e-05, %v7547_v27  ;;  %v11309_v19 = vpop.eup %11308  ;;  %v7635_v35 = vadd.f32 %v15091_v22, %v7613_v34 }
 0xcf7   : > { %v7525_v29 = vpop.xlane.xlu0 %7524  ;;  %v7592_v24 = vmul.f32 %v11309_v19, %v15021_v6 }
 0xcf8   : > { %v7548_v8 = vmul.f32 0.0078125, %v7525_v29  ;;  %11314 = vrsqrt.f32 %v7563_v30  ;;  %7651 = vst [vmem:[#allocation12 + $0x18] sm:$0xff] %v7635_v35 }
 0xcf9   : > { %v7614_v53 = vmul.f32 %v15085_v38, %v7592_v24 }
 0xcfa   : > { %v7564_v59 = vadd.f32 1e-05, %v7548_v8  ;;  %v11311_v14 = vpop.eup %11310 }
 0xcfb   : > { %v7527_v44 = vpop.xlane.xlu1 %7526  ;;  %v7593_v23 = vmul.f32 %v11311_v14, %v15024_v1  ;;  %v7636_v20 = vadd.f32 %v15091_v22, %v7614_v53 }
 0xcfc   : > { %v7549_v21 = vmul.f32 0.0078125, %v7527_v44  ;;  %11316 = vrsqrt.f32 %v7564_v59 }
 0xcfd   : > { %v7615_v37 = vmul.f32 %v15085_v38, %v7593_v23  ;;  %7652 = vst [vmem:[#allocation12 + $0x20] sm:$0xff] %v7636_v20 }
 0xcfe   : > { %v7565_v62 = vadd.f32 1e-05, %v7549_v21  ;;  %v11313_v0 = vpop.eup %11312 }
 0xcff   : > { %v7529_v50 = vpop.xlane.xlu0 %7528  ;;  %v7594_v49 = vmul.f32 %v11313_v0, %v15031_v12  ;;  %v7637_v43 = vadd.f32 %v15091_v22, %v7615_v37 }
 0xd00   : > { %v7550_v51 = vmul.f32 0.0078125, %v7529_v50  ;;  %11318 = vrsqrt.f32 %v7565_v62 }
 0xd01   : > { %v7616_v16 = vmul.f32 %v15085_v38, %v7594_v49  ;;  %7653 = vst [vmem:[#allocation12 + $0x28] sm:$0xff] %v7637_v43 }
 0xd02   : > { %v7566_v2 = vadd.f32 1e-05, %v7550_v51  ;;  %v11315_v28 = vpop.eup %11314 }
 0xd03   : > { %v7531_v40 = vpop.xlane.xlu1 %7530  ;;  %v7595_v57 = vmul.f32 %v11315_v28, %v15034_v48  ;;  %v7638_v12 = vadd.f32 %v15091_v22, %v7616_v16 }
 0xd04   : > { %v7551_v46 = vmul.f32 0.0078125, %v7531_v40  ;;  %11320 = vrsqrt.f32 %v7566_v2 }
 0xd05   : > { %v7617_v8 = vmul.f32 %v15085_v38, %v7595_v57  ;;  %7654 = vst [vmem:[#allocation12 + $0x30] sm:$0xff] %v7638_v12 }
 0xd06   : > { %v7567_v54 = vadd.f32 1e-05, %v7551_v46  ;;  %v11317_v1 = vpop.eup %11316 }
 0xd07   : > { %v7533_v25 = vpop.xlane.xlu0 %7532  ;;  %v7596_v29 = vmul.f32 %v11317_v1, %v15041_v10  ;;  %v7639_v48 = vadd.f32 %v15091_v22, %v7617_v8 }
 0xd08   : > { %v7552_v58 = vmul.f32 0.0078125, %v7533_v25  ;;  %11322 = vrsqrt.f32 %v7567_v54 }
 0xd09   : > { %v7618_v33 = vmul.f32 %v15085_v38, %v7596_v29  ;;  %7655 = vst [vmem:[#allocation12 + $0x38] sm:$0xff] %v7639_v48 }
 0xd0a   : > { %v7568_v7 = vadd.f32 1e-05, %v7552_v58  ;;  %v11319_v52 = vpop.eup %11318 }
 0xd0b   : > { %v7535_v26 = vpop.xlane.xlu1 %7534  ;;  %v7597_v61 = vmul.f32 %v11319_v52, %v15044_v13  ;;  %v7640_v3 = vadd.f32 %v15091_v22, %v7618_v33 }
 0xd0c   : > { %v7553_v17 = vmul.f32 0.0078125, %v7535_v26  ;;  %11324 = vrsqrt.f32 %v7568_v7 }
 0xd0d   : > { %v7619_v55 = vmul.f32 %v15085_v38, %v7597_v61  ;;  %7656 = vst [vmem:[#allocation12 + $0x40] sm:$0xff] %v7640_v3 }
 0xd0e   : > { %v7569_v36 = vadd.f32 1e-05, %v7553_v17  ;;  %v11321_v59 = vpop.eup %11320 }
 0xd0f   : > { %v7537_v6 = vpop.xlane.xlu0 %7536  ;;  %v7598_v10 = vmul.f32 %v11321_v59, %v15051_v45  ;;  %v7641_v21 = vadd.f32 %v15091_v22, %v7619_v55 }
 0xd10   : > { %v7554_v4 = vmul.f32 0.0078125, %v7537_v6  ;;  %11326 = vrsqrt.f32 %v7569_v36 }
 0xd11   : > { %v7620_v50 = vmul.f32 %v15085_v38, %v7598_v10  ;;  %7657 = vst [vmem:[#allocation12 + $0x48] sm:$0xff] %v7641_v21 }
 0xd12   : > { %v7570_v9 = vadd.f32 1e-05, %v7554_v4  ;;  %v11323_v44 = vpop.eup %11322 }
 0xd13   : > { %v7539_v47 = vpop.xlane.xlu1 %7538  ;;  %v7599_v51 = vmul.f32 %v11323_v44, %v15054_v18  ;;  %v7642_v32 = vadd.f32 %v15091_v22, %v7620_v50 }
 0xd14   : > { %v7555_v27 = vmul.f32 0.0078125, %v7539_v47  ;;  %11328 = vrsqrt.f32 %v7570_v9 }
 0xd15   : > { %v7621_v45 = vmul.f32 %v15085_v38, %v7599_v51  ;;  %7658 = vst [vmem:[#allocation12 + $0x50] sm:$0xff] %v7642_v32 }
 0xd16   : > { %v7571_v30 = vadd.f32 1e-05, %v7555_v27  ;;  %v11325_v56 = vpop.eup %11324 }
 0xd17   : > { %v7600_v13 = vmul.f32 %v11325_v56, %v15061_v63  ;;  %v7643_v2 = vadd.f32 %v15091_v22, %v7621_v45 }
 0xd18   : > { %11330 = vrsqrt.f32 %v7571_v30 }
 0xd19   : > { %v7622_v5 = vmul.f32 %v15085_v38, %v7600_v13  ;;  %7659 = vst [vmem:[#allocation12 + $0x58] sm:$0xff] %v7643_v2 }
 0xd1a   : > { %v11327_v39 = vpop.eup %11326 }
 0xd1b   : > { %v7601_v19 = vmul.f32 %v11327_v39, %v15064_v11  ;;  %v7644_v42 = vadd.f32 %v15091_v22, %v7622_v5 }
 0xd1d   : > { %v7623_v15 = vmul.f32 %v15085_v38, %v7601_v19  ;;  %7660 = vst [vmem:[#allocation12 + $0x60] sm:$0xff] %v7644_v42 }
 0xd1e   : > { %v11329_v62 = vpop.eup %11328 }
 0xd1f   : > { %v7602_v18 = vmul.f32 %v11329_v62, %v15071_v31  ;;  %v7645_v25 = vadd.f32 %v15091_v22, %v7623_v15 }
 0xd21   : > { %v7624_v40 = vmul.f32 %v15085_v38, %v7602_v18  ;;  %7661 = vst [vmem:[#allocation12 + $0x68] sm:$0xff] %v7645_v25 }
 0xd22   : > { %v11331_v63 = vpop.eup %11330 }
 0xd23   : > { %v7603_v60 = vmul.f32 %v11331_v63, %v15074_v41  ;;  %v7646_v24 = vadd.f32 %v15091_v22, %v7624_v40 }
 0xd25   : > { %v7625_v11 = vmul.f32 %v15085_v38, %v7603_v60  ;;  %7662 = vst [vmem:[#allocation12 + $0x70] sm:$0xff] %v7646_v24 }
 0xd27   : > { %v7647_v46 = vadd.f32 %v15091_v22, %v7625_v11 }
 0xd29   : > { %7663 = vst [vmem:[#allocation12 + $0x78] sm:$0xff] %v7647_v46 }
 0xd2a PF: > { %s15446_s16 = sld [smem:[#allocation33_spill]]  ;;  %s11659_s18 = smov [#allocation12]  }
 0xd2b   : > { %s7670_s23 = sshll.u32 %s11659_s18, 4  ;;  %s7671_s23 = int_to_ptr.vmem [resolvable:$true] %s7670_s23 }
 0xd2c   : > { %s11558_s6 = scalar_lea.vmem %s7671_s23, 2048  ;;  %p11565_p3 = scmp.lt.s32.totalorder %s7671_s23, %s7671_s23 }
 0xd2d   : > { %p11559_p13 = scmp.ne.s32.totalorder %s7671_s23, %s11558_s6  ;;  %p11566_p7 = scmp.lt.s32.totalorder %s11558_s6, %s11558_s6 }
 0xd2f   : > { %p11567_p8 = por %p11566_p7, %p11565_p3 }
 0xd30   : > { %p10327_p1 = scmp.eq.s32.totalorder %s15446_s16, 1 }
 0xd32   : > { %p11560_p5 = pnand %p11559_p13, %p10327_p1 }
 0xd34   : > { %p11561_p12 = pneg %p11560_p5 }
 0xd36   : > { %p11568_p10 = pnand %p11567_p8, %p11561_p12 }
 0xd38   : > { %11571 = shalt.err (!%p11568_p10)
}
 0xd39   : > { %s15447_s29 = sld [smem:[#allocation97_spill]] }
 0xd3f   : > { %s15448_s27 = smov %s15447_s29  ;;  %s11572_s5 = scalar_lea.hbm %s15447_s29, 2048 }
 0xd40   : > { %p11573_p11 = scmp.ne.s32.totalorder %s15448_s27, %s11572_s5  ;;  %p11578_p0 = scmp.lt.u32.totalorder %s11572_s5, %s15448_s27 }
 0xd42   : > { %p11574_p6 = pnand %p11573_p11, %p10327_p1 }
 0xd44   : > { %p11575_p2 = pneg %p11574_p6 }
 0xd46   : > { %p11580_p4 = pnand %p11578_p0, %p11575_p2 }
 0xd48   : > { %11583 = shalt.err (!%p11580_p4)
}
 0xd49   : > { %s11660_s30 = smov 128   ;;  %s11661_s20 = smov 8  }
 0xd4a   : > { %10312 = dma.vmem_to_hbm [thread:$0]  (%p10327_p1), %s7671_s23, 2048, %s15448_s27, [#allocation8], %s11660_s30, %s11660_s30, %s11661_s20  }
 0xd4b   : > { %11617 = dma.done.wait (%p10327_p1), [#allocation8], 2048  }
 0xd4c   : > { %11619 = vsyncadd (%p10327_p1), [#allocation8], 4294965248 }
 0xd4d PF: > { %s15449_s18 = sld [smem:[#allocation34_spill]]  ;;  %s15450_s29 = sld [smem:[#allocation31_spill]] }
 0xd4e   : > { %s15451_s0 = sld [smem:[#allocation32_spill]]  ;;  %s15452_s30 = sld [smem:[#allocation35_spill]] }
 0xd53   : > { %p37_p9 = scmp.ge.s32.totalorder %s15449_s18, 4  }
 0xd55   :  { %39 = sbr.rel (!%p37_p9) target bundleno = 30 (0x1e), region = 234 }
 0xd5c   :  { %7686 = vsyncpa [#allocation7], 1 }
 0xd5d   :  { %7688 = vsyncpa [#allocation7 + $0x1], 1 }
 0xd5e   :  { %7689 = vsyncpa [#allocation10], 1 }
 0xd5f   :  { %7691 = vsyncpa [#allocation10 + $0x1], 1 }
 0xd60   :  { %7692 = vsyncpa [#allocation8], 1 }
 0xd61   :  { %7694 = vsyncpa [#allocation8 + $0x1], 1 }
 0xd62   :  { %7695 = vsyncmov [#allocation3] }
 0xd65   :  { %s7696_s11 = vpop.sfrf %7695 }
 0xd66   :  { %p8260_p1 = scmp.ne.s32.totalorder %s7696_s11, 0 }
 0xd68   :  { %7700 = shalt.err (%p8260_p1)  }
 0xd69   :  { %7702 = vsyncmov [#allocation3 + $0x1] }
 0xd6c   :  { %s7703_s14 = vpop.sfrf %7702 }
 0xd6d   :  { %p8261_p13 = scmp.ne.s32.totalorder %s7703_s14, 0 }
 0xd6f   :  { %7707 = shalt.err (%p8261_p13)  }
 0xd70   :  { %7709 = vsyncmov [#allocation3 + $0x2] }
 0xd73   :  { %s7710_s21 = vpop.sfrf %7709 }
 0xd74   :  { %p8262_p5 = scmp.ne.s32.totalorder %s7710_s21, 0 }
 0xd76   :  { %7714 = shalt.err (%p8262_p5)  }
 0xd77   :  { %7716 = vsyncmov [#allocation3 + $0x3] }
 0xd7a   :  { %s7717_s15 = vpop.sfrf %7716 }
 0xd7b   :  { %p8263_p12 = scmp.ne.s32.totalorder %s7717_s15, 0 }
 0xd7d   :  { %7721 = shalt.err (%p8263_p12)  }

</bundles_post_ra>
